<compile_context>
chip_gen: v7x
topology: tpu7x:2x2x1
jax: 0.10.0
libtpu: 0.0.40
codegen_flags: <defaults>
</compile_context>

<pallas_src>
import functools

import jax
import jax.numpy as jnp
from jax.experimental import pallas as pl
from jax.experimental.pallas import tpu as pltpu


def block_kernel(x_ref, wqkv_ref, wo_ref, bo_ref,
                 g1_ref, be1_ref, g2_ref, be2_ref,
                 w1_ref, b1_ref, w2_ref, b2_ref,
                 o_ref, qkv_scr, head_scr, *, n_head):
    """BLK batch rows per grid step: LN1 -> MHA -> +res -> LN2 -> FFN -> +res."""
    BLK, T, C = x_ref.shape
    hs = C // n_head
    M = BLK * T
    eps = 1e-5                               # nn.LayerNorm default

    def layernorm(z, g_ref, b_ref):
        mu = jnp.mean(z, axis=-1, keepdims=True)
        var = jnp.mean((z - mu) ** 2, axis=-1, keepdims=True)
        return (z - mu) * jax.lax.rsqrt(var + eps) * g_ref[...] + b_ref[...]

    x = x_ref[...].reshape(M, C)             # (M, C) f32; M = BLK*T fills MXU rows

    # ---- self-attention branch on LN1(x) ----
    xn_bf = layernorm(x, g1_ref, be1_ref).astype(jnp.bfloat16)

    # Fused QKV projection (1/sqrt(hs) pre-folded into the Q columns on host).
    # Result parked in a bf16 VMEM scratch; head loop reads cheap ref slices.
    qkv_scr[...] = jnp.dot(xn_bf, wqkv_ref[...],
                           preferred_element_type=jnp.float32).astype(jnp.bfloat16)

    # Additive causal mask, per element (T, T); scores stay f32 so -1e30 is safe.
    row = jax.lax.broadcasted_iota(jnp.int32, (T, T), 0)
    col = jax.lax.broadcasted_iota(jnp.int32, (T, T), 1)
    mask_add = jnp.where(row >= col, jnp.float32(0.0), jnp.float32(-1e30))
    # TODO(synk): for large T (>=512 on v7x, >=1024 on v5e/v6e) tile the KV axis
    # flash-style (online softmax) and build the mask per (q_block, kv_block)
    # tile from block-local iotas instead of a full (T, T) live value.

    contract_last = (((1,), (1,)), ((), ()))  # q @ k^T without a relayout transpose

    # Per-element, per-head attention. Each head's bf16 output is stored to the
    # (M, C) head scratch at lane offset h*hs (multiples of 128 -> aligned), so
    # the output projection runs ONCE with full contraction depth K=C below.
    # TODO(synk): for n_head > ~4 convert this static unroll to
    # lax.fori_loop(..., unroll=True) over a VMEM-resident body to cap vreg
    # live ranges (demo uses n_head=2, so static unroll is fine).
    for e in range(BLK):
        r = pl.ds(e * T, T)
        for h in range(n_head):
            q = qkv_scr[r, pl.ds(h * hs, hs)]              # (T, hs) bf16, scale folded
            k = qkv_scr[r, pl.ds(C + h * hs, hs)]          # (T, hs) bf16
            v = qkv_scr[r, pl.ds(2 * C + h * hs, hs)]      # (T, hs) bf16

            wei = jax.lax.dot_general(q, k, contract_last,
                                      preferred_element_type=jnp.float32)  # (T,T) f32
            wei = wei + mask_add
            wei = wei - jnp.max(wei, axis=-1, keepdims=True)
            p = jnp.exp(wei)
            p = p * pl.reciprocal(jnp.sum(p, axis=-1, keepdims=True), approx=True)
            # TODO(synk): attention / residual dropout omitted (eval-mode identity).

            head = jnp.dot(p.astype(jnp.bfloat16), v,
                           preferred_element_type=jnp.float32)             # (T, hs)
            head_scr[r, pl.ds(h * hs, hs)] = head.astype(jnp.bfloat16)

    # Single full-K output projection (M, C) @ (C, C); bias added once here.
    sa = jnp.dot(head_scr[...], wo_ref[...],
                 preferred_element_type=jnp.float32) + bo_ref[...]
    x = x + sa

    # ---- feed-forward branch on LN2(x) ----
    xn2 = layernorm(x, g2_ref, be2_ref).astype(jnp.bfloat16)
    hdn = jnp.dot(xn2, w1_ref[...], preferred_element_type=jnp.float32) + b1_ref[...]
    hdn = jnp.maximum(hdn, 0.0).astype(jnp.bfloat16)                       # ReLU
    ff = jnp.dot(hdn, w2_ref[...], preferred_element_type=jnp.float32) + b2_ref[...]

    o_ref[...] = (x + ff).reshape(BLK, T, C)


def transformer_block(x, params, n_head):
    B, T, C = x.shape
    hs = C // n_head
    H4 = 4 * C
    (wq, wk, wv, wo, bo, g1, be1, g2, be2, w1, b1, w2, b2) = params

    # Host-side weight prep:
    #  * fuse per-head Q/K/V weights into one (C, 3C) matrix (torch.cat head order)
    #  * fold the 1/sqrt(hs) attention scale into the Q columns
    #  * cast all matmul weights to bf16 (kernel accumulates in f32)
    scale = hs ** -0.5
    wq_full = jnp.transpose(wq, (1, 0, 2)).reshape(C, C) * scale
    wk_full = jnp.transpose(wk, (1, 0, 2)).reshape(C, C)
    wv_full = jnp.transpose(wv, (1, 0, 2)).reshape(C, C)
    wqkv = jnp.concatenate([wq_full, wk_full, wv_full], axis=1).astype(jnp.bfloat16)
    wo_bf = wo.astype(jnp.bfloat16)
    w1_bf = w1.astype(jnp.bfloat16)
    w2_bf = w2.astype(jnp.bfloat16)
    # TODO(synk): on v7x, evaluate fp8 storage for wqkv/w1/w2 (MXU-native fp8)
    # behind an accuracy gate against the f32 reference.

    # Two batch rows per grid step when B allows: M = 2T fills the 256-row MXU on
    # v6e/v7x and halves per-grid-step overhead, while keeping grid length >= 2
    # so the "parallel" axis still shards across v7x's two TensorCores.
    blk = 2 if (B % 2 == 0 and B >= 4) else 1
    grid = (B // blk,)

    def _rep(shape):
        """Grid-invariant weight/bias block: constant index_map + single buffer
        (no double-buffer VMEM for blocks that are never re-fetched)."""
        n = len(shape)
        return pl.BlockSpec(shape, lambda b, n=n: (0,) * n,
                            pipeline_mode=pl.Buffered(1))

    kernel = functools.partial(block_kernel, n_head=n_head)
    # TODO(synk): for long sequences add a query-block grid axis with online
    # softmax (flash-style); threshold T>=512 on v7x (64 MiB VMEM), T>=1024 on
    # v5e/v6e. Not needed at these demo shapes.
    return pl.pallas_call(
        kernel,
        out_shape=jax.ShapeDtypeStruct((B, T, C), jnp.float32),
        grid_spec=pltpu.PrefetchScalarGridSpec(
            num_scalar_prefetch=0,
            grid=grid,
            in_specs=[
                pl.BlockSpec((blk, T, C), lambda b: (b, 0, 0)),  # x rows (pipelined)
                _rep((C, 3 * C)),                                # fused QKV weight (bf16)
                _rep((C, C)),                                    # out-proj weight (bf16)
                _rep((1, C)),                                    # out-proj bias
                _rep((1, C)), _rep((1, C)),                      # ln1 gamma / beta
                _rep((1, C)), _rep((1, C)),                      # ln2 gamma / beta
                _rep((C, H4)), _rep((1, H4)),                    # ffn W1 (bf16) / b1
                _rep((H4, C)), _rep((1, C)),                     # ffn W2 (bf16) / b2
            ],
            out_specs=pl.BlockSpec((blk, T, C), lambda b: (b, 0, 0)),
            scratch_shapes=[
                pltpu.VMEM((blk * T, 3 * C), jnp.bfloat16),      # fused QKV activations
                pltpu.VMEM((blk * T, C), jnp.bfloat16),          # concatenated head outs
            ],
        ),
        compiler_params=pltpu.CompilerParams(
            dimension_semantics=("parallel",),
            vmem_limit_bytes=48 * 1024 * 1024,   # explicit; within v7x 64 MiB physical
        ),
    )(x, wqkv, wo_bf, bo, g1, be1, g2, be2, w1_bf, b1, w2_bf, b2)


def reference_block(x, params, n_head):
    """Pure-JAX f32 reference mirroring the PyTorch forward (dropout = identity)."""
    (wq, wk, wv, wo, bo, g1, be1, g2, be2, w1, b1, w2, b2) = params
    eps = 1e-5
    B, T, C = x.shape
    hs = C // n_head

    def ln(z, g, b):
        mu = jnp.mean(z, -1, keepdims=True)
        var = jnp.mean((z - mu) ** 2, -1, keepdims=True)
        return (z - mu) / jnp.sqrt(var + eps) * g + b

    xn = ln(x, g1[0], be1[0])
    mask = jnp.tril(jnp.ones((T, T), bool))
    outs = []
    for h in range(n_head):
        q = xn @ wq[h]
        k = xn @ wk[h]
        v = xn @ wv[h]
        wei = (q @ jnp.swapaxes(k, -2, -1)) * hs ** (-0.5)
        wei = jnp.where(mask, wei, -jnp.inf)
        wei = jax.nn.softmax(wei, axis=-1)
        outs.append(wei @ v)
    sa = jnp.concatenate(outs, -1) @ wo + bo[0]
    x = x + sa
    xn2 = ln(x, g2[0], be2[0])
    ff = jnp.maximum(xn2 @ w1 + b1[0], 0.0) @ w2 + b2[0]
    return x + ff


def make_params(key, n_embd, n_head):
    hs = n_embd // n_head
    ks = jax.random.split(key, 10)
    s = 0.02
    wq = jax.random.normal(ks[0], (n_head, n_embd, hs), jnp.float32) * s
    wk = jax.random.normal(ks[1], (n_head, n_embd, hs), jnp.float32) * s
    wv = jax.random.normal(ks[2], (n_head, n_embd, hs), jnp.float32) * s
    wo = jax.random.normal(ks[3], (n_embd, n_embd), jnp.float32) * s
    bo = jax.random.normal(ks[4], (1, n_embd), jnp.float32) * s
    g1 = jnp.ones((1, n_embd), jnp.float32)
    be1 = jnp.zeros((1, n_embd), jnp.float32)
    g2 = jnp.ones((1, n_embd), jnp.float32)
    be2 = jnp.zeros((1, n_embd), jnp.float32)
    w1 = jax.random.normal(ks[5], (n_embd, 4 * n_embd), jnp.float32) * s
    b1 = jax.random.normal(ks[6], (1, 4 * n_embd), jnp.float32) * s
    w2 = jax.random.normal(ks[7], (4 * n_embd, n_embd), jnp.float32) * s
    b2 = jax.random.normal(ks[8], (1, n_embd), jnp.float32) * s
    return (wq, wk, wv, wo, bo, g1, be1, g2, be2, w1, b1, w2, b2)


if __name__ == "__main__":
    # Small but lane-dense shapes (C and head_size are multiples of 128),
    # consistent with the module: (B, T, n_embd), n_head heads.
    # B=4 so the kernel exercises the 2-rows-per-grid-step path (grid=(2,)).
    B, T, n_embd, n_head = 4, 128, 256, 2
    key = jax.random.PRNGKey(0)
    kx, kp = jax.random.split(key)
    x = jax.random.normal(kx, (B, T, n_embd), jnp.float32)
    params = make_params(kp, n_embd, n_head)

    out = transformer_block(x, params, n_head)
    out = jax.block_until_ready(out)

    ref = reference_block(x, params, n_head)
    assert out.shape == (B, T, n_embd)
    # bf16 matmul inputs (f32 accumulation) + approx-reciprocal softmax denom
    # -> loosened tolerance vs the f32 reference.
    assert jnp.allclose(out, ref, rtol=2e-2, atol=2e-2), "mismatch vs reference"
    print("KERNEL_OK")
</pallas_src>

<mosaic_0001>
module attributes {stable_mosaic.version = 11 : i64} {
  func.func @block_kernel(%arg0: i32, %arg1: memref<2x128x256xf32, #tpu.memory_space<vmem>>, %arg2: memref<256x768xbf16, #tpu.memory_space<vmem>>, %arg3: memref<256x256xbf16, #tpu.memory_space<vmem>>, %arg4: memref<1x256xf32, #tpu.memory_space<vmem>>, %arg5: memref<1x256xf32, #tpu.memory_space<vmem>>, %arg6: memref<1x256xf32, #tpu.memory_space<vmem>>, %arg7: memref<1x256xf32, #tpu.memory_space<vmem>>, %arg8: memref<1x256xf32, #tpu.memory_space<vmem>>, %arg9: memref<256x1024xbf16, #tpu.memory_space<vmem>>, %arg10: memref<1x1024xf32, #tpu.memory_space<vmem>>, %arg11: memref<1024x256xbf16, #tpu.memory_space<vmem>>, %arg12: memref<1x256xf32, #tpu.memory_space<vmem>>, %arg13: memref<2x128x256xf32, #tpu.memory_space<vmem>>, %arg14: memref<256x768xbf16, #tpu.memory_space<vmem>>, %arg15: memref<256x256xbf16, #tpu.memory_space<vmem>>) attributes {dimension_semantics = [#tpu.dimension_semantics<parallel>], iteration_bounds = array<i64: 2>, scalar_prefetch = 0 : i64, scratch_operands = 2 : i64, tpu.core_type = #tpu.core_type<tc>, window_params = [{transform_indices = @transform_0, window_bounds = array<i64: 2, 128, 256>}, {pipeline_mode = #tpu.pipeline_mode<synchronous>, transform_indices = @transform_1, window_bounds = array<i64: 256, 768>}, {pipeline_mode = #tpu.pipeline_mode<synchronous>, transform_indices = @transform_2, window_bounds = array<i64: 256, 256>}, {pipeline_mode = #tpu.pipeline_mode<synchronous>, transform_indices = @transform_3, window_bounds = array<i64: 1, 256>}, {pipeline_mode = #tpu.pipeline_mode<synchronous>, transform_indices = @transform_4, window_bounds = array<i64: 1, 256>}, {pipeline_mode = #tpu.pipeline_mode<synchronous>, transform_indices = @transform_5, window_bounds = array<i64: 1, 256>}, {pipeline_mode = #tpu.pipeline_mode<synchronous>, transform_indices = @transform_6, window_bounds = array<i64: 1, 256>}, {pipeline_mode = #tpu.pipeline_mode<synchronous>, transform_indices = @transform_7, window_bounds = array<i64: 1, 256>}, {pipeline_mode = #tpu.pipeline_mode<synchronous>, transform_indices = @transform_8, window_bounds = array<i64: 256, 1024>}, {pipeline_mode = #tpu.pipeline_mode<synchronous>, transform_indices = @transform_9, window_bounds = array<i64: 1, 1024>}, {pipeline_mode = #tpu.pipeline_mode<synchronous>, transform_indices = @transform_10, window_bounds = array<i64: 1024, 256>}, {pipeline_mode = #tpu.pipeline_mode<synchronous>, transform_indices = @transform_11, window_bounds = array<i64: 1, 256>}, {transform_indices = @transform_12, window_bounds = array<i64: 2, 128, 256>}]} {
    %c0 = arith.constant 0 : index
    %c0_0 = arith.constant 0 : index
    %c0_1 = arith.constant 0 : index
    %0 = vector.load %arg1[%c0, %c0_0, %c0_1] : memref<2x128x256xf32, #tpu.memory_space<vmem>>, vector<2x128x256xf32>
    %1 = vector.shape_cast %0 : vector<2x128x256xf32> to vector<256x256xf32>
    %cst = arith.constant dense<0.000000e+00> : vector<256xf32>
    %2 = vector.multi_reduction <add>, %1, %cst [1] : vector<256x256xf32> to vector<256xf32>
    %3 = vector.shape_cast %2 : vector<256xf32> to vector<256x1xf32>
    %cst_2 = arith.constant 2.560000e+02 : f32
    %4 = vector.broadcast %cst_2 : f32 to vector<256x1xf32>
    %5 = arith.divf %3, %4 : vector<256x1xf32>
    %6 = vector.broadcast %5 : vector<256x1xf32> to vector<256x256xf32>
    %7 = arith.subf %1, %6 : vector<256x256xf32>
    %8 = arith.mulf %7, %7 : vector<256x256xf32>
    %cst_3 = arith.constant dense<0.000000e+00> : vector<256xf32>
    %9 = vector.multi_reduction <add>, %8, %cst_3 [1] : vector<256x256xf32> to vector<256xf32>
    %10 = vector.shape_cast %9 : vector<256xf32> to vector<256x1xf32>
    %cst_4 = arith.constant 2.560000e+02 : f32
    %11 = vector.broadcast %cst_4 : f32 to vector<256x1xf32>
    %12 = arith.divf %10, %11 : vector<256x1xf32>
    %13 = vector.broadcast %5 : vector<256x1xf32> to vector<256x256xf32>
    %14 = arith.subf %1, %13 : vector<256x256xf32>
    %cst_5 = arith.constant 9.99999974E-6 : f32
    %15 = vector.broadcast %cst_5 : f32 to vector<256x1xf32>
    %16 = arith.addf %12, %15 : vector<256x1xf32>
    %17 = math.rsqrt %16 : vector<256x1xf32>
    %18 = vector.broadcast %17 : vector<256x1xf32> to vector<256x256xf32>
    %19 = arith.mulf %14, %18 : vector<256x256xf32>
    %c0_6 = arith.constant 0 : index
    %c0_7 = arith.constant 0 : index
    %20 = vector.load %arg5[%c0_6, %c0_7] : memref<1x256xf32, #tpu.memory_space<vmem>>, vector<1x256xf32>
    %21 = vector.broadcast %20 : vector<1x256xf32> to vector<256x256xf32>
    %22 = arith.mulf %19, %21 : vector<256x256xf32>
    %c0_8 = arith.constant 0 : index
    %c0_9 = arith.constant 0 : index
    %23 = vector.load %arg6[%c0_8, %c0_9] : memref<1x256xf32, #tpu.memory_space<vmem>>, vector<1x256xf32>
    %24 = vector.broadcast %23 : vector<1x256xf32> to vector<256x256xf32>
    %25 = arith.addf %22, %24 : vector<256x256xf32>
    %26 = arith.truncf %25 : vector<256x256xf32> to vector<256x256xbf16>
    %c0_10 = arith.constant 0 : index
    %c0_11 = arith.constant 0 : index
    %27 = vector.load %arg2[%c0_10, %c0_11] : memref<256x768xbf16, #tpu.memory_space<vmem>>, vector<256x768xbf16>
    %cst_12 = arith.constant dense<0.000000e+00> : vector<256x768xf32>
    %28 = tpu.matmul %26, %27, %cst_12 {dimension_numbers = #tpu.dot_dimension_numbers<[1], [0], [0], [1], [0, 0, 1, 1], [], []>} : vector<256x256xbf16>, vector<256x768xbf16>, vector<256x768xf32> -> vector<256x768xf32>
    %29 = arith.truncf %28 : vector<256x768xf32> to vector<256x768xbf16>
    %c0_13 = arith.constant 0 : index
    %c0_14 = arith.constant 0 : index
    %30 = vector.load %arg14[%c0_13, %c0_14] : memref<256x768xbf16, #tpu.memory_space<vmem>>, vector<256x768xbf16>
    tpu.vector_store %arg14[%c0_13, %c0_14], %29 {strides = array<i32>} : memref<256x768xbf16, #tpu.memory_space<vmem>>, vector<256x768xbf16>,
    %31 = tpu.iota {dimensions = array<i32: 0>} : vector<128x128xi32>
    %32 = tpu.iota {dimensions = array<i32: 1>} : vector<128x128xi32>
    %33 = arith.cmpi sge, %31, %32 : vector<128x128xi32>
    %cst_15 = arith.constant 0.000000e+00 : f32
    %cst_16 = arith.constant -1.000000e+30 : f32
    %34 = vector.broadcast %cst_15 : f32 to vector<128x128xf32>
    %35 = vector.broadcast %cst_16 : f32 to vector<128x128xf32>
    %36 = arith.select %33, %34, %35 : vector<128x128xi1>, vector<128x128xf32>
    %c0_17 = arith.constant 0 : index
    %c0_18 = arith.constant 0 : index
    %37 = vector.load %arg14[%c0_17, %c0_18] : memref<256x768xbf16, #tpu.memory_space<vmem>>, vector<128x128xbf16>
    %c0_19 = arith.constant 0 : index
    %c256 = arith.constant 256 : index
    %38 = vector.load %arg14[%c0_19, %c256] : memref<256x768xbf16, #tpu.memory_space<vmem>>, vector<128x128xbf16>
    %c0_20 = arith.constant 0 : index
    %c512 = arith.constant 512 : index
    %39 = vector.load %arg14[%c0_20, %c512] : memref<256x768xbf16, #tpu.memory_space<vmem>>, vector<128x128xbf16>
    %cst_21 = arith.constant dense<0.000000e+00> : vector<128x128xf32>
    %40 = tpu.matmul %37, %38, %cst_21 {dimension_numbers = #tpu.dot_dimension_numbers<[1], [1], [0], [0], [0, 0, 1, 0], [], []>} : vector<128x128xbf16>, vector<128x128xbf16>, vector<128x128xf32> -> vector<128x128xf32>
    %41 = arith.addf %40, %36 : vector<128x128xf32>
    %cst_22 = arith.constant dense<0xFF800000> : vector<128xf32>
    %42 = vector.multi_reduction <maximumf>, %41, %cst_22 [1] : vector<128x128xf32> to vector<128xf32>
    %43 = vector.shape_cast %42 : vector<128xf32> to vector<128x1xf32>
    %44 = vector.broadcast %43 : vector<128x1xf32> to vector<128x128xf32>
    %45 = arith.subf %41, %44 : vector<128x128xf32>
    %46 = math.exp %45 : vector<128x128xf32>
    %cst_23 = arith.constant dense<0.000000e+00> : vector<128xf32>
    %47 = vector.multi_reduction <add>, %46, %cst_23 [1] : vector<128x128xf32> to vector<128xf32>
    %48 = vector.shape_cast %47 : vector<128xf32> to vector<128x1xf32>
    %49 = tpu.reciprocal %48 {approx = true} : vector<128x1xf32> -> vector<128x1xf32>
    %50 = vector.broadcast %49 : vector<128x1xf32> to vector<128x128xf32>
    %51 = arith.mulf %46, %50 : vector<128x128xf32>
    %52 = arith.truncf %51 : vector<128x128xf32> to vector<128x128xbf16>
    %cst_24 = arith.constant dense<0.000000e+00> : vector<128x128xf32>
    %53 = tpu.matmul %52, %39, %cst_24 {dimension_numbers = #tpu.dot_dimension_numbers<[1], [0], [0], [1], [0, 0, 1, 1], [], []>} : vector<128x128xbf16>, vector<128x128xbf16>, vector<128x128xf32> -> vector<128x128xf32>
    %54 = arith.truncf %53 : vector<128x128xf32> to vector<128x128xbf16>
    %c0_25 = arith.constant 0 : index
    %c0_26 = arith.constant 0 : index
    %55 = vector.load %arg15[%c0_25, %c0_26] : memref<256x256xbf16, #tpu.memory_space<vmem>>, vector<128x128xbf16>
    tpu.vector_store %arg15[%c0_25, %c0_26], %54 {strides = array<i32>} : memref<256x256xbf16, #tpu.memory_space<vmem>>, vector<128x128xbf16>,
    %c0_27 = arith.constant 0 : index
    %c128 = arith.constant 128 : index
    %56 = vector.load %arg14[%c0_27, %c128] : memref<256x768xbf16, #tpu.memory_space<vmem>>, vector<128x128xbf16>
    %c0_28 = arith.constant 0 : index
    %c384 = arith.constant 384 : index
    %57 = vector.load %arg14[%c0_28, %c384] : memref<256x768xbf16, #tpu.memory_space<vmem>>, vector<128x128xbf16>
    %c0_29 = arith.constant 0 : index
    %c640 = arith.constant 640 : index
    %58 = vector.load %arg14[%c0_29, %c640] : memref<256x768xbf16, #tpu.memory_space<vmem>>, vector<128x128xbf16>
    %cst_30 = arith.constant dense<0.000000e+00> : vector<128x128xf32>
    %59 = tpu.matmul %56, %57, %cst_30 {dimension_numbers = #tpu.dot_dimension_numbers<[1], [1], [0], [0], [0, 0, 1, 0], [], []>} : vector<128x128xbf16>, vector<128x128xbf16>, vector<128x128xf32> -> vector<128x128xf32>
    %60 = arith.addf %59, %36 : vector<128x128xf32>
    %cst_31 = arith.constant dense<0xFF800000> : vector<128xf32>
    %61 = vector.multi_reduction <maximumf>, %60, %cst_31 [1] : vector<128x128xf32> to vector<128xf32>
    %62 = vector.shape_cast %61 : vector<128xf32> to vector<128x1xf32>
    %63 = vector.broadcast %62 : vector<128x1xf32> to vector<128x128xf32>
    %64 = arith.subf %60, %63 : vector<128x128xf32>
    %65 = math.exp %64 : vector<128x128xf32>
    %cst_32 = arith.constant dense<0.000000e+00> : vector<128xf32>
    %66 = vector.multi_reduction <add>, %65, %cst_32 [1] : vector<128x128xf32> to vector<128xf32>
    %67 = vector.shape_cast %66 : vector<128xf32> to vector<128x1xf32>
    %68 = tpu.reciprocal %67 {approx = true} : vector<128x1xf32> -> vector<128x1xf32>
    %69 = vector.broadcast %68 : vector<128x1xf32> to vector<128x128xf32>
    %70 = arith.mulf %65, %69 : vector<128x128xf32>
    %71 = arith.truncf %70 : vector<128x128xf32> to vector<128x128xbf16>
    %cst_33 = arith.constant dense<0.000000e+00> : vector<128x128xf32>
    %72 = tpu.matmul %71, %58, %cst_33 {dimension_numbers = #tpu.dot_dimension_numbers<[1], [0], [0], [1], [0, 0, 1, 1], [], []>} : vector<128x128xbf16>, vector<128x128xbf16>, vector<128x128xf32> -> vector<128x128xf32>
    %73 = arith.truncf %72 : vector<128x128xf32> to vector<128x128xbf16>
    %c0_34 = arith.constant 0 : index
    %c128_35 = arith.constant 128 : index
    %74 = vector.load %arg15[%c0_34, %c128_35] : memref<256x256xbf16, #tpu.memory_space<vmem>>, vector<128x128xbf16>
    tpu.vector_store %arg15[%c0_34, %c128_35], %73 {strides = array<i32>} : memref<256x256xbf16, #tpu.memory_space<vmem>>, vector<128x128xbf16>,
    %c128_36 = arith.constant 128 : index
    %c0_37 = arith.constant 0 : index
    %75 = vector.load %arg14[%c128_36, %c0_37] : memref<256x768xbf16, #tpu.memory_space<vmem>>, vector<128x128xbf16>
    %c128_38 = arith.constant 128 : index
    %c256_39 = arith.constant 256 : index
    %76 = vector.load %arg14[%c128_38, %c256_39] : memref<256x768xbf16, #tpu.memory_space<vmem>>, vector<128x128xbf16>
    %c128_40 = arith.constant 128 : index
    %c512_41 = arith.constant 512 : index
    %77 = vector.load %arg14[%c128_40, %c512_41] : memref<256x768xbf16, #tpu.memory_space<vmem>>, vector<128x128xbf16>
    %cst_42 = arith.constant dense<0.000000e+00> : vector<128x128xf32>
    %78 = tpu.matmul %75, %76, %cst_42 {dimension_numbers = #tpu.dot_dimension_numbers<[1], [1], [0], [0], [0, 0, 1, 0], [], []>} : vector<128x128xbf16>, vector<128x128xbf16>, vector<128x128xf32> -> vector<128x128xf32>
    %79 = arith.addf %78, %36 : vector<128x128xf32>
    %cst_43 = arith.constant dense<0xFF800000> : vector<128xf32>
    %80 = vector.multi_reduction <maximumf>, %79, %cst_43 [1] : vector<128x128xf32> to vector<128xf32>
    %81 = vector.shape_cast %80 : vector<128xf32> to vector<128x1xf32>
    %82 = vector.broadcast %81 : vector<128x1xf32> to vector<128x128xf32>
    %83 = arith.subf %79, %82 : vector<128x128xf32>
    %84 = math.exp %83 : vector<128x128xf32>
    %cst_44 = arith.constant dense<0.000000e+00> : vector<128xf32>
    %85 = vector.multi_reduction <add>, %84, %cst_44 [1] : vector<128x128xf32> to vector<128xf32>
    %86 = vector.shape_cast %85 : vector<128xf32> to vector<128x1xf32>
    %87 = tpu.reciprocal %86 {approx = true} : vector<128x1xf32> -> vector<128x1xf32>
    %88 = vector.broadcast %87 : vector<128x1xf32> to vector<128x128xf32>
    %89 = arith.mulf %84, %88 : vector<128x128xf32>
    %90 = arith.truncf %89 : vector<128x128xf32> to vector<128x128xbf16>
    %cst_45 = arith.constant dense<0.000000e+00> : vector<128x128xf32>
    %91 = tpu.matmul %90, %77, %cst_45 {dimension_numbers = #tpu.dot_dimension_numbers<[1], [0], [0], [1], [0, 0, 1, 1], [], []>} : vector<128x128xbf16>, vector<128x128xbf16>, vector<128x128xf32> -> vector<128x128xf32>
    %92 = arith.truncf %91 : vector<128x128xf32> to vector<128x128xbf16>
    %c128_46 = arith.constant 128 : index
    %c0_47 = arith.constant 0 : index
    %93 = vector.load %arg15[%c128_46, %c0_47] : memref<256x256xbf16, #tpu.memory_space<vmem>>, vector<128x128xbf16>
    tpu.vector_store %arg15[%c128_46, %c0_47], %92 {strides = array<i32>} : memref<256x256xbf16, #tpu.memory_space<vmem>>, vector<128x128xbf16>,
    %c128_48 = arith.constant 128 : index
    %c128_49 = arith.constant 128 : index
    %94 = vector.load %arg14[%c128_48, %c128_49] : memref<256x768xbf16, #tpu.memory_space<vmem>>, vector<128x128xbf16>
    %c128_50 = arith.constant 128 : index
    %c384_51 = arith.constant 384 : index
    %95 = vector.load %arg14[%c128_50, %c384_51] : memref<256x768xbf16, #tpu.memory_space<vmem>>, vector<128x128xbf16>
    %c128_52 = arith.constant 128 : index
    %c640_53 = arith.constant 640 : index
    %96 = vector.load %arg14[%c128_52, %c640_53] : memref<256x768xbf16, #tpu.memory_space<vmem>>, vector<128x128xbf16>
    %cst_54 = arith.constant dense<0.000000e+00> : vector<128x128xf32>
    %97 = tpu.matmul %94, %95, %cst_54 {dimension_numbers = #tpu.dot_dimension_numbers<[1], [1], [0], [0], [0, 0, 1, 0], [], []>} : vector<128x128xbf16>, vector<128x128xbf16>, vector<128x128xf32> -> vector<128x128xf32>
    %98 = arith.addf %97, %36 : vector<128x128xf32>
    %cst_55 = arith.constant dense<0xFF800000> : vector<128xf32>
    %99 = vector.multi_reduction <maximumf>, %98, %cst_55 [1] : vector<128x128xf32> to vector<128xf32>
    %100 = vector.shape_cast %99 : vector<128xf32> to vector<128x1xf32>
    %101 = vector.broadcast %100 : vector<128x1xf32> to vector<128x128xf32>
    %102 = arith.subf %98, %101 : vector<128x128xf32>
    %103 = math.exp %102 : vector<128x128xf32>
    %cst_56 = arith.constant dense<0.000000e+00> : vector<128xf32>
    %104 = vector.multi_reduction <add>, %103, %cst_56 [1] : vector<128x128xf32> to vector<128xf32>
    %105 = vector.shape_cast %104 : vector<128xf32> to vector<128x1xf32>
    %106 = tpu.reciprocal %105 {approx = true} : vector<128x1xf32> -> vector<128x1xf32>
    %107 = vector.broadcast %106 : vector<128x1xf32> to vector<128x128xf32>
    %108 = arith.mulf %103, %107 : vector<128x128xf32>
    %109 = arith.truncf %108 : vector<128x128xf32> to vector<128x128xbf16>
    %cst_57 = arith.constant dense<0.000000e+00> : vector<128x128xf32>
    %110 = tpu.matmul %109, %96, %cst_57 {dimension_numbers = #tpu.dot_dimension_numbers<[1], [0], [0], [1], [0, 0, 1, 1], [], []>} : vector<128x128xbf16>, vector<128x128xbf16>, vector<128x128xf32> -> vector<128x128xf32>
    %111 = arith.truncf %110 : vector<128x128xf32> to vector<128x128xbf16>
    %c128_58 = arith.constant 128 : index
    %c128_59 = arith.constant 128 : index
    %112 = vector.load %arg15[%c128_58, %c128_59] : memref<256x256xbf16, #tpu.memory_space<vmem>>, vector<128x128xbf16>
    tpu.vector_store %arg15[%c128_58, %c128_59], %111 {strides = array<i32>} : memref<256x256xbf16, #tpu.memory_space<vmem>>, vector<128x128xbf16>,
    %c0_60 = arith.constant 0 : index
    %c0_61 = arith.constant 0 : index
    %113 = vector.load %arg15[%c0_60, %c0_61] : memref<256x256xbf16, #tpu.memory_space<vmem>>, vector<256x256xbf16>
    %c0_62 = arith.constant 0 : index
    %c0_63 = arith.constant 0 : index
    %114 = vector.load %arg3[%c0_62, %c0_63] : memref<256x256xbf16, #tpu.memory_space<vmem>>, vector<256x256xbf16>
    %cst_64 = arith.constant dense<0.000000e+00> : vector<256x256xf32>
    %115 = tpu.matmul %113, %114, %cst_64 {dimension_numbers = #tpu.dot_dimension_numbers<[1], [0], [0], [1], [0, 0, 1, 1], [], []>} : vector<256x256xbf16>, vector<256x256xbf16>, vector<256x256xf32> -> vector<256x256xf32>
    %c0_65 = arith.constant 0 : index
    %c0_66 = arith.constant 0 : index
    %116 = vector.load %arg4[%c0_65, %c0_66] : memref<1x256xf32, #tpu.memory_space<vmem>>, vector<1x256xf32>
    %117 = vector.broadcast %116 : vector<1x256xf32> to vector<256x256xf32>
    %118 = arith.addf %115, %117 : vector<256x256xf32>
    %119 = arith.addf %1, %118 : vector<256x256xf32>
    %cst_67 = arith.constant dense<0.000000e+00> : vector<256xf32>
    %120 = vector.multi_reduction <add>, %119, %cst_67 [1] : vector<256x256xf32> to vector<256xf32>
    %121 = vector.shape_cast %120 : vector<256xf32> to vector<256x1xf32>
    %cst_68 = arith.constant 2.560000e+02 : f32
    %122 = vector.broadcast %cst_68 : f32 to vector<256x1xf32>
    %123 = arith.divf %121, %122 : vector<256x1xf32>
    %124 = vector.broadcast %123 : vector<256x1xf32> to vector<256x256xf32>
    %125 = arith.subf %119, %124 : vector<256x256xf32>
    %126 = arith.mulf %125, %125 : vector<256x256xf32>
    %cst_69 = arith.constant dense<0.000000e+00> : vector<256xf32>
    %127 = vector.multi_reduction <add>, %126, %cst_69 [1] : vector<256x256xf32> to vector<256xf32>
    %128 = vector.shape_cast %127 : vector<256xf32> to vector<256x1xf32>
    %cst_70 = arith.constant 2.560000e+02 : f32
    %129 = vector.broadcast %cst_70 : f32 to vector<256x1xf32>
    %130 = arith.divf %128, %129 : vector<256x1xf32>
    %131 = vector.broadcast %123 : vector<256x1xf32> to vector<256x256xf32>
    %132 = arith.subf %119, %131 : vector<256x256xf32>
    %cst_71 = arith.constant 9.99999974E-6 : f32
    %133 = vector.broadcast %cst_71 : f32 to vector<256x1xf32>
    %134 = arith.addf %130, %133 : vector<256x1xf32>
    %135 = math.rsqrt %134 : vector<256x1xf32>
    %136 = vector.broadcast %135 : vector<256x1xf32> to vector<256x256xf32>
    %137 = arith.mulf %132, %136 : vector<256x256xf32>
    %c0_72 = arith.constant 0 : index
    %c0_73 = arith.constant 0 : index
    %138 = vector.load %arg7[%c0_72, %c0_73] : memref<1x256xf32, #tpu.memory_space<vmem>>, vector<1x256xf32>
    %139 = vector.broadcast %138 : vector<1x256xf32> to vector<256x256xf32>
    %140 = arith.mulf %137, %139 : vector<256x256xf32>
    %c0_74 = arith.constant 0 : index
    %c0_75 = arith.constant 0 : index
    %141 = vector.load %arg8[%c0_74, %c0_75] : memref<1x256xf32, #tpu.memory_space<vmem>>, vector<1x256xf32>
    %142 = vector.broadcast %141 : vector<1x256xf32> to vector<256x256xf32>
    %143 = arith.addf %140, %142 : vector<256x256xf32>
    %144 = arith.truncf %143 : vector<256x256xf32> to vector<256x256xbf16>
    %c0_76 = arith.constant 0 : index
    %c0_77 = arith.constant 0 : index
    %145 = vector.load %arg9[%c0_76, %c0_77] : memref<256x1024xbf16, #tpu.memory_space<vmem>>, vector<256x1024xbf16>
    %cst_78 = arith.constant dense<0.000000e+00> : vector<256x1024xf32>
    %146 = tpu.matmul %144, %145, %cst_78 {dimension_numbers = #tpu.dot_dimension_numbers<[1], [0], [0], [1], [0, 0, 1, 1], [], []>} : vector<256x256xbf16>, vector<256x1024xbf16>, vector<256x1024xf32> -> vector<256x1024xf32>
    %c0_79 = arith.constant 0 : index
    %c0_80 = arith.constant 0 : index
    %147 = vector.load %arg10[%c0_79, %c0_80] : memref<1x1024xf32, #tpu.memory_space<vmem>>, vector<1x1024xf32>
    %148 = vector.broadcast %147 : vector<1x1024xf32> to vector<256x1024xf32>
    %149 = arith.addf %146, %148 : vector<256x1024xf32>
    %cst_81 = arith.constant 0.000000e+00 : f32
    %150 = vector.broadcast %cst_81 : f32 to vector<256x1024xf32>
    %151 = arith.maximumf %149, %150 : vector<256x1024xf32>
    %152 = arith.truncf %151 : vector<256x1024xf32> to vector<256x1024xbf16>
    %c0_82 = arith.constant 0 : index
    %c0_83 = arith.constant 0 : index
    %153 = vector.load %arg11[%c0_82, %c0_83] : memref<1024x256xbf16, #tpu.memory_space<vmem>>, vector<1024x256xbf16>
    %cst_84 = arith.constant dense<0.000000e+00> : vector<256x256xf32>
    %154 = tpu.matmul %152, %153, %cst_84 {dimension_numbers = #tpu.dot_dimension_numbers<[1], [0], [0], [1], [0, 0, 1, 1], [], []>} : vector<256x1024xbf16>, vector<1024x256xbf16>, vector<256x256xf32> -> vector<256x256xf32>
    %c0_85 = arith.constant 0 : index
    %c0_86 = arith.constant 0 : index
    %155 = vector.load %arg12[%c0_85, %c0_86] : memref<1x256xf32, #tpu.memory_space<vmem>>, vector<1x256xf32>
    %156 = vector.broadcast %155 : vector<1x256xf32> to vector<256x256xf32>
    %157 = arith.addf %154, %156 : vector<256x256xf32>
    %158 = arith.addf %119, %157 : vector<256x256xf32>
    %159 = vector.shape_cast %158 : vector<256x256xf32> to vector<2x128x256xf32>
    %c0_87 = arith.constant 0 : index
    %c0_88 = arith.constant 0 : index
    %c0_89 = arith.constant 0 : index
    %160 = vector.load %arg13[%c0_87, %c0_88, %c0_89] : memref<2x128x256xf32, #tpu.memory_space<vmem>>, vector<2x128x256xf32>
    tpu.vector_store %arg13[%c0_87, %c0_88, %c0_89], %159 {strides = array<i32>} : memref<2x128x256xf32, #tpu.memory_space<vmem>>, vector<2x128x256xf32>,
    return
  }
  func.func @transform_0(%arg0: i32) -> (i32, i32, i32) {
    %c0_i32 = arith.constant 0 : i32
    %c0_i32_0 = arith.constant 0 : i32
    %c0_i32_1 = arith.constant 0 : i32
    return %arg0, %c0_i32, %c0_i32_0 : i32, i32, i32
  }
  func.func @transform_1(%arg0: i32) -> (i32, i32) {
    %c0_i32 = arith.constant 0 : i32
    %c0_i32_0 = arith.constant 0 : i32
    %c0_i32_1 = arith.constant 0 : i32
    return %c0_i32, %c0_i32_0 : i32, i32
  }
  func.func @transform_2(%arg0: i32) -> (i32, i32) {
    %c0_i32 = arith.constant 0 : i32
    %c0_i32_0 = arith.constant 0 : i32
    %c0_i32_1 = arith.constant 0 : i32
    return %c0_i32, %c0_i32_0 : i32, i32
  }
  func.func @transform_3(%arg0: i32) -> (i32, i32) {
    %c0_i32 = arith.constant 0 : i32
    %c0_i32_0 = arith.constant 0 : i32
    %c0_i32_1 = arith.constant 0 : i32
    return %c0_i32, %c0_i32_0 : i32, i32
  }
  func.func @transform_4(%arg0: i32) -> (i32, i32) {
    %c0_i32 = arith.constant 0 : i32
    %c0_i32_0 = arith.constant 0 : i32
    %c0_i32_1 = arith.constant 0 : i32
    return %c0_i32, %c0_i32_0 : i32, i32
  }
  func.func @transform_5(%arg0: i32) -> (i32, i32) {
    %c0_i32 = arith.constant 0 : i32
    %c0_i32_0 = arith.constant 0 : i32
    %c0_i32_1 = arith.constant 0 : i32
    return %c0_i32, %c0_i32_0 : i32, i32
  }
  func.func @transform_6(%arg0: i32) -> (i32, i32) {
    %c0_i32 = arith.constant 0 : i32
    %c0_i32_0 = arith.constant 0 : i32
    %c0_i32_1 = arith.constant 0 : i32
    return %c0_i32, %c0_i32_0 : i32, i32
  }
  func.func @transform_7(%arg0: i32) -> (i32, i32) {
    %c0_i32 = arith.constant 0 : i32
    %c0_i32_0 = arith.constant 0 : i32
    %c0_i32_1 = arith.constant 0 : i32
    return %c0_i32, %c0_i32_0 : i32, i32
  }
  func.func @transform_8(%arg0: i32) -> (i32, i32) {
    %c0_i32 = arith.constant 0 : i32
    %c0_i32_0 = arith.constant 0 : i32
    %c0_i32_1 = arith.constant 0 : i32
    return %c0_i32, %c0_i32_0 : i32, i32
  }
  func.func @transform_9(%arg0: i32) -> (i32, i32) {
    %c0_i32 = arith.constant 0 : i32
    %c0_i32_0 = arith.constant 0 : i32
    %c0_i32_1 = arith.constant 0 : i32
    return %c0_i32, %c0_i32_0 : i32, i32
  }
  func.func @transform_10(%arg0: i32) -> (i32, i32) {
    %c0_i32 = arith.constant 0 : i32
    %c0_i32_0 = arith.constant 0 : i32
    %c0_i32_1 = arith.constant 0 : i32
    return %c0_i32, %c0_i32_0 : i32, i32
  }
  func.func @transform_11(%arg0: i32) -> (i32, i32) {
    %c0_i32 = arith.constant 0 : i32
    %c0_i32_0 = arith.constant 0 : i32
    %c0_i32_1 = arith.constant 0 : i32
    return %c0_i32, %c0_i32_0 : i32, i32
  }
  func.func @transform_12(%arg0: i32) -> (i32, i32, i32) {
    %c0_i32 = arith.constant 0 : i32
    %c0_i32_0 = arith.constant 0 : i32
    %c0_i32_1 = arith.constant 0 : i32
    return %arg0, %c0_i32, %c0_i32_0 : i32, i32, i32
  }
}

</mosaic_0001>

<bundles_post_ra>
// kernel: tpu_custom_call.1
= control target key start
LH: loop header
LB: loop body
LE: loop exit
PB: predicated region body
PF: predicated region fallthrough
CT: control target
= control target key end

     0   :  { %s16010_s0 = inlined_call_operand.hbm [shape: f32[4,128,256], index: 0, kind: input, shape index: {}]   ;;  %s16011_s1 = inlined_call_operand.hbm [shape: bf16[256,768], index: 1, kind: input, shape index: {}]   ;;  %s16012_s2 = inlined_call_operand.hbm [shape: bf16[256,256], index: 2, kind: input, shape index: {}]   ;;  %s16013_s3 = inlined_call_operand.vmem [shape: f32[1,256], index: 3, kind: input, shape index: {}]   ;;  %s16014_s4 = inlined_call_operand.vmem [shape: f32[1,256], index: 4, kind: input, shape index: {}]   ;;  %s16015_s5 = inlined_call_operand.vmem [shape: f32[1,256], index: 5, kind: input, shape index: {}]   ;;  %s16016_s6 = inlined_call_operand.vmem [shape: f32[1,256], index: 6, kind: input, shape index: {}]   ;;  %s16017_s7 = inlined_call_operand.vmem [shape: f32[1,256], index: 7, kind: input, shape index: {}]   ;;  %s16018_s8 = inlined_call_operand.hbm [shape: bf16[256,1024], index: 8, kind: input, shape index: {}]   ;;  %s16019_s9 = inlined_call_operand.vmem [shape: f32[1,1024], index: 9, kind: input, shape index: {}]   ;;  %s16020_s10 = inlined_call_operand.hbm [shape: bf16[1024,256], index: 10, kind: input, shape index: {}]   ;;  %s16021_s11 = inlined_call_operand.vmem [shape: f32[1,256], index: 11, kind: input, shape index: {}]   ;;  %s16022_s12 = inlined_call_operand.hbm [shape: f32[4,128,256], index: 12, kind: output, shape index: {}]  }
   0x1   :  { %16293 = sst [smem:[#allocation117_spill]] %s16011_s1 }
   0x2   :  { %16294 = sst [smem:[#allocation118_spill]] %s16019_s9 }
   0x3   :  { %16295 = sst [smem:[#allocation119_spill]] %s16021_s11 }
   0x4   :  { %16296 = sst [smem:[#allocation120_spill]] %s16022_s12 }
   0x5   :  { %17 = vsyncpa [#allocation5], 0 }
   0x6   :  { %19 = vsyncpa [#allocation5 + $0x1], 0 }
   0x7   :  { %20 = vsyncpa [#allocation8], 0 }
   0x8   :  { %21 = vsyncpa [#allocation11], 0 }
   0x9   :  { %22 = vsyncpa [#allocation6], 0 }
   0xa   :  { %24 = vsyncpa [#allocation6 + $0x1], 0  ;;  %s11529_s21 = smov 0   ;;  %s11531_s22 = smov 0  }
   0xb   :  { %s11533_s23 = smov 0   ;;  %s11535_s24 = smov 0  }
   0xc LB: > { %16297 = sst [smem:[#allocation18_spill]] %s11433_s21  ;;  %s11550_s25 = sadd.s32 4294967295, %s11445_s24   ;;  %s11445_s24 = sphi %s11535_s24, %s16910_s24   ;;  %s11441_s23 = sphi %s11533_s23, %s16909_s23   ;;  %s11437_s22 = sphi %s11531_s22, %s16908_s22   ;;  %s11433_s21 = sphi %s11529_s21, %s16907_s21  }
   0xd   : > { %s9158_s26 = sadd.s32 4294967294, %s11445_s24   ;;  %p50_p0 = scmp.ne.s32.totalorder %s11437_s22, %s11433_s21 }
   0xe   : > { %p16024_p1 = scmp.eq.s32.totalorder %s11550_s25, 0  ;;  %p311_p3 = scmp.eq.s32.totalorder %s9158_s26, 1 }
   0xf   : > { %p9159_p5 = scmp.ge.s32.totalorder %s11445_s24, 1  ;;  %p318_p7 = scmp.lt.s32.totalorder %s11445_s24, 3 }
  0x10   : > { %p11559_p4 = por %p16024_p1, %p50_p0  ;;  %p11564_p6 = por %p311_p3, %p50_p0 }
  0x11   : > { %p11569_p8 = pnand %p9159_p5, %p318_p7  ;;  %s11447_s30 = smov [#allocation7]  }
  0x12   : > { %s16298_s27 = scalar_select %p11559_p4, 1, 0 }
  0x13   : > { %s16299_s28 = scalar_select %p11564_p6, 1, 0 }
  0x14   : > { %s16301_s29 = scalar_select %p11569_p8, 1, 0 }
  0x15   : > { %16300 = sst [smem:[#allocation19_spill]] %s16299_s28  ;;  %s330_s13 = sshll.u32 %s11447_s30, 4  ;;  %s11573_s13 = int_to_ptr.vmem [resolvable:$true] %s330_s13 }
  0x16   : > { %p10262_p9 = pneg %p11569_p8  ;;  %s11448_s15 = smov [#allocation10]  }
  0x17   : > { %s371_s16 = sshll.u32 %s11448_s15, 4  ;;  %s16303_s1 = sld [smem:[#allocation117_spill]]  ;;  %s11584_s16 = int_to_ptr.vmem [resolvable:$true] %s371_s16 }
  0x18   : > { %p11580_p11 = pnand %p10262_p9, %p16024_p1 }
  0x1a   : > { %p11594_p13 = pneg %p11580_p11 }
  0x1d   : > { %s11229_s19 = scalar_lea.hbm %s16303_s1, 12288 }
  0x1e   : > { %p11230_p12 = scmp.ne.s32.totalorder %s16303_s1, %s11229_s19  ;;  %p11236_p5 = scmp.lt.u32.totalorder %s11229_s19, %s16303_s1 }
  0x20   : > { %p11232_p0 = pnand %p11594_p13, %p11230_p12 }
  0x22   : > { %p11233_p3 = pneg %p11232_p0 }
  0x24   : > { %p11238_p7 = pnand %p11236_p5, %p11233_p3 }
  0x26   : > { %11241 = shalt.err (!%p11238_p7)
}
  0x27   : > { %s11242_s17 = scalar_lea.vmem %s11573_s13, 12288  ;;  %p11250_p2 = scmp.lt.s32.totalorder %s11573_s13, %s11573_s13 }
  0x28   : > { %p11243_p9 = scmp.ne.s32.totalorder %s11573_s13, %s11242_s17  ;;  %p11251_p6 = scmp.lt.s32.totalorder %s11242_s17, %s11242_s17 }
  0x2a   : > { %p11245_p10 = pnand %p11243_p9, %p11594_p13  ;;  %p11252_p12 = por %p11251_p6, %p11250_p2 }
  0x2c   : > { %p11246_p1 = pneg %p11245_p10 }
  0x2e   : > { %p11253_p0 = pnand %p11252_p12, %p11246_p1 }
  0x30   : > { %11256 = shalt.err (!%p11253_p0)
}
  0x31   : > { %s11449_s18 = smov 384   ;;  %s11450_s28 = smov 24  }
  0x32   : > { %10265 = dma.hbm_to_vmem [thread:$0]  (!%p11580_p11), %s16303_s1, 12288, %s11573_s13, [#allocation8], %s11449_s18, %s11449_s18, %s11450_s28  }
  0x33   : > { %s11257_s21 = scalar_lea.hbm %s16018_s8, 16384 }
  0x34   : > { %p11258_p2 = scmp.ne.s32.totalorder %s16018_s8, %s11257_s21  ;;  %p11264_p10 = scmp.lt.u32.totalorder %s11257_s21, %s16018_s8 }
  0x36   : > { %p11260_p1 = pnand %p11258_p2, %p11594_p13 }
  0x38   : > { %p11261_p6 = pneg %p11260_p1 }
  0x3a   : > { %p11266_p3 = pnand %p11264_p10, %p11261_p6 }
  0x3c   : > { %11269 = shalt.err (!%p11266_p3)
}
  0x3d   : > { %s11270_s13 = scalar_lea.vmem %s11584_s16, 16384  ;;  %p11278_p12 = scmp.lt.s32.totalorder %s11584_s16, %s11584_s16 }
  0x3e   : > { %p11271_p5 = scmp.ne.s32.totalorder %s11584_s16, %s11270_s13  ;;  %p11279_p0 = scmp.lt.s32.totalorder %s11270_s13, %s11270_s13 }
  0x40   : > { %p11273_p7 = pnand %p11271_p5, %p11594_p13  ;;  %p11280_p2 = por %p11279_p0, %p11278_p12 }
  0x42   : > { %p11274_p9 = pneg %p11273_p7 }
  0x44   : > { %p11281_p1 = pnand %p11280_p2, %p11274_p9 }
  0x46   : > { %11284 = shalt.err (!%p11281_p1)
}
  0x47   : > { %s11451_s11 = smov 512   ;;  %s11452_s9 = smov 32  }
  0x48   : > { %10271 = dma.hbm_to_vmem [thread:$0]  (!%p11580_p11), %s16018_s8, 16384, %s11584_s16, [#allocation11], %s11451_s11, %s11451_s11, %s11452_s9  }
  0x49   : > { %s11453_s18 = smov [#allocation9]   ;;  %s11285_s26 = scalar_lea.hbm %s16012_s2, 4096 }
  0x4a   : > { %s343_s28 = sshll.u32 %s11453_s18, 4  ;;  %p11286_p6 = scmp.ne.s32.totalorder %s16012_s2, %s11285_s26  ;;  %s344_s28 = int_to_ptr.vmem [resolvable:$true] %s343_s28 }
  0x4b   : > { %p11292_p5 = scmp.lt.u32.totalorder %s11285_s26, %s16012_s2 }
  0x4c   : > { %p11288_p10 = pnand %p11286_p6, %p11594_p13 }
  0x4e   : > { %p11289_p3 = pneg %p11288_p10 }
  0x50   : > { %p11294_p7 = pnand %p11292_p5, %p11289_p3 }
  0x52   : > { %11297 = shalt.err (!%p11294_p7)
}
  0x53   : > { %s11298_s16 = scalar_lea.vmem %s344_s28, 4096  ;;  %p11306_p2 = scmp.lt.s32.totalorder %s344_s28, %s344_s28 }
  0x54   : > { %p11299_p9 = scmp.ne.s32.totalorder %s344_s28, %s11298_s16  ;;  %p11307_p1 = scmp.lt.s32.totalorder %s11298_s16, %s11298_s16 }
  0x56   : > { %p11301_p12 = pnand %p11299_p9, %p11594_p13  ;;  %p11308_p4 = por %p11307_p1, %p11306_p2 }
  0x58   : > { %p11302_p0 = pneg %p11301_p12 }
  0x5a   : > { %p11309_p8 = pnand %p11308_p4, %p11302_p0 }
  0x5c   : > { %11312 = shalt.err (!%p11309_p8)
}
  0x5d   : > { %s11454_s11 = smov 128   ;;  %s11455_s9 = smov 8  }
  0x5e   : > { %10268 = dma.hbm_to_vmem [thread:$0]  (!%p11580_p11), %s16012_s2, 4096, %s344_s28, [#allocation8], %s11454_s11, %s11454_s11, %s11455_s9  }
  0x5f   : > { %s11456_s21 = smov [#allocation12]   ;;  %s11313_s26 = scalar_lea.hbm %s16020_s10, 16384 }
  0x60   : > { %s387_s18 = sshll.u32 %s11456_s21, 4  ;;  %p11314_p4 = scmp.ne.s32.totalorder %s16020_s10, %s11313_s26  ;;  %s388_s18 = int_to_ptr.vmem [resolvable:$true] %s387_s18 }
  0x61   : > { %p11320_p10 = scmp.lt.u32.totalorder %s11313_s26, %s16020_s10 }
  0x62   : > { %p11316_p8 = pnand %p11314_p4, %p11594_p13 }
  0x64   : > { %p11317_p6 = pneg %p11316_p8 }
  0x66   : > { %p11322_p3 = pnand %p11320_p10, %p11317_p6 }
  0x68   : > { %11325 = shalt.err (!%p11322_p3)
}
  0x69   : > { %s11326_s28 = scalar_lea.vmem %s388_s18, 16384  ;;  %p11334_p12 = scmp.lt.s32.totalorder %s388_s18, %s388_s18 }
  0x6a   : > { %p11327_p5 = scmp.ne.s32.totalorder %s388_s18, %s11326_s28  ;;  %p11335_p0 = scmp.lt.s32.totalorder %s11326_s28, %s11326_s28 }
  0x6c   : > { %p11329_p7 = pnand %p11327_p5, %p11594_p13  ;;  %p11336_p2 = por %p11335_p0, %p11334_p12 }
  0x6e   : > { %p11330_p9 = pneg %p11329_p7 }
  0x70   : > { %p11337_p1 = pnand %p11336_p2, %p11330_p9 }
  0x72   : > { %11340 = shalt.err (!%p11337_p1)
}
  0x73   : > { %10274 = dma.hbm_to_vmem [thread:$0]  (!%p11580_p11), %s16020_s10, 16384, %s388_s18, [#allocation11], %s11454_s11, %s11454_s11, %s11455_s9  }
  0x74   : > { %s11675_s30 = sadd.s32 1, %s11445_s24   ;;  %s37_s21 = sadd.s32 1, %s11441_s23 }
  0x75   : > { %s34_s14 = ssub.s32 %s11445_s24, %s11675_s30  ;;  %p44_p13 = scmp.ne.s32.totalorder %s11441_s23, %s11437_s22 }
  0x76   : > { %p35_p4 = scmp.eq.s32.totalorder %s34_s14, 0  ;;  %p45_p8 = scmp.eq.s32.totalorder %s11445_s24, 0 }
  0x77   : > { %p16305_p6 = scmp.eq.s32.totalorder %s11550_s25, 1  ;;  %p10287_p3 = scmp.lt.s32.totalorder %s11445_s24, 2 }
  0x78   : > { %s11691_s20 = scalar_select %p35_p4, %s11441_s23, %s37_s21  }
  0x79   : > { %p11685_p10 = por %p16305_p6, %p44_p13  ;;  %p46_p5 = por %p45_p8, %p44_p13 }
  0x7a   : > { %s404_s26 = sand.u32 1, %s11441_s23   ;;  %s9567_s11 = sshll.u32 %s11445_s24, 13 }
  0x7b   : > { %s9165_s15 = sshll.u32 %s404_s26, 9  ;;  %s11698_s17 = scalar_lea.hbm %s16010_s0, %s9567_s11 }
  0x7c   : > { %s408_s13 = scalar_lea.vmem [#allocation4], %s9165_s15  ;;  %p11702_p11 = pnand %p10287_p3, %p46_p5 }
  0x7d   : > { %s416_s16 = sshll.u32 %s408_s13, 4  ;;  %s11706_s1 = scalar_lea.sflag [#allocation5], %s404_s26  ;;  %s11700_s16 = int_to_ptr.vmem [resolvable:$true] %s416_s16 }
  0x7e   : > { %s11341_s12 = scalar_lea.hbm %s11698_s17, 8192  ;;  %p11343_p9 = pneg %p11702_p11 }
  0x7f   : > { %p11342_p7 = scmp.ne.s32.totalorder %s11698_s17, %s11341_s12  ;;  %s11346_s15 = scalar_lea.hbm %s16010_s0, 16384 }
  0x80   : > { %p11347_p2 = scmp.lt.u32.totalorder %s11698_s17, %s16010_s0  ;;  %p11348_p1 = scmp.lt.u32.totalorder %s11346_s15, %s11341_s12 }
  0x81   : > { %p11344_p12 = pnand %p11343_p9, %p11342_p7  ;;  %p11350_p4 = scmp.lt.u32.totalorder %s11341_s12, %s11698_s17 }
  0x82   : > { %p11349_p13 = por %p11348_p1, %p11347_p2 }
  0x83   : > { %p11345_p0 = pneg %p11344_p12 }
  0x84   : > { %p11351_p8 = por %p11350_p4, %p11349_p13 }
  0x86   : > { %p11352_p6 = pnand %p11351_p8, %p11345_p0 }
  0x88   : > { %11355 = shalt.err (!%p11352_p6)
}
  0x89   : > { %s11356_s26 = scalar_lea.vmem %s11700_s16, 8192  ;;  %s11457_s18 = smov [#allocation4]  }
  0x8a   : > { %p11357_p3 = scmp.ne.s32.totalorder %s11700_s16, %s11356_s26  ;;  %s11361_s13 = sshll.u32 %s11457_s18, 4  ;;  %s11362_s13 = int_to_ptr.vmem [resolvable:$false] %s11361_s13 }
  0x8b   : > { %s11363_s21 = scalar_lea.vmem %s11362_s13, 16384  ;;  %p11364_p12 = scmp.lt.s32.totalorder %s11700_s16, %s11362_s13 }
  0x8c   : > { %p11359_p5 = pnand %p11357_p3, %p11343_p9  ;;  %p11365_p2 = scmp.lt.s32.totalorder %s11363_s21, %s11356_s26 }
  0x8e   : > { %p11360_p7 = pneg %p11359_p5  ;;  %p11366_p1 = por %p11365_p2, %p11364_p12 }
  0x90   : > { %p11367_p13 = pnand %p11366_p1, %p11360_p7 }
  0x92   : > { %11370 = shalt.err (!%p11367_p13)
}
  0x93   : > { %s11458_s12 = smov 256   ;;  %s11459_s14 = smov 16  }
  0x94   : > { %10278 = dma.hbm_to_vmem [thread:$0]  (!%p11702_p11), %s11698_s17, 8192, %s11700_s16, %s11706_s1, %s11458_s12, %s11458_s12, %s11459_s14  }
  0x95   : > { %p16308_p9 = scmp.ne.s32.totalorder %s16301_s29, 0 }
  0x97   : > { %428 = sbr.rel (%p16308_p9) target bundleno = 4500 (0x1194), region = 68 }
  0x9e   : > { %s11737_s15 = sand.u32 1, %s11437_s22   ;;  %p16309_p0 = scmp.ne.s32.totalorder %s16298_s27, 0 }
  0x9f   : > { %s9170_s11 = sshll.u32 %s11737_s15, 9  ;;  %s431_s9 = scalar_lea.sflag [#allocation5], %s11737_s15 }
  0xa0   : > { %s11743_s26 = scalar_lea.vmem [#allocation4], %s9170_s11 }
  0xa1   : > { %11416 = dma.done.wait (%p16309_p0), %s431_s9, 8192  }
  0xa2   : > { %11418 = vsyncadd (%p16309_p0), %s431_s9, 4294959104  ;;  %p16310_p11 = scmp.eq.s32.totalorder %s11550_s25, 0 }
  0xa4   : > { %11420 = dma.done.wait (%p16310_p11), [#allocation8], 16384   ;;  %p16311_p4 = pmov %p16310_p11 }
  0xa6   : > { %11422 = vsyncadd (%p16311_p4), [#allocation8], 4294950912  ;;  %p16312_p8 = pmov %p16311_p4 }
  0xa7   : > { %p16313_p6 = pmov %p16311_p4 }
  0xa8   : > { %11424 = dma.done.wait (%p16312_p8), [#allocation11], 32768  }
  0xa9   : > { %11426 = vsyncadd (%p16313_p6), [#allocation11], 4294934528  ;;  %v11758_v0 = vld [vmem:[%s11743_s26] sm:$0xff]  ;;  %v11761_v1 = vld [vmem:[%s11743_s26 + $0x8] sm:$0xff]  ;;  %s16835_s28 = sld [smem:[#allocation119_spill]]  ;;  %s15771_s1 = scalar_lea.vmem [#allocation13], %s9170_s11 }
  0xaa   : > { %v11764_v2 = vld [vmem:[%s11743_s26 + $0x10] sm:$0xff]  ;;  %v558_v3 = vadd.f32 %v11761_v1, %v11758_v0  ;;  %v11769_v4 = vld [vmem:[%s11743_s26 + $0x18] sm:$0xff]  ;;  %v11772_v5 = vld [vmem:[%s11743_s26 + $0x20] sm:$0xff]  ;;  %s9569_s11 = sshll.u32 %s11550_s25, 13  ;;  %s9047_s18 = sshll.u32 %s15771_s1, 4  ;;  %s15962_s18 = int_to_ptr.vmem [resolvable:$true] %s9047_s18 }
  0xab   : > { %v11775_v6 = vld [vmem:[%s11743_s26 + $0x28] sm:$0xff]  ;;  %v11780_v8 = vld [vmem:[%s11743_s26 + $0x30] sm:$0xff]  ;;  %v11783_v9 = vld [vmem:[%s11743_s26 + $0x38] sm:$0xff]  ;;  %v561_v10 = vadd.f32 %v11769_v4, %v11764_v2  ;;  %s16901_s12 = sld [smem:[#allocation120_spill]]  ;;  %s9033_s25 = scalar_lea.sflag [#allocation6], %s11737_s15 }
  0xac   : > { %v564_v7 = vadd.f32 %v11775_v6, %v11772_v5  ;;  %559 = vadd.xlane.f32.xlu0 %v558_v3  ;;  %v567_v11 = vadd.f32 %v11783_v9, %v11780_v8  ;;  %v11790_v12 = vld [vmem:[%s11743_s26 + $0x40] sm:$0xff]  ;;  %v11793_v13 = vld [vmem:[%s11743_s26 + $0x48] sm:$0xff]  ;;  %v11796_v14 = vld [vmem:[%s11743_s26 + $0x50] sm:$0xff]  ;;  %s11371_s9 = scalar_lea.vmem %s15962_s18, 8192  ;;  %s11461_s27 = smov [#allocation13]  }
  0xad   : > { %v11799_v15 = vld [vmem:[%s11743_s26 + $0x58] sm:$0xff]  ;;  %v570_v16 = vadd.f32 %v11793_v13, %v11790_v12  ;;  %v11806_v18 = vld [vmem:[%s11743_s26 + $0x60] sm:$0xff]  ;;  %v11809_v19 = vld [vmem:[%s11743_s26 + $0x68] sm:$0xff]  ;;  %p11372_p3 = scmp.ne.s32.totalorder %s15962_s18, %s11371_s9  ;;  %s11375_s29 = sshll.u32 %s11461_s27, 4  ;;  %s11376_s29 = int_to_ptr.vmem [resolvable:$false] %s11375_s29 }
  0xae   : > { %565 = vadd.xlane.f32.xlu1 %v564_v7  ;;  %v573_v17 = vadd.f32 %v11799_v15, %v11796_v14  ;;  %v11812_v20 = vld [vmem:[%s11743_s26 + $0x70] sm:$0xff]  ;;  %v11815_v21 = vld [vmem:[%s11743_s26 + $0x78] sm:$0xff]  ;;  %v576_v22 = vadd.f32 %v11809_v19, %v11806_v18  ;;  %v11822_v24 = vld [vmem:[%s11743_s26 + $0x80] sm:$0xff]  ;;  %s11377_s17 = scalar_lea.vmem %s11376_s29, 16384  ;;  %p11378_p12 = scmp.lt.s32.totalorder %s15962_s18, %s11376_s29 }
  0xaf   : > { %v579_v23 = vadd.f32 %v11815_v21, %v11812_v20  ;;  %v11825_v25 = vld [vmem:[%s11743_s26 + $0x88] sm:$0xff]  ;;  %v11828_v26 = vld [vmem:[%s11743_s26 + $0x90] sm:$0xff]  ;;  %v11831_v27 = vld [vmem:[%s11743_s26 + $0x98] sm:$0xff]  ;;  %p11373_p5 = pnand %p11372_p3, %p11685_p10  ;;  %p11379_p2 = scmp.lt.s32.totalorder %s11377_s17, %s11371_s9 }
  0xb0   : > { %562 = vadd.xlane.f32.xlu0 %v561_v10  ;;  %v514_v28 = vld [vmem:[%s11743_s26 + $0xa0] sm:$0xff]  ;;  %v515_v29 = vld [vmem:[%s11743_s26 + $0xa8] sm:$0xff]  ;;  %v582_v30 = vadd.f32 %v11825_v25, %v11822_v24  ;;  %v516_v31 = vld [vmem:[%s11743_s26 + $0xb0] sm:$0xff]  ;;  %v585_v33 = vadd.f32 %v11831_v27, %v11828_v26 }
  0xb1   : > { %v517_v32 = vld [vmem:[%s11743_s26 + $0xb8] sm:$0xff]  ;;  %v518_v34 = vld [vmem:[%s11743_s26 + $0xc0] sm:$0xff]  ;;  %v519_v35 = vld [vmem:[%s11743_s26 + $0xc8] sm:$0xff]  ;;  %v588_v36 = vadd.f32 %v515_v29, %v514_v28  ;;  %s15960_s14 = scalar_lea.hbm %s16901_s12, %s9569_s11  ;;  %p11374_p7 = pneg %p11373_p5 }
  0xb2   : > { %568 = vadd.xlane.f32.xlu1 %v567_v11  ;;  %v520_v37 = vld [vmem:[%s11743_s26 + $0xd0] sm:$0xff]  ;;  %v521_v38 = vld [vmem:[%s11743_s26 + $0xd8] sm:$0xff]  ;;  %v591_v39 = vadd.f32 %v517_v32, %v516_v31  ;;  %v522_v40 = vld [vmem:[%s11743_s26 + $0xe0] sm:$0xff]  ;;  %v594_v42 = vadd.f32 %v519_v35, %v518_v34  ;;  %p11380_p1 = por %p11379_p2, %p11378_p12 }
  0xb3   : > { %v523_v41 = vld [vmem:[%s11743_s26 + $0xe8] sm:$0xff]  ;;  %v597_v43 = vadd.f32 %v521_v38, %v520_v37  ;;  %v524_v44 = vld [vmem:[%s11743_s26 + $0xf0] sm:$0xff]  ;;  %v525_v45 = vld [vmem:[%s11743_s26 + $0xf8] sm:$0xff] }
  0xb4   : > { %571 = vadd.xlane.f32.xlu0 %v570_v16  ;;  %v526_v46 = vld [vmem:[%s11743_s26 + $0x100] sm:$0xff]  ;;  %v527_v47 = vld [vmem:[%s11743_s26 + $0x108] sm:$0xff]  ;;  %v600_v48 = vadd.f32 %v523_v41, %v522_v40  ;;  %v528_v49 = vld [vmem:[%s11743_s26 + $0x110] sm:$0xff]  ;;  %v603_v51 = vadd.f32 %v525_v45, %v524_v44  ;;  %p11381_p13 = pnand %p11380_p1, %p11374_p7 }
  0xb5   : > { %v529_v50 = vld [vmem:[%s11743_s26 + $0x118] sm:$0xff]  ;;  %v530_v52 = vld [vmem:[%s11743_s26 + $0x120] sm:$0xff]  ;;  %v531_v53 = vld [vmem:[%s11743_s26 + $0x128] sm:$0xff]  ;;  %v606_v54 = vadd.f32 %v527_v47, %v526_v46 }
  0xb6   : > { %574 = vadd.xlane.f32.xlu1 %v573_v17  ;;  %v609_v55 = vadd.f32 %v529_v50, %v528_v49  ;;  %v532_v56 = vld [vmem:[%s11743_s26 + $0x130] sm:$0xff]  ;;  %v533_v57 = vld [vmem:[%s11743_s26 + $0x138] sm:$0xff]  ;;  %v534_v58 = vld [vmem:[%s11743_s26 + $0x140] sm:$0xff]  ;;  %v612_v60 = vadd.f32 %v531_v53, %v530_v52 }
  0xb7   : > { %v535_v59 = vld [vmem:[%s11743_s26 + $0x148] sm:$0xff]  ;;  %v615_v61 = vadd.f32 %v533_v57, %v532_v56  ;;  %v536_v62 = vld [vmem:[%s11743_s26 + $0x150] sm:$0xff]  ;;  %v537_v63 = vld [vmem:[%s11743_s26 + $0x158] sm:$0xff] }
  0xb8   : > { %577 = vadd.xlane.f32.xlu0 %v576_v22  ;;  %v618_v3 = vadd.f32 %v535_v59, %v534_v58  ;;  %v621_v7 = vadd.f32 %v537_v63, %v536_v62  ;;  %v10340_v10 = vld [vmem:[#allocation7 + $0x4] ss:$24 sps:$4 sm:$0xff]   ;;  %v10342_v11 = vld [vmem:[#allocation7 + $0x14] ss:$24 sps:$4 sm:$0xff]   ;;  %v10344_v16 = vld [vmem:[#allocation7] ss:$24 sps:$4 sm:$0xff]  }
  0xb9   : > { %v10345_v17 = vld [vmem:[#allocation7 + $0x10] ss:$24 sps:$4 sm:$0xff]   ;;  %v10346_v22 = vld [vmem:[#allocation7 + $0x34] ss:$24 sps:$4 sm:$0xff]   ;;  %1831 = vmatprep.subr.bf16.mxu1 %v10340_v10  ;;  %2217 = vmatprep.subr.bf16.mxu0 %v10342_v11  ;;  %v10351_v29 = vld [vmem:[#allocation7 + $0x40] ss:$24 sps:$4 sm:$0xff]  }
  0xba   : > { %580 = vadd.xlane.f32.xlu1 %v579_v23  ;;  %v10348_v23 = vld [vmem:[#allocation7 + $0x44] ss:$24 sps:$4 sm:$0xff]   ;;  %1832 = vmatpush1.bf16.msra.mxu1 %v10344_v16  ;;  %v10350_v28 = vld [vmem:[#allocation7 + $0x30] ss:$24 sps:$4 sm:$0xff]   ;;  %v10354_v31 = vld [vmem:[#allocation7 + $0x74] ss:$24 sps:$4 sm:$0xff]  }
  0xbb   : > { %2218 = vmatpush1.bf16.msra.mxu0 %v10345_v17  ;;  %1833 = vmatprep.subr.bf16.mxu1 %v10346_v22  ;;  %v10356_v32 = vld [vmem:[#allocation7 + $0x60] ss:$24 sps:$4 sm:$0xff]   ;;  %v10358_v34 = vld [vmem:[#allocation7 + $0x94] ss:$24 sps:$4 sm:$0xff]   ;;  %v10360_v35 = vld [vmem:[#allocation7 + $0xa4] ss:$24 sps:$4 sm:$0xff]  }
  0xbc   : > { %583 = vadd.xlane.f32.xlu0 %v582_v30  ;;  %2219 = vmatprep.subr.bf16.mxu0 %v10348_v23  ;;  %v10352_v30 = vld [vmem:[#allocation7 + $0x64] ss:$24 sps:$4 sm:$0xff]   ;;  %v10363_v37 = vld [vmem:[#allocation7 + $0xa0] ss:$24 sps:$4 sm:$0xff]   ;;  %v10369_v41 = vld [vmem:[#allocation7 + $0xd0] ss:$24 sps:$4 sm:$0xff]  }
  0xbd   : > { %v10364_v38 = vld [vmem:[#allocation7 + $0xc4] ss:$24 sps:$4 sm:$0xff]   ;;  %v10368_v40 = vld [vmem:[#allocation7 + $0xc0] ss:$24 sps:$4 sm:$0xff]   ;;  %v10374_v44 = vld [vmem:[#allocation7 + $0xf0] ss:$24 sps:$4 sm:$0xff]  }
  0xbe   : > { %586 = vadd.xlane.f32.xlu1 %v585_v33  ;;  %1834 = vmatpush1.bf16.msra.mxu1 %v10350_v28  ;;  %v10357_v33 = vld [vmem:[#allocation7 + $0x70] ss:$24 sps:$4 sm:$0xff]   ;;  %v10375_v45 = vld [vmem:[#allocation7 + $0x100] ss:$24 sps:$4 sm:$0xff]   ;;  %v10376_v46 = vld [vmem:[#allocation7 + $0x124] ss:$24 sps:$4 sm:$0xff]  }
  0xbf   : > { %2220 = vmatpush1.bf16.msra.mxu0 %v10351_v29  ;;  %1835 = vmatprep.subr.bf16.mxu1 %v10352_v30  ;;  %v10378_v47 = vld [vmem:[#allocation7 + $0x134] ss:$24 sps:$4 sm:$0xff]   ;;  %v10381_v49 = vld [vmem:[#allocation7 + $0x130] ss:$24 sps:$4 sm:$0xff]   ;;  %v10387_v53 = vld [vmem:[#allocation7 + $0x160] ss:$24 sps:$4 sm:$0xff]  }
  0xc0   : > { %589 = vadd.xlane.f32.xlu0 %v588_v36  ;;  %2221 = vmatprep.subr.bf16.mxu0 %v10354_v31  ;;  %v10362_v36 = vld [vmem:[#allocation7 + $0x90] ss:$24 sps:$4 sm:$0xff]   ;;  %v10382_v50 = vld [vmem:[#allocation7 + $0x154] ss:$24 sps:$4 sm:$0xff]   ;;  %v10392_v56 = vld [vmem:[#allocation7 + $0x180] ss:$24 sps:$4 sm:$0xff]  }
  0xc1   : > { %v10386_v52 = vld [vmem:[#allocation7 + $0x150] ss:$24 sps:$4 sm:$0xff]  }
  0xc2   : > { %592 = vadd.xlane.f32.xlu1 %v591_v39  ;;  %1836 = vmatpush1.bf16.msra.mxu1 %v10356_v32  ;;  %v10366_v39 = vld [vmem:[#allocation7 + $0xd4] ss:$24 sps:$4 sm:$0xff]   ;;  %v10393_v57 = vld [vmem:[#allocation7 + $0x190] ss:$24 sps:$4 sm:$0xff]  }
  0xc3   : > { %2222 = vmatpush1.bf16.msra.mxu0 %v10357_v33  ;;  %1837 = vmatprep.subr.bf16.mxu1 %v10358_v34 }
  0xc4   : > { %595 = vadd.xlane.f32.xlu0 %v594_v42  ;;  %2223 = vmatprep.subr.bf16.mxu0 %v10360_v35  ;;  %v10370_v42 = vld [vmem:[#allocation7 + $0xf4] ss:$24 sps:$4 sm:$0xff]  }
  0xc5   : > { %v11906_v35 = vld [vmem:[%s11743_s26 + $0x170] sm:$0xff] }
  0xc6   : > { %598 = vadd.xlane.f32.xlu1 %v597_v43  ;;  %v10372_v43 = vld [vmem:[#allocation7 + $0x104] ss:$24 sps:$4 sm:$0xff]   ;;  %1838 = vmatpush1.bf16.msra.mxu1 %v10362_v36 }
  0xc7   : > { %2224 = vmatpush1.bf16.msra.mxu0 %v10363_v37  ;;  %1839 = vmatprep.subr.bf16.mxu1 %v10364_v38  ;;  %v11909_v36 = vld [vmem:[%s11743_s26 + $0x178] sm:$0xff] }
  0xc8   : > { %601 = vadd.xlane.f32.xlu0 %v600_v48  ;;  %2225 = vmatprep.subr.bf16.mxu0 %v10366_v39  ;;  %v10380_v48 = vld [vmem:[#allocation7 + $0x120] ss:$24 sps:$4 sm:$0xff]  }
  0xca   : > { %604 = vadd.xlane.f32.xlu1 %v603_v51  ;;  %1840 = vmatpush1.bf16.msra.mxu1 %v10368_v40  ;;  %v10384_v51 = vld [vmem:[#allocation7 + $0x164] ss:$24 sps:$4 sm:$0xff]  }
  0xcb   : > { %2226 = vmatpush1.bf16.msra.mxu0 %v10369_v41  ;;  %1841 = vmatprep.subr.bf16.mxu1 %v10370_v42 }
  0xcc   : > { %607 = vadd.xlane.f32.xlu0 %v606_v54  ;;  %2227 = vmatprep.subr.bf16.mxu0 %v10372_v43  ;;  %v10388_v54 = vld [vmem:[#allocation7 + $0x184] ss:$24 sps:$4 sm:$0xff]  }
  0xce   : > { %610 = vadd.xlane.f32.xlu1 %v609_v55  ;;  %1842 = vmatpush1.bf16.msra.mxu1 %v10374_v44  ;;  %v10390_v55 = vld [vmem:[#allocation7 + $0x194] ss:$24 sps:$4 sm:$0xff]  }
  0xcf   : > { %2228 = vmatpush1.bf16.msra.mxu0 %v10375_v45  ;;  %1843 = vmatprep.subr.bf16.mxu1 %v10376_v46  ;;  %v11922_v45 = vld [vmem:[%s11743_s26 + $0x180] sm:$0xff]  ;;  %v11925_v46 = vld [vmem:[%s11743_s26 + $0x188] sm:$0xff] }
  0xd0   : > { %613 = vadd.xlane.f32.xlu0 %v612_v60  ;;  %2229 = vmatprep.subr.bf16.mxu0 %v10378_v47 }
  0xd2   : > { %616 = vadd.xlane.f32.xlu1 %v615_v61  ;;  %1844 = vmatpush1.bf16.msra.mxu1 %v10380_v48 }
  0xd3   : > { %2230 = vmatpush1.bf16.msra.mxu0 %v10381_v49  ;;  %1845 = vmatprep.subr.bf16.mxu1 %v10382_v50 }
  0xd4   : > { %619 = vadd.xlane.f32.xlu0 %v618_v3  ;;  %2231 = vmatprep.subr.bf16.mxu0 %v10384_v51 }
  0xd6   : > { %622 = vadd.xlane.f32.xlu1 %v621_v7  ;;  %1846 = vmatpush1.bf16.msra.mxu1 %v10386_v52 }
  0xd7   : > { %2232 = vmatpush1.bf16.msra.mxu0 %v10387_v53  ;;  %1847 = vmatprep.subr.bf16.mxu1 %v10388_v54  ;;  %v11938_v53 = vld [vmem:[%s11743_s26 + $0x190] sm:$0xff]  ;;  %v11941_v54 = vld [vmem:[%s11743_s26 + $0x198] sm:$0xff] }
  0xd8   : > { %2233 = vmatprep.subr.bf16.mxu0 %v10390_v55 }
  0xda   : > { %1848 = vmatpush1.bf16.msra.mxu1 %v10392_v56  ;;  %v633_v56 = vadd.f32 %v11941_v54, %v11938_v53 }
  0xdb   : > { %2234 = vmatpush1.bf16.msra.mxu0 %v10393_v57 }
 0x139   : > { %v560_v58 = vpop.xlane.xlu0 %559 }
 0x13a   : > { %v655_v59 = vmul.f32 0.00390625, %v560_v58 }
 0x13b   : > { %v566_v60 = vpop.xlane.xlu1 %565 }
 0x13c   : > { %v657_v61 = vmul.f32 0.00390625, %v566_v60  ;;  %v11862_v62 = vsub.f32 %v11758_v0, %v655_v59  ;;  %v11865_v63 = vsub.f32 %v11761_v1, %v655_v59  ;;  %v11878_v0 = vld [vmem:[%s11743_s26 + $0x160] sm:$0xff]  ;;  %v11881_v1 = vld [vmem:[%s11743_s26 + $0x168] sm:$0xff] }
 0x13d   : > { %v563_v3 = vpop.xlane.xlu0 %562  ;;  %v624_v30 = vadd.f32 %v11881_v1, %v11878_v0  ;;  %v11954_v60 = vld [vmem:[%s11743_s26 + $0x1a0] sm:$0xff] }
 0x13e   : > { %v11868_v7 = vsub.f32 %v11772_v5, %v657_v61  ;;  %v11871_v10 = vsub.f32 %v11775_v6, %v657_v61  ;;  %v656_v11 = vmul.f32 0.00390625, %v563_v3  ;;  %v751_v16 = vmul.f32 %v11862_v62, %v11862_v62 }
 0x13f   : > { %v752_v17 = vmul.f32 %v11865_v63, %v11865_v63  ;;  %v569_v22 = vpop.xlane.xlu1 %568 }
 0x140   : > { %v658_v23 = vmul.f32 0.00390625, %v569_v22  ;;  %v11884_v5 = vsub.f32 %v11764_v2, %v656_v11  ;;  %v11887_v6 = vsub.f32 %v11769_v4, %v656_v11  ;;  %v755_v32 = vmul.f32 %v11868_v7, %v11868_v7  ;;  %v10394_v22 = vld [vmem:[#allocation7 + $0x1b4] ss:$24 sps:$4 sm:$0xff]  }
 0x141   : > { %v815_v28 = vadd.f32 %v752_v17, %v751_v16  ;;  %v572_v31 = vpop.xlane.xlu0 %571  ;;  %v756_v33 = vmul.f32 %v11871_v10, %v11871_v10  ;;  %v11965_v17 = vld [vmem:[%s11743_s26 + $0x1a8] sm:$0xff]  ;;  %1849 = vmatprep.subr.bf16.mxu1 %v10394_v22 }
 0x142   : > { %v11890_v29 = vsub.f32 %v11780_v8, %v658_v23  ;;  %v11899_v2 = vsub.f32 %v11783_v9, %v658_v23  ;;  %v753_v4 = vmul.f32 %v11884_v5, %v11884_v5  ;;  %v754_v8 = vmul.f32 %v11887_v6, %v11887_v6  ;;  %v10396_v23 = vld [vmem:[#allocation7 + $0x1c4] ss:$24 sps:$4 sm:$0xff]  }
 0x143   : > { %816 = vadd.xlane.f32.xlu0 %v815_v28  ;;  %v659_v34 = vmul.f32 0.00390625, %v572_v31  ;;  %v575_v37 = vpop.xlane.xlu1 %574  ;;  %v821_v39 = vadd.f32 %v756_v33, %v755_v32  ;;  %v627_v9 = vadd.f32 %v11909_v36, %v11906_v35  ;;  %v10398_v28 = vld [vmem:[#allocation7 + $0x1b0] ss:$24 sps:$4 sm:$0xff]   ;;  %2235 = vmatprep.subr.bf16.mxu0 %v10396_v23 }
 0x144   : > { %v818_v38 = vadd.f32 %v754_v8, %v753_v4  ;;  %v660_v40 = vmul.f32 0.00390625, %v575_v37  ;;  %v757_v41 = vmul.f32 %v11890_v29, %v11890_v29  ;;  %v758_v47 = vmul.f32 %v11899_v2, %v11899_v2  ;;  %v11976_v33 = vld [vmem:[%s11743_s26 + $0x1b0] sm:$0xff]  ;;  %1850 = vmatpush1.bf16.msra.mxu1 %v10398_v28  ;;  %v10400_v37 = vld [vmem:[#allocation7 + $0x1e4] ss:$24 sps:$4 sm:$0xff]  }
 0x145   : > { %v578_v42 = vpop.xlane.xlu0 %577  ;;  %v11916_v43 = vsub.f32 %v11790_v12, %v659_v34  ;;  %v11919_v44 = vsub.f32 %v11793_v13, %v659_v34  ;;  %v630_v12 = vadd.f32 %v11925_v46, %v11922_v45  ;;  %v11979_v34 = vld [vmem:[%s11743_s26 + $0x1b8] sm:$0xff]  ;;  %1851 = vmatprep.subr.bf16.mxu1 %v10400_v37 }
 0x146   : > { %819 = vadd.xlane.f32.xlu1 %v818_v38  ;;  %v11930_v49 = vsub.f32 %v11796_v14, %v660_v40  ;;  %v11933_v50 = vsub.f32 %v11799_v15, %v660_v40  ;;  %v824_v51 = vadd.f32 %v758_v47, %v757_v41  ;;  %v661_v52 = vmul.f32 0.00390625, %v578_v42  ;;  %v10402_v38 = vld [vmem:[#allocation7 + $0x1f4] ss:$24 sps:$4 sm:$0xff]   ;;  %v10405_v40 = vld [vmem:[#allocation7 + $0x1f0] ss:$24 sps:$4 sm:$0xff]  }
 0x147   : > { %625 = vadd.xlane.f32.xlu0 %v624_v30  ;;  %v581_v48 = vpop.xlane.xlu1 %580  ;;  %v759_v14 = vmul.f32 %v11916_v43, %v11916_v43  ;;  %v760_v15 = vmul.f32 %v11919_v44, %v11919_v44  ;;  %v10399_v30 = vld [vmem:[#allocation7 + $0x1c0] ss:$24 sps:$4 sm:$0xff]   ;;  %v639_v41 = vadd.f32 %v11979_v34, %v11976_v33 }
 0x148   : > { %v662_v57 = vmul.f32 0.00390625, %v581_v48  ;;  %v761_v58 = vmul.f32 %v11930_v49, %v11930_v49  ;;  %v762_v59 = vmul.f32 %v11933_v50, %v11933_v50  ;;  %v11959_v3 = vsub.f32 %v11806_v18, %v661_v52  ;;  %2236 = vmatpush1.bf16.msra.mxu0 %v10399_v30  ;;  %v12016_v30 = vld [vmem:[%s11743_s26 + $0x1d8] sm:$0xff] }
 0x149   : > { %v584_v13 = vpop.xlane.xlu0 %583  ;;  %v11962_v11 = vsub.f32 %v11809_v19, %v661_v52  ;;  %v827_v16 = vadd.f32 %v760_v15, %v759_v14  ;;  %v636_v19 = vadd.f32 %v11965_v17, %v11954_v60  ;;  %2237 = vmatprep.subr.bf16.mxu0 %v10402_v38  ;;  %v12001_v14 = vld [vmem:[%s11743_s26 + $0x1c8] sm:$0xff] }
 0x14a   : > { %628 = vadd.xlane.f32.xlu1 %v627_v9  ;;  %16314 = vst [vmem:[#allocation20_spill] sm:$0xff] %v11959_v3  ;;  %v11968_v32 = vsub.f32 %v11812_v20, %v662_v57  ;;  %v11971_v18 = vsub.f32 %v11815_v21, %v662_v57  ;;  %v830_v4 = vadd.f32 %v762_v59, %v761_v58  ;;  %v663_v8 = vmul.f32 0.00390625, %v584_v13  ;;  %v10404_v9 = vld [vmem:[#allocation7 + $0x1e0] ss:$24 sps:$4 sm:$0xff]   ;;  %v10410_v57 = vld [vmem:[#allocation7 + $0x210] ss:$24 sps:$4 sm:$0xff]  }
 0x14b   : > { %822 = vadd.xlane.f32.xlu0 %v821_v39  ;;  %v587_v55 = vpop.xlane.xlu1 %586  ;;  %v763_v20 = vmul.f32 %v11959_v3, %v11959_v3  ;;  %v764_v21 = vmul.f32 %v11962_v11, %v11962_v11  ;;  %1852 = vmatpush1.bf16.msra.mxu1 %v10404_v9  ;;  %v10411_v58 = vld [vmem:[#allocation7 + $0x220] ss:$24 sps:$4 sm:$0xff]  }
 0x14c   : > { %16315 = vst [vmem:[#allocation21_spill] sm:$0xff] %v11968_v32  ;;  %v664_v42 = vmul.f32 0.00390625, %v587_v55  ;;  %v765_v47 = vmul.f32 %v11968_v32, %v11968_v32  ;;  %v766_v48 = vmul.f32 %v11971_v18, %v11971_v18  ;;  %2238 = vmatpush1.bf16.msra.mxu0 %v10405_v40  ;;  %v11995_v13 = vsub.f32 %v11822_v24, %v663_v8  ;;  %v10406_v55 = vld [vmem:[#allocation7 + $0x214] ss:$24 sps:$4 sm:$0xff]   ;;  %v11119_v3 = vld [vmem:[%s11743_s26 + $0xf8] sm:$0xff] }
 0x14d   : > { %v11956_v61 = vpop.xlane.xlu0 %589  ;;  %v833_v52 = vadd.f32 %v764_v21, %v763_v20  ;;  %1853 = vmatprep.subr.bf16.mxu1 %v10406_v55  ;;  %v10416_v21 = vld [vmem:[#allocation7 + $0x240] ss:$24 sps:$4 sm:$0xff]  }
 0x14e   : > { %825 = vadd.xlane.f32.xlu1 %v824_v51  ;;  %16316 = vst [vmem:[#allocation22_spill] sm:$0xff] %v11995_v13  ;;  %v11998_v51 = vsub.f32 %v11825_v25, %v663_v8  ;;  %v12004_v59 = vsub.f32 %v11828_v26, %v664_v42  ;;  %v12007_v24 = vsub.f32 %v11831_v27, %v664_v42  ;;  %v665_v28 = vmul.f32 0.00390625, %v11956_v61  ;;  %v10417_v61 = vld [vmem:[#allocation7 + $0x250] ss:$24 sps:$4 sm:$0xff]  }
 0x14f   : > { %631 = vadd.xlane.f32.xlu0 %v630_v12  ;;  %v593_v31 = vpop.xlane.xlu1 %592  ;;  %v11992_v12 = vld [vmem:[%s11743_s26 + $0x1c0] sm:$0xff]  ;;  %1854 = vmatpush1.bf16.msra.mxu1 %v10410_v57  ;;  %v836_v23 = vadd.f32 %v766_v48, %v765_v47  ;;  %v767_v26 = vmul.f32 %v11995_v13, %v11995_v13  ;;  %v11109_v42 = vld [vmem:[%s11743_s26 + $0xa8] sm:$0xff] }
 0x150   : > { %16317 = vst [vmem:[#allocation23_spill] sm:$0xff] %v11998_v51  ;;  %16318 = vst [vmem:[#allocation24_spill] sm:$0xff] %v12004_v59  ;;  %v642_v25 = vadd.f32 %v12001_v14, %v11992_v12  ;;  %v768_v27 = vmul.f32 %v11998_v51, %v11998_v51  ;;  %v666_v8 = vmul.f32 0.00390625, %v593_v31  ;;  %v769_v9 = vmul.f32 %v12004_v59, %v12004_v59  ;;  %v11108_v31 = vld [vmem:[%s11743_s26 + $0xa0] sm:$0xff]  ;;  %v11118_v51 = vld [vmem:[%s11743_s26 + $0xf0] sm:$0xff] }
 0x151   : > { %v596_v39 = vpop.xlane.xlu0 %595  ;;  %16319 = vst [vmem:[#allocation25_spill] sm:$0xff] %v12007_v24  ;;  %v770_v40 = vmul.f32 %v12007_v24, %v12007_v24  ;;  %v12032_v47 = vsub.f32 %v11109_v42, %v665_v28  ;;  %v10420_v57 = vld [vmem:[#allocation7 + $0x284] ss:$24 sps:$4 sm:$0xff]   ;;  %v11113_v42 = vld [vmem:[%s11743_s26 + $0xc8] sm:$0xff] }
 0x152   : > { %634 = vadd.xlane.f32.xlu1 %v633_v56  ;;  %v10408_v56 = vld [vmem:[#allocation7 + $0x224] ss:$24 sps:$4 sm:$0xff]   ;;  %v667_v38 = vmul.f32 0.00390625, %v596_v39  ;;  %v839_v48 = vadd.f32 %v768_v27, %v767_v26  ;;  %v12038_v39 = vld [vmem:[%s11743_s26 + $0x1e8] sm:$0xff]  ;;  %v10423_v26 = vld [vmem:[#allocation7 + $0x280] ss:$24 sps:$4 sm:$0xff]  }
 0x153   : > { %828 = vadd.xlane.f32.xlu0 %v827_v16  ;;  %v599_v15 = vpop.xlane.xlu1 %598  ;;  %2239 = vmatprep.subr.bf16.mxu0 %v10408_v56  ;;  %v12012_v16 = vld [vmem:[%s11743_s26 + $0x1d0] sm:$0xff]  ;;  %16321 = vst [vmem:[#allocation27_spill] sm:$0xff] %v12032_v47  ;;  %v11112_v27 = vld [vmem:[%s11743_s26 + $0xc0] sm:$0xff] }
 0x154   : > { %2240 = vmatpush1.bf16.msra.mxu0 %v10411_v58  ;;  %v645_v37 = vadd.f32 %v12016_v30, %v12012_v16  ;;  %v10418_v56 = vld [vmem:[#allocation7 + $0x274] ss:$24 sps:$4 sm:$0xff]   ;;  %v12050_v59 = vsub.f32 %v11113_v42, %v667_v38 }
 0x155   : > { %v602_v22 = vpop.xlane.xlu0 %601  ;;  %v11110_v58 = vld [vmem:[%s11743_s26 + $0xb0] sm:$0xff] }
 0x156   : > { %831 = vadd.xlane.f32.xlu1 %v830_v4  ;;  %v10414_v4 = vld [vmem:[#allocation7 + $0x254] ss:$24 sps:$4 sm:$0xff]   ;;  %16325 = vst [vmem:[#allocation31_spill] sm:$0xff] %v12050_v59  ;;  %v776_v24 = vmul.f32 %v12050_v59, %v12050_v59  ;;  %v10432_v59 = vld [vmem:[#allocation7 + $0x2e4] ss:$24 sps:$4 sm:$0xff]  }
 0x157   : > { %637 = vadd.xlane.f32.xlu0 %v636_v19  ;;  %v10412_v19 = vld [vmem:[#allocation7 + $0x244] ss:$24 sps:$4 sm:$0xff]   ;;  %v605_v20 = vpop.xlane.xlu1 %604  ;;  %2241 = vmatprep.subr.bf16.mxu0 %v10414_v4  ;;  %v10422_v4 = vld [vmem:[#allocation7 + $0x270] ss:$24 sps:$4 sm:$0xff]  }
 0x158   : > { %1855 = vmatprep.subr.bf16.mxu1 %v10412_v19  ;;  %2242 = vmatpush1.bf16.msra.mxu0 %v10417_v61  ;;  %v669_v61 = vmul.f32 0.00390625, %v602_v22  ;;  %v670_v22 = vmul.f32 0.00390625, %v605_v20  ;;  %v10429_v20 = vld [vmem:[#allocation7 + $0x2b0] ss:$24 sps:$4 sm:$0xff]  }
 0x159   : > { %v608_v55 = vpop.xlane.xlu0 %607  ;;  %1856 = vmatpush1.bf16.msra.mxu1 %v10416_v21  ;;  %2243 = vmatprep.subr.bf16.mxu0 %v10420_v57  ;;  %v10426_v57 = vld [vmem:[#allocation7 + $0x2b4] ss:$24 sps:$4 sm:$0xff]  }
 0x15a   : > { %640 = vadd.xlane.f32.xlu1 %v639_v41  ;;  %v12029_v41 = vsub.f32 %v11108_v31, %v665_v28  ;;  %v668_v28 = vmul.f32 0.00390625, %v599_v15  ;;  %v12047_v31 = vsub.f32 %v11112_v27, %v667_v38  ;;  %1857 = vmatprep.subr.bf16.mxu1 %v10418_v56  ;;  %v842_v15 = vadd.f32 %v770_v40, %v769_v9  ;;  %v12062_v27 = vld [vmem:[%s11743_s26 + $0x1f8] sm:$0xff] }
 0x15b   : > { %834 = vadd.xlane.f32.xlu0 %v833_v52  ;;  %v12035_v52 = vld [vmem:[%s11743_s26 + $0x1e0] sm:$0xff]  ;;  %v772_v38 = vmul.f32 %v12032_v47, %v12032_v47  ;;  %v11115_v9 = vld [vmem:[%s11743_s26 + $0xd8] sm:$0xff]  ;;  %v671_v13 = vmul.f32 0.00390625, %v608_v55  ;;  %v12087_v32 = vsub.f32 %v11118_v51, %v670_v22 }
 0x15c   : > { %16320 = vst [vmem:[#allocation26_spill] sm:$0xff] %v12029_v41  ;;  %16324 = vst [vmem:[#allocation30_spill] sm:$0xff] %v12047_v31  ;;  %v648_v21 = vadd.f32 %v12038_v39, %v12035_v52  ;;  %2244 = vmatpush1.bf16.msra.mxu0 %v10423_v26  ;;  %v10424_v56 = vld [vmem:[#allocation7 + $0x2a4] ss:$24 sps:$4 sm:$0xff]   ;;  %v12068_v40 = vsub.f32 %v11115_v9, %v668_v28  ;;  %v10428_v47 = vld [vmem:[#allocation7 + $0x2a0] ss:$24 sps:$4 sm:$0xff]  }
 0x15d   : > { %1858 = vmatpush1.bf16.msra.mxu1 %v10422_v4  ;;  %v11116_v4 = vld [vmem:[%s11743_s26 + $0xe0] sm:$0xff]  ;;  %2245 = vmatprep.subr.bf16.mxu0 %v10426_v57  ;;  %v11117_v9 = vld [vmem:[%s11743_s26 + $0xe8] sm:$0xff]  ;;  %16328 = vst [vmem:[#allocation34_spill] sm:$0xff] %v12087_v32 }
 0x15e   : > { %837 = vadd.xlane.f32.xlu1 %v836_v23  ;;  %v11111_v23 = vld [vmem:[%s11743_s26 + $0xb8] sm:$0xff]  ;;  %v12075_v26 = vsub.f32 %v11116_v4, %v669_v61  ;;  %1859 = vmatprep.subr.bf16.mxu1 %v10424_v56  ;;  %v12090_v56 = vsub.f32 %v11119_v3, %v670_v22  ;;  %v11120_v3 = vld [vmem:[%s11743_s26 + $0x100] sm:$0xff] }
 0x15f   : > { %643 = vadd.xlane.f32.xlu0 %v642_v25  ;;  %v12041_v25 = vsub.f32 %v11110_v58, %v666_v8  ;;  %v12044_v19 = vsub.f32 %v11111_v23, %v666_v8  ;;  %v12055_v8 = vld [vmem:[%s11743_s26 + $0x1f0] sm:$0xff]  ;;  %v771_v58 = vmul.f32 %v12029_v41, %v12029_v41  ;;  %v611_v23 = vpop.xlane.xlu1 %610  ;;  %v10435_v55 = vld [vmem:[#allocation7 + $0x2e0] ss:$24 sps:$4 sm:$0xff]  }
 0x160   : > { %16326 = vst [vmem:[#allocation32_spill] sm:$0xff] %v12075_v26  ;;  %2246 = vmatpush1.bf16.msra.mxu0 %v10429_v20  ;;  %v779_v20 = vmul.f32 %v12075_v26, %v12075_v26 }
 0x161   : > { %16322 = vst [vmem:[#allocation28_spill] sm:$0xff] %v12041_v25  ;;  %16323 = vst [vmem:[#allocation29_spill] sm:$0xff] %v12044_v19  ;;  %v773_v42 = vmul.f32 %v12041_v25, %v12041_v25  ;;  %v774_v41 = vmul.f32 %v12044_v19, %v12044_v19  ;;  %v12082_v25 = vsub.f32 %v11117_v9, %v669_v61  ;;  %1860 = vmatpush1.bf16.msra.mxu1 %v10428_v47 }
 0x162   : > { %646 = vadd.xlane.f32.xlu1 %v645_v37  ;;  %v11114_v37 = vld [vmem:[%s11743_s26 + $0xd0] sm:$0xff]  ;;  %v651_v19 = vadd.f32 %v12062_v27, %v12055_v8  ;;  %v845_v4 = vadd.f32 %v772_v38, %v771_v58  ;;  %v672_v61 = vmul.f32 0.00390625, %v611_v23  ;;  %v778_v47 = vmul.f32 %v12068_v40, %v12068_v40  ;;  %2247 = vmatprep.subr.bf16.mxu0 %v10432_v59  ;;  %v11121_v23 = vld [vmem:[%s11743_s26 + $0x108] sm:$0xff] }
 0x163   : > { %840 = vadd.xlane.f32.xlu0 %v839_v48  ;;  %v12065_v48 = vsub.f32 %v11114_v37, %v668_v28  ;;  %v775_v37 = vmul.f32 %v12047_v31, %v12047_v31  ;;  %v614_v28 = vpop.xlane.xlu0 %613  ;;  %16327 = vst [vmem:[#allocation33_spill] sm:$0xff] %v12082_v25  ;;  %v10430_v31 = vld [vmem:[#allocation7 + $0x2d4] ss:$24 sps:$4 sm:$0xff]   ;;  %v617_v57 = vpop.xlane.xlu1 %616  ;;  %v10434_v58 = vld [vmem:[#allocation7 + $0x2d0] ss:$24 sps:$4 sm:$0xff]   ;;  %v780_v22 = vmul.f32 %v12082_v25, %v12082_v25 }
 0x164   : > { %v673_v51 = vmul.f32 0.00390625, %v614_v28  ;;  %1861 = vmatprep.subr.bf16.mxu1 %v10430_v31  ;;  %2248 = vmatpush1.bf16.msra.mxu0 %v10435_v55  ;;  %v11122_v59 = vld [vmem:[%s11743_s26 + $0x110] sm:$0xff]  ;;  %v11123_v31 = vld [vmem:[%s11743_s26 + $0x118] sm:$0xff]  ;;  %v674_v9 = vmul.f32 0.00390625, %v617_v57 }
 0x165   : > { %v851_v38 = vadd.f32 %v776_v24, %v775_v37  ;;  %v12102_v24 = vsub.f32 %v11121_v23, %v671_v13  ;;  %v781_v37 = vmul.f32 %v12087_v32, %v12087_v32  ;;  %1862 = vmatpush1.bf16.msra.mxu1 %v10434_v58  ;;  %v12112_v28 = vsub.f32 %v11123_v31, %v672_v61  ;;  %v11125_v23 = vld [vmem:[%s11743_s26 + $0x128] sm:$0xff] }
 0x166   : > { %843 = vadd.xlane.f32.xlu1 %v842_v15  ;;  %v777_v15 = vmul.f32 %v12065_v48, %v12065_v48  ;;  %v12120_v26 = vsub.f32 %v11125_v23, %v673_v51  ;;  %v857_v55 = vadd.f32 %v780_v22, %v779_v20 }
 0x167   : > { %649 = vadd.xlane.f32.xlu0 %v648_v21  ;;  %v848_v21 = vadd.f32 %v774_v41, %v773_v42  ;;  %v12099_v41 = vsub.f32 %v11120_v3, %v671_v13  ;;  %v620_v42 = vpop.xlane.xlu0 %619  ;;  %v782_v13 = vmul.f32 %v12090_v56, %v12090_v56  ;;  %v784_v57 = vmul.f32 %v12102_v24, %v12102_v24  ;;  %v623_v31 = vpop.xlane.xlu1 %622 }
 0x168   : > { %16331 = vst [vmem:[#allocation37_spill] sm:$0xff] %v12120_v26  ;;  %v854_v58 = vadd.f32 %v778_v47, %v777_v15  ;;  %v786_v15 = vmul.f32 %v12112_v28, %v12112_v28  ;;  %v676_v47 = vmul.f32 0.00390625, %v623_v31  ;;  %v788_v22 = vmul.f32 %v12120_v26, %v12120_v26 }
 0x169   : > { %16329 = vst [vmem:[#allocation35_spill] sm:$0xff] %v12099_v41  ;;  %v860_v25 = vadd.f32 %v782_v13, %v781_v37  ;;  %v11129_v13 = vld [vmem:[%s11743_s26 + $0x148] sm:$0xff] }
 0x16a   : > { %652 = vadd.xlane.f32.xlu1 %v651_v19  ;;  %v12109_v19 = vsub.f32 %v11122_v59, %v672_v61  ;;  %v675_v59 = vmul.f32 0.00390625, %v620_v42  ;;  %v783_v61 = vmul.f32 %v12099_v41, %v12099_v41  ;;  %v11128_v42 = vld [vmem:[%s11743_s26 + $0x140] sm:$0xff] }
 0x16b   : > { %846 = vadd.xlane.f32.xlu0 %v845_v4  ;;  %v11124_v4 = vld [vmem:[%s11743_s26 + $0x120] sm:$0xff] }
 0x16c   : > { %v12117_v3 = vsub.f32 %v11124_v4, %v673_v51  ;;  %v11126_v4 = vld [vmem:[%s11743_s26 + $0x130] sm:$0xff]  ;;  %v12141_v37 = vsub.f32 %v11128_v42, %v675_v59  ;;  %v12144_v23 = vsub.f32 %v11129_v13, %v675_v59  ;;  %v16048_v13 = vlaneseq }
 0x16d   : > { %v12127_v32 = vsub.f32 %v11126_v4, %v674_v9  ;;  %v863_v4 = vadd.f32 %v784_v57, %v783_v61 }
 0x16e   : > { %16330 = vst [vmem:[#allocation36_spill] sm:$0xff] %v12117_v3  ;;  %849 = vadd.xlane.f32.xlu1 %v848_v21  ;;  %v785_v21 = vmul.f32 %v12109_v19, %v12109_v19  ;;  %v787_v20 = vmul.f32 %v12117_v3, %v12117_v3  ;;  %v791_v59 = vmul.f32 %v12141_v37, %v12141_v37 }
 0x16f   : > { %852 = vadd.xlane.f32.xlu0 %v851_v38  ;;  %v11127_v38 = vld [vmem:[%s11743_s26 + $0x138] sm:$0xff]  ;;  %v789_v3 = vmul.f32 %v12127_v32, %v12127_v32  ;;  %v792_v61 = vmul.f32 %v12144_v23, %v12144_v23 }
 0x170   : > { %v12134_v51 = vsub.f32 %v11127_v38, %v674_v9  ;;  %v866_v41 = vadd.f32 %v786_v15, %v785_v21  ;;  %v11130_v9 = vld [vmem:[%s11743_s26 + $0x150] sm:$0xff]  ;;  %v869_v31 = vadd.f32 %v788_v22, %v787_v20  ;;  %v10438_v20 = vld [vmem:[#allocation7 + $0xc] ss:$24 sps:$4 sm:$0xff]  }
 0x171   : > { %v12147_v38 = vsub.f32 %v11130_v9, %v676_v47  ;;  %v875_v21 = vadd.f32 %v792_v61, %v791_v59  ;;  %2024 = vmatprep.subr.bf16.mxu1 %v10438_v20 }
 0x172   : > { %855 = vadd.xlane.f32.xlu1 %v854_v58  ;;  %v790_v26 = vmul.f32 %v12134_v51, %v12134_v51  ;;  %v11131_v58 = vld [vmem:[%s11743_s26 + $0x158] sm:$0xff] }
 0x173   : > { %858 = vadd.xlane.f32.xlu0 %v857_v55  ;;  %v12154_v55 = vsub.f32 %v11131_v58, %v676_v47  ;;  %v793_v15 = vmul.f32 %v12147_v38, %v12147_v38 }
 0x174   : > { %v872_v57 = vadd.f32 %v790_v26, %v789_v3 }
 0x176   : > { %861 = vadd.xlane.f32.xlu1 %v860_v25  ;;  %v794_v25 = vmul.f32 %v12154_v55, %v12154_v55 }
 0x177   : > { %864 = vadd.xlane.f32.xlu0 %v863_v4 }
 0x178   : > { %v878_v47 = vadd.f32 %v794_v25, %v793_v15 }
 0x17a   : > { %867 = vadd.xlane.f32.xlu1 %v866_v41 }
 0x17b   : > { %870 = vadd.xlane.f32.xlu0 %v869_v31  ;;  %v12165_v31 = vshrl.u32 %v16048_v13, 7 }
 0x17d   : > { %16332 = vst [vmem:[#allocation38_spill] sm:$0xff] %v12165_v31 }
 0x17e   : > { %873 = vadd.xlane.f32.xlu1 %v872_v57 }
 0x17f   : > { %876 = vadd.xlane.f32.xlu0 %v875_v21 }
 0x182   : > { %879 = vadd.xlane.f32.xlu1 %v878_v47 }
 0x1d0   : > { %v817_v22 = vpop.xlane.xlu0 %816 }
 0x1d1   : > { %v911_v42 = vmul.f32 0.00390625, %v817_v22  ;;  %v12178_v22 = vsub.s32 1, %v12165_v31 }
 0x1d3   : > { %v943_v4 = vadd.f32 1e-05, %v911_v42  ;;  %v820_v26 = vpop.xlane.xlu1 %819  ;;  %16333 = vst [vmem:[#allocation39_spill] sm:$0xff] %v12178_v22 }
 0x1d4   : > { %v626_v41 = vpop.xlane.xlu0 %625  ;;  %v912_v3 = vmul.f32 0.00390625, %v820_v26  ;;  %v12190_v26 = vsub.s32 0, %v12165_v31 }
 0x1d5   : > { %10724 = vrsqrt.f32 %v943_v4  ;;  %v677_v9 = vmul.f32 0.00390625, %v626_v41  ;;  %v1071_v4 = vld [vmem:[%s16014_s4] sm:$0x3] }
 0x1d6   : > { %v944_v58 = vadd.f32 1e-05, %v912_v3  ;;  %16336 = vst [vmem:[#allocation42_spill] sm:$0xff] %v12190_v26 }
 0x1d7   : > { %v12168_v59 = vsub.f32 %v11878_v0, %v677_v9  ;;  %v12171_v61 = vsub.f32 %v11881_v1, %v677_v9  ;;  %v629_v57 = vpop.xlane.xlu1 %628 }
 0x1d8   : > { %v823_v21 = vpop.xlane.xlu0 %822  ;;  %10726 = vrsqrt.f32 %v944_v58  ;;  %v678_v15 = vmul.f32 0.00390625, %v629_v57 }
 0x1d9   : > { %v913_v25 = vmul.f32 0.00390625, %v823_v21  ;;  %v795_v47 = vmul.f32 %v12168_v59, %v12168_v59  ;;  %v796_v20 = vmul.f32 %v12171_v61, %v12171_v61  ;;  %v12197_v21 = vrot.slane %v1071_v4, %v12178_v22 }
 0x1da   : > { %v12181_v0 = vsub.f32 %v11906_v35, %v678_v15  ;;  %v12184_v1 = vsub.f32 %v11909_v36, %v678_v15 }
 0x1db   : > { %v945_v42 = vadd.f32 1e-05, %v913_v25  ;;  %v826_v41 = vpop.xlane.xlu1 %825  ;;  %v881_v9 = vadd.f32 %v796_v20, %v795_v47  ;;  %v1147_v20 = vld [vmem:[%s16015_s5] sm:$0x3] }
 0x1dc   : > { %16334 = vst [vmem:[#allocation40_spill] sm:$0xff] %v12181_v0  ;;  %16335 = vst [vmem:[#allocation41_spill] sm:$0xff] %v12184_v1  ;;  %v632_v3 = vpop.xlane.xlu0 %631  ;;  %v914_v58 = vmul.f32 0.00390625, %v826_v41  ;;  %v797_v35 = vmul.f32 %v12181_v0, %v12181_v0  ;;  %v798_v36 = vmul.f32 %v12184_v1, %v12184_v1  ;;  %v12219_v1 = vrot.slane %v1147_v20, %v12178_v22 }
 0x1dd   : > { %10728 = vrsqrt.f32 %v945_v42  ;;  %v679_v57 = vmul.f32 0.00390625, %v632_v3  ;;  %882 = vadd.xlane.f32.xlu0 %v881_v9  ;;  %v12209_v42 = vrot.slane %v1071_v4, %v12190_v26 }
 0x1de   : > { %v946_v25 = vadd.f32 1e-05, %v914_v58  ;;  %v884_v9 = vadd.f32 %v798_v36, %v797_v35  ;;  %v12222_v35 = vrot.slane %v1147_v20, %v12190_v26 }
 0x1df   : > { %v10725_v15 = vpop.eup %10724  ;;  %v12200_v13 = vsub.f32 %v11922_v45, %v679_v57  ;;  %v12203_v47 = vsub.f32 %v11925_v46, %v679_v57  ;;  %v635_v41 = vpop.xlane.xlu1 %634 }
 0x1e0   : > { %v829_v3 = vpop.xlane.xlu0 %828  ;;  %v1008_v31 = vmul.f32 %v10725_v15, %v11865_v63  ;;  %v1007_v58 = vmul.f32 %v10725_v15, %v11862_v62  ;;  %10730 = vrsqrt.f32 %v946_v25  ;;  %v680_v45 = vmul.f32 0.00390625, %v635_v41  ;;  %885 = vadd.xlane.f32.xlu1 %v884_v9 }
 0x1e1   : > { %v915_v0 = vmul.f32 0.00390625, %v829_v3  ;;  %v799_v46 = vmul.f32 %v12200_v13, %v12200_v13  ;;  %v800_v57 = vmul.f32 %v12203_v47, %v12203_v47 }
 0x1e2   : > { %v1084_v4 = vmul.f32 %v12197_v21, %v1008_v31  ;;  %v10727_v63 = vpop.eup %10726  ;;  %v12225_v62 = vsub.f32 %v11938_v53, %v680_v45  ;;  %v12228_v36 = vsub.f32 %v11941_v54, %v680_v45  ;;  %v1083_v25 = vmul.f32 %v12209_v42, %v1007_v58 }
 0x1e3   : > { %v947_v15 = vadd.f32 1e-05, %v915_v0  ;;  %v832_v41 = vpop.xlane.xlu1 %831  ;;  %v887_v9 = vadd.f32 %v800_v57, %v799_v46  ;;  %v1010_v31 = vmul.f32 %v10727_v63, %v11887_v6  ;;  %v1009_v22 = vmul.f32 %v10727_v63, %v11884_v5 }
 0x1e4   : > { %v638_v3 = vpop.xlane.xlu0 %637  ;;  %v916_v20 = vmul.f32 0.00390625, %v832_v41  ;;  %v801_v53 = vmul.f32 %v12225_v62, %v12225_v62  ;;  %v802_v54 = vmul.f32 %v12228_v36, %v12228_v36  ;;  %v1160_v58 = vadd.f32 %v12219_v1, %v1084_v4 }
 0x1e5   : > { %10732 = vrsqrt.f32 %v947_v15  ;;  %v681_v26 = vmul.f32 0.00390625, %v638_v3  ;;  %888 = vadd.xlane.f32.xlu0 %v887_v9  ;;  %v1086_v0 = vmul.f32 %v12197_v21, %v1010_v31  ;;  %v1085_v45 = vmul.f32 %v12209_v42, %v1009_v22 }
 0x1e6   : > { %v948_v6 = vadd.f32 1e-05, %v916_v20  ;;  %v1159_v63 = vadd.f32 %v12222_v35, %v1083_v25  ;;  %v890_v3 = vadd.f32 %v802_v54, %v801_v53 }
 0x1e7   : > { %v10729_v46 = vpop.eup %10728  ;;  %v12241_v5 = vsub.f32 %v11954_v60, %v681_v26  ;;  %v12244_v57 = vsub.f32 %v11965_v17, %v681_v26  ;;  %v641_v15 = vpop.xlane.xlu1 %640  ;;  %v1162_v9 = vadd.f32 %v12219_v1, %v1086_v0  ;;  %v1161_v31 = vadd.f32 %v12222_v35, %v1085_v45 }
 0x1e8   : > { %v835_v41 = vpop.xlane.xlu0 %834  ;;  %v1012_v4 = vmul.f32 %v10729_v46, %v11871_v10  ;;  %10734 = vrsqrt.f32 %v948_v6  ;;  %v682_v22 = vmul.f32 0.00390625, %v641_v15  ;;  %891 = vadd.xlane.f32.xlu1 %v890_v3  ;;  %v1011_v6 = vmul.f32 %v10729_v46, %v11868_v7  ;;  %v10436_v15 = vld [vmem:[#allocation7 + $0x8] ss:$24 sps:$4 sm:$0xff]  }
 0x1e9   : > { %v917_v20 = vmul.f32 0.00390625, %v835_v41  ;;  %v803_v60 = vmul.f32 %v12241_v5, %v12241_v5  ;;  %v12252_v17 = vpack.c.bf16 %v1162_v9, %v1160_v58  ;;  %v12254_v26 = vpack.c.bf16 %v1161_v31, %v1159_v63  ;;  %v10441_v9 = vld [vmem:[#allocation7 + $0x3c] ss:$24 sps:$4 sm:$0xff]  }
 0x1ea   : > { %v804_v25 = vmul.f32 %v12244_v57, %v12244_v57  ;;  %v1088_v53 = vmul.f32 %v12197_v21, %v1012_v4  ;;  %v10731_v54 = vpop.eup %10730  ;;  %v12260_v0 = vsub.f32 %v11976_v33, %v682_v22  ;;  %v12263_v10 = vsub.f32 %v11979_v34, %v682_v22 }
 0x1eb   : > { %16337 = vst [vmem:[#allocation43_spill] sm:$0xff] %v12254_v26  ;;  %v949_v45 = vadd.f32 1e-05, %v917_v20  ;;  %v838_v58 = vpop.xlane.xlu1 %837  ;;  %1863 = vmatprep.mubr.bf16.mxu1 %v12252_v17  ;;  %2249 = vmatprep.mubr.bf16.mxu0 %v12252_v17  ;;  %v1014_v3 = vmul.f32 %v10731_v54, %v11899_v2  ;;  %v1013_v2 = vmul.f32 %v10731_v54, %v11890_v29 }
 0x1ec   : > { %v644_v63 = vpop.xlane.xlu0 %643  ;;  %v893_v41 = vadd.f32 %v804_v25, %v803_v60  ;;  %v918_v31 = vmul.f32 0.00390625, %v838_v58  ;;  %1864 = vmatmul.mubr.bf16.vlgmr.msra.gmra.mrb[0].mxu1 %v12254_v26  ;;  %2250 = vmatmul.mubr.bf16.vlgmr.msra.gmra.mrb[0].mxu0 %v12254_v26  ;;  %v805_v7 = vmul.f32 %v12260_v0, %v12260_v0  ;;  %v1164_v34 = vadd.f32 %v12219_v1, %v1088_v53  ;;  %v10439_v53 = vld [vmem:[#allocation7 + $0x38] ss:$24 sps:$4 sm:$0xff]  }
 0x1ed   : > { %v683_v33 = vmul.f32 0.00390625, %v644_v63  ;;  %v806_v46 = vmul.f32 %v12263_v10, %v12263_v10  ;;  %v1090_v4 = vmul.f32 %v12197_v21, %v1014_v3  ;;  %v1087_v22 = vmul.f32 %v12209_v42, %v1011_v6  ;;  %2025 = vmatpush1.bf16.msra.mxu1 %v10436_v15 }
 0x1ee   : > { %894 = vadd.xlane.f32.xlu0 %v893_v41  ;;  %10736 = vrsqrt.f32 %v949_v45  ;;  %v950_v60 = vadd.f32 1e-05, %v918_v31  ;;  %v1089_v29 = vmul.f32 %v12209_v42, %v1013_v2  ;;  %2026 = vmatprep.subr.bf16.mxu1 %v10441_v9 }
 0x1ef   : > { %v10733_v20 = vpop.eup %10732  ;;  %v12280_v25 = vsub.f32 %v11992_v12, %v683_v33  ;;  %v12283_v58 = vsub.f32 %v12001_v14, %v683_v33  ;;  %v647_v63 = vpop.xlane.xlu1 %646  ;;  %v896_v26 = vadd.f32 %v806_v46, %v805_v7  ;;  %v1166_v3 = vadd.f32 %v12219_v1, %v1090_v4  ;;  %v10444_v14 = vld [vmem:[#allocation7 + $0x6c] ss:$24 sps:$4 sm:$0xff]  }
 0x1f0   : > { %v841_v41 = vpop.xlane.xlu0 %840  ;;  %v1163_v54 = vadd.f32 %v12222_v35, %v1087_v22  ;;  %10738 = vrsqrt.f32 %v950_v60  ;;  %v684_v45 = vmul.f32 0.00390625, %v647_v63  ;;  %v1165_v31 = vadd.f32 %v12222_v35, %v1089_v29 }
 0x1f1   : > { %v919_v6 = vmul.f32 0.00390625, %v841_v41  ;;  %v807_v12 = vmul.f32 %v12280_v25, %v12280_v25  ;;  %897 = vadd.xlane.f32.xlu1 %v896_v26  ;;  %v12290_v15 = vpack.c.bf16 %v1166_v3, %v1164_v34  ;;  %v808_v33 = vmul.f32 %v12283_v58, %v12283_v58  ;;  %2027 = vmatpush1.bf16.msra.mxu1 %v10439_v53  ;;  %v10442_v26 = vld [vmem:[#allocation7 + $0x68] ss:$24 sps:$4 sm:$0xff]   ;;  %v10447_v41 = vld [vmem:[#allocation7 + $0x9c] ss:$24 sps:$4 sm:$0xff]  }
 0x1f2   : > { %v1016_v7 = vmul.f32 %v10733_v20, %v11919_v44  ;;  %v10735_v46 = vpop.eup %10734  ;;  %v12297_v9 = vsub.f32 %v12012_v16, %v684_v45  ;;  %v12300_v4 = vsub.f32 %v12016_v30, %v684_v45  ;;  %v1015_v22 = vmul.f32 %v10733_v20, %v11916_v43  ;;  %2028 = vmatprep.subr.bf16.mxu1 %v10444_v14 }
 0x1f3   : > { %v951_v2 = vadd.f32 1e-05, %v919_v6  ;;  %v844_v34 = vpop.xlane.xlu1 %843  ;;  %1873 = vmatprep.mubr.bf16.mxu1 %v12290_v15  ;;  %2259 = vmatprep.mubr.bf16.mxu0 %v12290_v15  ;;  %v12305_v63 = vpack.c.bf16 %v1165_v31, %v1163_v54  ;;  %v899_v44 = vadd.f32 %v808_v33, %v807_v12  ;;  %v1018_v16 = vmul.f32 %v10735_v46, %v11933_v50  ;;  %v10445_v12 = vld [vmem:[#allocation7 + $0x98] ss:$24 sps:$4 sm:$0xff]  }
 0x1f4   : > { %v650_v60 = vpop.xlane.xlu0 %649  ;;  %v920_v30 = vmul.f32 0.00390625, %v844_v34  ;;  %v809_v43 = vmul.f32 %v12297_v9, %v12297_v9  ;;  %v810_v20 = vmul.f32 %v12300_v4, %v12300_v4  ;;  %v1092_v53 = vmul.f32 %v12197_v21, %v1016_v7 }
 0x1f5   : > { %10740 = vrsqrt.f32 %v951_v2  ;;  %v685_v3 = vmul.f32 0.00390625, %v650_v60  ;;  %1874 = vmatmul.mubr.bf16.gmra.mrb[4].mxu1 %v12305_v63  ;;  %2260 = vmatmul.mubr.bf16.gmra.mrb[4].mxu0 %v12305_v63  ;;  %v1094_v29 = vmul.f32 %v12197_v21, %v1018_v16  ;;  %v1017_v6 = vmul.f32 %v10735_v46, %v11930_v49  ;;  %v10450_v16 = vld [vmem:[#allocation7 + $0xcc] ss:$24 sps:$4 sm:$0xff]  }
 0x1f6   : > { %v952_v50 = vadd.f32 1e-05, %v920_v30  ;;  %900 = vadd.xlane.f32.xlu0 %v899_v44  ;;  %2029 = vmatpush1.bf16.msra.mxu1 %v10442_v26  ;;  %v902_v33 = vadd.f32 %v810_v20, %v809_v43  ;;  %v1168_v2 = vadd.f32 %v12219_v1, %v1092_v53  ;;  %v1091_v34 = vmul.f32 %v12209_v42, %v1015_v22 }
 0x1f7   : > { %v12317_v54 = vsub.f32 %v12035_v52, %v685_v3  ;;  %v12320_v45 = vsub.f32 %v12038_v39, %v685_v3  ;;  %v653_v14 = vpop.xlane.xlu1 %652  ;;  %v1170_v7 = vadd.f32 %v12219_v1, %v1094_v29  ;;  %2030 = vmatprep.subr.bf16.mxu1 %v10447_v41  ;;  %v1093_v44 = vmul.f32 %v12209_v42, %v1017_v6 }
 0x1f8   : > { %v847_v31 = vpop.xlane.xlu0 %846  ;;  %v10737_v52 = vpop.eup %10736  ;;  %10742 = vrsqrt.f32 %v952_v50  ;;  %v686_v60 = vmul.f32 0.00390625, %v653_v14  ;;  %903 = vadd.xlane.f32.xlu1 %v902_v33  ;;  %v1167_v46 = vadd.f32 %v12222_v35, %v1091_v34 }
 0x1f9   : > { %v921_v39 = vmul.f32 0.00390625, %v847_v31  ;;  %v12327_v49 = vpack.c.bf16 %v1170_v7, %v1168_v2  ;;  %v811_v26 = vmul.f32 %v12317_v54, %v12317_v54  ;;  %v812_v30 = vmul.f32 %v12320_v45, %v12320_v45  ;;  %v10453_v2 = vld [vmem:[#allocation7 + $0xfc] ss:$24 sps:$4 sm:$0xff]  }
 0x1fa   : > { %v10739_v22 = vpop.eup %10738  ;;  %v12335_v41 = vsub.f32 %v12055_v8, %v686_v60  ;;  %v12338_v3 = vsub.f32 %v12062_v27, %v686_v60  ;;  %v1169_v20 = vadd.f32 %v12222_v35, %v1093_v44  ;;  %2031 = vmatpush1.bf16.msra.mxu1 %v10445_v12  ;;  %v1020_v6 = vmul.f32 %v10737_v52, %v11962_v11  ;;  %v10448_v8 = vld [vmem:[#allocation7 + $0xc8] ss:$24 sps:$4 sm:$0xff]  }
 0x1fb   : > { %v953_v43 = vadd.f32 1e-05, %v921_v39  ;;  %v850_v53 = vpop.xlane.xlu1 %849  ;;  %1883 = vmatprep.mubr.bf16.mxu1 %v12327_v49  ;;  %2269 = vmatprep.mubr.bf16.mxu0 %v12327_v49  ;;  %v905_v50 = vadd.f32 %v812_v30, %v811_v26  ;;  %v1022_v14 = vmul.f32 %v10739_v22, %v11971_v18  ;;  %v16339_v44 = vld [vmem:[#allocation20_spill] sm:$0xff] }
 0x1fc   : > { %v853_v29 = vpop.xlane.xlu0 %852  ;;  %v922_v31 = vmul.f32 0.00390625, %v850_v53  ;;  %v12345_v33 = vpack.c.bf16 %v1169_v20, %v1167_v46  ;;  %2032 = vmatprep.subr.bf16.mxu1 %v10450_v16  ;;  %v813_v12 = vmul.f32 %v12335_v41, %v12335_v41  ;;  %v814_v7 = vmul.f32 %v12338_v3, %v12338_v3  ;;  %v16340_v46 = vld [vmem:[#allocation21_spill] sm:$0xff] }
 0x1fd   : > { %10744 = vrsqrt.f32 %v953_v43  ;;  %v923_v27 = vmul.f32 0.00390625, %v853_v29  ;;  %906 = vadd.xlane.f32.xlu0 %v905_v50  ;;  %v1096_v34 = vmul.f32 %v12197_v21, %v1020_v6  ;;  %v1098_v11 = vmul.f32 %v12197_v21, %v1022_v14  ;;  %v16341_v50 = vld [vmem:[#allocation23_spill] sm:$0xff] }
 0x1fe   : > { %16338 = vst [vmem:[#allocation44_spill] sm:$0xff] %v12345_v33  ;;  %v954_v60 = vadd.f32 1e-05, %v922_v31  ;;  %1884 = vmatmul.mubr.bf16.gmra.mrb[8].mxu1 %v12345_v33  ;;  %2270 = vmatmul.mubr.bf16.gmra.mrb[8].mxu0 %v12345_v33  ;;  %v1019_v16 = vmul.f32 %v10737_v52, %v16339_v44  ;;  %v1021_v26 = vmul.f32 %v10739_v22, %v16340_v46  ;;  %v10451_v33 = vld [vmem:[#allocation7 + $0xf8] ss:$24 sps:$4 sm:$0xff]  }
 0x1ff   : > { %v10741_v18 = vpop.eup %10740  ;;  %v955_v39 = vadd.f32 1e-05, %v923_v27  ;;  %v856_v30 = vpop.xlane.xlu1 %855  ;;  %v908_v20 = vadd.f32 %v814_v7, %v813_v12  ;;  %v1172_v53 = vadd.f32 %v12219_v1, %v1096_v34  ;;  %v1174_v29 = vadd.f32 %v12219_v1, %v1098_v11  ;;  %2033 = vmatpush1.bf16.msra.mxu1 %v10448_v8  ;;  %v10456_v12 = vld [vmem:[#allocation7 + $0x12c] ss:$24 sps:$4 sm:$0xff]   ;;  %v16342_v44 = vld [vmem:[#allocation22_spill] sm:$0xff] }
 0x200   : > { %v859_v43 = vpop.xlane.xlu0 %858  ;;  %v1024_v6 = vmul.f32 %v10741_v18, %v16341_v50  ;;  %10746 = vrsqrt.f32 %v954_v60  ;;  %v924_v14 = vmul.f32 0.00390625, %v856_v30  ;;  %v1095_v27 = vmul.f32 %v12209_v42, %v1019_v16  ;;  %2034 = vmatprep.subr.bf16.mxu1 %v10453_v2  ;;  %v16343_v16 = vld [vmem:[#allocation25_spill] sm:$0xff] }
 0x201   : > { %v925_v31 = vmul.f32 0.00390625, %v859_v43  ;;  %10748 = vrsqrt.f32 %v955_v39  ;;  %909 = vadd.xlane.f32.xlu1 %v908_v20  ;;  %v12361_v52 = vpack.c.bf16 %v1174_v29, %v1172_v53  ;;  %v1097_v22 = vmul.f32 %v12209_v42, %v1021_v26  ;;  %v16344_v20 = vld [vmem:[#allocation24_spill] sm:$0xff] }
 0x202   : > { %v10743_v7 = vpop.eup %10742  ;;  %v956_v34 = vadd.f32 1e-05, %v924_v14  ;;  %v1100_v11 = vmul.f32 %v12197_v21, %v1024_v6  ;;  %v1023_v8 = vmul.f32 %v10741_v18, %v16342_v44  ;;  %v1171_v2 = vadd.f32 %v12222_v35, %v1095_v27  ;;  %v10454_v29 = vld [vmem:[#allocation7 + $0x128] ss:$24 sps:$4 sm:$0xff]   ;;  %v10459_v14 = vld [vmem:[#allocation7 + $0x15c] ss:$24 sps:$4 sm:$0xff]  }
 0x203   : > { %v957_v60 = vadd.f32 1e-05, %v925_v31  ;;  %v862_v46 = vpop.xlane.xlu1 %861  ;;  %1893 = vmatprep.mubr.bf16.mxu1 %v12361_v52  ;;  %2279 = vmatprep.mubr.bf16.mxu0 %v12361_v52  ;;  %v1173_v39 = vadd.f32 %v12222_v35, %v1097_v22  ;;  %v1026_v30 = vmul.f32 %v10743_v7, %v16343_v16  ;;  %v1025_v53 = vmul.f32 %v10743_v7, %v16344_v20  ;;  %v16348_v16 = vld [vmem:[#allocation26_spill] sm:$0xff] }
 0x204   : > { %10750 = vrsqrt.f32 %v956_v34  ;;  %v926_v26 = vmul.f32 0.00390625, %v862_v46  ;;  %v865_v43 = vpop.xlane.xlu0 %864  ;;  %2035 = vmatpush1.bf16.msra.mxu1 %v10451_v33  ;;  %v1099_v6 = vmul.f32 %v12209_v42, %v1023_v8  ;;  %v1176_v22 = vadd.f32 %v12219_v1, %v1100_v11  ;;  %v16346_v46 = vld [vmem:[#allocation27_spill] sm:$0xff] }
 0x205   : > { %v12372_v18 = vpack.c.bf16 %v1173_v39, %v1171_v2  ;;  %v1102_v50 = vmul.f32 %v12197_v21, %v1026_v30  ;;  %2036 = vmatprep.subr.bf16.mxu1 %v10456_v12  ;;  %v1101_v34 = vmul.f32 %v12209_v42, %v1025_v53  ;;  %10752 = vrsqrt.f32 %v957_v60  ;;  %v10457_v39 = vld [vmem:[#allocation7 + $0x158] ss:$24 sps:$4 sm:$0xff]  }
 0x206   : > { %v958_v27 = vadd.f32 1e-05, %v926_v26  ;;  %v927_v44 = vmul.f32 0.00390625, %v865_v43  ;;  %v1175_v60 = vadd.f32 %v12222_v35, %v1099_v6  ;;  %v10462_v26 = vld [vmem:[#allocation7 + $0x18c] ss:$24 sps:$4 sm:$0xff]  }
 0x207   : > { %16345 = vst [vmem:[#allocation20_spill] sm:$0xff] %v12372_v18  ;;  %v10745_v31 = vpop.eup %10744  ;;  %1894 = vmatmul.mubr.bf16.gmra.mrb[12].mxu1 %v12372_v18  ;;  %2280 = vmatmul.mubr.bf16.gmra.mrb[12].mxu0 %v12372_v18  ;;  %v868_v33 = vpop.xlane.xlu1 %867  ;;  %v1178_v7 = vadd.f32 %v12219_v1, %v1102_v50  ;;  %v1177_v8 = vadd.f32 %v12222_v35, %v1101_v34  ;;  %v16350_v34 = vld [vmem:[#allocation28_spill] sm:$0xff] }
 0x208   : > { %v1028_v2 = vmul.f32 %v10745_v31, %v16346_v46  ;;  %10754 = vrsqrt.f32 %v958_v27  ;;  %v928_v12 = vmul.f32 0.00390625, %v868_v33  ;;  %2037 = vmatpush1.bf16.msra.mxu1 %v10454_v29  ;;  %v1027_v30 = vmul.f32 %v10745_v31, %v16348_v16  ;;  %v871_v27 = vpop.xlane.xlu0 %870  ;;  %v16351_v16 = vld [vmem:[#allocation31_spill] sm:$0xff] }
 0x209   : > { %v12383_v11 = vpack.c.bf16 %v1178_v7, %v1176_v22  ;;  %2038 = vmatprep.subr.bf16.mxu1 %v10459_v14  ;;  %v959_v46 = vadd.f32 1e-05, %v927_v44  ;;  %v12390_v29 = vpack.c.bf16 %v1177_v8, %v1175_v60  ;;  %v16349_v22 = vld [vmem:[#allocation29_spill] sm:$0xff]  ;;  %v929_v60 = vmul.f32 0.00390625, %v871_v27 }
 0x20a   : > { %v10747_v43 = vpop.eup %10746  ;;  %v960_v20 = vadd.f32 1e-05, %v928_v12  ;;  %v1104_v53 = vmul.f32 %v12197_v21, %v1028_v2  ;;  %v1103_v14 = vmul.f32 %v12209_v42, %v1027_v30  ;;  %v10460_v7 = vld [vmem:[#allocation7 + $0x188] ss:$24 sps:$4 sm:$0xff]  }
 0x20b   : > { %16347 = vst [vmem:[#allocation21_spill] sm:$0xff] %v12383_v11  ;;  %v10749_v50 = vpop.eup %10748  ;;  %v874_v33 = vpop.xlane.xlu1 %873  ;;  %1903 = vmatprep.mubr.bf16.mxu1 %v12383_v11  ;;  %2289 = vmatprep.mubr.bf16.mxu0 %v12383_v11  ;;  %v1030_v6 = vmul.f32 %v10747_v43, %v16349_v22  ;;  %v1029_v31 = vmul.f32 %v10747_v43, %v16350_v34  ;;  %v10465_v11 = vld [vmem:[#allocation7 + $0x1bc] ss:$24 sps:$4 sm:$0xff]  }
 0x20c   : > { %10756 = vrsqrt.f32 %v960_v20  ;;  %2039 = vmatpush1.bf16.msra.mxu1 %v10457_v39  ;;  %v930_v2 = vmul.f32 0.00390625, %v874_v33  ;;  %v1032_v18 = vmul.f32 %v10749_v50, %v16351_v16  ;;  %v1180_v22 = vadd.f32 %v12219_v1, %v1104_v53  ;;  %v10463_v33 = vld [vmem:[#allocation7 + $0x1b8] ss:$24 sps:$4 sm:$0xff]  }
 0x20d   : > { %v1106_v44 = vmul.f32 %v12197_v21, %v1030_v6  ;;  %v1105_v12 = vmul.f32 %v12209_v42, %v1029_v31  ;;  %2040 = vmatprep.subr.bf16.mxu1 %v10462_v26  ;;  %10758 = vrsqrt.f32 %v959_v46  ;;  %v1179_v20 = vadd.f32 %v12222_v35, %v1103_v14 }
 0x20e   : > { %v10751_v8 = vpop.eup %10750  ;;  %v1108_v26 = vmul.f32 %v12197_v21, %v1032_v18  ;;  %v962_v6 = vadd.f32 1e-05, %v930_v2  ;;  %v961_v14 = vadd.f32 1e-05, %v929_v60  ;;  %v10466_v60 = vld [vmem:[#allocation7 + $0x1e8] ss:$24 sps:$4 sm:$0xff]  }
 0x20f   : > { %1904 = vmatmul.mubr.bf16.gmra.mrb[16].mxu1 %v12390_v29  ;;  %2290 = vmatmul.mubr.bf16.gmra.mrb[16].mxu0 %v12390_v29  ;;  %v1182_v39 = vadd.f32 %v12219_v1, %v1106_v44  ;;  %v1181_v30 = vadd.f32 %v12222_v35, %v1105_v12  ;;  %v1034_v43 = vmul.f32 %v10751_v8, %v12068_v40  ;;  %v10753_v27 = vpop.eup %10752  ;;  %v880_v44 = vpop.xlane.xlu1 %879  ;;  %v16352_v40 = vld [vmem:[#allocation30_spill] sm:$0xff] }
 0x210   : > { %2041 = vmatpush1.bf16.msra.mxu1 %v10460_v7  ;;  %v1033_v34 = vmul.f32 %v10751_v8, %v12065_v48  ;;  %v1031_v16 = vmul.f32 %v10749_v50, %v16352_v40  ;;  %v1184_v18 = vadd.f32 %v12219_v1, %v1108_v26  ;;  %v877_v48 = vpop.xlane.xlu0 %876  ;;  %10760 = vrsqrt.f32 %v962_v6  ;;  %v16354_v40 = vld [vmem:[#allocation34_spill] sm:$0xff] }
 0x211   : > { %v12406_v53 = vpack.c.bf16 %v1182_v39, %v1180_v22  ;;  %v1110_v46 = vmul.f32 %v12197_v21, %v1034_v43  ;;  %2042 = vmatprep.subr.bf16.mxu1 %v10465_v11  ;;  %v12410_v12 = vpack.c.bf16 %v1181_v30, %v1179_v20  ;;  %v10468_v22 = vld [vmem:[#allocation7 + $0x1ec] ss:$24 sps:$4 sm:$0xff]   ;;  %v932_v39 = vmul.f32 0.00390625, %v880_v44 }
 0x212   : > { %v10755_v31 = vpop.eup %10754  ;;  %v16353_v11 = vld [vmem:[#allocation33_spill] sm:$0xff]  ;;  %v1109_v50 = vmul.f32 %v12209_v42, %v1033_v34  ;;  %10762 = vrsqrt.f32 %v961_v14  ;;  %v931_v26 = vmul.f32 0.00390625, %v877_v48  ;;  %v10469_v14 = vld [vmem:[#allocation7 + $0x218] ss:$24 sps:$4 sm:$0xff]   ;;  %v16355_v48 = vld [vmem:[#allocation32_spill] sm:$0xff] }
 0x213   : > { %1913 = vmatprep.mubr.bf16.mxu1 %v12406_v53  ;;  %2299 = vmatprep.mubr.bf16.mxu0 %v12406_v53  ;;  %v1186_v7 = vadd.f32 %v12219_v1, %v1110_v46  ;;  %v1038_v2 = vmul.f32 %v10755_v31, %v12090_v56  ;;  %v1036_v8 = vmul.f32 %v10753_v27, %v16353_v11  ;;  %v964_v34 = vadd.f32 1e-05, %v932_v39 }
 0x214   : > { %2043 = vmatpush1.bf16.msra.mxu1 %v10463_v33  ;;  %v1107_v56 = vmul.f32 %v12209_v42, %v1031_v16  ;;  %v10471_v33 = vld [vmem:[#allocation7 + $0x21c] ss:$24 sps:$4 sm:$0xff]   ;;  %v1185_v44 = vadd.f32 %v12222_v35, %v1109_v50  ;;  %v1035_v11 = vmul.f32 %v10753_v27, %v16355_v48  ;;  %v16357_v48 = vld [vmem:[#allocation37_spill] sm:$0xff] }
 0x215   : > { %v12419_v30 = vpack.c.bf16 %v1186_v7, %v1184_v18  ;;  %2044 = vmatprep.subr.bf16.mxu1 %v10468_v22  ;;  %v1114_v20 = vmul.f32 %v12197_v21, %v1038_v2  ;;  %v1112_v6 = vmul.f32 %v12197_v21, %v1036_v8  ;;  %v1037_v18 = vmul.f32 %v10755_v31, %v16354_v40 }
 0x216   : > { %v10757_v43 = vpop.eup %10756  ;;  %v963_v22 = vadd.f32 1e-05, %v931_v26  ;;  %v1183_v16 = vadd.f32 %v12222_v35, %v1107_v56  ;;  %10764 = vrsqrt.f32 %v964_v34  ;;  %v1111_v27 = vmul.f32 %v12209_v42, %v1035_v11  ;;  %v10472_v26 = vld [vmem:[#allocation7 + $0x248] ss:$24 sps:$4 sm:$0xff]   ;;  %v10474_v56 = vld [vmem:[#allocation7 + $0x24c] ss:$24 sps:$4 sm:$0xff]  }
 0x217   : > { %1914 = vmatmul.mubr.bf16.gmra.mrb[20].mxu1 %v12410_v12  ;;  %2300 = vmatmul.mubr.bf16.gmra.mrb[20].mxu0 %v12410_v12  ;;  %v10759_v46 = vpop.eup %10758  ;;  %v1190_v7 = vadd.f32 %v12219_v1, %v1114_v20  ;;  %v1042_v2 = vmul.f32 %v10757_v43, %v12112_v28  ;;  %v1188_v8 = vadd.f32 %v12219_v1, %v1112_v6 }
 0x218   : > { %1923 = vmatprep.mubr.bf16.mxu1 %v12419_v30  ;;  %2045 = vmatpush1.bf16.msra.mxu1 %v10466_v60  ;;  %v1040_v39 = vmul.f32 %v10759_v46, %v12102_v24  ;;  %v12436_v50 = vpack.c.bf16 %v1185_v44, %v1183_v16  ;;  %v1113_v31 = vmul.f32 %v12209_v42, %v1037_v18  ;;  %10766 = vrsqrt.f32 %v963_v22 }
 0x219   : > { %2046 = vmatprep.subr.bf16.mxu1 %v10471_v33  ;;  %v12439_v60 = vpack.c.bf16 %v1190_v7, %v1188_v8  ;;  %v1118_v28 = vmul.f32 %v12197_v21, %v1042_v2  ;;  %v10477_v33 = vld [vmem:[#allocation7 + $0x27c] ss:$24 sps:$4 sm:$0xff]   ;;  %v1041_v44 = vmul.f32 %v10757_v43, %v12109_v19  ;;  %v1187_v7 = vadd.f32 %v12222_v35, %v1111_v27 }
 0x21a   : > { %v10761_v20 = vpop.eup %10760  ;;  %v1116_v24 = vmul.f32 %v12197_v21, %v1040_v39  ;;  %v1189_v34 = vadd.f32 %v12222_v35, %v1113_v31  ;;  %v16356_v2 = vld [vmem:[#allocation35_spill] sm:$0xff] }
 0x21b   : > { %v1194_v40 = vadd.f32 %v12219_v1, %v1118_v28  ;;  %v1046_v18 = vmul.f32 %v10761_v20, %v12134_v51  ;;  %v1039_v22 = vmul.f32 %v10759_v46, %v16356_v2  ;;  %v1117_v19 = vmul.f32 %v12209_v42, %v1041_v44  ;;  %v10478_v46 = vld [vmem:[#allocation7 + $0x2a8] ss:$24 sps:$4 sm:$0xff]   ;;  %v10480_v28 = vld [vmem:[#allocation7 + $0x2ac] ss:$24 sps:$4 sm:$0xff]  }
 0x21c   : > { %2047 = vmatpush1.bf16.msra.mxu1 %v10469_v14  ;;  %v10763_v6 = vpop.eup %10762  ;;  %v10475_v14 = vld [vmem:[#allocation7 + $0x278] ss:$24 sps:$4 sm:$0xff]   ;;  %v1192_v16 = vadd.f32 %v12219_v1, %v1116_v24  ;;  %v12454_v8 = vpack.c.bf16 %v1189_v34, %v1187_v7 }
 0x21d   : > { %2048 = vmatprep.subr.bf16.mxu1 %v10474_v56  ;;  %v1044_v11 = vmul.f32 %v10763_v6, %v16357_v48  ;;  %v1122_v39 = vmul.f32 %v12197_v21, %v1046_v18  ;;  %v1115_v31 = vmul.f32 %v12209_v42, %v1039_v22  ;;  %v1193_v24 = vadd.f32 %v12222_v35, %v1117_v19 }
 0x21e   : > { %v12457_v43 = vpack.c.bf16 %v1194_v40, %v1192_v16  ;;  %v10481_v40 = vld [vmem:[#allocation7 + $0x2d8] ss:$24 sps:$4 sm:$0xff]  }
 0x21f   : > { %1924 = vmatmul.mubr.bf16.gmra.mrb[24].mxu1 %v12436_v50  ;;  %v1120_v27 = vmul.f32 %v12197_v21, %v1044_v11  ;;  %v1198_v34 = vadd.f32 %v12219_v1, %v1122_v39  ;;  %v1191_v18 = vadd.f32 %v12222_v35, %v1115_v31  ;;  %v11132_v11 = vld [vmem:[#allocation7 + $0x14] ss:$24 sps:$4 sm:$0xff]  }
 0x220   : > { %1933 = vmatprep.mubr.bf16.mxu1 %v12439_v60  ;;  %2049 = vmatpush1.bf16.msra.mxu1 %v10472_v26  ;;  %v10765_v51 = vpop.eup %10764  ;;  %v10483_v26 = vld [vmem:[#allocation7 + $0x2dc] ss:$24 sps:$4 sm:$0xff]  }
 0x221   : > { %2050 = vmatprep.subr.bf16.mxu1 %v10477_v33  ;;  %v1045_v33 = vmul.f32 %v10761_v20, %v12127_v32  ;;  %v1050_v44 = vmul.f32 %v10765_v51, %v12154_v55  ;;  %v1196_v2 = vadd.f32 %v12219_v1, %v1120_v27  ;;  %v12472_v16 = vpack.c.bf16 %v1193_v24, %v1191_v18 }
 0x222   : > { %v10767_v56 = vpop.eup %10766  ;;  %v1049_v19 = vmul.f32 %v10765_v51, %v12147_v38 }
 0x223   : > { %v1048_v22 = vmul.f32 %v10767_v56, %v12144_v23  ;;  %v1121_v32 = vmul.f32 %v12209_v42, %v1045_v33  ;;  %v12475_v20 = vpack.c.bf16 %v1198_v34, %v1196_v2  ;;  %v1126_v48 = vmul.f32 %v12197_v21, %v1050_v44 }
 0x224   : > { %2051 = vmatpush1.bf16.msra.mxu1 %v10475_v14  ;;  %v16358_v14 = vld [vmem:[#allocation36_spill] sm:$0xff] }
 0x225   : > { %2052 = vmatprep.subr.bf16.mxu1 %v10480_v28  ;;  %v1043_v7 = vmul.f32 %v10763_v6, %v16358_v14  ;;  %v1124_v6 = vmul.f32 %v12197_v21, %v1048_v22  ;;  %v1197_v23 = vadd.f32 %v12222_v35, %v1121_v32  ;;  %v1202_v39 = vadd.f32 %v12219_v1, %v1126_v48 }
 0x227   : > { %1934 = vmatmul.mubr.bf16.gmra.mrb[28].mxu1 %v12454_v8  ;;  %v1119_v55 = vmul.f32 %v12209_v42, %v1043_v7  ;;  %v1200_v28 = vadd.f32 %v12219_v1, %v1124_v6 }
 0x228   : > { %1943 = vmatprep.mubr.bf16.mxu1 %v12457_v43  ;;  %2053 = vmatpush1.bf16.msra.mxu1 %v10478_v46  ;;  %v1047_v46 = vmul.f32 %v10767_v56, %v12141_v37 }
 0x229   : > { %2054 = vmatprep.subr.bf16.mxu1 %v10483_v26  ;;  %v1195_v31 = vadd.f32 %v12222_v35, %v1119_v55  ;;  %v1125_v26 = vmul.f32 %v12209_v42, %v1049_v19  ;;  %v12491_v24 = vpack.c.bf16 %v1202_v39, %v1200_v28 }
 0x22a   : > { %v1123_v33 = vmul.f32 %v12209_v42, %v1047_v46 }
 0x22b   : > { %v12488_v27 = vpack.c.bf16 %v1197_v23, %v1195_v31  ;;  %v1201_v38 = vadd.f32 %v12222_v35, %v1125_v26 }
 0x22c   : > { %2055 = vmatpush1.bf16.msra.mxu1 %v10481_v40  ;;  %v1199_v51 = vadd.f32 %v12222_v35, %v1123_v33 }
 0x22d   : > { %9954 = vmatprep.subr.bf16.mxu1 %v11132_v11 }
 0x22e   : > { %v12498_v34 = vpack.c.bf16 %v1201_v38, %v1199_v51  ;;  %v16359_v38 = vld [vmem:[#allocation41_spill] sm:$0xff] }
 0x22f   : > { %1944 = vmatmul.mubr.bf16.gmra.mrb[32].mxu1 %v12472_v16 }
 0x230   : > { %1953 = vmatprep.mubr.bf16.mxu1 %v12475_v20 }
 0x237   : > { %1954 = vmatmul.mubr.bf16.gmra.mrb[36].mxu1 %v12488_v27 }
 0x238   : > { %1963 = vmatprep.mubr.bf16.mxu1 %v12491_v24 }
 0x23f   : > { %1964 = vmatmul.mubr.bf16.gmra.mrb[40].mxu1 %v12498_v34 }
 0x26a   : > { %v883_v37 = vpop.xlane.xlu0 %882 }
 0x26b   : > { %v933_v56 = vmul.f32 0.00390625, %v883_v37  ;;  %v16360_v37 = vld [vmem:[#allocation40_spill] sm:$0xff] }
 0x26d   : > { %v965_v44 = vadd.f32 1e-05, %v933_v56  ;;  %v886_v40 = vpop.xlane.xlu1 %885 }
 0x26e   : > { %v934_v18 = vmul.f32 0.00390625, %v886_v40 }
 0x26f   : > { %10768 = vrsqrt.f32 %v965_v44 }
 0x270   : > { %v966_v14 = vadd.f32 1e-05, %v934_v18 }
 0x272   : > { %v889_v7 = vpop.xlane.xlu0 %888  ;;  %10770 = vrsqrt.f32 %v966_v14 }
 0x273   : > { %v935_v2 = vmul.f32 0.00390625, %v889_v7 }
 0x275   : > { %v967_v22 = vadd.f32 1e-05, %v935_v2  ;;  %v892_v32 = vpop.xlane.xlu1 %891 }
 0x276   : > { %v936_v48 = vmul.f32 0.00390625, %v892_v32 }
 0x277   : > { %10772 = vrsqrt.f32 %v967_v22 }
 0x278   : > { %v968_v11 = vadd.f32 1e-05, %v936_v48 }
 0x279   : > { %v10769_v55 = vpop.eup %10768 }
 0x27a   : > { %v1052_v23 = vmul.f32 %v10769_v55, %v12171_v61  ;;  %v1051_v19 = vmul.f32 %v10769_v55, %v12168_v59  ;;  %10774 = vrsqrt.f32 %v968_v11 }
 0x27b   : > { %v895_v6 = vpop.xlane.xlu0 %894 }
 0x27c   : > { %v937_v39 = vmul.f32 0.00390625, %v895_v6  ;;  %v10771_v31 = vpop.eup %10770  ;;  %v1128_v28 = vmul.f32 %v12197_v21, %v1052_v23  ;;  %v1127_v26 = vmul.f32 %v12209_v42, %v1051_v19 }
 0x27d   : > { %v1054_v51 = vmul.f32 %v10771_v31, %v16359_v38  ;;  %v1053_v56 = vmul.f32 %v10771_v31, %v16360_v37 }
 0x27e   : > { %v969_v46 = vadd.f32 1e-05, %v937_v39  ;;  %v898_v33 = vpop.xlane.xlu1 %897  ;;  %v1204_v14 = vadd.f32 %v12219_v1, %v1128_v28  ;;  %v1203_v7 = vadd.f32 %v12222_v35, %v1127_v26 }
 0x27f   : > { %v938_v44 = vmul.f32 0.00390625, %v898_v33  ;;  %v1130_v40 = vmul.f32 %v12197_v21, %v1054_v51  ;;  %v1129_v61 = vmul.f32 %v12209_v42, %v1053_v56 }
 0x280   : > { %10776 = vrsqrt.f32 %v969_v46 }
 0x281   : > { %v10773_v59 = vpop.eup %10772  ;;  %v970_v18 = vadd.f32 1e-05, %v938_v44  ;;  %v1206_v2 = vadd.f32 %v12219_v1, %v1130_v40  ;;  %v1205_v22 = vadd.f32 %v12222_v35, %v1129_v61 }
 0x282   : > { %v1056_v32 = vmul.f32 %v10773_v59, %v12203_v47  ;;  %v1055_v48 = vmul.f32 %v10773_v59, %v12200_v13 }
 0x283   : > { %10778 = vrsqrt.f32 %v970_v18  ;;  %v901_v55 = vpop.xlane.xlu0 %900  ;;  %v12515_v6 = vpack.c.bf16 %v1206_v2, %v1204_v14  ;;  %v12517_v23 = vpack.c.bf16 %v1205_v22, %v1203_v7 }
 0x284   : > { %v939_v11 = vmul.f32 0.00390625, %v901_v55  ;;  %v10775_v19 = vpop.eup %10774  ;;  %v1132_v39 = vmul.f32 %v12197_v21, %v1056_v32  ;;  %v1131_v31 = vmul.f32 %v12209_v42, %v1055_v48 }
 0x285   : > { %v904_v28 = vpop.xlane.xlu1 %903  ;;  %1973 = vmatprep.mubr.bf16.mxu1 %v12515_v6  ;;  %v1058_v47 = vmul.f32 %v10775_v19, %v12228_v36  ;;  %v1057_v13 = vmul.f32 %v10775_v19, %v12225_v62 }
 0x286   : > { %v971_v46 = vadd.f32 1e-05, %v939_v11  ;;  %v940_v26 = vmul.f32 0.00390625, %v904_v28  ;;  %1974 = vmatmul.mubr.bf16.gmra.mrb[44].mxu1 %v12517_v23  ;;  %v1208_v56 = vadd.f32 %v12219_v1, %v1132_v39  ;;  %v1207_v44 = vadd.f32 %v12222_v35, %v1131_v31 }
 0x287   : > { %v1134_v33 = vmul.f32 %v12197_v21, %v1058_v47  ;;  %v1133_v38 = vmul.f32 %v12209_v42, %v1057_v13 }
 0x288   : > { %10780 = vrsqrt.f32 %v971_v46  ;;  %v972_v37 = vadd.f32 1e-05, %v940_v26 }
 0x289   : > { %v1210_v61 = vadd.f32 %v12219_v1, %v1134_v33  ;;  %v1209_v36 = vadd.f32 %v12222_v35, %v1133_v38 }
 0x28a   : > { %v10777_v51 = vpop.eup %10776  ;;  %v907_v40 = vpop.xlane.xlu0 %906  ;;  %10782 = vrsqrt.f32 %v972_v37 }
 0x28b   : > { %v1060_v62 = vmul.f32 %v10777_v51, %v12244_v57  ;;  %v1059_v59 = vmul.f32 %v10777_v51, %v12241_v5  ;;  %v941_v18 = vmul.f32 0.00390625, %v907_v40  ;;  %v12533_v14 = vpack.c.bf16 %v1210_v61, %v1208_v56 }
 0x28c   : > { %v12535_v7 = vpack.c.bf16 %v1209_v36, %v1207_v44 }
 0x28d   : > { %v10779_v2 = vpop.eup %10778  ;;  %v973_v22 = vadd.f32 1e-05, %v941_v18  ;;  %1983 = vmatprep.mubr.bf16.mxu1 %v12533_v14  ;;  %v1136_v55 = vmul.f32 %v12197_v21, %v1060_v62  ;;  %v1135_v57 = vmul.f32 %v12209_v42, %v1059_v59 }
 0x28e   : > { %v910_v32 = vpop.xlane.xlu1 %909  ;;  %v1062_v48 = vmul.f32 %v10779_v2, %v12263_v10  ;;  %v1061_v11 = vmul.f32 %v10779_v2, %v12260_v0  ;;  %1984 = vmatmul.mubr.bf16.gmra.mrb[48].mxu1 %v12535_v7 }
 0x28f   : > { %10784 = vrsqrt.f32 %v973_v22  ;;  %v942_v5 = vmul.f32 0.00390625, %v910_v32  ;;  %v1212_v28 = vadd.f32 %v12219_v1, %v1136_v55  ;;  %v1211_v47 = vadd.f32 %v12222_v35, %v1135_v57 }
 0x290   : > { %v1138_v19 = vmul.f32 %v12197_v21, %v1062_v48  ;;  %v1137_v39 = vmul.f32 %v12209_v42, %v1061_v11 }
 0x291   : > { %v974_v31 = vadd.f32 1e-05, %v942_v5 }
 0x292   : > { %v10781_v46 = vpop.eup %10780  ;;  %v1214_v10 = vadd.f32 %v12219_v1, %v1138_v19  ;;  %v1213_v0 = vadd.f32 %v12222_v35, %v1137_v39 }
 0x293   : > { %10786 = vrsqrt.f32 %v974_v31  ;;  %v1064_v13 = vmul.f32 %v10781_v46, %v12283_v58  ;;  %v1063_v26 = vmul.f32 %v10781_v46, %v12280_v25 }
 0x294   : > { %v12551_v33 = vpack.c.bf16 %v1214_v10, %v1212_v28  ;;  %v12553_v38 = vpack.c.bf16 %v1213_v0, %v1211_v47  ;;  %v10783_v51 = vpop.eup %10782  ;;  %v11137_v28 = vld [vmem:[#allocation7 + $0x70] ss:$24 sps:$4 sm:$0xff]   ;;  %v11138_v10 = vld [vmem:[#allocation7 + $0xa4] ss:$24 sps:$4 sm:$0xff]   ;;  %v11140_v47 = vld [vmem:[#allocation7 + $0xd4] ss:$24 sps:$4 sm:$0xff]  }
 0x295   : > { %v1140_v37 = vmul.f32 %v12197_v21, %v1064_v13  ;;  %v1139_v56 = vmul.f32 %v12209_v42, %v1063_v26  ;;  %v1066_v44 = vmul.f32 %v10783_v51, %v12300_v4  ;;  %v1065_v40 = vmul.f32 %v10783_v51, %v12297_v9  ;;  %v11141_v51 = vld [vmem:[#allocation7 + $0xd0] ss:$24 sps:$4 sm:$0xff]  }
 0x296   : > { %1993 = vmatprep.mubr.bf16.mxu1 %v12551_v33 }
 0x297   : > { %1994 = vmatmul.mubr.bf16.gmra.mrb[52].mxu1 %v12553_v38  ;;  %v1142_v58 = vmul.f32 %v12197_v21, %v1066_v44  ;;  %v1141_v25 = vmul.f32 %v12209_v42, %v1065_v40  ;;  %v1216_v36 = vadd.f32 %v12219_v1, %v1140_v37  ;;  %v1215_v62 = vadd.f32 %v12222_v35, %v1139_v56  ;;  %v11142_v56 = vld [vmem:[#allocation7 + $0x104] ss:$24 sps:$4 sm:$0xff]  }
 0x299   : > { %v10785_v61 = vpop.eup %10784  ;;  %v1218_v59 = vadd.f32 %v12219_v1, %v1142_v58  ;;  %v1217_v18 = vadd.f32 %v12222_v35, %v1141_v25 }
 0x29a   : > { %v1068_v2 = vmul.f32 %v10785_v61, %v12320_v45  ;;  %v1067_v4 = vmul.f32 %v10785_v61, %v12317_v54 }
 0x29b   : > { %v12569_v9 = vpack.c.bf16 %v1218_v59, %v1216_v36  ;;  %v12571_v22 = vpack.c.bf16 %v1217_v18, %v1215_v62  ;;  %v11143_v36 = vld [vmem:[#allocation7 + $0x100] ss:$24 sps:$4 sm:$0xff]   ;;  %v11144_v62 = vld [vmem:[#allocation7 + $0x134] ss:$24 sps:$4 sm:$0xff]  }
 0x29c   : > { %v1144_v55 = vmul.f32 %v12197_v21, %v1068_v2  ;;  %v1143_v57 = vmul.f32 %v12209_v42, %v1067_v4  ;;  %v16363_v59 = vld [vmem:[#allocation20_spill] sm:$0xff]  ;;  %v16364_v2 = vld [vmem:[#allocation21_spill] sm:$0xff] }
 0x29d   : > { %v10787_v32 = vpop.eup %10786  ;;  %2003 = vmatprep.mubr.bf16.mxu1 %v12569_v9 }
 0x29e   : > { %v1070_v48 = vmul.f32 %v10787_v32, %v12338_v3  ;;  %v1069_v11 = vmul.f32 %v10787_v32, %v12335_v41  ;;  %v1220_v5 = vadd.f32 %v12219_v1, %v1144_v55  ;;  %v1219_v39 = vadd.f32 %v12222_v35, %v1143_v57  ;;  %v11135_v41 = vld [vmem:[#allocation7 + $0x40] ss:$24 sps:$4 sm:$0xff]   ;;  %v11145_v32 = vld [vmem:[#allocation7 + $0x130] ss:$24 sps:$4 sm:$0xff]  }
 0x29f   : > { %2004 = vmatmul.mubr.bf16.gmra.mrb[56].mxu1 %v12571_v22 }
 0x2a0   : > { %v1146_v45 = vmul.f32 %v12197_v21, %v1070_v48  ;;  %v1145_v54 = vmul.f32 %v12209_v42, %v1069_v11  ;;  %v16361_v21 = vld [vmem:[#allocation43_spill] sm:$0xff]  ;;  %v11133_v42 = vld [vmem:[#allocation7 + $0x10] ss:$24 sps:$4 sm:$0xff]  }
 0x2a1   : > { %v11146_v11 = vld [vmem:[#allocation7 + $0x164] ss:$24 sps:$4 sm:$0xff]  }
 0x2a2   : > { %v1222_v19 = vadd.f32 %v12219_v1, %v1146_v45  ;;  %v1221_v3 = vadd.f32 %v12222_v35, %v1145_v54  ;;  %v11134_v1 = vld [vmem:[#allocation7 + $0x44] ss:$24 sps:$4 sm:$0xff]   ;;  %v11136_v35 = vld [vmem:[#allocation7 + $0x74] ss:$24 sps:$4 sm:$0xff]  }
 0x2a4   : > { %v12585_v31 = vpack.c.bf16 %v1222_v19, %v1220_v5  ;;  %v12587_v46 = vpack.c.bf16 %v1221_v3, %v1219_v39 }
 0x2a6   : > { %2013 = vmatprep.mubr.bf16.mxu1 %v12585_v31 }
 0x2a7   : > { %2014 = vmatmul.mubr.bf16.gmra.mrb[60].mxu1 %v12587_v46 }
 0x2a8   : > { %2056 = vmatprep.mubr.bf16.mxu1 %v12252_v17  ;;  %v11139_v17 = vld [vmem:[#allocation7 + $0xa0] ss:$24 sps:$4 sm:$0xff]  }
 0x2af   : > { %2057 = vmatmul.mubr.bf16.vlgmr.msra.gmra.mrb[64].mxu1 %v16361_v21 }
 0x2b0   : > { %2066 = vmatprep.mubr.bf16.mxu1 %v12290_v15  ;;  %9970 = vmatpush1.bf16.msra.mxu1 %v11133_v42  ;;  %v16362_v15 = vld [vmem:[#allocation44_spill] sm:$0xff] }
 0x2b1   : > { %9955 = vmatprep.subr.bf16.mxu1 %v11134_v1  ;;  %v11147_v42 = vld [vmem:[#allocation7 + $0x160] ss:$24 sps:$4 sm:$0xff]   ;;  %v11148_v1 = vld [vmem:[#allocation7 + $0x194] ss:$24 sps:$4 sm:$0xff]  }
 0x2b4   : > { %9971 = vmatpush1.bf16.msra.mxu1 %v11135_v41  ;;  %v11149_v41 = vld [vmem:[#allocation7 + $0x190] ss:$24 sps:$4 sm:$0xff]  }
 0x2b5   : > { %9956 = vmatprep.subr.bf16.mxu1 %v11136_v35 }
 0x2b7   : > { %2067 = vmatmul.mubr.bf16.gmra.mrb[68].mxu1 %v12305_v63 }
 0x2b8   : > { %2076 = vmatprep.mubr.bf16.mxu1 %v12327_v49  ;;  %9972 = vmatpush1.bf16.msra.mxu1 %v11137_v28 }
 0x2b9   : > { %9957 = vmatprep.subr.bf16.mxu1 %v11138_v10  ;;  %v11150_v10 = vld [vmem:[#allocation7 + $0x1c4] ss:$24 sps:$4 sm:$0xff]  }
 0x2bc   : > { %9973 = vmatpush1.bf16.msra.mxu1 %v11139_v17 }
 0x2bd   : > { %9958 = vmatprep.subr.bf16.mxu1 %v11140_v47 }
 0x2bf   : > { %2077 = vmatmul.mubr.bf16.gmra.mrb[72].mxu1 %v16362_v15  ;;  %v12597_v0 = vpop.f32.mrb[0].mxu1  ;;  %v2251_v13 = vpop.f32.mrb[0].mxu0 }
 0x2c0   : > { %2086 = vmatprep.mubr.bf16.mxu1 %v12361_v52  ;;  %v12600_v26 = vpop.f32.mrb[1].mxu1  ;;  %v2253_v63 = vpop.f32.mrb[1].mxu0  ;;  %9974 = vmatpush1.bf16.msra.mxu1 %v11141_v51 }
 0x2c1   : > { %v12602_v49 = vpop.f32.mrb[2].mxu1  ;;  %v2255_v37 = vpop.f32.mrb[2].mxu0  ;;  %9959 = vmatprep.subr.bf16.mxu1 %v11142_v56 }
 0x2c2   : > { %v12606_v40 = vpop.f32.mrb[3].mxu1  ;;  %v2257_v58 = vpop.f32.mrb[3].mxu0  ;;  %v12608_v25 = vpack.c.bf16 %v2255_v37, %v2251_v13  ;;  %v11151_v37 = vld [vmem:[#allocation7 + $0x1c0] ss:$24 sps:$4 sm:$0xff]  }
 0x2c3   : > { %v2415_v61 = vpack.c.bf16 %v2257_v58, %v2253_v63 }
 0x2c4   : > { %9975 = vmatpush1.bf16.msra.mxu1 %v11143_v36  ;;  %v11153_v36 = vld [vmem:[#allocation7 + $0x1f0] ss:$24 sps:$4 sm:$0xff]  }
 0x2c5   : > { %9794 = vmatprep.subr.bf16.mxu0 %v2415_v61  ;;  %9960 = vmatprep.subr.bf16.mxu1 %v11144_v62 }
 0x2c6   : > { %9795 = vmatpush3.bf16.msra.mxu0 %v2415_v61  ;;  %v11152_v61 = vld [vmem:[#allocation7 + $0x1f4] ss:$24 sps:$4 sm:$0xff]  }
 0x2c7   : > { %2087 = vmatmul.mubr.bf16.gmra.mrb[76].mxu1 %v16363_v59 }
 0x2c8   : > { %v12613_v18 = vpop.f32.mrb[4].mxu1  ;;  %2096 = vmatprep.mubr.bf16.mxu1 %v16364_v2  ;;  %v2261_v4 = vpop.f32.mrb[4].mxu0  ;;  %9976 = vmatpush1.bf16.msra.mxu1 %v11145_v32  ;;  %v11154_v2 = vld [vmem:[#allocation7 + $0x224] ss:$24 sps:$4 sm:$0xff]  }
 0x2c9   : > { %v12616_v48 = vpop.f32.mrb[5].mxu1  ;;  %v2263_v55 = vpop.f32.mrb[5].mxu0  ;;  %9961 = vmatprep.subr.bf16.mxu1 %v11146_v11 }
 0x2ca   : > { %v12618_v57 = vpop.f32.mrb[6].mxu1  ;;  %v2265_v45 = vpop.f32.mrb[6].mxu0 }
 0x2cb   : > { %v12622_v5 = vpop.f32.mrb[7].mxu1  ;;  %v2267_v19 = vpop.f32.mrb[7].mxu0  ;;  %v12624_v39 = vpack.c.bf16 %v2265_v45, %v2261_v4 }
 0x2cc   : > { %v2421_v21 = vpack.c.bf16 %v2267_v19, %v2263_v55  ;;  %9977 = vmatpush1.bf16.msra.mxu1 %v11147_v42  ;;  %v11155_v42 = vld [vmem:[#allocation7 + $0x220] ss:$24 sps:$4 sm:$0xff]  }
 0x2cd   : > { %9962 = vmatprep.subr.bf16.mxu1 %v11148_v1 }
 0x2ce   : > { %9796 = vmatprep.subr.bf16.mxu0 %v2421_v21 }
 0x2cf   : > { %2097 = vmatmul.mubr.bf16.gmra.mrb[80].mxu1 %v12390_v29  ;;  %9797 = vmatpush3.bf16.msra.mxu0 %v2421_v21 }
 0x2d0   : > { %2106 = vmatprep.mubr.bf16.mxu1 %v12406_v53  ;;  %9978 = vmatpush1.bf16.msra.mxu1 %v11149_v41 }
 0x2d1   : > { %v12630_v35 = vpop.f32.mrb[8].mxu1  ;;  %v2271_v28 = vpop.f32.mrb[8].mxu0  ;;  %9963 = vmatprep.subr.bf16.mxu1 %v11150_v10  ;;  %v11157_v10 = vld [vmem:[#allocation7 + $0x250] ss:$24 sps:$4 sm:$0xff]  }
 0x2d2   : > { %v12632_v17 = vpop.f32.mrb[9].mxu1  ;;  %v2273_v47 = vpop.f32.mrb[9].mxu0 }
 0x2d3   : > { %v12634_v15 = vpop.f32.mrb[10].mxu1  ;;  %v2275_v13 = vpop.f32.mrb[10].mxu0 }
 0x2d4   : > { %v12638_v29 = vpack.c.bf16 %v2275_v13, %v2271_v28  ;;  %v12640_v51 = vpop.f32.mrb[11].mxu1  ;;  %v2277_v53 = vpop.f32.mrb[11].mxu0  ;;  %9979 = vmatpush1.bf16.msra.mxu1 %v11151_v37  ;;  %v11156_v28 = vld [vmem:[#allocation7 + $0x254] ss:$24 sps:$4 sm:$0xff]  }
 0x2d5   : > { %v2427_v58 = vpack.c.bf16 %v2277_v53, %v2273_v47  ;;  %9964 = vmatprep.subr.bf16.mxu1 %v11152_v61  ;;  %v11158_v53 = vld [vmem:[#allocation7 + $0x284] ss:$24 sps:$4 sm:$0xff]  }
 0x2d7   : > { %9798 = vmatprep.subr.bf16.mxu0 %v2427_v58  ;;  %2107 = vmatmul.mubr.bf16.gmra.mrb[84].mxu1 %v12410_v12 }
 0x2d8   : > { %9799 = vmatpush3.bf16.msra.mxu0 %v2427_v58  ;;  %2116 = vmatprep.mubr.bf16.mxu1 %v12419_v30 }
 0x2d9   : > { %9980 = vmatpush1.bf16.msra.mxu1 %v11153_v36 }
 0x2da   : > { %v12646_v62 = vpop.f32.mrb[12].mxu1  ;;  %v2281_v59 = vpop.f32.mrb[12].mxu0  ;;  %9965 = vmatprep.subr.bf16.mxu1 %v11154_v2 }
 0x2db   : > { %v12648_v4 = vpop.f32.mrb[13].mxu1  ;;  %v2283_v32 = vpop.f32.mrb[13].mxu0 }
 0x2dc   : > { %v12650_v55 = vpop.f32.mrb[14].mxu1  ;;  %v2285_v11 = vpop.f32.mrb[14].mxu0 }
 0x2dd   : > { %v12654_v12 = vpack.c.bf16 %v2285_v11, %v2281_v59  ;;  %v12656_v19 = vpop.f32.mrb[15].mxu1  ;;  %v2287_v21 = vpop.f32.mrb[15].mxu0  ;;  %9981 = vmatpush1.bf16.msra.mxu1 %v11155_v42 }
 0x2de   : > { %v2433_v41 = vpack.c.bf16 %v2287_v21, %v2283_v32  ;;  %9966 = vmatprep.subr.bf16.mxu1 %v11156_v28  ;;  %v11159_v21 = vld [vmem:[#allocation7 + $0x280] ss:$24 sps:$4 sm:$0xff]   ;;  %v11160_v28 = vld [vmem:[#allocation7 + $0x2b4] ss:$24 sps:$4 sm:$0xff]  }
 0x2df   : > { %2117 = vmatmul.mubr.bf16.gmra.mrb[88].mxu1 %v12436_v50 }
 0x2e0   : > { %9800 = vmatprep.subr.bf16.mxu0 %v2433_v41  ;;  %2126 = vmatprep.mubr.bf16.mxu1 %v12439_v60 }
 0x2e1   : > { %9801 = vmatpush3.bf16.msra.mxu0 %v2433_v41  ;;  %9982 = vmatpush1.bf16.msra.mxu1 %v11157_v10  ;;  %v11161_v10 = vld [vmem:[#allocation7 + $0x2b0] ss:$24 sps:$4 sm:$0xff]  }
 0x2e2   : > { %v12662_v47 = vpop.f32.mrb[16].mxu1  ;;  %v2291_v13 = vpop.f32.mrb[16].mxu0  ;;  %9967 = vmatprep.subr.bf16.mxu1 %v11158_v53 }
 0x2e3   : > { %v12664_v37 = vpop.f32.mrb[17].mxu1  ;;  %v2293_v58 = vpop.f32.mrb[17].mxu0 }
 0x2e4   : > { %v12666_v61 = vpop.f32.mrb[18].mxu1  ;;  %v2295_v36 = vpop.f32.mrb[18].mxu0 }
 0x2e5   : > { %v12670_v2 = vpack.c.bf16 %v2295_v36, %v2291_v13  ;;  %v12672_v32 = vpop.f32.mrb[19].mxu1  ;;  %v2297_v11 = vpop.f32.mrb[19].mxu0  ;;  %9983 = vmatpush1.bf16.msra.mxu1 %v11159_v21  ;;  %v11162_v36 = vld [vmem:[#allocation7 + $0x2e4] ss:$24 sps:$4 sm:$0xff]  }
 0x2e6   : > { %v2439_v41 = vpack.c.bf16 %v2297_v11, %v2293_v58  ;;  %9968 = vmatprep.subr.bf16.mxu1 %v11160_v28 }
 0x2e7   : > { %2127 = vmatmul.mubr.bf16.gmra.mrb[92].mxu1 %v12454_v8 }
 0x2e8   : > { %9802 = vmatprep.subr.bf16.mxu0 %v2439_v41  ;;  %2136 = vmatprep.mubr.bf16.mxu1 %v12457_v43 }
 0x2e9   : > { %9803 = vmatpush3.bf16.msra.mxu0 %v2439_v41  ;;  %9984 = vmatpush1.bf16.msra.mxu1 %v11161_v10  ;;  %v11163_v10 = vld [vmem:[#allocation7 + $0x2e0] ss:$24 sps:$4 sm:$0xff]  }
 0x2ea   : > { %v12678_v13 = vpop.f32.mrb[20].mxu1  ;;  %v2301_v53 = vpop.f32.mrb[20].mxu0  ;;  %9969 = vmatprep.subr.bf16.mxu1 %v11162_v36 }
 0x2eb   : > { %v12680_v21 = vpop.f32.mrb[21].mxu1  ;;  %v2303_v1 = vpop.f32.mrb[21].mxu0 }
 0x2ec   : > { %16365 = vst [vmem:[#allocation23_spill] sm:$0xff] %v12680_v21  ;;  %v12682_v42 = vpop.f32.mrb[22].mxu1  ;;  %v2305_v58 = vpop.f32.mrb[22].mxu0 }
 0x2ed   : > { %v12686_v28 = vpack.c.bf16 %v2305_v58, %v2301_v53  ;;  %v12688_v56 = vpop.f32.mrb[23].mxu1  ;;  %v2307_v41 = vpop.f32.mrb[23].mxu0  ;;  %9985 = vmatpush1.bf16.msra.mxu1 %v11163_v10 }
 0x2ee   : > { %v2445_v36 = vpack.c.bf16 %v2307_v41, %v2303_v1 }
 0x2ef   : > { %2137 = vmatmul.mubr.bf16.gmra.mrb[96].mxu1 %v12472_v16 }
 0x2f0   : > { %9804 = vmatprep.subr.bf16.mxu0 %v2445_v36  ;;  %2146 = vmatprep.mubr.bf16.mxu1 %v12475_v20 }
 0x2f1   : > { %9805 = vmatpush3.bf16.msra.mxu0 %v2445_v36 }
 0x2f2   : > { %v12694_v52 = vpop.f32.mrb[24].mxu1 }
 0x2f3   : > { %v12696_v11 = vpop.f32.mrb[25].mxu1 }
 0x2f4   : > { %16366 = vst [vmem:[#allocation22_spill] sm:$0xff] %v12696_v11  ;;  %v12698_v53 = vpop.f32.mrb[26].mxu1 }
 0x2f5   : > { %v12702_v10 = vpop.f32.mrb[27].mxu1 }
 0x2f6   : > { %16367 = vst [vmem:[#allocation25_spill] sm:$0xff] %v12702_v10 }
 0x2f7   : > { %2147 = vmatmul.mubr.bf16.gmra.mrb[100].mxu1 %v12488_v27 }
 0x2f8   : > { %2156 = vmatprep.mubr.bf16.mxu1 %v12491_v24 }
 0x2fa   : > { %v12708_v41 = vpop.f32.mrb[28].mxu1 }
 0x2fb   : > { %v12710_v36 = vpop.f32.mrb[29].mxu1 }
 0x2fc   : > { %16368 = vst [vmem:[#allocation24_spill] sm:$0xff] %v12710_v36  ;;  %v12712_v3 = vpop.f32.mrb[30].mxu1 }
 0x2fd   : > { %v12716_v45 = vpop.f32.mrb[31].mxu1 }
 0x2fe   : > { %16369 = vst [vmem:[#allocation27_spill] sm:$0xff] %v12716_v45 }
 0x2ff   : > { %2157 = vmatmul.mubr.bf16.gmra.mrb[104].mxu1 %v12498_v34 }
 0x300   : > { %2166 = vmatprep.mubr.bf16.mxu1 %v12515_v6 }
 0x302   : > { %v12722_v1 = vpop.f32.mrb[32].mxu1 }
 0x303   : > { %16370 = vst [vmem:[#allocation26_spill] sm:$0xff] %v12722_v1  ;;  %v12724_v63 = vpop.f32.mrb[33].mxu1 }
 0x304   : > { %16371 = vst [vmem:[#allocation29_spill] sm:$0xff] %v12724_v63  ;;  %v12726_v54 = vpop.f32.mrb[34].mxu1 }
 0x305   : > { %16372 = vst [vmem:[#allocation28_spill] sm:$0xff] %v12726_v54  ;;  %v12730_v11 = vpop.f32.mrb[35].mxu1 }
 0x306   : > { %16373 = vst [vmem:[#allocation31_spill] sm:$0xff] %v12730_v11 }
 0x307   : > { %2167 = vmatmul.mubr.bf16.gmra.mrb[108].mxu1 %v12517_v23 }
 0x308   : > { %2176 = vmatprep.mubr.bf16.mxu1 %v12533_v14 }
 0x30a   : > { %v12736_v58 = vpop.f32.mrb[36].mxu1 }
 0x30b   : > { %v12738_v36 = vpop.f32.mrb[37].mxu1 }
 0x30c   : > { %16374 = vst [vmem:[#allocation30_spill] sm:$0xff] %v12738_v36  ;;  %v12740_v45 = vpop.f32.mrb[38].mxu1 }
 0x30d   : > { %v12744_v21 = vpop.f32.mrb[39].mxu1 }
 0x30e   : > { %16375 = vst [vmem:[#allocation33_spill] sm:$0xff] %v12744_v21 }
 0x30f   : > { %2177 = vmatmul.mubr.bf16.gmra.mrb[112].mxu1 %v12535_v7 }
 0x310   : > { %2186 = vmatprep.mubr.bf16.mxu1 %v12551_v33 }
 0x312   : > { %v12750_v59 = vpop.f32.mrb[40].mxu1 }
 0x313   : > { %v12752_v63 = vpop.f32.mrb[41].mxu1 }
 0x314   : > { %16376 = vst [vmem:[#allocation34_spill] sm:$0xff] %v12752_v63  ;;  %v12754_v11 = vpop.f32.mrb[42].mxu1 }
 0x315   : > { %v12758_v54 = vpop.f32.mrb[43].mxu1 }
 0x316   : > { %16377 = vst [vmem:[#allocation32_spill] sm:$0xff] %v12758_v54 }
 0x317   : > { %2187 = vmatmul.mubr.bf16.gmra.mrb[116].mxu1 %v12553_v38 }
 0x318   : > { %2196 = vmatprep.mubr.bf16.mxu1 %v12569_v9 }
 0x31f   : > { %2197 = vmatmul.mubr.bf16.gmra.mrb[120].mxu1 %v12571_v22 }
 0x320   : > { %2206 = vmatprep.mubr.bf16.mxu1 %v12585_v31 }
 0x327   : > { %2207 = vmatmul.mubr.bf16.gmra.mrb[124].mxu1 %v12587_v46 }
 0x328   : > { %2309 = vmatprep.mubr.bf16.mxu1 %v12419_v30 }
 0x32f   : > { %2310 = vmatmul.mubr.bf16.vlgmr.msra.gmra.mrb[128].mxu1 %v12436_v50 }
 0x330   : > { %2319 = vmatprep.mubr.bf16.mxu1 %v12439_v60 }
 0x337   : > { %2320 = vmatmul.mubr.bf16.gmra.mrb[132].mxu1 %v12454_v8 }
 0x338   : > { %2329 = vmatprep.mubr.bf16.mxu1 %v12457_v43 }
 0x33f   : > { %2330 = vmatmul.mubr.bf16.gmra.mrb[136].mxu1 %v12472_v16 }
 0x340   : > { %2339 = vmatprep.mubr.bf16.mxu1 %v12475_v20 }
 0x347   : > { %2340 = vmatmul.mubr.bf16.gmra.mrb[140].mxu1 %v12488_v27 }
 0x348   : > { %2349 = vmatprep.mubr.bf16.mxu1 %v12491_v24 }
 0x34f   : > { %2350 = vmatmul.mubr.bf16.gmra.mrb[144].mxu1 %v12498_v34 }
 0x350   : > { %2359 = vmatprep.mubr.bf16.mxu1 %v12515_v6 }
 0x357   : > { %2360 = vmatmul.mubr.bf16.gmra.mrb[148].mxu1 %v12517_v23 }
 0x358   : > { %2369 = vmatprep.mubr.bf16.mxu1 %v12533_v14 }
 0x359   : > { %v12780_v30 = vpop.f32.mrb[44].mxu1 }
 0x35a   : > { %16378 = vst [vmem:[#allocation35_spill] sm:$0xff] %v12780_v30  ;;  %v12782_v50 = vpop.f32.mrb[45].mxu1 }
 0x35b   : > { %16379 = vst [vmem:[#allocation37_spill] sm:$0xff] %v12782_v50  ;;  %v12784_v60 = vpop.f32.mrb[46].mxu1 }
 0x35c   : > { %16380 = vst [vmem:[#allocation36_spill] sm:$0xff] %v12784_v60  ;;  %v12788_v43 = vpop.f32.mrb[47].mxu1 }
 0x35d   : > { %16381 = vst [vmem:[#allocation41_spill] sm:$0xff] %v12788_v43 }
 0x35f   : > { %2370 = vmatmul.mubr.bf16.gmra.mrb[152].mxu1 %v12535_v7 }
 0x360   : > { %2379 = vmatprep.mubr.bf16.mxu1 %v12551_v33 }
 0x361   : > { %v12794_v20 = vpop.f32.mrb[48].mxu1 }
 0x362   : > { %16382 = vst [vmem:[#allocation40_spill] sm:$0xff] %v12794_v20  ;;  %v12796_v27 = vpop.f32.mrb[49].mxu1 }
 0x363   : > { %16383 = vst [vmem:[#allocation43_spill] sm:$0xff] %v12796_v27  ;;  %v12798_v24 = vpop.f32.mrb[50].mxu1 }
 0x364   : > { %16384 = vst [vmem:[#allocation44_spill] sm:$0xff] %v12798_v24  ;;  %v12802_v6 = vpop.f32.mrb[51].mxu1 }
 0x365   : > { %16385 = vst [vmem:[#allocation20_spill] sm:$0xff] %v12802_v6 }
 0x367   : > { %2380 = vmatmul.mubr.bf16.gmra.mrb[156].mxu1 %v12553_v38 }
 0x368   : > { %2389 = vmatprep.mubr.bf16.mxu1 %v12569_v9 }
 0x36a   : > { %v12808_v14 = vpop.f32.mrb[52].mxu1 }
 0x36b   : > { %16386 = vst [vmem:[#allocation21_spill] sm:$0xff] %v12808_v14  ;;  %v12810_v7 = vpop.f32.mrb[53].mxu1 }
 0x36c   : > { %16387 = vst [vmem:[#allocation45_spill] sm:$0xff] %v12810_v7  ;;  %v12812_v33 = vpop.f32.mrb[54].mxu1 }
 0x36d   : > { %16388 = vst [vmem:[#allocation46_spill] sm:$0xff] %v12812_v33  ;;  %v12816_v10 = vpop.f32.mrb[55].mxu1 }
 0x36e   : > { %16389 = vst [vmem:[#allocation47_spill] sm:$0xff] %v12816_v10 }
 0x36f   : > { %2390 = vmatmul.mubr.bf16.gmra.mrb[160].mxu1 %v12571_v22  ;;  %v16394_v22 = vpack.c.bf16 %v12602_v49, %v12597_v0 }
 0x370   : > { %2399 = vmatprep.mubr.bf16.mxu1 %v12585_v31 }
 0x372   : > { %v12822_v38 = vpop.f32.mrb[56].mxu1 }
 0x373   : > { %16390 = vst [vmem:[#allocation48_spill] sm:$0xff] %v12822_v38  ;;  %v12824_v9 = vpop.f32.mrb[57].mxu1 }
 0x374   : > { %16391 = vst [vmem:[#allocation49_spill] sm:$0xff] %v12824_v9  ;;  %v12826_v23 = vpop.f32.mrb[58].mxu1 }
 0x375   : > { %16392 = vst [vmem:[#allocation50_spill] sm:$0xff] %v12826_v23  ;;  %v12830_v8 = vpop.f32.mrb[59].mxu1 }
 0x376   : > { %16393 = vst [vmem:[#allocation51_spill] sm:$0xff] %v12830_v8 }
 0x377   : > { %2400 = vmatmul.mubr.bf16.gmra.mrb[164].mxu1 %v12587_v46 }
 0x378   : > { %9714 = vmatprep.mubr.bf16.mxu1 %v16394_v22 }
 0x37a   : > { %v12838_v31 = vpop.f32.mrb[60].mxu1 }
 0x37b   : > { %16395 = vst [vmem:[#allocation52_spill] sm:$0xff] %v12838_v31  ;;  %v12840_v44 = vpop.f32.mrb[61].mxu1 }
 0x37c   : > { %16396 = vst [vmem:[#allocation53_spill] sm:$0xff] %v12840_v44  ;;  %v12842_v1 = vpop.f32.mrb[62].mxu1 }
 0x37d   : > { %16397 = vst [vmem:[#allocation54_spill] sm:$0xff] %v12842_v1  ;;  %v12846_v7 = vpop.f32.mrb[63].mxu1 }
 0x37e   : > { %16398 = vst [vmem:[#allocation55_spill] sm:$0xff] %v12846_v7 }
 0x382   : > { %v2058_v9 = vpop.f32.mrb[64].mxu1 }
 0x383   : > { %v2060_v46 = vpop.f32.mrb[65].mxu1 }
 0x384   : > { %v2062_v8 = vpop.f32.mrb[66].mxu1 }
 0x385   : > { %v2412_v10 = vpack.c.bf16 %v2062_v8, %v2058_v9  ;;  %v2064_v0 = vpop.f32.mrb[67].mxu1 }
 0x386   : > { %v12850_v49 = vpack.c.bf16 %v2064_v0, %v2060_v46 }
 0x387   : > { %9698 = vmatprep.subr.bf16.mxu1 %v2412_v10 }
 0x388   : > { %9699 = vmatpush3.bf16.xpose.msra.mxu1 %v2412_v10 }
 0x38a   : > { %v2068_v22 = vpop.f32.mrb[68].mxu1 }
 0x38b   : > { %v2070_v27 = vpop.f32.mrb[69].mxu1 }
 0x38c   : > { %v2072_v6 = vpop.f32.mrb[70].mxu1 }
 0x38d   : > { %v2418_v50 = vpack.c.bf16 %v2072_v6, %v2068_v22  ;;  %v2074_v43 = vpop.f32.mrb[71].mxu1 }
 0x38e   : > { %v12852_v34 = vpack.c.bf16 %v2074_v43, %v2070_v27 }
 0x38f   : > { %9700 = vmatprep.subr.bf16.mxu1 %v2418_v50 }
 0x390   : > { %9701 = vmatpush3.bf16.xpose.msra.mxu1 %v2418_v50 }
 0x392   : > { %v2078_v63 = vpop.f32.mrb[72].mxu1 }
 0x393   : > { %v2080_v16 = vpop.f32.mrb[73].mxu1 }
 0x394   : > { %v2082_v44 = vpop.f32.mrb[74].mxu1 }
 0x395   : > { %v2424_v7 = vpack.c.bf16 %v2082_v44, %v2078_v63  ;;  %v2084_v54 = vpop.f32.mrb[75].mxu1 }
 0x396   : > { %v12854_v8 = vpack.c.bf16 %v2084_v54, %v2080_v16 }
 0x397   : > { %9702 = vmatprep.subr.bf16.mxu1 %v2424_v7 }
 0x398   : > { %9703 = vmatpush3.bf16.xpose.msra.mxu1 %v2424_v7 }
 0x39a   : > { %v2088_v9 = vpop.f32.mrb[76].mxu1 }
 0x39b   : > { %v2090_v10 = vpop.f32.mrb[77].mxu1 }
 0x39c   : > { %v2092_v46 = vpop.f32.mrb[78].mxu1 }
 0x39d   : > { %v2430_v0 = vpack.c.bf16 %v2092_v46, %v2088_v9  ;;  %v2094_v36 = vpop.f32.mrb[79].mxu1 }
 0x39e   : > { %v12856_v6 = vpack.c.bf16 %v2094_v36, %v2090_v10 }
 0x39f   : > { %9704 = vmatprep.subr.bf16.mxu1 %v2430_v0 }
 0x3a0   : > { %9705 = vmatpush3.bf16.xpose.msra.mxu1 %v2430_v0 }
 0x3a2   : > { %v2098_v43 = vpop.f32.mrb[80].mxu1 }
 0x3a3   : > { %v2100_v50 = vpop.f32.mrb[81].mxu1 }
 0x3a4   : > { %v2102_v27 = vpop.f32.mrb[82].mxu1 }
 0x3a5   : > { %v2436_v22 = vpack.c.bf16 %v2102_v27, %v2098_v43  ;;  %v2104_v21 = vpop.f32.mrb[83].mxu1 }
 0x3a6   : > { %v12858_v44 = vpack.c.bf16 %v2104_v21, %v2100_v50 }
 0x3a7   : > { %9706 = vmatprep.subr.bf16.mxu1 %v2436_v22 }
 0x3a8   : > { %9707 = vmatpush3.bf16.xpose.msra.mxu1 %v2436_v22 }
 0x3aa   : > { %v2108_v54 = vpop.f32.mrb[84].mxu1 }
 0x3ab   : > { %v2110_v63 = vpop.f32.mrb[85].mxu1 }
 0x3ac   : > { %v2112_v16 = vpop.f32.mrb[86].mxu1 }
 0x3ad   : > { %v2442_v7 = vpack.c.bf16 %v2112_v16, %v2108_v54  ;;  %v2114_v31 = vpop.f32.mrb[87].mxu1 }
 0x3ae   : > { %v12860_v9 = vpack.c.bf16 %v2114_v31, %v2110_v63 }
 0x3af   : > { %9708 = vmatprep.subr.bf16.mxu1 %v2442_v7 }
 0x3b0   : > { %9709 = vmatpush3.bf16.xpose.msra.mxu1 %v2442_v7 }
 0x3b2   : > { %v2118_v36 = vpop.f32.mrb[88].mxu1 }
 0x3b3   : > { %v2120_v10 = vpop.f32.mrb[89].mxu1 }
 0x3b4   : > { %v2122_v46 = vpop.f32.mrb[90].mxu1 }
 0x3b5   : > { %v2448_v0 = vpack.c.bf16 %v2122_v46, %v2118_v36  ;;  %v2124_v1 = vpop.f32.mrb[91].mxu1 }
 0x3b6   : > { %v12862_v43 = vpack.c.bf16 %v2124_v1, %v2120_v10  ;;  %v16400_v10 = vpack.c.bf16 %v12618_v57, %v12613_v18  ;;  %v16403_v57 = vpack.c.bf16 %v12650_v55, %v12646_v62  ;;  %v16406_v55 = vpack.c.bf16 %v12682_v42, %v12678_v13 }
 0x3b7   : > { %9710 = vmatprep.subr.bf16.mxu1 %v2448_v0  ;;  %v16409_v42 = vpack.c.bf16 %v12712_v3, %v12708_v41 }
 0x3b8   : > { %9711 = vmatpush3.bf16.xpose.msra.mxu1 %v2448_v0 }
 0x3ba   : > { %v2128_v21 = vpop.f32.mrb[92].mxu1 }
 0x3bb   : > { %v2130_v50 = vpop.f32.mrb[93].mxu1 }
 0x3bc   : > { %v2132_v27 = vpop.f32.mrb[94].mxu1 }
 0x3bd   : > { %v2454_v22 = vpack.c.bf16 %v2132_v27, %v2128_v21  ;;  %v2134_v38 = vpop.f32.mrb[95].mxu1 }
 0x3be   : > { %v12864_v54 = vpack.c.bf16 %v2134_v38, %v2130_v50  ;;  %v16401_v38 = vpack.c.bf16 %v12634_v15, %v12630_v35 }
 0x3bf   : > { %9712 = vmatprep.subr.bf16.mxu1 %v2454_v22 }
 0x3c0   : > { %9713 = vmatpush3.bf16.xpose.msra.mxu1 %v2454_v22 }
 0x3c1   : > { %9730 = vmatprep.subr.bf16.mxu1 %v12608_v25 }
 0x3c2   : > { %v2138_v31 = vpop.f32.mrb[96].mxu1 }
 0x3c3   : > { %v2140_v63 = vpop.f32.mrb[97].mxu1 }
 0x3c4   : > { %v2142_v16 = vpop.f32.mrb[98].mxu1 }
 0x3c5   : > { %v12867_v7 = vpack.c.bf16 %v2142_v16, %v2138_v31  ;;  %v2144_v1 = vpop.f32.mrb[99].mxu1 }
 0x3c6   : > { %v12869_v36 = vpack.c.bf16 %v2144_v1, %v2140_v63 }
 0x3c7   : > { %9715 = vmatmul.mubr.bf16.vlgmr.msra.gmra.mrb[168].mxu1 %v16400_v10 }
 0x3c8   : > { %16399 = vst [vmem:[#allocation56_spill] sm:$0xff] %v12869_v36  ;;  %9718 = vmatprep.mubr.bf16.mxu1 %v16401_v38  ;;  %9731 = vmatpush3.bf16.msra.mxu1 %v12608_v25  ;;  %v16404_v25 = vpack.c.bf16 %v12666_v61, %v12662_v47 }
 0x3c9   : > { %9732 = vmatprep.subr.bf16.mxu1 %v12624_v39 }
 0x3ca   : > { %v2148_v46 = vpop.f32.mrb[100].mxu1 }
 0x3cb   : > { %v2150_v0 = vpop.f32.mrb[101].mxu1 }
 0x3cc   : > { %v2152_v21 = vpop.f32.mrb[102].mxu1  ;;  %9733 = vmatpush3.bf16.msra.mxu1 %v12624_v39 }
 0x3cd   : > { %v12880_v50 = vpack.c.bf16 %v2152_v21, %v2148_v46  ;;  %v2154_v27 = vpop.f32.mrb[103].mxu1  ;;  %9734 = vmatprep.subr.bf16.mxu1 %v12638_v29 }
 0x3ce   : > { %v12883_v18 = vpack.c.bf16 %v2154_v27, %v2150_v0 }
 0x3cf   : > { %9719 = vmatmul.mubr.bf16.gmra.mrb[172].mxu1 %v16403_v57 }
 0x3d0   : > { %16402 = vst [vmem:[#allocation57_spill] sm:$0xff] %v12883_v18  ;;  %9722 = vmatprep.mubr.bf16.mxu1 %v16404_v25  ;;  %9735 = vmatpush3.bf16.msra.mxu1 %v12638_v29  ;;  %v16407_v29 = vpack.c.bf16 %v12698_v53, %v12694_v52 }
 0x3d1   : > { %9736 = vmatprep.subr.bf16.mxu1 %v12654_v12 }
 0x3d2   : > { %v2158_v39 = vpop.f32.mrb[104].mxu1 }
 0x3d3   : > { %v2160_v35 = vpop.f32.mrb[105].mxu1 }
 0x3d4   : > { %v2162_v15 = vpop.f32.mrb[106].mxu1  ;;  %9737 = vmatpush3.bf16.msra.mxu1 %v12654_v12 }
 0x3d5   : > { %v12894_v22 = vpack.c.bf16 %v2162_v15, %v2158_v39  ;;  %v2164_v31 = vpop.f32.mrb[107].mxu1  ;;  %9738 = vmatprep.subr.bf16.mxu1 %v12670_v2 }
 0x3d6   : > { %v12897_v62 = vpack.c.bf16 %v2164_v31, %v2160_v35 }
 0x3d7   : > { %9723 = vmatmul.mubr.bf16.gmra.mrb[176].mxu1 %v16406_v55 }
 0x3d8   : > { %16405 = vst [vmem:[#allocation58_spill] sm:$0xff] %v12897_v62  ;;  %9726 = vmatprep.mubr.bf16.mxu1 %v16407_v29  ;;  %9739 = vmatpush3.bf16.msra.mxu1 %v12670_v2 }
 0x3d9   : > { %9740 = vmatprep.subr.bf16.mxu1 %v12686_v28 }
 0x3da   : > { %v2168_v12 = vpop.f32.mrb[108].mxu1 }
 0x3db   : > { %v2170_v47 = vpop.f32.mrb[109].mxu1 }
 0x3dc   : > { %v2172_v61 = vpop.f32.mrb[110].mxu1  ;;  %9741 = vmatpush3.bf16.msra.mxu1 %v12686_v28 }
 0x3dd   : > { %v12908_v63 = vpack.c.bf16 %v2172_v61, %v2168_v12  ;;  %v2174_v16 = vpop.f32.mrb[111].mxu1 }
 0x3de   : > { %v12910_v1 = vpack.c.bf16 %v2174_v16, %v2170_v47 }
 0x3df   : > { %9727 = vmatmul.mubr.bf16.gmra.mrb[180].mxu1 %v16409_v42 }
 0x3e0   : > { %16408 = vst [vmem:[#allocation59_spill] sm:$0xff] %v12910_v1 }
 0x3e2   : > { %v2178_v52 = vpop.f32.mrb[112].mxu1 }
 0x3e3   : > { %v2180_v13 = vpop.f32.mrb[113].mxu1 }
 0x3e4   : > { %v2182_v53 = vpop.f32.mrb[114].mxu1 }
 0x3e5   : > { %v12915_v2 = vpack.c.bf16 %v2182_v53, %v2178_v52  ;;  %v2184_v10 = vpop.f32.mrb[115].mxu1 }
 0x3e6   : > { %v12917_v38 = vpack.c.bf16 %v2184_v10, %v2180_v13 }
 0x3e8   : > { %16410 = vst [vmem:[#allocation60_spill] sm:$0xff] %v12917_v38 }
 0x3ea   : > { %v2188_v46 = vpop.f32.mrb[116].mxu1 }
 0x3eb   : > { %v2190_v0 = vpop.f32.mrb[117].mxu1 }
 0x3ec   : > { %v2192_v28 = vpop.f32.mrb[118].mxu1 }
 0x3ed   : > { %v12919_v21 = vpack.c.bf16 %v2192_v28, %v2188_v46  ;;  %v2194_v27 = vpop.f32.mrb[119].mxu1 }
 0x3ee   : > { %v12921_v57 = vpack.c.bf16 %v2194_v27, %v2190_v0 }
 0x3f0   : > { %16411 = vst [vmem:[#allocation61_spill] sm:$0xff] %v12921_v57 }
 0x3f2   : > { %v2198_v25 = vpop.f32.mrb[120].mxu1 }
 0x3f3   : > { %v2200_v39 = vpop.f32.mrb[121].mxu1 }
 0x3f4   : > { %v2202_v3 = vpop.f32.mrb[122].mxu1 }
 0x3f5   : > { %v12923_v41 = vpack.c.bf16 %v2202_v3, %v2198_v25  ;;  %v2204_v35 = vpop.f32.mrb[123].mxu1 }
 0x3f6   : > { %v12925_v15 = vpack.c.bf16 %v2204_v35, %v2200_v39 }
 0x3f8   : > { %16412 = vst [vmem:[#allocation62_spill] sm:$0xff] %v12925_v15 }
 0x3fa   : > { %v2208_v31 = vpop.f32.mrb[124].mxu1 }
 0x3fb   : > { %v2210_v55 = vpop.f32.mrb[125].mxu1 }
 0x3fc   : > { %v2212_v29 = vpop.f32.mrb[126].mxu1 }
 0x3fd   : > { %v12927_v12 = vpack.c.bf16 %v2212_v29, %v2208_v31  ;;  %v2214_v47 = vpop.f32.mrb[127].mxu1 }
 0x3fe   : > { %v12929_v61 = vpack.c.bf16 %v2214_v47, %v2210_v55 }
 0x400   : > { %16413 = vst [vmem:[#allocation63_spill] sm:$0xff] %v12929_v61 }
 0x402   : > { %v2311_v16 = vpop.f32.mrb[128].mxu1 }
 0x403   : > { %v2313_v42 = vpop.f32.mrb[129].mxu1 }
 0x404   : > { %v2315_v52 = vpop.f32.mrb[130].mxu1 }
 0x405   : > { %v2450_v13 = vpack.c.bf16 %v2315_v52, %v2311_v16  ;;  %v2317_v53 = vpop.f32.mrb[131].mxu1 }
 0x406   : > { %v2451_v10 = vpack.c.bf16 %v2317_v53, %v2313_v42 }
 0x407   : > { %9742 = vmatprep.subr.bf16.mxu1 %v2450_v13 }
 0x408   : > { %9743 = vmatpush3.bf16.msra.mxu1 %v2450_v13  ;;  %9806 = vmatprep.subr.bf16.mxu0 %v2451_v10 }
 0x409   : > { %9807 = vmatpush3.bf16.msra.mxu0 %v2451_v10 }
 0x40a   : > { %v2321_v46 = vpop.f32.mrb[132].mxu1 }
 0x40b   : > { %v2323_v0 = vpop.f32.mrb[133].mxu1 }
 0x40c   : > { %v2325_v28 = vpop.f32.mrb[134].mxu1 }
 0x40d   : > { %v2456_v27 = vpack.c.bf16 %v2325_v28, %v2321_v46  ;;  %v2327_v25 = vpop.f32.mrb[135].mxu1 }
 0x40e   : > { %v2457_v39 = vpack.c.bf16 %v2327_v25, %v2323_v0 }
 0x40f   : > { %9744 = vmatprep.subr.bf16.mxu1 %v2456_v27 }
 0x410   : > { %9745 = vmatpush3.bf16.msra.mxu1 %v2456_v27  ;;  %9808 = vmatprep.subr.bf16.mxu0 %v2457_v39 }
 0x411   : > { %9762 = vmatprep.subr.bf16.mxu1 %v12850_v49  ;;  %9809 = vmatpush3.bf16.msra.mxu0 %v2457_v39 }
 0x412   : > { %v2331_v3 = vpop.f32.mrb[136].mxu1 }
 0x413   : > { %v2333_v35 = vpop.f32.mrb[137].mxu1 }
 0x414   : > { %v2335_v31 = vpop.f32.mrb[138].mxu1 }
 0x415   : > { %v12932_v55 = vpack.c.bf16 %v2335_v31, %v2331_v3  ;;  %v2337_v29 = vpop.f32.mrb[139].mxu1 }
 0x416   : > { %v12934_v47 = vpack.c.bf16 %v2337_v29, %v2333_v35 }
 0x417   : > { %16414 = vst [vmem:[#allocation64_spill] sm:$0xff] %v12932_v55  ;;  %9858 = vmatprep.subr.bf16.mxu0 %v12932_v55 }
 0x41a   : > { %v2341_v16 = vpop.f32.mrb[140].mxu1 }
 0x41b   : > { %v2343_v42 = vpop.f32.mrb[141].mxu1 }
 0x41c   : > { %v2345_v52 = vpop.f32.mrb[142].mxu1 }
 0x41d   : > { %v12937_v13 = vpack.c.bf16 %v2345_v52, %v2341_v16  ;;  %v2347_v53 = vpop.f32.mrb[143].mxu1 }
 0x41e   : > { %v12939_v10 = vpack.c.bf16 %v2347_v53, %v2343_v42 }
 0x41f   : > { %16415 = vst [vmem:[#allocation65_spill] sm:$0xff] %v12937_v13 }
 0x420   : > { %16416 = vst [vmem:[#allocation66_spill] sm:$0xff] %v12939_v10 }
 0x422   : > { %v2351_v46 = vpop.f32.mrb[144].mxu1 }
 0x423   : > { %v2353_v0 = vpop.f32.mrb[145].mxu1 }
 0x424   : > { %v2355_v28 = vpop.f32.mrb[146].mxu1 }
 0x425   : > { %v12941_v27 = vpack.c.bf16 %v2355_v28, %v2351_v46  ;;  %v2357_v25 = vpop.f32.mrb[147].mxu1 }
 0x426   : > { %v12943_v39 = vpack.c.bf16 %v2357_v25, %v2353_v0 }
 0x427   : > { %16417 = vst [vmem:[#allocation67_spill] sm:$0xff] %v12941_v27 }
 0x428   : > { %16418 = vst [vmem:[#allocation68_spill] sm:$0xff] %v12943_v39 }
 0x42a   : > { %v2361_v3 = vpop.f32.mrb[148].mxu1 }
 0x42b   : > { %v2363_v35 = vpop.f32.mrb[149].mxu1 }
 0x42c   : > { %v2365_v31 = vpop.f32.mrb[150].mxu1 }
 0x42d   : > { %v12945_v29 = vpack.c.bf16 %v2365_v31, %v2361_v3  ;;  %v2367_v61 = vpop.f32.mrb[151].mxu1 }
 0x42e   : > { %v12947_v15 = vpack.c.bf16 %v2367_v61, %v2363_v35 }
 0x42f   : > { %16419 = vst [vmem:[#allocation69_spill] sm:$0xff] %v12945_v29 }
 0x430   : > { %16420 = vst [vmem:[#allocation70_spill] sm:$0xff] %v12947_v15 }
 0x432   : > { %v2371_v16 = vpop.f32.mrb[152].mxu1 }
 0x433   : > { %v2373_v52 = vpop.f32.mrb[153].mxu1 }
 0x434   : > { %v2375_v42 = vpop.f32.mrb[154].mxu1 }
 0x435   : > { %v12949_v53 = vpack.c.bf16 %v2375_v42, %v2371_v16  ;;  %v2377_v57 = vpop.f32.mrb[155].mxu1 }
 0x436   : > { %v12951_v38 = vpack.c.bf16 %v2377_v57, %v2373_v52 }
 0x437   : > { %16421 = vst [vmem:[#allocation71_spill] sm:$0xff] %v12949_v53 }
 0x438   : > { %16422 = vst [vmem:[#allocation72_spill] sm:$0xff] %v12951_v38 }
 0x43a   : > { %v2381_v46 = vpop.f32.mrb[156].mxu1 }
 0x43b   : > { %v2383_v28 = vpop.f32.mrb[157].mxu1 }
 0x43c   : > { %v2385_v0 = vpop.f32.mrb[158].mxu1 }
 0x43d   : > { %v12953_v25 = vpack.c.bf16 %v2385_v0, %v2381_v46  ;;  %v2387_v1 = vpop.f32.mrb[159].mxu1  ;;  %v16429_v46 = vlaneseq }
 0x43e   : > { %v12955_v62 = vpack.c.bf16 %v2387_v1, %v2383_v28  ;;  %v16430_v1 = vld [vmem:[#allocation38_spill] sm:$0xff] }
 0x43f   : > { %16423 = vst [vmem:[#allocation73_spill] sm:$0xff] %v12953_v25  ;;  %v12966_v0 = vand.u32 127, %v16429_v46  ;;  %v2604_v28 = vadd.s32 8, %v16430_v1  ;;  %v2609_v27 = vadd.s32 48, %v16430_v1  ;;  %v2610_v13 = vadd.s32 56, %v16430_v1 }
 0x440   : > { %16424 = vst [vmem:[#allocation74_spill] sm:$0xff] %v12955_v62  ;;  %v2616_v14 = vadd.s32 104, %v16430_v1  ;;  %v2617_v33 = vadd.s32 112, %v16430_v1 }
 0x441   : > { %vm2621_vm0 = vcmp.ge.s32.totalorder %v16430_v1, %v12966_v0  ;;  %vm2622_vm1 = vcmp.ge.s32.totalorder %v2604_v28, %v12966_v0  ;;  %v2608_v28 = vadd.s32 40, %v16430_v1  ;;  %vm2627_vm6 = vcmp.ge.s32.totalorder %v2609_v27, %v12966_v0 }
 0x442   : > { %v2391_v3 = vpop.f32.mrb[160].mxu1  ;;  %vm2628_vm7 = vcmp.ge.s32.totalorder %v2610_v13, %v12966_v0  ;;  %vm2634_vm13 = vcmp.ge.s32.totalorder %v2616_v14, %v12966_v0  ;;  %vm2635_vm14 = vcmp.ge.s32.totalorder %v2617_v33, %v12966_v0 }
 0x443   : > { %v2393_v31 = vpop.f32.mrb[161].mxu1  ;;  %vm2626_vm5 = vcmp.ge.s32.totalorder %v2608_v28, %v12966_v0 }
 0x444   : > { %v2395_v61 = vpop.f32.mrb[162].mxu1 }
 0x445   : > { %v12957_v35 = vpack.c.bf16 %v2395_v61, %v2391_v3  ;;  %v2397_v18 = vpop.f32.mrb[163].mxu1  ;;  %v2605_v3 = vadd.s32 16, %v16430_v1 }
 0x446   : > { %v12959_v36 = vpack.c.bf16 %v2397_v18, %v2393_v31  ;;  %v2606_v18 = vadd.s32 24, %v16430_v1  ;;  %v11460_v31 = vmov -1e+30  }
 0x447   : > { %16425 = vst [vmem:[#allocation75_spill] sm:$0xff] %v12957_v35  ;;  %v12975_v61 = vsel %vm2621_vm0, 0.0, %v11460_v31  ;;  %vm2623_vm2 = vcmp.ge.s32.totalorder %v2605_v3, %v12966_v0  ;;  %v13086_v15 = vsel %vm2634_vm13, 0.0, %v11460_v31 }
 0x448   : > { %16426 = vst [vmem:[#allocation76_spill] sm:$0xff] %v12959_v36  ;;  %16431 = vst [vmem:[#allocation79_spill] sm:$0xff] %v12975_v61  ;;  %vm2624_vm3 = vcmp.ge.s32.totalorder %v2606_v18, %v12966_v0  ;;  %v12988_v25 = vsel %vm2623_vm2, 0.0, %v11460_v31  ;;  %v2613_v36 = vadd.s32 80, %v16430_v1 }
 0x449   : > { %16433 = vst [vmem:[#allocation81_spill] sm:$0xff] %v12988_v25  ;;  %16444 = vst [vmem:[#allocation92_spill] sm:$0xff] %v13086_v15 }
 0x44a   : > { %v2401_v16 = vpop.f32.mrb[164].mxu1  ;;  %vm2631_vm10 = vcmp.ge.s32.totalorder %v2613_v36, %v12966_v0 }
 0x44b   : > { %v2403_v42 = vpop.f32.mrb[165].mxu1 }
 0x44c   : > { %v2405_v57 = vpop.f32.mrb[166].mxu1 }
 0x44d   : > { %v12961_v52 = vpack.c.bf16 %v2405_v57, %v2401_v16  ;;  %v2407_v53 = vpop.f32.mrb[167].mxu1  ;;  %v2607_v16 = vadd.s32 32, %v16430_v1  ;;  %v12980_v57 = vsel %vm2622_vm1, 0.0, %v11460_v31 }
 0x44e   : > { %v12963_v29 = vpack.c.bf16 %v2407_v53, %v2403_v42  ;;  %16432 = vst [vmem:[#allocation80_spill] sm:$0xff] %v12980_v57 }
 0x44f   : > { %16427 = vst [vmem:[#allocation77_spill] sm:$0xff] %v12961_v52  ;;  %vm2625_vm4 = vcmp.ge.s32.totalorder %v2607_v16, %v12966_v0 }
 0x450   : > { %16428 = vst [vmem:[#allocation78_spill] sm:$0xff] %v12963_v29  ;;  %v13006_v55 = vsel %vm2625_vm4, 0.0, %v11460_v31  ;;  %v2612_v29 = vadd.s32 72, %v16430_v1 }
 0x451   : > { %16435 = vst [vmem:[#allocation83_spill] sm:$0xff] %v13006_v55 }
 0x452   : > { %vm2630_vm9 = vcmp.ge.s32.totalorder %v2612_v29, %v12966_v0 }
 0x49a   : > { %v9716_v53 = vpop.f32.mrb[168].mxu1 }
 0x49b   : > { %v2711_v42 = vpop.f32.mrb[169].mxu1  ;;  %v13001_v18 = vadd.f32 %v9716_v53, %v12988_v25  ;;  %v13015_v53 = vsel %vm2626_vm5, 0.0, %v11460_v31 }
 0x49c   : > { %v9717_v46 = vpop.f32.mrb[170].mxu1  ;;  %v12983_v52 = vadd.f32 %v2711_v42, %v12975_v61  ;;  %v12997_v42 = vsel %vm2624_vm3, 0.0, %v11460_v31  ;;  %16436 = vst [vmem:[#allocation84_spill] sm:$0xff] %v13015_v53 }
 0x49d   : > { %v2714_v35 = vpop.f32.mrb[171].mxu1  ;;  %16434 = vst [vmem:[#allocation82_spill] sm:$0xff] %v12997_v42  ;;  %v13010_v16 = vadd.f32 %v9717_v46, %v12997_v42  ;;  %v13024_v42 = vsel %vm2627_vm6, 0.0, %v11460_v31 }
 0x49e   : > { %2774 = vmax.xlane.f32.xlu0 %v12983_v52  ;;  %v12992_v3 = vadd.f32 %v2714_v35, %v12980_v57  ;;  %v2611_v57 = vadd.s32 64, %v16430_v1  ;;  %16437 = vst [vmem:[#allocation85_spill] sm:$0xff] %v13024_v42 }
 0x4a0   : > { %2776 = vmax.xlane.f32.xlu1 %v12992_v3  ;;  %vm2629_vm8 = vcmp.ge.s32.totalorder %v2611_v57, %v12966_v0 }
 0x4a1   : > { %v13042_v62 = vsel %vm2629_vm8, 0.0, %v11460_v31 }
 0x4a2   : > { %v9720_v35 = vpop.f32.mrb[172].mxu1  ;;  %2778 = vmax.xlane.f32.xlu0 %v13001_v18  ;;  %16439 = vst [vmem:[#allocation87_spill] sm:$0xff] %v13042_v62 }
 0x4a3   : > { %v2727_v61 = vpop.f32.mrb[173].mxu1  ;;  %v13037_v13 = vadd.f32 %v9720_v35, %v13024_v42  ;;  %v13051_v35 = vsel %vm2630_vm9, 0.0, %v11460_v31 }
 0x4a4   : > { %v9721_v28 = vpop.f32.mrb[174].mxu1  ;;  %2780 = vmax.xlane.f32.xlu1 %v13010_v16  ;;  %v13019_v25 = vadd.f32 %v2727_v61, %v13006_v55  ;;  %v13033_v61 = vsel %vm2628_vm7, 0.0, %v11460_v31  ;;  %v2614_v55 = vadd.s32 88, %v16430_v1  ;;  %16440 = vst [vmem:[#allocation88_spill] sm:$0xff] %v13051_v35 }
 0x4a5   : > { %v2730_v46 = vpop.f32.mrb[175].mxu1  ;;  %16438 = vst [vmem:[#allocation86_spill] sm:$0xff] %v13033_v61  ;;  %v13046_v57 = vadd.f32 %v9721_v28, %v13033_v61  ;;  %v13060_v61 = vsel %vm2631_vm10, 0.0, %v11460_v31 }
 0x4a6   : > { %2782 = vmax.xlane.f32.xlu0 %v13019_v25  ;;  %v13028_v27 = vadd.f32 %v2730_v46, %v13015_v53  ;;  %v2615_v53 = vadd.s32 96, %v16430_v1  ;;  %vm2632_vm11 = vcmp.ge.s32.totalorder %v2614_v55, %v12966_v0  ;;  %16441 = vst [vmem:[#allocation89_spill] sm:$0xff] %v13060_v61 }
 0x4a8   : > { %2784 = vmax.xlane.f32.xlu1 %v13028_v27  ;;  %vm2633_vm12 = vcmp.ge.s32.totalorder %v2615_v53, %v12966_v0 }
 0x4a9   : > { %v13078_v38 = vsel %vm2633_vm12, 0.0, %v11460_v31 }
 0x4aa   : > { %v9724_v46 = vpop.f32.mrb[176].mxu1  ;;  %2786 = vmax.xlane.f32.xlu0 %v13037_v13  ;;  %16443 = vst [vmem:[#allocation91_spill] sm:$0xff] %v13078_v38 }
 0x4ab   : > { %v2743_v23 = vpop.f32.mrb[177].mxu1  ;;  %v13073_v55 = vadd.f32 %v9724_v46, %v13060_v61  ;;  %v13094_v61 = vsel %vm2635_vm14, 0.0, %v11460_v31 }
 0x4ac   : > { %v9725_v29 = vpop.f32.mrb[178].mxu1  ;;  %2788 = vmax.xlane.f32.xlu1 %v13046_v57  ;;  %v13055_v42 = vadd.f32 %v2743_v23, %v13042_v62  ;;  %v13069_v23 = vsel %vm2632_vm11, 0.0, %v11460_v31  ;;  %v2618_v62 = vadd.s32 120, %v16430_v1  ;;  %16445 = vst [vmem:[#allocation93_spill] sm:$0xff] %v13094_v61 }
 0x4ad   : > { %v2746_v28 = vpop.f32.mrb[179].mxu1  ;;  %16442 = vst [vmem:[#allocation90_spill] sm:$0xff] %v13069_v23  ;;  %v13082_v53 = vadd.f32 %v9725_v29, %v13069_v23 }
 0x4ae   : > { %2790 = vmax.xlane.f32.xlu0 %v13055_v42  ;;  %v13064_v36 = vadd.f32 %v2746_v28, %v13051_v35  ;;  %vm2636_vm15 = vcmp.ge.s32.totalorder %v2618_v62, %v12966_v0 }
 0x4af   : > { %v13101_v29 = vsel %vm2636_vm15, 0.0, %v11460_v31 }
 0x4b0   : > { %2792 = vmax.xlane.f32.xlu1 %v13064_v36  ;;  %16446 = vst [vmem:[#allocation94_spill] sm:$0xff] %v13101_v29 }
 0x4b2   : > { %v9728_v28 = vpop.f32.mrb[180].mxu1  ;;  %2794 = vmax.xlane.f32.xlu0 %v13073_v55 }
 0x4b3   : > { %v2759_v35 = vpop.f32.mrb[181].mxu1  ;;  %v13105_v23 = vadd.f32 %v9728_v28, %v13094_v61 }
 0x4b4   : > { %v9729_v46 = vpop.f32.mrb[182].mxu1  ;;  %2796 = vmax.xlane.f32.xlu1 %v13082_v53  ;;  %v13090_v14 = vadd.f32 %v2759_v35, %v13078_v38 }
 0x4b5   : > { %v2762_v1 = vpop.f32.mrb[183].mxu1  ;;  %v13109_v62 = vadd.f32 %v9729_v46, %v13101_v29 }
 0x4b6   : > { %2798 = vmax.xlane.f32.xlu0 %v13090_v14  ;;  %v13098_v33 = vadd.f32 %v2762_v1, %v13086_v15 }
 0x4b8   : > { %2800 = vmax.xlane.f32.xlu1 %v13098_v33 }
 0x4ba   : > { %2802 = vmax.xlane.f32.xlu0 %v13105_v23 }
 0x4bc   : > { %2804 = vmax.xlane.f32.xlu1 %v13109_v62 }
 0x52b   : > { %v2775_v0 = vpop.xlane.xlu0 %2774 }
 0x52c   : > { %v2806_v35 = vsub.f32 %v12983_v52, %v2775_v0 }
 0x52d   : > { %v2777_v1 = vpop.xlane.xlu1 %2776 }
 0x52e   : > { %v2822_v15 = vmul.f32 1.442695, %v2806_v35  ;;  %v2807_v31 = vsub.f32 %v12992_v3, %v2777_v1 }
 0x52f   : > { %v2779_v38 = vpop.xlane.xlu0 %2778 }
 0x530   : > { %10788 = vpow2.f32 %v2822_v15  ;;  %v2824_v20 = vmul.f32 1.442695, %v2807_v31  ;;  %v2808_v28 = vsub.f32 %v13001_v18, %v2779_v38 }
 0x531   : > { %v2781_v61 = vpop.xlane.xlu1 %2780 }
 0x532   : > { %10790 = vpow2.f32 %v2824_v20  ;;  %v2826_v24 = vmul.f32 1.442695, %v2808_v28  ;;  %v2809_v46 = vsub.f32 %v13010_v16, %v2781_v61 }
 0x533   : > { %v2783_v29 = vpop.xlane.xlu0 %2782 }
 0x534   : > { %10792 = vpow2.f32 %v2826_v24  ;;  %v2828_v30 = vmul.f32 1.442695, %v2809_v46  ;;  %v2810_v60 = vsub.f32 %v13019_v25, %v2783_v29 }
 0x535   : > { %v2785_v52 = vpop.xlane.xlu1 %2784 }
 0x536   : > { %10794 = vpow2.f32 %v2828_v30  ;;  %v2830_v0 = vmul.f32 1.442695, %v2810_v60  ;;  %v2811_v3 = vsub.f32 %v13028_v27, %v2785_v52 }
 0x537   : > { %v2787_v35 = vpop.xlane.xlu0 %2786 }
 0x538   : > { %10796 = vpow2.f32 %v2830_v0  ;;  %v2832_v15 = vmul.f32 1.442695, %v2811_v3  ;;  %v2812_v38 = vsub.f32 %v13037_v13, %v2787_v35 }
 0x539   : > { %v2789_v18 = vpop.xlane.xlu1 %2788 }
 0x53a   : > { %v13119_v20 = vpop.eup %10788  ;;  %10798 = vpow2.f32 %v2832_v15  ;;  %v2834_v16 = vmul.f32 1.442695, %v2812_v38  ;;  %v2813_v24 = vsub.f32 %v13046_v57, %v2789_v18 }
 0x53b   : > { %2854 = vadd.xlane.f32.xlu0 %v13119_v20  ;;  %v2791_v25 = vpop.xlane.xlu0 %2790 }
 0x53c   : > { %v13123_v61 = vpop.eup %10790  ;;  %10800 = vpow2.f32 %v2834_v16  ;;  %v2836_v30 = vmul.f32 1.442695, %v2813_v24  ;;  %v2814_v60 = vsub.f32 %v13055_v42, %v2791_v25 }
 0x53d   : > { %2856 = vadd.xlane.f32.xlu1 %v13123_v61  ;;  %v2793_v27 = vpop.xlane.xlu1 %2792 }
 0x53e   : > { %v13127_v13 = vpop.eup %10792  ;;  %10802 = vpow2.f32 %v2836_v30  ;;  %v2838_v29 = vmul.f32 1.442695, %v2814_v60  ;;  %v2815_v1 = vsub.f32 %v13064_v36, %v2793_v27 }
 0x53f   : > { %2858 = vadd.xlane.f32.xlu0 %v13127_v13  ;;  %v2795_v57 = vpop.xlane.xlu0 %2794 }
 0x540   : > { %v13131_v31 = vpop.eup %10794  ;;  %10804 = vpow2.f32 %v2838_v29  ;;  %v2840_v28 = vmul.f32 1.442695, %v2815_v1  ;;  %v2816_v46 = vsub.f32 %v13073_v55, %v2795_v57 }
 0x541   : > { %2860 = vadd.xlane.f32.xlu1 %v13131_v31  ;;  %v2797_v42 = vpop.xlane.xlu1 %2796 }
 0x542   : > { %v13135_v52 = vpop.eup %10796  ;;  %10806 = vpow2.f32 %v2840_v28  ;;  %v2842_v0 = vmul.f32 1.442695, %v2816_v46  ;;  %v2817_v3 = vsub.f32 %v13082_v53, %v2797_v42 }
 0x543   : > { %2862 = vadd.xlane.f32.xlu0 %v13135_v52  ;;  %v2799_v36 = vpop.xlane.xlu0 %2798 }
 0x544   : > { %v13139_v35 = vpop.eup %10798  ;;  %10808 = vpow2.f32 %v2842_v0  ;;  %v2844_v15 = vmul.f32 1.442695, %v2817_v3  ;;  %v2818_v38 = vsub.f32 %v13090_v14, %v2799_v36 }
 0x545   : > { %2864 = vadd.xlane.f32.xlu1 %v13139_v35  ;;  %v2801_v55 = vpop.xlane.xlu1 %2800 }
 0x546   : > { %v13143_v18 = vpop.eup %10800  ;;  %10810 = vpow2.f32 %v2844_v15  ;;  %v2846_v16 = vmul.f32 1.442695, %v2818_v38  ;;  %v2819_v24 = vsub.f32 %v13098_v33, %v2801_v55 }
 0x547   : > { %2866 = vadd.xlane.f32.xlu0 %v13143_v18  ;;  %v2803_v53 = vpop.xlane.xlu0 %2802 }
 0x548   : > { %v13147_v25 = vpop.eup %10802  ;;  %10812 = vpow2.f32 %v2846_v16  ;;  %v2848_v30 = vmul.f32 1.442695, %v2819_v24  ;;  %v2820_v60 = vsub.f32 %v13105_v23, %v2803_v53 }
 0x549   : > { %2868 = vadd.xlane.f32.xlu1 %v13147_v25  ;;  %v2805_v14 = vpop.xlane.xlu1 %2804 }
 0x54a   : > { %v13151_v27 = vpop.eup %10804  ;;  %10814 = vpow2.f32 %v2848_v30  ;;  %v2850_v29 = vmul.f32 1.442695, %v2820_v60  ;;  %v2821_v1 = vsub.f32 %v13109_v62, %v2805_v14 }
 0x54b   : > { %2870 = vadd.xlane.f32.xlu0 %v13151_v27 }
 0x54c   : > { %v13155_v33 = vpop.eup %10806  ;;  %10816 = vpow2.f32 %v2850_v29  ;;  %v2852_v57 = vmul.f32 1.442695, %v2821_v1 }
 0x54d   : > { %2872 = vadd.xlane.f32.xlu1 %v13155_v33 }
 0x54e   : > { %v13158_v28 = vpop.eup %10808  ;;  %10818 = vpow2.f32 %v2852_v57 }
 0x54f   : > { %2874 = vadd.xlane.f32.xlu0 %v13158_v28 }
 0x550   : > { %v13161_v23 = vpop.eup %10810 }
 0x551   : > { %2876 = vadd.xlane.f32.xlu1 %v13161_v23 }
 0x552   : > { %v13164_v46 = vpop.eup %10812 }
 0x553   : > { %2878 = vadd.xlane.f32.xlu0 %v13164_v46 }
 0x554   : > { %v13167_v62 = vpop.eup %10814 }
 0x555   : > { %2880 = vadd.xlane.f32.xlu1 %v13167_v62 }
 0x556   : > { %v13170_v42 = vpop.eup %10816 }
 0x557   : > { %2882 = vadd.xlane.f32.xlu0 %v13170_v42 }
 0x558   : > { %v13173_v0 = vpop.eup %10818 }
 0x559   : > { %2884 = vadd.xlane.f32.xlu1 %v13173_v0 }
 0x5c8   : > { %v2855_v3 = vpop.xlane.xlu0 %2854 }
 0x5c9   : > { %10820 = vrcp.f32 %v2855_v3 }
 0x5ca   : > { %v2857_v36 = vpop.xlane.xlu1 %2856 }
 0x5cb   : > { %10822 = vrcp.f32 %v2857_v36 }
 0x5cc   : > { %v2859_v15 = vpop.xlane.xlu0 %2858 }
 0x5cd   : > { %10824 = vrcp.f32 %v2859_v15 }
 0x5ce   : > { %v2861_v38 = vpop.xlane.xlu1 %2860 }
 0x5cf   : > { %10826 = vrcp.f32 %v2861_v38 }
 0x5d0   : > { %v2863_v55 = vpop.xlane.xlu0 %2862 }
 0x5d1   : > { %10828 = vrcp.f32 %v2863_v55 }
 0x5d2   : > { %v2865_v16 = vpop.xlane.xlu1 %2864 }
 0x5d3   : > { %v10821_v24 = vpop.eup %10820  ;;  %10830 = vrcp.f32 %v2865_v16 }
 0x5d4   : > { %v2867_v53 = vpop.xlane.xlu0 %2866  ;;  %v2902_v14 = vmul.f32 %v10821_v24, %v13119_v20 }
 0x5d5   : > { %v10823_v30 = vpop.eup %10822  ;;  %10832 = vrcp.f32 %v2867_v53 }
 0x5d6   : > { %v2869_v60 = vpop.xlane.xlu1 %2868  ;;  %v2903_v29 = vmul.f32 %v10823_v30, %v13123_v61 }
 0x5d7   : > { %v10825_v1 = vpop.eup %10824  ;;  %10834 = vrcp.f32 %v2869_v60 }
 0x5d8   : > { %v2871_v57 = vpop.xlane.xlu0 %2870  ;;  %v2918_v3 = vpack.c.bf16 %v2903_v29, %v2902_v14  ;;  %v2904_v15 = vmul.f32 %v10825_v1, %v13127_v13 }
 0x5d9   : > { %v10827_v36 = vpop.eup %10826  ;;  %10836 = vrcp.f32 %v2871_v57 }
 0x5da   : > { %v2905_v38 = vmul.f32 %v10827_v36, %v13131_v31  ;;  %v2873_v55 = vpop.xlane.xlu1 %2872  ;;  %9746 = vmatprep.mubr.bf16.mxu1 %v2918_v3 }
 0x5db   : > { %v10829_v16 = vpop.eup %10828  ;;  %10838 = vrcp.f32 %v2873_v55 }
 0x5dc   : > { %v2875_v53 = vpop.xlane.xlu0 %2874  ;;  %v2919_v39 = vpack.c.bf16 %v2905_v38, %v2904_v15  ;;  %v2906_v61 = vmul.f32 %v10829_v16, %v13135_v52 }
 0x5dd   : > { %v10831_v10 = vpop.eup %10830  ;;  %10840 = vrcp.f32 %v2875_v53 }
 0x5de   : > { %v2877_v20 = vpop.xlane.xlu1 %2876  ;;  %9747 = vmatmul.mubr.bf16.vlgmr.msra.gmra.mrb[184].mxu1 %v2919_v39  ;;  %v2907_v24 = vmul.f32 %v10831_v10, %v13139_v35 }
 0x5df   : > { %v10833_v30 = vpop.eup %10832  ;;  %10842 = vrcp.f32 %v2877_v20  ;;  %9763 = vmatpush3.bf16.xpose.msra.mxu1 %v12850_v49 }
 0x5e0   : > { %9764 = vmatprep.subr.bf16.mxu1 %v12852_v34  ;;  %v2879_v13 = vpop.xlane.xlu0 %2878  ;;  %v2920_v31 = vpack.c.bf16 %v2907_v24, %v2906_v61  ;;  %v2908_v29 = vmul.f32 %v10833_v30, %v13143_v18  ;;  %v16481_v30 = vld [vmem:[#allocation74_spill] sm:$0xff] }
 0x5e1   : > { %v10835_v60 = vpop.eup %10834  ;;  %10844 = vrcp.f32 %v2879_v13  ;;  %v16482_v13 = vld [vmem:[#allocation76_spill] sm:$0xff] }
 0x5e2   : > { %v2881_v14 = vpop.xlane.xlu1 %2880  ;;  %9750 = vmatprep.mubr.bf16.mxu1 %v2920_v31  ;;  %v2909_v39 = vmul.f32 %v10835_v60, %v13147_v25  ;;  %v16483_v31 = vld [vmem:[#allocation54_spill] sm:$0xff]  ;;  %v16484_v60 = vld [vmem:[#allocation52_spill] sm:$0xff] }
 0x5e3   : > { %v10837_v1 = vpop.eup %10836  ;;  %10846 = vrcp.f32 %v2881_v14  ;;  %v16485_v14 = vpack.c.bf16 %v16483_v31, %v16484_v60 }
 0x5e4   : > { %v2883_v52 = vpop.xlane.xlu0 %2882  ;;  %v2921_v10 = vpack.c.bf16 %v2909_v39, %v2908_v29  ;;  %v2910_v49 = vmul.f32 %v10837_v1, %v13151_v27  ;;  %v16486_v29 = vld [vmem:[#allocation78_spill] sm:$0xff] }
 0x5e5   : > { %v10839_v35 = vpop.eup %10838  ;;  %10848 = vrcp.f32 %v2883_v52 }
 0x5e6   : > { %v2885_v57 = vpop.xlane.xlu1 %2884  ;;  %9751 = vmatmul.mubr.bf16.gmra.mrb[188].mxu1 %v2921_v10  ;;  %v2911_v3 = vmul.f32 %v10839_v35, %v13155_v33 }
 0x5e7   : > { %v10841_v36 = vpop.eup %10840  ;;  %10850 = vrcp.f32 %v2885_v57  ;;  %9765 = vmatpush3.bf16.xpose.msra.mxu1 %v12852_v34 }
 0x5e8   : > { %9766 = vmatprep.subr.bf16.mxu1 %v12854_v8  ;;  %v2922_v18 = vpack.c.bf16 %v2911_v3, %v2910_v49  ;;  %v2912_v15 = vmul.f32 %v10841_v36, %v13158_v28 }
 0x5e9   : > { %v10843_v25 = vpop.eup %10842 }
 0x5ea   : > { %9754 = vmatprep.mubr.bf16.mxu1 %v2922_v18  ;;  %v2913_v38 = vmul.f32 %v10843_v25, %v13161_v23 }
 0x5eb   : > { %v10845_v55 = vpop.eup %10844 }
 0x5ec   : > { %v2923_v16 = vpack.c.bf16 %v2913_v38, %v2912_v15  ;;  %v2914_v27 = vmul.f32 %v10845_v55, %v13164_v46  ;;  %v16447_v46 = vpack.c.bf16 %v12606_v40, %v12600_v26  ;;  %v16448_v26 = vpack.c.bf16 %v12622_v5, %v12616_v48  ;;  %v16452_v48 = vld [vmem:[#allocation23_spill] sm:$0xff] }
 0x5ed   : > { %v10847_v53 = vpop.eup %10846  ;;  %v16449_v40 = vpack.c.bf16 %v12640_v51, %v12632_v17  ;;  %v16453_v5 = vpack.c.bf16 %v12688_v56, %v16452_v48  ;;  %v16454_v17 = vld [vmem:[#allocation25_spill] sm:$0xff]  ;;  %v16455_v51 = vld [vmem:[#allocation22_spill] sm:$0xff]  ;;  %v16463_v56 = vpack.c.bf16 %v12740_v45, %v12736_v58 }
 0x5ee   : > { %9755 = vmatmul.mubr.bf16.gmra.mrb[192].mxu1 %v2923_v16  ;;  %v2915_v33 = vmul.f32 %v10847_v53, %v13167_v62  ;;  %v16475_v58 = vld [vmem:[#allocation46_spill] sm:$0xff] }
 0x5ef   : > { %v10849_v20 = vpop.eup %10848  ;;  %9767 = vmatpush3.bf16.xpose.msra.mxu1 %v12854_v8  ;;  %v16450_v8 = vpack.c.bf16 %v12656_v19, %v12648_v4  ;;  %v16457_v4 = vld [vmem:[#allocation27_spill] sm:$0xff]  ;;  %v16458_v19 = vld [vmem:[#allocation24_spill] sm:$0xff]  ;;  %v16478_v62 = vld [vmem:[#allocation50_spill] sm:$0xff] }
 0x5f0   : > { %9768 = vmatprep.subr.bf16.mxu1 %v12856_v6  ;;  %v2924_v34 = vpack.c.bf16 %v2915_v33, %v2914_v27  ;;  %v2916_v28 = vmul.f32 %v10849_v20, %v13170_v42  ;;  %v16479_v42 = vld [vmem:[#allocation48_spill] sm:$0xff] }
 0x5f1   : > { %v10851_v61 = vpop.eup %10850 }
 0x5f2   : > { %9758 = vmatprep.mubr.bf16.mxu1 %v2924_v34  ;;  %v2917_v23 = vmul.f32 %v10851_v61, %v13173_v0  ;;  %v16480_v0 = vpack.c.bf16 %v16478_v62, %v16479_v42  ;;  %v16513_v42 = vld [vmem:[#allocation89_spill] sm:$0xff] }
 0x5f4   : > { %v2925_v24 = vpack.c.bf16 %v2917_v23, %v2916_v28 }
 0x5f6   : > { %9759 = vmatmul.mubr.bf16.gmra.mrb[196].mxu1 %v2925_v24 }
 0x5f7   : > { %9769 = vmatpush3.bf16.xpose.msra.mxu1 %v12856_v6  ;;  %9778 = vmatprep.mubr.bf16.mxu1 %v16447_v46  ;;  %v16451_v6 = vpack.c.bf16 %v12672_v32, %v12664_v37  ;;  %v16459_v37 = vpack.c.bf16 %v16457_v4, %v16458_v19  ;;  %v16460_v32 = vld [vmem:[#allocation28_spill] sm:$0xff]  ;;  %v16506_v4 = vld [vmem:[#allocation82_spill] sm:$0xff] }
 0x5f8   : > { %9770 = vmatprep.subr.bf16.mxu1 %v12858_v44 }
 0x5ff   : > { %9771 = vmatpush3.bf16.xpose.msra.mxu1 %v12858_v44  ;;  %v16456_v44 = vpack.c.bf16 %v16454_v17, %v16455_v51  ;;  %v16505_v51 = vld [vmem:[#allocation81_spill] sm:$0xff] }
 0x600   : > { %9772 = vmatprep.subr.bf16.mxu1 %v12860_v9 }
 0x607   : > { %9773 = vmatpush3.bf16.xpose.msra.mxu1 %v12860_v9  ;;  %v16461_v9 = vld [vmem:[#allocation26_spill] sm:$0xff] }
 0x608   : > { %9774 = vmatprep.subr.bf16.mxu1 %v12862_v43 }
 0x60f   : > { %9775 = vmatpush3.bf16.xpose.msra.mxu1 %v12862_v43  ;;  %v16462_v43 = vpack.c.bf16 %v16460_v32, %v16461_v9  ;;  %v16507_v9 = vld [vmem:[#allocation83_spill] sm:$0xff] }
 0x610   : > { %9776 = vmatprep.subr.bf16.mxu1 %v12864_v54 }
 0x617   : > { %9777 = vmatpush3.bf16.xpose.msra.mxu1 %v12864_v54  ;;  %v16464_v54 = vpack.c.bf16 %v12754_v11, %v12750_v59  ;;  %v16473_v59 = vld [vmem:[#allocation70_spill] sm:$0xff]  ;;  %v16474_v11 = vld [vmem:[#allocation72_spill] sm:$0xff] }
 0x618   : > { %9826 = vmatprep.subr.bf16.mxu1 %v12867_v7 }
 0x61e   : > { %9779 = vmatmul.mubr.bf16.vlgmr.msra.gmra.mrb[200].mxu1 %v16448_v26 }
 0x61f   : > { %9782 = vmatprep.mubr.bf16.mxu1 %v16449_v40  ;;  %9827 = vmatpush3.bf16.xpose.msra.mxu1 %v12867_v7  ;;  %v16465_v7 = vld [vmem:[#allocation66_spill] sm:$0xff]  ;;  %v16503_v40 = vld [vmem:[#allocation79_spill] sm:$0xff] }
 0x620   : > { %9828 = vmatprep.subr.bf16.mxu1 %v12880_v50 }
 0x626   : > { %9783 = vmatmul.mubr.bf16.gmra.mrb[204].mxu1 %v16450_v8 }
 0x627   : > { %9786 = vmatprep.mubr.bf16.mxu1 %v16451_v6  ;;  %9829 = vmatpush3.bf16.xpose.msra.mxu1 %v12880_v50  ;;  %v16466_v50 = vld [vmem:[#allocation68_spill] sm:$0xff] }
 0x628   : > { %9830 = vmatprep.subr.bf16.mxu1 %v12894_v22 }
 0x62e   : > { %9787 = vmatmul.mubr.bf16.gmra.mrb[208].mxu1 %v16453_v5  ;;  %v16504_v5 = vld [vmem:[#allocation80_spill] sm:$0xff] }
 0x62f   : > { %9790 = vmatprep.mubr.bf16.mxu1 %v16456_v44  ;;  %9831 = vmatpush3.bf16.xpose.msra.mxu1 %v12894_v22  ;;  %v16467_v22 = vld [vmem:[#allocation36_spill] sm:$0xff] }
 0x630   : > { %9832 = vmatprep.subr.bf16.mxu1 %v12908_v63 }
 0x636   : > { %9791 = vmatmul.mubr.bf16.gmra.mrb[212].mxu1 %v16459_v37 }
 0x637   : > { %9833 = vmatpush3.bf16.xpose.msra.mxu1 %v12908_v63  ;;  %9842 = vmatprep.mubr.bf16.mxu1 %v16462_v43  ;;  %v16468_v63 = vld [vmem:[#allocation35_spill] sm:$0xff] }
 0x638   : > { %9834 = vmatprep.subr.bf16.mxu1 %v12915_v2 }
 0x63f   : > { %9835 = vmatpush3.bf16.xpose.msra.mxu1 %v12915_v2  ;;  %v16469_v2 = vpack.c.bf16 %v16467_v22, %v16468_v63  ;;  %v16509_v22 = vld [vmem:[#allocation85_spill] sm:$0xff] }
 0x640   : > { %9836 = vmatprep.subr.bf16.mxu1 %v12919_v21 }
 0x647   : > { %9837 = vmatpush3.bf16.xpose.msra.mxu1 %v12919_v21  ;;  %v16470_v21 = vld [vmem:[#allocation44_spill] sm:$0xff] }
 0x648   : > { %9838 = vmatprep.subr.bf16.mxu1 %v12923_v41 }
 0x64f   : > { %9839 = vmatpush3.bf16.xpose.msra.mxu1 %v12923_v41  ;;  %v16471_v41 = vld [vmem:[#allocation40_spill] sm:$0xff] }
 0x650   : > { %9840 = vmatprep.subr.bf16.mxu1 %v12927_v12  ;;  %v16472_v45 = vpack.c.bf16 %v16470_v21, %v16471_v41 }
 0x657   : > { %9841 = vmatpush3.bf16.xpose.msra.mxu1 %v12927_v12  ;;  %v16476_v12 = vld [vmem:[#allocation21_spill] sm:$0xff] }
 0x658   : > { %9922 = vmatprep.subr.bf16.mxu1 %v12934_v47 }
 0x65e   : > { %9843 = vmatmul.mubr.bf16.vlgmr.msra.gmra.mrb[216].mxu1 %v16463_v56 }
 0x65f   : > { %9846 = vmatprep.mubr.bf16.mxu1 %v16464_v54  ;;  %9923 = vmatpush3.bf16.msra.mxu1 %v12934_v47  ;;  %v16477_v47 = vpack.c.bf16 %v16475_v58, %v16476_v12 }
 0x660   : > { %9924 = vmatprep.subr.bf16.mxu1 %v16465_v7 }
 0x663   : > { %9925 = vmatpush3.bf16.msra.mxu1 %v16465_v7  ;;  %v16508_v7 = vld [vmem:[#allocation84_spill] sm:$0xff] }
 0x664   : > { %9926 = vmatprep.subr.bf16.mxu1 %v16466_v50 }
 0x666   : > { %9847 = vmatmul.mubr.bf16.gmra.mrb[220].mxu1 %v16469_v2  ;;  %v16510_v2 = vld [vmem:[#allocation86_spill] sm:$0xff] }
 0x667   : > { %9850 = vmatprep.mubr.bf16.mxu1 %v16472_v45  ;;  %9927 = vmatpush3.bf16.msra.mxu1 %v16466_v50 }
 0x668   : > { %9928 = vmatprep.subr.bf16.mxu1 %v16473_v59 }
 0x66b   : > { %9929 = vmatpush3.bf16.msra.mxu1 %v16473_v59  ;;  %v16511_v59 = vld [vmem:[#allocation87_spill] sm:$0xff] }
 0x66c   : > { %9930 = vmatprep.subr.bf16.mxu1 %v16474_v11 }
 0x66e   : > { %9851 = vmatmul.mubr.bf16.gmra.mrb[224].mxu1 %v16477_v47  ;;  %v16512_v47 = vld [vmem:[#allocation88_spill] sm:$0xff] }
 0x66f   : > { %9854 = vmatprep.mubr.bf16.mxu1 %v16480_v0  ;;  %9931 = vmatpush3.bf16.msra.mxu1 %v16474_v11 }
 0x670   : > { %9932 = vmatprep.subr.bf16.mxu1 %v16481_v30 }
 0x673   : > { %9933 = vmatpush3.bf16.msra.mxu1 %v16481_v30  ;;  %v16514_v30 = vld [vmem:[#allocation90_spill] sm:$0xff] }
 0x674   : > { %9934 = vmatprep.subr.bf16.mxu1 %v16482_v13 }
 0x676   : > { %9855 = vmatmul.mubr.bf16.gmra.mrb[228].mxu1 %v16485_v14  ;;  %v16515_v14 = vld [vmem:[#allocation91_spill] sm:$0xff] }
 0x677   : > { %9935 = vmatpush3.bf16.msra.mxu1 %v16482_v13 }
 0x678   : > { %9936 = vmatprep.subr.bf16.mxu1 %v16486_v29 }
 0x67b   : > { %9937 = vmatpush3.bf16.msra.mxu1 %v16486_v29 }
 0x6b1   : > { %v13287_v39 = vpop.f32.mrb[184].mxu1 }
 0x6b2   : > { %16487 = vst [vmem:[#allocation23_spill] sm:$0xff] %v13287_v39  ;;  %v13289_v1 = vpop.f32.mrb[185].mxu1 }
 0x6b3   : > { %16488 = vst [vmem:[#allocation25_spill] sm:$0xff] %v13289_v1  ;;  %v13291_v52 = vpop.f32.mrb[186].mxu1 }
 0x6b4   : > { %16489 = vst [vmem:[#allocation22_spill] sm:$0xff] %v13291_v52  ;;  %v13295_v35 = vpop.f32.mrb[187].mxu1 }
 0x6b5   : > { %16490 = vst [vmem:[#allocation27_spill] sm:$0xff] %v13295_v35 }
 0x6b9   : > { %v13299_v49 = vpop.f32.mrb[188].mxu1 }
 0x6ba   : > { %16491 = vst [vmem:[#allocation24_spill] sm:$0xff] %v13299_v49  ;;  %v13301_v3 = vpop.f32.mrb[189].mxu1 }
 0x6bb   : > { %16492 = vst [vmem:[#allocation28_spill] sm:$0xff] %v13301_v3  ;;  %v13303_v36 = vpop.f32.mrb[190].mxu1 }
 0x6bc   : > { %16493 = vst [vmem:[#allocation26_spill] sm:$0xff] %v13303_v36  ;;  %v13307_v25 = vpop.f32.mrb[191].mxu1 }
 0x6bd   : > { %16494 = vst [vmem:[#allocation66_spill] sm:$0xff] %v13307_v25 }
 0x6c1   : > { %v13311_v38 = vpop.f32.mrb[192].mxu1 }
 0x6c2   : > { %16495 = vst [vmem:[#allocation68_spill] sm:$0xff] %v13311_v38  ;;  %v13313_v55 = vpop.f32.mrb[193].mxu1 }
 0x6c3   : > { %16496 = vst [vmem:[#allocation36_spill] sm:$0xff] %v13313_v55  ;;  %v13315_v16 = vpop.f32.mrb[194].mxu1 }
 0x6c4   : > { %16497 = vst [vmem:[#allocation35_spill] sm:$0xff] %v13315_v16  ;;  %v13319_v27 = vpop.f32.mrb[195].mxu1 }
 0x6c5   : > { %16498 = vst [vmem:[#allocation44_spill] sm:$0xff] %v13319_v27 }
 0x6c9   : > { %v13323_v20 = vpop.f32.mrb[196].mxu1 }
 0x6ca   : > { %16499 = vst [vmem:[#allocation40_spill] sm:$0xff] %v13323_v20  ;;  %v13325_v34 = vpop.f32.mrb[197].mxu1 }
 0x6cb   : > { %16500 = vst [vmem:[#allocation70_spill] sm:$0xff] %v13325_v34  ;;  %v13327_v61 = vpop.f32.mrb[198].mxu1 }
 0x6cc   : > { %16501 = vst [vmem:[#allocation72_spill] sm:$0xff] %v13327_v61  ;;  %v13331_v23 = vpop.f32.mrb[199].mxu1 }
 0x6cd   : > { %16502 = vst [vmem:[#allocation46_spill] sm:$0xff] %v13331_v23 }
 0x6f1   : > { %v9780_v46 = vpop.f32.mrb[200].mxu1 }
 0x6f2   : > { %v3097_v26 = vpop.f32.mrb[201].mxu1  ;;  %v13343_v44 = vadd.f32 %v9780_v46, %v16505_v51 }
 0x6f3   : > { %v13336_v8 = vadd.f32 %v3097_v26, %v16503_v40  ;;  %v9781_v6 = vpop.f32.mrb[202].mxu1 }
 0x6f4   : > { %v3100_v48 = vpop.f32.mrb[203].mxu1  ;;  %v13347_v19 = vadd.f32 %v9781_v6, %v16506_v4  ;;  %v16516_v6 = vld [vmem:[#allocation92_spill] sm:$0xff] }
 0x6f5   : > { %v13339_v17 = vadd.f32 %v3100_v48, %v16504_v5  ;;  %3160 = vmax.xlane.f32.xlu0 %v13336_v8 }
 0x6f7   : > { %3162 = vmax.xlane.f32.xlu1 %v13339_v17 }
 0x6f9   : > { %v9784_v37 = vpop.f32.mrb[204].mxu1  ;;  %3164 = vmax.xlane.f32.xlu0 %v13343_v44 }
 0x6fa   : > { %v3113_v32 = vpop.f32.mrb[205].mxu1  ;;  %v13359_v63 = vadd.f32 %v9784_v37, %v16509_v22  ;;  %v16517_v37 = vld [vmem:[#allocation93_spill] sm:$0xff] }
 0x6fb   : > { %v13351_v43 = vadd.f32 %v3113_v32, %v16507_v9  ;;  %v9785_v56 = vpop.f32.mrb[206].mxu1  ;;  %3166 = vmax.xlane.f32.xlu1 %v13347_v19 }
 0x6fc   : > { %v3116_v54 = vpop.f32.mrb[207].mxu1  ;;  %v13363_v21 = vadd.f32 %v9785_v56, %v16510_v2  ;;  %v16518_v56 = vld [vmem:[#allocation94_spill] sm:$0xff] }
 0x6fd   : > { %v13355_v50 = vadd.f32 %v3116_v54, %v16508_v7  ;;  %3168 = vmax.xlane.f32.xlu0 %v13351_v43 }
 0x6ff   : > { %3170 = vmax.xlane.f32.xlu1 %v13355_v50 }
 0x701   : > { %v9788_v41 = vpop.f32.mrb[208].mxu1  ;;  %3172 = vmax.xlane.f32.xlu0 %v13359_v63 }
 0x702   : > { %v3129_v45 = vpop.f32.mrb[209].mxu1  ;;  %v13375_v0 = vadd.f32 %v9788_v41, %v16513_v42 }
 0x703   : > { %v13367_v11 = vadd.f32 %v3129_v45, %v16511_v59  ;;  %v9789_v58 = vpop.f32.mrb[210].mxu1  ;;  %3174 = vmax.xlane.f32.xlu1 %v13363_v21 }
 0x704   : > { %v3132_v12 = vpop.f32.mrb[211].mxu1  ;;  %v13379_v13 = vadd.f32 %v9789_v58, %v16514_v30 }
 0x705   : > { %v13371_v62 = vadd.f32 %v3132_v12, %v16512_v47  ;;  %3176 = vmax.xlane.f32.xlu0 %v13367_v11 }
 0x707   : > { %3178 = vmax.xlane.f32.xlu1 %v13371_v62 }
 0x709   : > { %v9792_v31 = vpop.f32.mrb[212].mxu1  ;;  %3180 = vmax.xlane.f32.xlu0 %v13375_v0 }
 0x70a   : > { %v3145_v60 = vpop.f32.mrb[213].mxu1  ;;  %v13391_v32 = vadd.f32 %v9792_v31, %v16517_v37 }
 0x70b   : > { %v13383_v29 = vadd.f32 %v3145_v60, %v16515_v14  ;;  %v9793_v46 = vpop.f32.mrb[214].mxu1  ;;  %3182 = vmax.xlane.f32.xlu1 %v13379_v13 }
 0x70c   : > { %v3148_v26 = vpop.f32.mrb[215].mxu1  ;;  %v13395_v54 = vadd.f32 %v9793_v46, %v16518_v56 }
 0x70d   : > { %v13387_v48 = vadd.f32 %v3148_v26, %v16516_v6  ;;  %3184 = vmax.xlane.f32.xlu0 %v13383_v29 }
 0x70f   : > { %3186 = vmax.xlane.f32.xlu1 %v13387_v48 }
 0x711   : > { %3188 = vmax.xlane.f32.xlu0 %v13391_v32 }
 0x713   : > { %3190 = vmax.xlane.f32.xlu1 %v13395_v54 }
 0x731   : > { %v9844_v41 = vpop.f32.mrb[216].mxu1 }
 0x732   : > { %v3483_v45 = vpop.f32.mrb[217].mxu1  ;;  %v13407_v31 = vadd.f32 %v9844_v41, %v16505_v51 }
 0x733   : > { %v13400_v58 = vadd.f32 %v3483_v45, %v16503_v40  ;;  %v9845_v12 = vpop.f32.mrb[218].mxu1 }
 0x734   : > { %v3486_v60 = vpop.f32.mrb[219].mxu1  ;;  %v13411_v46 = vadd.f32 %v9845_v12, %v16506_v4 }
 0x735   : > { %v13403_v26 = vadd.f32 %v3486_v60, %v16504_v5  ;;  %3546 = vmax.xlane.f32.xlu0 %v13400_v58 }
 0x737   : > { %3548 = vmax.xlane.f32.xlu1 %v13403_v26 }
 0x739   : > { %v9848_v28 = vpop.f32.mrb[220].mxu1  ;;  %3550 = vmax.xlane.f32.xlu0 %v13407_v31 }
 0x73a   : > { %v13415_v45 = vadd.f32 %v9848_v28, %v16509_v22  ;;  %v3499_v24 = vpop.f32.mrb[221].mxu1 }
 0x73b   : > { %v9849_v53 = vpop.f32.mrb[222].mxu1  ;;  %3552 = vmax.xlane.f32.xlu1 %v13411_v46  ;;  %v13423_v33 = vadd.f32 %v3499_v24, %v16507_v9 }
 0x73c   : > { %v13419_v60 = vadd.f32 %v9849_v53, %v16510_v2  ;;  %v3502_v41 = vpop.f32.mrb[223].mxu1 }
 0x73d   : > { %3558 = vmax.xlane.f32.xlu0 %v13415_v45  ;;  %v13427_v12 = vadd.f32 %v3502_v41, %v16508_v7 }
 0x73f   : > { %3560 = vmax.xlane.f32.xlu1 %v13419_v60 }
 0x741   : > { %v9852_v28 = vpop.f32.mrb[224].mxu1  ;;  %3554 = vmax.xlane.f32.xlu0 %v13423_v33 }
 0x742   : > { %v13431_v18 = vadd.f32 %v9852_v28, %v16513_v42  ;;  %v3515_v15 = vpop.f32.mrb[225].mxu1 }
 0x743   : > { %v9853_v53 = vpop.f32.mrb[226].mxu1  ;;  %3556 = vmax.xlane.f32.xlu1 %v13427_v12  ;;  %v13439_v57 = vadd.f32 %v3515_v15, %v16511_v59 }
 0x744   : > { %v13435_v10 = vadd.f32 %v9853_v53, %v16514_v30  ;;  %v3518_v24 = vpop.f32.mrb[227].mxu1 }
 0x745   : > { %3566 = vmax.xlane.f32.xlu0 %v13431_v18  ;;  %v13443_v41 = vadd.f32 %v3518_v24, %v16512_v47 }
 0x747   : > { %3568 = vmax.xlane.f32.xlu1 %v13435_v10 }
 0x749   : > { %v9856_v28 = vpop.f32.mrb[228].mxu1  ;;  %3562 = vmax.xlane.f32.xlu0 %v13439_v57 }
 0x74a   : > { %v3531_v20 = vpop.f32.mrb[229].mxu1 }
 0x74b   : > { %v9857_v61 = vpop.f32.mrb[230].mxu1  ;;  %3564 = vmax.xlane.f32.xlu1 %v13443_v41 }
 0x74c   : > { %v3534_v53 = vpop.f32.mrb[231].mxu1 }
 0x782   : > { %v3161_v34 = vpop.xlane.xlu0 %3160 }
 0x783   : > { %v3192_v16 = vsub.f32 %v13336_v8, %v3161_v34 }
 0x784   : > { %v3163_v23 = vpop.xlane.xlu1 %3162 }
 0x785   : > { %v3193_v27 = vsub.f32 %v13339_v17, %v3163_v23  ;;  %v3208_v3 = vmul.f32 1.442695, %v3192_v16 }
 0x786   : > { %v3165_v38 = vpop.xlane.xlu0 %3164 }
 0x787   : > { %v3194_v15 = vsub.f32 %v13343_v44, %v3165_v38  ;;  %v3210_v52 = vmul.f32 1.442695, %v3193_v27 }
 0x788   : > { %v3167_v55 = vpop.xlane.xlu1 %3166 }
 0x789   : > { %v3212_v24 = vmul.f32 1.442695, %v3194_v15  ;;  %v3195_v49 = vsub.f32 %v13347_v19, %v3167_v55 }
 0x78a   : > { %v3169_v36 = vpop.xlane.xlu0 %3168 }
 0x78b   : > { %10852 = vpow2.f32 %v3212_v24  ;;  %v3214_v25 = vmul.f32 1.442695, %v3195_v49  ;;  %v3196_v38 = vsub.f32 %v13351_v43, %v3169_v36  ;;  %v13468_v43 = vadd.f32 %v3531_v20, %v16515_v14 }
 0x78c   : > { %v3171_v39 = vpop.xlane.xlu1 %3170 }
 0x78d   : > { %10854 = vpow2.f32 %v3214_v25  ;;  %v3197_v23 = vsub.f32 %v13355_v50, %v3171_v39  ;;  %v3216_v49 = vmul.f32 1.442695, %v3196_v38 }
 0x78e   : > { %v3173_v1 = vpop.xlane.xlu0 %3172  ;;  %10856 = vpow2.f32 %v3208_v3 }
 0x78f   : > { %10858 = vpow2.f32 %v3210_v52  ;;  %v3198_v16 = vsub.f32 %v13359_v63, %v3173_v1  ;;  %v3218_v52 = vmul.f32 1.442695, %v3197_v23 }
 0x790   : > { %v3175_v35 = vpop.xlane.xlu1 %3174  ;;  %10860 = vpow2.f32 %v3216_v49 }
 0x791   : > { %v3199_v36 = vsub.f32 %v13363_v21, %v3175_v35  ;;  %v3220_v39 = vmul.f32 1.442695, %v3198_v16  ;;  %10862 = vpow2.f32 %v3218_v52  ;;  %v13473_v35 = vadd.f32 %v3534_v53, %v16516_v6 }
 0x792   : > { %v3177_v34 = vpop.xlane.xlu0 %3176  ;;  %v13483_v53 = vadd.f32 %v9857_v61, %v16518_v56 }
 0x793   : > { %v3200_v19 = vsub.f32 %v13367_v11, %v3177_v34  ;;  %v3222_v1 = vmul.f32 1.442695, %v3199_v36  ;;  %10864 = vpow2.f32 %v3220_v39  ;;  %v13478_v11 = vadd.f32 %v9856_v28, %v16517_v37 }
 0x794   : > { %v3179_v8 = vpop.xlane.xlu1 %3178 }
 0x795   : > { %v13452_v44 = vpop.eup %10852  ;;  %v3201_v50 = vsub.f32 %v13371_v62, %v3179_v8  ;;  %v3224_v21 = vmul.f32 1.442695, %v3200_v19  ;;  %10866 = vpow2.f32 %v3222_v1 }
 0x796   : > { %3244 = vadd.xlane.f32.xlu0 %v13452_v44  ;;  %v3181_v25 = vpop.xlane.xlu0 %3180 }
 0x797   : > { %v13456_v55 = vpop.eup %10854  ;;  %v3202_v15 = vsub.f32 %v13375_v0, %v3181_v25  ;;  %v3226_v24 = vmul.f32 1.442695, %v3201_v50  ;;  %10868 = vpow2.f32 %v3224_v21 }
 0x798   : > { %3246 = vadd.xlane.f32.xlu1 %v13456_v55  ;;  %v13460_v3 = vpop.eup %10856  ;;  %v3183_v27 = vpop.xlane.xlu1 %3182 }
 0x799   : > { %v13464_v17 = vpop.eup %10858  ;;  %v3203_v62 = vsub.f32 %v13379_v13, %v3183_v27  ;;  %v3228_v34 = vmul.f32 1.442695, %v3202_v15  ;;  %10870 = vpow2.f32 %v3226_v24 }
 0x79a   : > { %3240 = vadd.xlane.f32.xlu0 %v13460_v3  ;;  %v3185_v63 = vpop.xlane.xlu0 %3184  ;;  %v13488_v28 = vpop.eup %10860 }
 0x79b   : > { %v3204_v38 = vsub.f32 %v13383_v29, %v3185_v63  ;;  %v3230_v8 = vmul.f32 1.442695, %v3203_v62  ;;  %v13492_v61 = vpop.eup %10862  ;;  %10872 = vpow2.f32 %v3228_v34 }
 0x79c   : > { %3242 = vadd.xlane.f32.xlu1 %v13464_v17  ;;  %v3187_v20 = vpop.xlane.xlu1 %3186 }
 0x79d   : > { %v3205_v23 = vsub.f32 %v13387_v48, %v3187_v20  ;;  %v3232_v13 = vmul.f32 1.442695, %v3204_v38  ;;  %v13496_v29 = vpop.eup %10864  ;;  %10874 = vpow2.f32 %v3230_v8 }
 0x79e   : > { %3570 = vmax.xlane.f32.xlu0 %v13468_v43  ;;  %v3189_v0 = vpop.xlane.xlu0 %3188 }
 0x79f   : > { %v3206_v16 = vsub.f32 %v13391_v32, %v3189_v0  ;;  %v3234_v25 = vmul.f32 1.442695, %v3205_v23  ;;  %v13500_v48 = vpop.eup %10866  ;;  %10876 = vpow2.f32 %v3232_v13 }
 0x7a0   : > { %3572 = vmax.xlane.f32.xlu1 %v13473_v35  ;;  %v3191_v49 = vpop.xlane.xlu1 %3190 }
 0x7a1   : > { %v3207_v52 = vsub.f32 %v13395_v54, %v3191_v49  ;;  %v3236_v36 = vmul.f32 1.442695, %v3206_v16  ;;  %v13503_v27 = vpop.eup %10868  ;;  %10878 = vpow2.f32 %v3234_v25 }
 0x7a2   : > { %3574 = vmax.xlane.f32.xlu0 %v13478_v11 }
 0x7a3   : > { %v3238_v32 = vmul.f32 1.442695, %v3207_v52  ;;  %v13506_v39 = vpop.eup %10870  ;;  %10880 = vpow2.f32 %v3236_v36 }
 0x7a4   : > { %3576 = vmax.xlane.f32.xlu1 %v13483_v53 }
 0x7a5   : > { %v13509_v54 = vpop.eup %10872  ;;  %10882 = vpow2.f32 %v3238_v32 }
 0x7a6   : > { %3248 = vadd.xlane.f32.xlu0 %v13488_v28 }
 0x7a7   : > { %v13512_v19 = vpop.eup %10874 }
 0x7a8   : > { %3250 = vadd.xlane.f32.xlu1 %v13492_v61 }
 0x7a9   : > { %v13515_v1 = vpop.eup %10876 }
 0x7aa   : > { %3252 = vadd.xlane.f32.xlu0 %v13496_v29 }
 0x7ab   : > { %v13518_v50 = vpop.eup %10878 }
 0x7ac   : > { %3254 = vadd.xlane.f32.xlu1 %v13500_v48 }
 0x7ad   : > { %v13521_v63 = vpop.eup %10880 }
 0x7ae   : > { %3256 = vadd.xlane.f32.xlu0 %v13503_v27 }
 0x7af   : > { %v13524_v21 = vpop.eup %10882 }
 0x7b0   : > { %3258 = vadd.xlane.f32.xlu1 %v13506_v39 }
 0x7b2   : > { %3260 = vadd.xlane.f32.xlu0 %v13509_v54 }
 0x7b4   : > { %3262 = vadd.xlane.f32.xlu1 %v13512_v19 }
 0x7b6   : > { %3264 = vadd.xlane.f32.xlu0 %v13515_v1 }
 0x7b8   : > { %3266 = vadd.xlane.f32.xlu1 %v13518_v50 }
 0x7ba   : > { %3268 = vadd.xlane.f32.xlu0 %v13521_v63 }
 0x7bc   : > { %3270 = vadd.xlane.f32.xlu1 %v13524_v21 }
 0x7c2   : > { %v3547_v15 = vpop.xlane.xlu0 %3546 }
 0x7c3   : > { %v3578_v20 = vsub.f32 %v13400_v58, %v3547_v15 }
 0x7c4   : > { %v3549_v24 = vpop.xlane.xlu1 %3548 }
 0x7c5   : > { %v3594_v62 = vmul.f32 1.442695, %v3578_v20  ;;  %v3579_v34 = vsub.f32 %v13403_v26, %v3549_v24 }
 0x7c6   : > { %v3551_v38 = vpop.xlane.xlu0 %3550 }
 0x7c7   : > { %10884 = vpow2.f32 %v3594_v62  ;;  %v3596_v0 = vmul.f32 1.442695, %v3579_v34  ;;  %v3580_v8 = vsub.f32 %v13407_v31, %v3551_v38 }
 0x7c8   : > { %v3553_v23 = vpop.xlane.xlu1 %3552 }
 0x7c9   : > { %10886 = vpow2.f32 %v3596_v0  ;;  %v3598_v49 = vmul.f32 1.442695, %v3580_v8  ;;  %v3581_v13 = vsub.f32 %v13411_v46, %v3553_v23 }
 0x7ca   : > { %v3559_v16 = vpop.xlane.xlu0 %3558 }
 0x7cb   : > { %10888 = vpow2.f32 %v3598_v49  ;;  %v3600_v25 = vmul.f32 1.442695, %v3581_v13  ;;  %v3584_v36 = vsub.f32 %v13415_v45, %v3559_v16 }
 0x7cc   : > { %v3561_v52 = vpop.xlane.xlu1 %3560 }
 0x7cd   : > { %10890 = vpow2.f32 %v3600_v25  ;;  %v3585_v31 = vsub.f32 %v13419_v60, %v3561_v52  ;;  %v3606_v34 = vmul.f32 1.442695, %v3584_v36 }
 0x7ce   : > { %v3555_v58 = vpop.xlane.xlu0 %3554 }
 0x7cf   : > { %v3582_v26 = vsub.f32 %v13423_v33, %v3555_v58  ;;  %v3608_v0 = vmul.f32 1.442695, %v3585_v31 }
 0x7d0   : > { %v3557_v32 = vpop.xlane.xlu1 %3556 }
 0x7d1   : > { %v13533_v15 = vpop.eup %10884  ;;  %v3602_v20 = vmul.f32 1.442695, %v3582_v26  ;;  %v3583_v24 = vsub.f32 %v13427_v12, %v3557_v32 }
 0x7d2   : > { %3626 = vadd.xlane.f32.xlu0 %v13533_v15  ;;  %v3567_v46 = vpop.xlane.xlu0 %3566 }
 0x7d3   : > { %v13538_v62 = vpop.eup %10886  ;;  %10892 = vpow2.f32 %v3602_v20  ;;  %v3604_v38 = vmul.f32 1.442695, %v3583_v24  ;;  %v3588_v12 = vsub.f32 %v13431_v18, %v3567_v46 }
 0x7d4   : > { %3628 = vadd.xlane.f32.xlu1 %v13538_v62  ;;  %v3569_v45 = vpop.xlane.xlu1 %3568 }
 0x7d5   : > { %v13541_v33 = vpop.eup %10888  ;;  %10894 = vpow2.f32 %v3604_v38  ;;  %v3589_v13 = vsub.f32 %v13435_v10, %v3569_v45  ;;  %v3614_v52 = vmul.f32 1.442695, %v3588_v12 }
 0x7d6   : > { %3630 = vadd.xlane.f32.xlu0 %v13541_v33  ;;  %v3563_v60 = vpop.xlane.xlu0 %3562  ;;  %10896 = vpow2.f32 %v3606_v34 }
 0x7d7   : > { %v13544_v8 = vpop.eup %10890  ;;  %v3586_v23 = vsub.f32 %v13439_v57, %v3563_v60  ;;  %10898 = vpow2.f32 %v3608_v0  ;;  %v3616_v26 = vmul.f32 1.442695, %v3589_v13 }
 0x7d8   : > { %3632 = vadd.xlane.f32.xlu1 %v13544_v8  ;;  %v3565_v49 = vpop.xlane.xlu1 %3564 }
 0x7d9   : > { %v3610_v16 = vmul.f32 1.442695, %v3586_v23  ;;  %v3587_v25 = vsub.f32 %v13443_v41, %v3565_v49 }
 0x7db   : > { %10900 = vpow2.f32 %v3610_v16  ;;  %v3612_v58 = vmul.f32 1.442695, %v3587_v25 }
 0x7dd   : > { %v13551_v36 = vpop.eup %10892  ;;  %10902 = vpow2.f32 %v3612_v58 }
 0x7de   : > { %3634 = vadd.xlane.f32.xlu0 %v13551_v36  ;;  %10904 = vpow2.f32 %v3614_v52 }
 0x7df   : > { %v13554_v18 = vpop.eup %10894  ;;  %10906 = vpow2.f32 %v3616_v26 }
 0x7e0   : > { %3636 = vadd.xlane.f32.xlu1 %v13554_v18  ;;  %v13557_v57 = vpop.eup %10896 }
 0x7e1   : > { %v13560_v10 = vpop.eup %10898 }
 0x7e2   : > { %3638 = vadd.xlane.f32.xlu0 %v13557_v57 }
 0x7e4   : > { %3640 = vadd.xlane.f32.xlu1 %v13560_v10 }
 0x7e5   : > { %v13563_v41 = vpop.eup %10900 }
 0x7e6   : > { %3642 = vadd.xlane.f32.xlu0 %v13563_v41 }
 0x7e7   : > { %v13566_v32 = vpop.eup %10902 }
 0x7e8   : > { %3644 = vadd.xlane.f32.xlu1 %v13566_v32  ;;  %v13569_v31 = vpop.eup %10904 }
 0x7e9   : > { %v13572_v20 = vpop.eup %10906 }
 0x7ea   : > { %3646 = vadd.xlane.f32.xlu0 %v13569_v31 }
 0x7ec   : > { %3648 = vadd.xlane.f32.xlu1 %v13572_v20 }
 0x823   : > { %v3245_v24 = vpop.xlane.xlu0 %3244 }
 0x825   : > { %v3247_v46 = vpop.xlane.xlu1 %3246 }
 0x826   : > { %10908 = vrcp.f32 %v3247_v46 }
 0x827   : > { %v3241_v34 = vpop.xlane.xlu0 %3240 }
 0x828   : > { %10910 = vrcp.f32 %v3241_v34 }
 0x829   : > { %10912 = vrcp.f32 %v3245_v24  ;;  %v3243_v38 = vpop.xlane.xlu1 %3242 }
 0x82a   : > { %10914 = vrcp.f32 %v3243_v38 }
 0x82b   : > { %v3571_v45 = vpop.xlane.xlu0 %3570 }
 0x82c   : > { %v3590_v0 = vsub.f32 %v13468_v43, %v3571_v45 }
 0x82d   : > { %v3573_v60 = vpop.xlane.xlu1 %3572 }
 0x82e   : > { %v3618_v12 = vmul.f32 1.442695, %v3590_v0  ;;  %v3591_v23 = vsub.f32 %v13473_v35, %v3573_v60 }
 0x82f   : > { %v3575_v49 = vpop.xlane.xlu0 %3574 }
 0x830   : > { %10916 = vpow2.f32 %v3618_v12  ;;  %v3620_v13 = vmul.f32 1.442695, %v3591_v23  ;;  %v3592_v16 = vsub.f32 %v13478_v11, %v3575_v49  ;;  %v10909_v25 = vpop.eup %10908 }
 0x831   : > { %v3577_v52 = vpop.xlane.xlu1 %3576  ;;  %v3291_v43 = vmul.f32 %v10909_v25, %v13456_v55  ;;  %v16519_v55 = vld [vmem:[#allocation64_spill] sm:$0xff] }
 0x832   : > { %v10911_v58 = vpop.eup %10910  ;;  %10918 = vpow2.f32 %v3620_v13  ;;  %v3622_v26 = vmul.f32 1.442695, %v3592_v16  ;;  %v3593_v24 = vsub.f32 %v13483_v53, %v3577_v52 }
 0x833   : > { %v10913_v46 = vpop.eup %10912  ;;  %v3249_v34 = vpop.xlane.xlu0 %3248  ;;  %v3288_v0 = vmul.f32 %v10911_v58, %v13460_v3 }
 0x834   : > { %v10915_v38 = vpop.eup %10914  ;;  %10920 = vpow2.f32 %v3622_v26  ;;  %v3624_v45 = vmul.f32 1.442695, %v3593_v24  ;;  %v3290_v60 = vmul.f32 %v10913_v46, %v13452_v44  ;;  %v16520_v44 = vld [vmem:[#allocation65_spill] sm:$0xff]  ;;  %v16521_v24 = vld [vmem:[#allocation67_spill] sm:$0xff] }
 0x835   : > { %10922 = vrcp.f32 %v3249_v34  ;;  %v3251_v35 = vpop.xlane.xlu1 %3250  ;;  %v3289_v11 = vmul.f32 %v10915_v38, %v13464_v17 }
 0x836   : > { %10924 = vpow2.f32 %v3624_v45  ;;  %v3305_v53 = vpack.c.bf16 %v3291_v43, %v3290_v60 }
 0x837   : > { %10926 = vrcp.f32 %v3251_v35  ;;  %v3253_v12 = vpop.xlane.xlu0 %3252  ;;  %v3304_v23 = vpack.c.bf16 %v3289_v11, %v3288_v0  ;;  %v16522_v11 = vld [vmem:[#allocation69_spill] sm:$0xff] }
 0x838   : > { %10928 = vrcp.f32 %v3253_v12 }
 0x839   : > { %v3255_v49 = vpop.xlane.xlu1 %3254  ;;  %9810 = vmatprep.mubr.bf16.mxu0 %v3304_v23 }
 0x83a   : > { %v13583_v13 = vpop.eup %10916  ;;  %10930 = vrcp.f32 %v3255_v49  ;;  %9811 = vmatmul.mubr.bf16.vlgmr.msra.gmra.mrb[24].mxu0 %v3305_v53 }
 0x83b   : > { %9859 = vmatpush3.bf16.msra.mxu0 %v16519_v55  ;;  %3650 = vadd.xlane.f32.xlu0 %v13583_v13  ;;  %v3257_v3 = vpop.xlane.xlu0 %3256 }
 0x83c   : > { %v13587_v17 = vpop.eup %10918  ;;  %9860 = vmatprep.subr.bf16.mxu0 %v16520_v44  ;;  %10932 = vrcp.f32 %v3257_v3  ;;  %v16523_v3 = vld [vmem:[#allocation71_spill] sm:$0xff] }
 0x83d   : > { %3652 = vadd.xlane.f32.xlu1 %v13587_v17  ;;  %v3259_v16 = vpop.xlane.xlu1 %3258 }
 0x83e   : > { %v13591_v25 = vpop.eup %10920  ;;  %10934 = vrcp.f32 %v3259_v16 }
 0x83f   : > { %v10923_v52 = vpop.eup %10922  ;;  %9861 = vmatpush3.bf16.msra.mxu0 %v16520_v44  ;;  %3654 = vadd.xlane.f32.xlu0 %v13591_v25  ;;  %v3261_v58 = vpop.xlane.xlu0 %3260 }
 0x840   : > { %v13595_v26 = vpop.eup %10924  ;;  %9862 = vmatprep.subr.bf16.mxu0 %v16521_v24  ;;  %10936 = vrcp.f32 %v3261_v58  ;;  %v3292_v43 = vmul.f32 %v10923_v52, %v13488_v28 }
 0x841   : > { %v10927_v46 = vpop.eup %10926  ;;  %3656 = vadd.xlane.f32.xlu1 %v13595_v26  ;;  %v3263_v34 = vpop.xlane.xlu1 %3262 }
 0x842   : > { %v10929_v38 = vpop.eup %10928  ;;  %10938 = vrcp.f32 %v3263_v34  ;;  %v3293_v45 = vmul.f32 %v10927_v46, %v13492_v61 }
 0x843   : > { %9863 = vmatpush3.bf16.msra.mxu0 %v16521_v24  ;;  %v3265_v35 = vpop.xlane.xlu0 %3264  ;;  %v3294_v23 = vmul.f32 %v10929_v38, %v13496_v29  ;;  %v16524_v24 = vld [vmem:[#allocation73_spill] sm:$0xff] }
 0x844   : > { %v10931_v0 = vpop.eup %10930  ;;  %9864 = vmatprep.subr.bf16.mxu0 %v16522_v11  ;;  %10940 = vrcp.f32 %v3265_v35  ;;  %v3306_v60 = vpack.c.bf16 %v3293_v45, %v3292_v43  ;;  %v16525_v45 = vld [vmem:[#allocation75_spill] sm:$0xff] }
 0x845   : > { %v3267_v12 = vpop.xlane.xlu1 %3266  ;;  %v3295_v53 = vmul.f32 %v10931_v0, %v13500_v48 }
 0x846   : > { %v10933_v49 = vpop.eup %10932  ;;  %10942 = vrcp.f32 %v3267_v12  ;;  %9814 = vmatprep.mubr.bf16.mxu0 %v3306_v60 }
 0x847   : > { %9865 = vmatpush3.bf16.msra.mxu0 %v16522_v11  ;;  %v3269_v28 = vpop.xlane.xlu0 %3268  ;;  %v3307_v61 = vpack.c.bf16 %v3295_v53, %v3294_v23  ;;  %v3296_v16 = vmul.f32 %v10933_v49, %v13503_v27  ;;  %v16527_v53 = vld [vmem:[#allocation56_spill] sm:$0xff] }
 0x848   : > { %v10935_v55 = vpop.eup %10934  ;;  %9866 = vmatprep.subr.bf16.mxu0 %v16523_v3  ;;  %10944 = vrcp.f32 %v3269_v28 }
 0x849   : > { %v3271_v44 = vpop.xlane.xlu1 %3270  ;;  %9815 = vmatmul.mubr.bf16.gmra.mrb[28].mxu0 %v3307_v61  ;;  %v3297_v52 = vmul.f32 %v10935_v55, %v13506_v39 }
 0x84a   : > { %v10937_v29 = vpop.eup %10936  ;;  %10946 = vrcp.f32 %v3271_v44 }
 0x84b   : > { %9867 = vmatpush3.bf16.msra.mxu0 %v16523_v3  ;;  %v3308_v48 = vpack.c.bf16 %v3297_v52, %v3296_v16  ;;  %v3298_v46 = vmul.f32 %v10937_v29, %v13509_v54  ;;  %v16526_v54 = vld [vmem:[#allocation77_spill] sm:$0xff] }
 0x84c   : > { %v10939_v58 = vpop.eup %10938  ;;  %9868 = vmatprep.subr.bf16.mxu0 %v16524_v24 }
 0x84d   : > { %9818 = vmatprep.mubr.bf16.mxu0 %v3308_v48  ;;  %v3299_v34 = vmul.f32 %v10939_v58, %v13512_v19 }
 0x84e   : > { %v10941_v38 = vpop.eup %10940 }
 0x84f   : > { %9869 = vmatpush3.bf16.msra.mxu0 %v16524_v24  ;;  %v3309_v43 = vpack.c.bf16 %v3299_v34, %v3298_v46  ;;  %v3300_v39 = vmul.f32 %v10941_v38, %v13515_v1 }
 0x850   : > { %v10943_v27 = vpop.eup %10942  ;;  %9870 = vmatprep.subr.bf16.mxu0 %v16525_v45 }
 0x851   : > { %9819 = vmatmul.mubr.bf16.gmra.mrb[32].mxu0 %v3309_v43  ;;  %v3301_v35 = vmul.f32 %v10943_v27, %v13518_v50 }
 0x852   : > { %v10945_v0 = vpop.eup %10944 }
 0x853   : > { %9871 = vmatpush3.bf16.msra.mxu0 %v16525_v45  ;;  %v3310_v11 = vpack.c.bf16 %v3301_v35, %v3300_v39  ;;  %v3302_v19 = vmul.f32 %v10945_v0, %v13521_v63 }
 0x854   : > { %v10947_v60 = vpop.eup %10946  ;;  %9872 = vmatprep.subr.bf16.mxu0 %v16526_v54 }
 0x855   : > { %9822 = vmatprep.mubr.bf16.mxu0 %v3310_v11  ;;  %v3303_v12 = vmul.f32 %v10947_v60, %v13524_v21 }
 0x857   : > { %9873 = vmatpush3.bf16.msra.mxu0 %v16526_v54  ;;  %v3311_v23 = vpack.c.bf16 %v3303_v12, %v3302_v19  ;;  %v16529_v12 = vld [vmem:[#allocation58_spill] sm:$0xff] }
 0x858   : > { %9890 = vmatprep.subr.bf16.mxu0 %v16527_v53 }
 0x859   : > { %9823 = vmatmul.mubr.bf16.gmra.mrb[36].mxu0 %v3311_v23 }
 0x85f   : > { %v3627_v1 = vpop.xlane.xlu0 %3626 }
 0x860   : > { %10948 = vrcp.f32 %v3627_v1 }
 0x861   : > { %v3629_v50 = vpop.xlane.xlu1 %3628 }
 0x862   : > { %10950 = vrcp.f32 %v3629_v50 }
 0x863   : > { %v3631_v49 = vpop.xlane.xlu0 %3630 }
 0x864   : > { %10952 = vrcp.f32 %v3631_v49 }
 0x865   : > { %v3633_v28 = vpop.xlane.xlu1 %3632 }
 0x866   : > { %10954 = vrcp.f32 %v3633_v28  ;;  %v16530_v28 = vld [vmem:[#allocation59_spill] sm:$0xff] }
 0x86a   : > { %v10949_v61 = vpop.eup %10948 }
 0x86b   : > { %v3635_v55 = vpop.xlane.xlu0 %3634  ;;  %v3674_v21 = vmul.f32 %v10949_v61, %v13533_v15 }
 0x86c   : > { %v10951_v3 = vpop.eup %10950  ;;  %10956 = vrcp.f32 %v3635_v55  ;;  %v16531_v55 = vld [vmem:[#allocation60_spill] sm:$0xff] }
 0x86d   : > { %v3637_v63 = vpop.xlane.xlu1 %3636  ;;  %v3675_v44 = vmul.f32 %v10951_v3, %v13538_v62  ;;  %v16528_v62 = vld [vmem:[#allocation57_spill] sm:$0xff] }
 0x86e   : > { %v10953_v16 = vpop.eup %10952  ;;  %10958 = vrcp.f32 %v3637_v63 }
 0x86f   : > { %v3639_v52 = vpop.xlane.xlu0 %3638  ;;  %v3690_v29 = vpack.c.bf16 %v3675_v44, %v3674_v21  ;;  %v3676_v58 = vmul.f32 %v10953_v16, %v13541_v33 }
 0x870   : > { %v10955_v48 = vpop.eup %10954  ;;  %10960 = vrcp.f32 %v3639_v52 }
 0x871   : > { %v3677_v24 = vmul.f32 %v10955_v48, %v13544_v8  ;;  %v3641_v46 = vpop.xlane.xlu1 %3640  ;;  %9874 = vmatprep.mubr.bf16.mxu0 %v3690_v29 }
 0x872   : > { %10962 = vrcp.f32 %v3641_v46 }
 0x873   : > { %v3643_v34 = vpop.xlane.xlu0 %3642  ;;  %v3691_v38 = vpack.c.bf16 %v3677_v24, %v3676_v58 }
 0x874   : > { %10964 = vrcp.f32 %v3643_v34 }
 0x875   : > { %v3645_v43 = vpop.xlane.xlu1 %3644  ;;  %9875 = vmatmul.mubr.bf16.vlgmr.msra.gmra.mrb[40].mxu0 %v3691_v38 }
 0x876   : > { %v10957_v15 = vpop.eup %10956  ;;  %10966 = vrcp.f32 %v3645_v43  ;;  %9891 = vmatpush3.bf16.xpose.msra.mxu0 %v16527_v53  ;;  %v16535_v43 = vld [vmem:[#allocation31_spill] sm:$0xff] }
 0x877   : > { %9892 = vmatprep.subr.bf16.mxu0 %v16528_v62  ;;  %v3647_v27 = vpop.xlane.xlu0 %3646  ;;  %v3678_v8 = vmul.f32 %v10957_v15, %v13551_v36  ;;  %v16536_v15 = vld [vmem:[#allocation29_spill] sm:$0xff] }
 0x878   : > { %v10959_v45 = vpop.eup %10958  ;;  %10968 = vrcp.f32 %v3647_v27  ;;  %v16538_v27 = vld [vmem:[#allocation33_spill] sm:$0xff] }
 0x879   : > { %v3649_v33 = vpop.xlane.xlu1 %3648  ;;  %v3679_v39 = vmul.f32 %v10959_v45, %v13554_v18  ;;  %v16539_v45 = vld [vmem:[#allocation30_spill] sm:$0xff] }
 0x87a   : > { %v10961_v35 = vpop.eup %10960  ;;  %10970 = vrcp.f32 %v3649_v33  ;;  %v16540_v33 = vpack.c.bf16 %v16538_v27, %v16539_v45 }
 0x87b   : > { %v3692_v0 = vpack.c.bf16 %v3679_v39, %v3678_v8  ;;  %v3680_v60 = vmul.f32 %v10961_v35, %v13557_v57  ;;  %v16544_v39 = vld [vmem:[#allocation41_spill] sm:$0xff] }
 0x87c   : > { %v10963_v11 = vpop.eup %10962  ;;  %v16545_v35 = vld [vmem:[#allocation37_spill] sm:$0xff] }
 0x87d   : > { %9878 = vmatprep.mubr.bf16.mxu0 %v3692_v0  ;;  %v3681_v54 = vmul.f32 %v10963_v11, %v13560_v10  ;;  %v16546_v0 = vpack.c.bf16 %v16544_v39, %v16545_v35 }
 0x87e   : > { %v10965_v19 = vpop.eup %10964  ;;  %9893 = vmatpush3.bf16.xpose.msra.mxu0 %v16528_v62  ;;  %v16537_v62 = vpack.c.bf16 %v16535_v43, %v16536_v15 }
 0x87f   : > { %9894 = vmatprep.subr.bf16.mxu0 %v16529_v12  ;;  %v3693_v23 = vpack.c.bf16 %v3681_v54, %v3680_v60  ;;  %v3682_v36 = vmul.f32 %v10965_v19, %v13563_v41  ;;  %v16532_v41 = vld [vmem:[#allocation61_spill] sm:$0xff]  ;;  %v16550_v60 = vld [vmem:[#allocation47_spill] sm:$0xff] }
 0x880   : > { %v10967_v53 = vpop.eup %10966  ;;  %v16551_v54 = vld [vmem:[#allocation45_spill] sm:$0xff] }
 0x881   : > { %9879 = vmatmul.mubr.bf16.gmra.mrb[44].mxu0 %v3693_v23  ;;  %v3683_v18 = vmul.f32 %v10967_v53, %v13566_v32  ;;  %v16533_v32 = vld [vmem:[#allocation62_spill] sm:$0xff]  ;;  %v16552_v19 = vpack.c.bf16 %v16550_v60, %v16551_v54  ;;  %v16554_v23 = vld [vmem:[#allocation49_spill] sm:$0xff] }
 0x882   : > { %v10969_v1 = vpop.eup %10968 }
 0x883   : > { %v3694_v50 = vpack.c.bf16 %v3683_v18, %v3682_v36  ;;  %v3684_v57 = vmul.f32 %v10969_v1, %v13569_v31  ;;  %v16534_v31 = vld [vmem:[#allocation63_spill] sm:$0xff]  ;;  %v16557_v18 = vld [vmem:[#allocation53_spill] sm:$0xff] }
 0x884   : > { %v10971_v49 = vpop.eup %10970  ;;  %v16556_v36 = vld [vmem:[#allocation55_spill] sm:$0xff] }
 0x885   : > { %9882 = vmatprep.mubr.bf16.mxu0 %v3694_v50  ;;  %v3685_v10 = vmul.f32 %v10971_v49, %v13572_v20  ;;  %v16558_v1 = vpack.c.bf16 %v16556_v36, %v16557_v18 }
 0x886   : > { %9895 = vmatpush3.bf16.xpose.msra.mxu0 %v16529_v12  ;;  %v16553_v12 = vld [vmem:[#allocation51_spill] sm:$0xff] }
 0x887   : > { %9896 = vmatprep.subr.bf16.mxu0 %v16530_v28  ;;  %v3695_v61 = vpack.c.bf16 %v3685_v10, %v3684_v57  ;;  %v16555_v53 = vpack.c.bf16 %v16553_v12, %v16554_v23 }
 0x889   : > { %9883 = vmatmul.mubr.bf16.gmra.mrb[48].mxu0 %v3695_v61 }
 0x88e   : > { %9897 = vmatpush3.bf16.xpose.msra.mxu0 %v16530_v28 }
 0x88f   : > { %9898 = vmatprep.subr.bf16.mxu0 %v16531_v55 }
 0x896   : > { %9899 = vmatpush3.bf16.xpose.msra.mxu0 %v16531_v55 }
 0x897   : > { %9900 = vmatprep.subr.bf16.mxu0 %v16532_v41 }
 0x89e   : > { %9901 = vmatpush3.bf16.xpose.msra.mxu0 %v16532_v41 }
 0x89f   : > { %9902 = vmatprep.subr.bf16.mxu0 %v16533_v32 }
 0x8a6   : > { %9903 = vmatpush3.bf16.xpose.msra.mxu0 %v16533_v32 }
 0x8a7   : > { %9904 = vmatprep.subr.bf16.mxu0 %v16534_v31 }
 0x8ae   : > { %9905 = vmatpush3.bf16.xpose.msra.mxu0 %v16534_v31 }
 0x8c8   : > { %v3651_v20 = vpop.xlane.xlu0 %3650 }
 0x8c9   : > { %10972 = vrcp.f32 %v3651_v20 }
 0x8ca   : > { %v3653_v3 = vpop.xlane.xlu1 %3652 }
 0x8cb   : > { %10974 = vrcp.f32 %v3653_v3 }
 0x8cc   : > { %v3655_v63 = vpop.xlane.xlu0 %3654 }
 0x8cd   : > { %10976 = vrcp.f32 %v3655_v63 }
 0x8ce   : > { %v3657_v21 = vpop.xlane.xlu1 %3656 }
 0x8cf   : > { %10978 = vrcp.f32 %v3657_v21 }
 0x8d3   : > { %v10973_v44 = vpop.eup %10972 }
 0x8d4   : > { %v3686_v52 = vmul.f32 %v10973_v44, %v13583_v13  ;;  %v16541_v13 = vld [vmem:[#allocation32_spill] sm:$0xff] }
 0x8d5   : > { %v10975_v16 = vpop.eup %10974 }
 0x8d6   : > { %v3687_v29 = vmul.f32 %v10975_v16, %v13587_v17  ;;  %v16542_v17 = vld [vmem:[#allocation34_spill] sm:$0xff] }
 0x8d7   : > { %v10977_v48 = vpop.eup %10976  ;;  %v16543_v8 = vpack.c.bf16 %v16541_v13, %v16542_v17 }
 0x8d8   : > { %v3696_v58 = vpack.c.bf16 %v3687_v29, %v3686_v52  ;;  %v3688_v46 = vmul.f32 %v10977_v48, %v13591_v25  ;;  %v16547_v25 = vld [vmem:[#allocation20_spill] sm:$0xff] }
 0x8d9   : > { %v10979_v24 = vpop.eup %10978 }
 0x8da   : > { %9886 = vmatprep.mubr.bf16.mxu0 %v3696_v58  ;;  %v3689_v34 = vmul.f32 %v10979_v24, %v13595_v26  ;;  %v16548_v26 = vld [vmem:[#allocation43_spill] sm:$0xff] }
 0x8db   : > { %v16549_v11 = vpack.c.bf16 %v16547_v25, %v16548_v26 }
 0x8dc   : > { %v3697_v38 = vpack.c.bf16 %v3689_v34, %v3688_v46 }
 0x8de   : > { %9887 = vmatmul.mubr.bf16.gmra.mrb[52].mxu0 %v3697_v38 }
 0x8df   : > { %9906 = vmatprep.mubr.bf16.mxu0 %v16537_v62 }
 0x8e6   : > { %9907 = vmatmul.mubr.bf16.vlgmr.msra.gmra.mrb[56].mxu0 %v16540_v33 }
 0x8e7   : > { %9910 = vmatprep.mubr.bf16.mxu0 %v16543_v8 }
 0x8ee   : > { %9911 = vmatmul.mubr.bf16.gmra.mrb[60].mxu0 %v16546_v0 }
 0x8ef   : > { %9914 = vmatprep.mubr.bf16.mxu0 %v16549_v11 }
 0x8f6   : > { %9915 = vmatmul.mubr.bf16.gmra.mrb[64].mxu0 %v16552_v19 }
 0x8f7   : > { %9918 = vmatprep.mubr.bf16.mxu0 %v16555_v53 }
 0x8fe   : > { %9919 = vmatmul.mubr.bf16.gmra.mrb[68].mxu0 %v16558_v1 }
 0x90d   : > { %v13678_v50 = vpop.f32.mrb[24].mxu0 }
 0x90e   : > { %v13680_v49 = vpop.f32.mrb[25].mxu0 }
 0x90f   : > { %v13682_v57 = vpop.f32.mrb[26].mxu0 }
 0x910   : > { %v13686_v28 = vpop.f32.mrb[27].mxu0 }
 0x91c   : > { %v13690_v55 = vpop.f32.mrb[28].mxu0 }
 0x91d   : > { %v13692_v41 = vpop.f32.mrb[29].mxu0 }
 0x91e   : > { %v13694_v32 = vpop.f32.mrb[30].mxu0 }
 0x91f   : > { %v13698_v20 = vpop.f32.mrb[31].mxu0 }
 0x924   : > { %v13702_v63 = vpop.f32.mrb[32].mxu0 }
 0x925   : > { %v13704_v21 = vpop.f32.mrb[33].mxu0 }
 0x926   : > { %v13706_v44 = vpop.f32.mrb[34].mxu0 }
 0x927   : > { %v13710_v52 = vpop.f32.mrb[35].mxu0 }
 0x92c   : > { %v13714_v48 = vpop.f32.mrb[36].mxu0 }
 0x92d   : > { %v13716_v58 = vpop.f32.mrb[37].mxu0 }
 0x92e   : > { %v13718_v24 = vpop.f32.mrb[38].mxu0 }
 0x92f   : > { %v13722_v34 = vpop.f32.mrb[39].mxu0 }
 0x948   : > { %v13726_v43 = vpop.f32.mrb[40].mxu0 }
 0x949   : > { %v13728_v15 = vpop.f32.mrb[41].mxu0 }
 0x94a   : > { %v13730_v62 = vpop.f32.mrb[42].mxu0 }
 0x94b   : > { %v13734_v45 = vpop.f32.mrb[43].mxu0 }
 0x954   : > { %v13738_v13 = vpop.f32.mrb[44].mxu0 }
 0x955   : > { %v13740_v17 = vpop.f32.mrb[45].mxu0 }
 0x956   : > { %v13742_v8 = vpop.f32.mrb[46].mxu0 }
 0x957   : > { %v13746_v35 = vpop.f32.mrb[47].mxu0 }
 0x95c   : > { %v13750_v25 = vpop.f32.mrb[48].mxu0 }
 0x95d   : > { %v13752_v26 = vpop.f32.mrb[49].mxu0 }
 0x95e   : > { %v13754_v11 = vpop.f32.mrb[50].mxu0 }
 0x95f   : > { %v13758_v54 = vpop.f32.mrb[51].mxu0 }
 0x9b1   : > { %v13762_v12 = vpop.f32.mrb[52].mxu0 }
 0x9b2   : > { %16559 = vst [vmem:[#allocation21_spill] sm:$0xff] %v13762_v12  ;;  %v13764_v23 = vpop.f32.mrb[53].mxu0 }
 0x9b3   : > { %v13766_v53 = vpop.f32.mrb[54].mxu0 }
 0x9b4   : > { %v13770_v18 = vpop.f32.mrb[55].mxu0 }
 0x9b9   : > { %v9908_v60 = vpop.f32.mrb[56].mxu0 }
 0x9ba   : > { %v3869_v39 = vpop.f32.mrb[57].mxu0  ;;  %v3878_v46 = vadd.f32 %v9908_v60, %v16505_v51 }
 0x9bb   : > { %v3870_v0 = vadd.f32 %v3869_v39, %v16503_v40  ;;  %v9909_v27 = vpop.f32.mrb[58].mxu0 }
 0x9bc   : > { %v3872_v19 = vpop.f32.mrb[59].mxu0  ;;  %v3881_v38 = vadd.f32 %v9909_v27, %v16506_v4 }
 0x9bd   : > { %v3873_v33 = vadd.f32 %v3872_v19, %v16504_v5  ;;  %3932 = vmax.xlane.f32.xlu0 %v3870_v0 }
 0x9bf   : > { %3934 = vmax.xlane.f32.xlu1 %v3873_v33 }
 0x9c1   : > { %v9912_v36 = vpop.f32.mrb[60].mxu0  ;;  %3936 = vmax.xlane.f32.xlu0 %v3878_v46 }
 0x9c2   : > { %v3885_v16 = vpop.f32.mrb[61].mxu0  ;;  %v3894_v39 = vadd.f32 %v9912_v36, %v16509_v22 }
 0x9c3   : > { %v3886_v29 = vadd.f32 %v3885_v16, %v16507_v9  ;;  %v9913_v1 = vpop.f32.mrb[62].mxu0  ;;  %3938 = vmax.xlane.f32.xlu1 %v3881_v38 }
 0x9c4   : > { %v3888_v31 = vpop.f32.mrb[63].mxu0  ;;  %v3897_v5 = vadd.f32 %v9913_v1, %v16510_v2 }
 0x9c5   : > { %v3889_v40 = vadd.f32 %v3888_v31, %v16508_v7  ;;  %3940 = vmax.xlane.f32.xlu0 %v3886_v29 }
 0x9c7   : > { %3942 = vmax.xlane.f32.xlu1 %v3889_v40 }
 0x9c9   : > { %v9916_v51 = vpop.f32.mrb[64].mxu0  ;;  %3944 = vmax.xlane.f32.xlu0 %v3894_v39 }
 0x9ca   : > { %v3901_v60 = vpop.f32.mrb[65].mxu0  ;;  %v13790_v7 = vadd.f32 %v9916_v51, %v16513_v42 }
 0x9cb   : > { %v13783_v4 = vadd.f32 %v3901_v60, %v16511_v59  ;;  %v9917_v27 = vpop.f32.mrb[66].mxu0  ;;  %3946 = vmax.xlane.f32.xlu1 %v3897_v5 }
 0x9cc   : > { %v3904_v9 = vpop.f32.mrb[67].mxu0  ;;  %v13794_v22 = vadd.f32 %v9917_v27, %v16514_v30 }
 0x9cd   : > { %v13786_v16 = vadd.f32 %v3904_v9, %v16512_v47  ;;  %3948 = vmax.xlane.f32.xlu0 %v13783_v4 }
 0x9cf   : > { %3950 = vmax.xlane.f32.xlu1 %v13786_v16 }
 0x9d1   : > { %v9920_v2 = vpop.f32.mrb[68].mxu0  ;;  %3952 = vmax.xlane.f32.xlu0 %v13790_v7 }
 0x9d2   : > { %v3917_v59 = vpop.f32.mrb[69].mxu0  ;;  %v13806_v42 = vadd.f32 %v9920_v2, %v16517_v37 }
 0x9d3   : > { %v13798_v31 = vadd.f32 %v3917_v59, %v16515_v14  ;;  %v9921_v19 = vpop.f32.mrb[70].mxu0  ;;  %3954 = vmax.xlane.f32.xlu1 %v13794_v22 }
 0x9d4   : > { %v3920_v47 = vpop.f32.mrb[71].mxu0  ;;  %v13810_v30 = vadd.f32 %v9921_v19, %v16518_v56 }
 0x9d5   : > { %v13802_v36 = vadd.f32 %v3920_v47, %v16516_v6  ;;  %3956 = vmax.xlane.f32.xlu0 %v13798_v31 }
 0x9d7   : > { %3958 = vmax.xlane.f32.xlu1 %v13802_v36 }
 0x9d9   : > { %3960 = vmax.xlane.f32.xlu0 %v13806_v42 }
 0x9db   : > { %3962 = vmax.xlane.f32.xlu1 %v13810_v30 }
 0xa4a   : > { %v3933_v14 = vpop.xlane.xlu0 %3932 }
 0xa4b   : > { %v3964_v1 = vsub.f32 %v3870_v0, %v3933_v14 }
 0xa4c   : > { %v3935_v51 = vpop.xlane.xlu1 %3934 }
 0xa4d   : > { %v3980_v60 = vmul.f32 1.442695, %v3964_v1  ;;  %v3965_v6 = vsub.f32 %v3873_v33, %v3935_v51 }
 0xa4e   : > { %v3937_v27 = vpop.xlane.xlu0 %3936 }
 0xa4f   : > { %10980 = vpow2.f32 %v3980_v60  ;;  %v3982_v9 = vmul.f32 1.442695, %v3965_v6  ;;  %v3966_v59 = vsub.f32 %v3878_v46, %v3937_v27 }
 0xa50   : > { %v3939_v37 = vpop.xlane.xlu1 %3938 }
 0xa51   : > { %10982 = vpow2.f32 %v3982_v9  ;;  %v3984_v2 = vmul.f32 1.442695, %v3966_v59  ;;  %v3967_v47 = vsub.f32 %v3881_v38, %v3939_v37 }
 0xa52   : > { %v3941_v3 = vpop.xlane.xlu0 %3940 }
 0xa53   : > { %10984 = vpow2.f32 %v3984_v2  ;;  %v3986_v56 = vmul.f32 1.442695, %v3967_v47  ;;  %v3968_v19 = vsub.f32 %v3886_v29, %v3941_v3 }
 0xa54   : > { %v3943_v10 = vpop.xlane.xlu1 %3942 }
 0xa55   : > { %10986 = vpow2.f32 %v3986_v56  ;;  %v3988_v61 = vmul.f32 1.442695, %v3968_v19  ;;  %v3969_v12 = vsub.f32 %v3889_v40, %v3943_v10 }
 0xa56   : > { %v3945_v0 = vpop.xlane.xlu0 %3944 }
 0xa57   : > { %10988 = vpow2.f32 %v3988_v61  ;;  %v3990_v14 = vmul.f32 1.442695, %v3969_v12  ;;  %v3970_v33 = vsub.f32 %v3894_v39, %v3945_v0 }
 0xa58   : > { %v3947_v1 = vpop.xlane.xlu1 %3946 }
 0xa59   : > { %v13814_v51 = vpop.eup %10980  ;;  %10990 = vpow2.f32 %v3990_v14  ;;  %v3992_v46 = vmul.f32 1.442695, %v3970_v33  ;;  %v3971_v60 = vsub.f32 %v3897_v5, %v3947_v1 }
 0xa5a   : > { %4012 = vadd.xlane.f32.xlu0 %v13814_v51  ;;  %v3949_v38 = vpop.xlane.xlu0 %3948 }
 0xa5b   : > { %v13817_v6 = vpop.eup %10982  ;;  %10992 = vpow2.f32 %v3992_v46  ;;  %v3994_v3 = vmul.f32 1.442695, %v3971_v60  ;;  %v3972_v29 = vsub.f32 %v13783_v4, %v3949_v38 }
 0xa5c   : > { %4014 = vadd.xlane.f32.xlu1 %v13817_v6  ;;  %v3951_v10 = vpop.xlane.xlu1 %3950 }
 0xa5d   : > { %v13821_v61 = vpop.eup %10984  ;;  %10994 = vpow2.f32 %v3994_v3  ;;  %v3996_v12 = vmul.f32 1.442695, %v3972_v29  ;;  %v3973_v40 = vsub.f32 %v13786_v16, %v3951_v10 }
 0xa5e   : > { %4016 = vadd.xlane.f32.xlu0 %v13821_v61  ;;  %v3953_v39 = vpop.xlane.xlu0 %3952 }
 0xa5f   : > { %v13825_v5 = vpop.eup %10986  ;;  %10996 = vpow2.f32 %v3996_v12  ;;  %v3998_v27 = vmul.f32 1.442695, %v3973_v40  ;;  %v3974_v9 = vsub.f32 %v13790_v7, %v3953_v39 }
 0xa60   : > { %4018 = vadd.xlane.f32.xlu1 %v13825_v5  ;;  %v3955_v4 = vpop.xlane.xlu1 %3954 }
 0xa61   : > { %v13829_v59 = vpop.eup %10988  ;;  %10998 = vpow2.f32 %v3998_v27  ;;  %v4000_v37 = vmul.f32 1.442695, %v3974_v9  ;;  %v3975_v2 = vsub.f32 %v13794_v22, %v3955_v4  ;;  %v10486_v9 = vld [vmem:[#allocation9 + $0x4] ss:$8 sps:$4 sm:$0xff]  }
 0xa62   : > { %4020 = vadd.xlane.f32.xlu0 %v13829_v59  ;;  %v3957_v16 = vpop.xlane.xlu0 %3956  ;;  %4433 = vmatprep.subr.bf16.mxu1 %v10486_v9 }
 0xa63   : > { %v13833_v47 = vpop.eup %10990  ;;  %11000 = vpow2.f32 %v4000_v37  ;;  %v4002_v56 = vmul.f32 1.442695, %v3975_v2  ;;  %v3976_v19 = vsub.f32 %v13798_v31, %v3957_v16 }
 0xa64   : > { %4022 = vadd.xlane.f32.xlu1 %v13833_v47  ;;  %v3959_v7 = vpop.xlane.xlu1 %3958 }
 0xa65   : > { %v13837_v0 = vpop.eup %10992  ;;  %11002 = vpow2.f32 %v4002_v56  ;;  %v4004_v14 = vmul.f32 1.442695, %v3976_v19  ;;  %v3977_v33 = vsub.f32 %v13802_v36, %v3959_v7 }
 0xa66   : > { %4024 = vadd.xlane.f32.xlu0 %v13837_v0  ;;  %v3961_v22 = vpop.xlane.xlu0 %3960 }
 0xa67   : > { %v13841_v1 = vpop.eup %10994  ;;  %11004 = vpow2.f32 %v4004_v14  ;;  %v4006_v46 = vmul.f32 1.442695, %v3977_v33  ;;  %v3978_v60 = vsub.f32 %v13806_v42, %v3961_v22 }
 0xa68   : > { %4026 = vadd.xlane.f32.xlu1 %v13841_v1  ;;  %v3963_v31 = vpop.xlane.xlu1 %3962 }
 0xa69   : > { %v13845_v38 = vpop.eup %10996  ;;  %11006 = vpow2.f32 %v4006_v46  ;;  %v4008_v3 = vmul.f32 1.442695, %v3978_v60  ;;  %v3979_v29 = vsub.f32 %v13810_v30, %v3963_v31 }
 0xa6a   : > { %4028 = vadd.xlane.f32.xlu0 %v13845_v38 }
 0xa6b   : > { %v13849_v36 = vpop.eup %10998  ;;  %11008 = vpow2.f32 %v4008_v3  ;;  %v4010_v10 = vmul.f32 1.442695, %v3979_v29 }
 0xa6c   : > { %4030 = vadd.xlane.f32.xlu1 %v13849_v36 }
 0xa6d   : > { %v13852_v12 = vpop.eup %11000  ;;  %11010 = vpow2.f32 %v4010_v10 }
 0xa6e   : > { %4032 = vadd.xlane.f32.xlu0 %v13852_v12 }
 0xa6f   : > { %v13855_v42 = vpop.eup %11002 }
 0xa70   : > { %4034 = vadd.xlane.f32.xlu1 %v13855_v42 }
 0xa71   : > { %v13858_v40 = vpop.eup %11004 }
 0xa72   : > { %4036 = vadd.xlane.f32.xlu0 %v13858_v40 }
 0xa73   : > { %v13861_v30 = vpop.eup %11006 }
 0xa74   : > { %4038 = vadd.xlane.f32.xlu1 %v13861_v30 }
 0xa75   : > { %v13864_v39 = vpop.eup %11008 }
 0xa76   : > { %4040 = vadd.xlane.f32.xlu0 %v13864_v39 }
 0xa77   : > { %v13867_v27 = vpop.eup %11010 }
 0xa78   : > { %4042 = vadd.xlane.f32.xlu1 %v13867_v27 }
 0xae7   : > { %v4013_v4 = vpop.xlane.xlu0 %4012 }
 0xae8   : > { %11012 = vrcp.f32 %v4013_v4 }
 0xae9   : > { %v4015_v37 = vpop.xlane.xlu1 %4014 }
 0xaea   : > { %11014 = vrcp.f32 %v4015_v37 }
 0xaeb   : > { %v4017_v2 = vpop.xlane.xlu0 %4016 }
 0xaec   : > { %11016 = vrcp.f32 %v4017_v2 }
 0xaed   : > { %v4019_v16 = vpop.xlane.xlu1 %4018 }
 0xaee   : > { %11018 = vrcp.f32 %v4019_v16  ;;  %v10484_v16 = vld [vmem:[#allocation9] ss:$8 sps:$4 sm:$0xff]  }
 0xaef   : > { %v4021_v56 = vpop.xlane.xlu0 %4020 }
 0xaf0   : > { %11020 = vrcp.f32 %v4021_v56 }
 0xaf1   : > { %v4023_v19 = vpop.xlane.xlu1 %4022 }
 0xaf2   : > { %v11013_v7 = vpop.eup %11012  ;;  %11022 = vrcp.f32 %v4023_v19 }
 0xaf3   : > { %v4025_v14 = vpop.xlane.xlu0 %4024  ;;  %v4060_v46 = vmul.f32 %v11013_v7, %v13814_v51  ;;  %v10489_v51 = vld [vmem:[#allocation9 + $0x14] ss:$8 sps:$4 sm:$0xff]  }
 0xaf4   : > { %v11015_v33 = vpop.eup %11014  ;;  %11024 = vrcp.f32 %v4025_v14 }
 0xaf5   : > { %v4027_v22 = vpop.xlane.xlu1 %4026  ;;  %v4061_v60 = vmul.f32 %v11015_v33, %v13817_v6 }
 0xaf6   : > { %v11017_v31 = vpop.eup %11016  ;;  %11026 = vrcp.f32 %v4027_v22 }
 0xaf7   : > { %v4029_v3 = vpop.xlane.xlu0 %4028  ;;  %v4076_v29 = vpack.c.bf16 %v4061_v60, %v4060_v46  ;;  %v4062_v9 = vmul.f32 %v11017_v31, %v13821_v61  ;;  %v10487_v61 = vld [vmem:[#allocation9 + $0x10] ss:$8 sps:$4 sm:$0xff]   ;;  %v10492_v60 = vld [vmem:[#allocation9 + $0x24] ss:$8 sps:$4 sm:$0xff]  }
 0xaf8   : > { %v11019_v10 = vpop.eup %11018  ;;  %11028 = vrcp.f32 %v4029_v3 }
 0xaf9   : > { %v4063_v4 = vmul.f32 %v11019_v10, %v13825_v5  ;;  %v4031_v37 = vpop.xlane.xlu1 %4030  ;;  %9938 = vmatprep.mubr.bf16.mxu1 %v4076_v29 }
 0xafa   : > { %v11021_v2 = vpop.eup %11020  ;;  %11030 = vrcp.f32 %v4031_v37  ;;  %v10495_v37 = vld [vmem:[#allocation9 + $0x34] ss:$8 sps:$4 sm:$0xff]  }
 0xafb   : > { %v4033_v56 = vpop.xlane.xlu0 %4032  ;;  %v4077_v19 = vpack.c.bf16 %v4063_v4, %v4062_v9  ;;  %v4064_v14 = vmul.f32 %v11021_v2, %v13829_v59  ;;  %v10490_v59 = vld [vmem:[#allocation9 + $0x20] ss:$8 sps:$4 sm:$0xff]  }
 0xafc   : > { %v11023_v7 = vpop.eup %11022  ;;  %11032 = vrcp.f32 %v4033_v56 }
 0xafd   : > { %v4035_v6 = vpop.xlane.xlu1 %4034  ;;  %9939 = vmatmul.mubr.bf16.vlgmr.msra.gmra.mrb[232].mxu1 %v4077_v19  ;;  %v4065_v33 = vmul.f32 %v11023_v7, %v13833_v47  ;;  %v10498_v7 = vld [vmem:[#allocation9 + $0x44] ss:$8 sps:$4 sm:$0xff]  }
 0xafe   : > { %v11025_v22 = vpop.eup %11024  ;;  %11034 = vrcp.f32 %v4035_v6  ;;  %4434 = vmatpush1.bf16.msra.mxu1 %v10484_v16 }
 0xaff   : > { %v4037_v5 = vpop.xlane.xlu0 %4036  ;;  %4435 = vmatprep.subr.bf16.mxu1 %v10489_v51  ;;  %v4078_v46 = vpack.c.bf16 %v4065_v33, %v4064_v14  ;;  %v4066_v29 = vmul.f32 %v11025_v22, %v13837_v0  ;;  %v10493_v0 = vld [vmem:[#allocation9 + $0x30] ss:$8 sps:$4 sm:$0xff]  }
 0xb00   : > { %v11027_v31 = vpop.eup %11026  ;;  %11036 = vrcp.f32 %v4037_v5  ;;  %v10501_v5 = vld [vmem:[#allocation9 + $0x54] ss:$8 sps:$4 sm:$0xff]  }
 0xb01   : > { %v4039_v3 = vpop.xlane.xlu1 %4038  ;;  %9942 = vmatprep.mubr.bf16.mxu1 %v4078_v46  ;;  %v4067_v10 = vmul.f32 %v11027_v31, %v13841_v1 }
 0xb02   : > { %v11029_v9 = vpop.eup %11028  ;;  %11038 = vrcp.f32 %v4039_v3  ;;  %4436 = vmatpush1.bf16.msra.mxu1 %v10487_v61  ;;  %v10496_v61 = vld [vmem:[#allocation9 + $0x40] ss:$8 sps:$4 sm:$0xff]   ;;  %v10499_v3 = vld [vmem:[#allocation9 + $0x50] ss:$8 sps:$4 sm:$0xff]  }
 0xb03   : > { %v4041_v47 = vpop.xlane.xlu0 %4040  ;;  %4437 = vmatprep.subr.bf16.mxu1 %v10492_v60  ;;  %v4079_v4 = vpack.c.bf16 %v4067_v10, %v4066_v29  ;;  %v4068_v56 = vmul.f32 %v11029_v9, %v13845_v38 }
 0xb04   : > { %v11031_v2 = vpop.eup %11030  ;;  %11040 = vrcp.f32 %v4041_v47 }
 0xb05   : > { %v4043_v16 = vpop.xlane.xlu1 %4042  ;;  %9943 = vmatmul.mubr.bf16.gmra.mrb[236].mxu1 %v4079_v4  ;;  %v4069_v19 = vmul.f32 %v11031_v2, %v13849_v36  ;;  %v10507_v4 = vld [vmem:[#allocation9 + $0x74] ss:$8 sps:$4 sm:$0xff]   ;;  %v10508_v2 = vld [vmem:[#allocation9 + $0x80] ss:$8 sps:$4 sm:$0xff]  }
 0xb06   : > { %v11033_v51 = vpop.eup %11032  ;;  %11042 = vrcp.f32 %v4043_v16  ;;  %4438 = vmatpush1.bf16.msra.mxu1 %v10490_v59  ;;  %v10502_v59 = vld [vmem:[#allocation9 + $0x60] ss:$8 sps:$4 sm:$0xff]   ;;  %v10516_v16 = vld [vmem:[#allocation9 + $0xa4] ss:$8 sps:$4 sm:$0xff]  }
 0xb07   : > { %4439 = vmatprep.subr.bf16.mxu1 %v10495_v37  ;;  %v4080_v1 = vpack.c.bf16 %v4069_v19, %v4068_v56  ;;  %v4070_v14 = vmul.f32 %v11033_v51, %v13852_v12  ;;  %v10504_v12 = vld [vmem:[#allocation9 + $0x64] ss:$8 sps:$4 sm:$0xff]   ;;  %v10514_v56 = vld [vmem:[#allocation9 + $0xa0] ss:$8 sps:$4 sm:$0xff]   ;;  %v10519_v19 = vld [vmem:[#allocation9 + $0xb4] ss:$8 sps:$4 sm:$0xff]  }
 0xb08   : > { %v11035_v6 = vpop.eup %11034  ;;  %v10510_v37 = vld [vmem:[#allocation9 + $0x84] ss:$8 sps:$4 sm:$0xff]   ;;  %v10517_v51 = vld [vmem:[#allocation9 + $0xb0] ss:$8 sps:$4 sm:$0xff]  }
 0xb09   : > { %9946 = vmatprep.mubr.bf16.mxu1 %v4080_v1  ;;  %v4071_v33 = vmul.f32 %v11035_v6, %v13855_v42  ;;  %v10523_v1 = vld [vmem:[#allocation9 + $0xd0] ss:$8 sps:$4 sm:$0xff]   ;;  %v10526_v6 = vld [vmem:[#allocation9 + $0xe0] ss:$8 sps:$4 sm:$0xff]  }
 0xb0a   : > { %v11037_v22 = vpop.eup %11036  ;;  %4440 = vmatpush1.bf16.msra.mxu1 %v10493_v0  ;;  %v10525_v0 = vld [vmem:[#allocation9 + $0xd4] ss:$8 sps:$4 sm:$0xff]  }
 0xb0b   : > { %4441 = vmatprep.subr.bf16.mxu1 %v10498_v7  ;;  %v4081_v38 = vpack.c.bf16 %v4071_v33, %v4070_v14  ;;  %v4072_v46 = vmul.f32 %v11037_v22, %v13858_v40  ;;  %v16560_v40 = vpack.c.bf16 %v13686_v28, %v13680_v49  ;;  %v10522_v49 = vld [vmem:[#allocation9 + $0xc4] ss:$8 sps:$4 sm:$0xff]   ;;  %v10520_v28 = vld [vmem:[#allocation9 + $0xc0] ss:$8 sps:$4 sm:$0xff]   ;;  %v10531_v14 = vld [vmem:[#allocation9 + $0xf4] ss:$8 sps:$4 sm:$0xff]  }
 0xb0c   : > { %v11039_v36 = vpop.eup %11038  ;;  %v10528_v7 = vld [vmem:[#allocation9 + $0xe4] ss:$8 sps:$4 sm:$0xff]   ;;  %v10529_v33 = vld [vmem:[#allocation9 + $0xf0] ss:$8 sps:$4 sm:$0xff]  }
 0xb0d   : > { %9947 = vmatmul.mubr.bf16.gmra.mrb[240].mxu1 %v4081_v38  ;;  %v4073_v60 = vmul.f32 %v11039_v36, %v13861_v30  ;;  %v10505_v30 = vld [vmem:[#allocation9 + $0x70] ss:$8 sps:$4 sm:$0xff]  }
 0xb0e   : > { %v11041_v31 = vpop.eup %11040  ;;  %4442 = vmatpush1.bf16.msra.mxu1 %v10496_v61  ;;  %v16561_v22 = vld [vmem:[#allocation27_spill] sm:$0xff]  ;;  %v16562_v61 = vld [vmem:[#allocation25_spill] sm:$0xff]  ;;  %v16565_v36 = vld [vmem:[#allocation22_spill] sm:$0xff] }
 0xb0f   : > { %4443 = vmatprep.subr.bf16.mxu1 %v10501_v5  ;;  %v4082_v29 = vpack.c.bf16 %v4073_v60, %v4072_v46  ;;  %v4074_v42 = vmul.f32 %v11041_v31, %v13864_v39  ;;  %v10513_v39 = vld [vmem:[#allocation9 + $0x94] ss:$8 sps:$4 sm:$0xff]   ;;  %v16563_v38 = vpack.c.bf16 %v16561_v22, %v16562_v61  ;;  %v16564_v5 = vpack.c.bf16 %v13682_v57, %v13678_v50 }
 0xb10   : > { %v11043_v10 = vpop.eup %11042  ;;  %v16566_v46 = vld [vmem:[#allocation23_spill] sm:$0xff]  ;;  %v16568_v31 = vpack.c.bf16 %v13698_v20, %v13692_v41  ;;  %v16576_v57 = vpack.c.bf16 %v13710_v52, %v13704_v21  ;;  %v16580_v20 = vpack.c.bf16 %v13706_v44, %v13702_v63  ;;  %v16588_v52 = vpack.c.bf16 %v13718_v24, %v13714_v48 }
 0xb11   : > { %9950 = vmatprep.mubr.bf16.mxu1 %v4082_v29  ;;  %v4075_v9 = vmul.f32 %v11043_v10, %v13867_v27  ;;  %v10511_v27 = vld [vmem:[#allocation9 + $0x90] ss:$8 sps:$4 sm:$0xff]   ;;  %v16567_v60 = vpack.c.bf16 %v16565_v36, %v16566_v46  ;;  %v16570_v29 = vld [vmem:[#allocation28_spill] sm:$0xff]  ;;  %v16572_v10 = vpack.c.bf16 %v13694_v32, %v13690_v55  ;;  %v16584_v32 = vpack.c.bf16 %v13722_v34, %v13716_v58 }
 0xb12   : > { %4444 = vmatpush1.bf16.msra.mxu1 %v10499_v3  ;;  %v16569_v3 = vld [vmem:[#allocation66_spill] sm:$0xff]  ;;  %v16592_v58 = vpack.c.bf16 %v13734_v45, %v13728_v15  ;;  %v16594_v15 = vpack.c.bf16 %v13746_v35, %v13740_v17  ;;  %v16597_v17 = vpack.c.bf16 %v13754_v11, %v13750_v25  ;;  %v16598_v35 = vpack.c.bf16 %v13770_v18, %v13764_v23  ;;  %v16601_v25 = vld [vmem:[#allocation21_spill] sm:$0xff] }
 0xb13   : > { %4445 = vmatprep.subr.bf16.mxu1 %v10504_v12  ;;  %v4083_v47 = vpack.c.bf16 %v4075_v9, %v4074_v42  ;;  %v16571_v12 = vpack.c.bf16 %v16569_v3, %v16570_v29  ;;  %v16573_v42 = vld [vmem:[#allocation26_spill] sm:$0xff]  ;;  %v16574_v9 = vld [vmem:[#allocation24_spill] sm:$0xff]  ;;  %v16602_v11 = vpack.c.bf16 %v13766_v53, %v16601_v25 }
 0xb14   : > { %v16575_v50 = vpack.c.bf16 %v16573_v42, %v16574_v9 }
 0xb15   : > { %9951 = vmatmul.mubr.bf16.gmra.mrb[244].mxu1 %v4083_v47  ;;  %v16578_v47 = vld [vmem:[#allocation36_spill] sm:$0xff] }
 0xb16   : > { %4446 = vmatpush1.bf16.msra.mxu1 %v10502_v59  ;;  %4465 = vmatprep.mubr.bf16.mxu1 %v16560_v40  ;;  %v16577_v59 = vld [vmem:[#allocation44_spill] sm:$0xff] }
 0xb17   : > { %4447 = vmatprep.subr.bf16.mxu1 %v10507_v4  ;;  %v16579_v41 = vpack.c.bf16 %v16577_v59, %v16578_v47  ;;  %v16581_v4 = vld [vmem:[#allocation35_spill] sm:$0xff]  ;;  %v16582_v40 = vld [vmem:[#allocation68_spill] sm:$0xff]  ;;  %v11166_v47 = vld [vmem:[%s11743_s26 + $0x10] sm:$0xff] }
 0xb18   : > { %v16583_v55 = vpack.c.bf16 %v16581_v4, %v16582_v40 }
 0xb1a   : > { %4448 = vmatpush1.bf16.msra.mxu1 %v10505_v30  ;;  %v16585_v30 = vld [vmem:[#allocation46_spill] sm:$0xff] }
 0xb1b   : > { %4449 = vmatprep.subr.bf16.mxu1 %v10510_v37  ;;  %v16586_v37 = vld [vmem:[#allocation70_spill] sm:$0xff] }
 0xb1c   : > { %v16587_v21 = vpack.c.bf16 %v16585_v30, %v16586_v37 }
 0xb1e   : > { %4450 = vmatpush1.bf16.msra.mxu1 %v10508_v2  ;;  %v16589_v2 = vld [vmem:[#allocation72_spill] sm:$0xff] }
 0xb1f   : > { %4451 = vmatprep.subr.bf16.mxu1 %v10513_v39  ;;  %v16590_v39 = vld [vmem:[#allocation40_spill] sm:$0xff] }
 0xb20   : > { %v16591_v63 = vpack.c.bf16 %v16589_v2, %v16590_v39  ;;  %v11168_v2 = vld [vmem:[%s11743_s26 + $0x20] sm:$0xff] }
 0xb22   : > { %4452 = vmatpush1.bf16.msra.mxu1 %v10511_v27 }
 0xb23   : > { %4453 = vmatprep.subr.bf16.mxu1 %v10516_v16 }
 0xb26   : > { %4454 = vmatpush1.bf16.msra.mxu1 %v10514_v56 }
 0xb27   : > { %4455 = vmatprep.subr.bf16.mxu1 %v10519_v19 }
 0xb2a   : > { %4456 = vmatpush1.bf16.msra.mxu1 %v10517_v51 }
 0xb2b   : > { %4457 = vmatprep.subr.bf16.mxu1 %v10522_v49 }
 0xb2e   : > { %4458 = vmatpush1.bf16.msra.mxu1 %v10520_v28 }
 0xb2f   : > { %4459 = vmatprep.subr.bf16.mxu1 %v10525_v0 }
 0xb32   : > { %4460 = vmatpush1.bf16.msra.mxu1 %v10523_v1  ;;  %v16593_v1 = vpack.c.bf16 %v13730_v62, %v13726_v43  ;;  %v16595_v43 = vpack.c.bf16 %v13742_v8, %v13738_v13  ;;  %v16596_v62 = vpack.c.bf16 %v13758_v54, %v13752_v26  ;;  %v4261_v13 = vld [vmem:[%s16013_s3] sm:$0x3]  ;;  %v16599_v8 = vld [vmem:[#allocation42_spill] sm:$0xff]  ;;  %v16600_v54 = vld [vmem:[#allocation39_spill] sm:$0xff] }
 0xb33   : > { %4461 = vmatprep.subr.bf16.mxu1 %v10528_v7  ;;  %v13959_v26 = vrot.slane %v4261_v13, %v16599_v8 }
 0xb36   : > { %4462 = vmatpush1.bf16.msra.mxu1 %v10526_v6 }
 0xb37   : > { %4463 = vmatprep.subr.bf16.mxu1 %v10531_v14 }
 0xb3a   : > { %4464 = vmatpush1.bf16.msra.mxu1 %v10529_v33 }
 0xb3d   : > { %4466 = vmatmul.mubr.bf16.vlgmr.msra.gmra.mrb[248].mxu1 %v16563_v38 }
 0xb3e   : > { %4475 = vmatprep.mubr.bf16.mxu1 %v16564_v5 }
 0xb45   : > { %4476 = vmatmul.mubr.bf16.gmra.mrb[252].mxu1 %v16567_v60 }
 0xb46   : > { %4485 = vmatprep.mubr.bf16.mxu1 %v16568_v31  ;;  %v13962_v31 = vrot.slane %v4261_v13, %v16600_v54  ;;  %v11211_v54 = vld [vmem:[%s11743_s26 + $0x178] sm:$0xff] }
 0xb4d   : > { %4486 = vmatmul.mubr.bf16.gmra.mrb[0].mxu1 %v16571_v12 }
 0xb4e   : > { %4495 = vmatprep.mubr.bf16.mxu1 %v16572_v10  ;;  %v11164_v10 = vld [vmem:[%s11743_s26] sm:$0xff] }
 0xb55   : > { %4496 = vmatmul.mubr.bf16.gmra.mrb[4].mxu1 %v16575_v50 }
 0xb56   : > { %4505 = vmatprep.mubr.bf16.mxu1 %v16576_v57  ;;  %v11165_v57 = vld [vmem:[%s11743_s26 + $0x8] sm:$0xff] }
 0xb5d   : > { %4506 = vmatmul.mubr.bf16.gmra.mrb[8].mxu1 %v16579_v41 }
 0xb5e   : > { %4515 = vmatprep.mubr.bf16.mxu1 %v16580_v20  ;;  %v11167_v20 = vld [vmem:[%s11743_s26 + $0x18] sm:$0xff] }
 0xb65   : > { %4516 = vmatmul.mubr.bf16.gmra.mrb[12].mxu1 %v16583_v55 }
 0xb66   : > { %4525 = vmatprep.mubr.bf16.mxu1 %v16584_v32 }
 0xb6d   : > { %4526 = vmatmul.mubr.bf16.gmra.mrb[16].mxu1 %v16587_v21 }
 0xb6e   : > { %4535 = vmatprep.mubr.bf16.mxu1 %v16588_v52 }
 0xb75   : > { %4536 = vmatmul.mubr.bf16.gmra.mrb[20].mxu1 %v16591_v63 }
 0xbd0   : > { %v9940_v44 = vpop.f32.mrb[232].mxu1 }
 0xbd1   : > { %v4118_v27 = vpop.f32.mrb[233].mxu1 }
 0xbd2   : > { %v9941_v16 = vpop.f32.mrb[234].mxu1 }
 0xbd3   : > { %v4182_v56 = vpack.c.bf16 %v9941_v16, %v9940_v44  ;;  %v4121_v19 = vpop.f32.mrb[235].mxu1 }
 0xbd4   : > { %v4181_v51 = vpack.c.bf16 %v4121_v19, %v4118_v27  ;;  %v11169_v27 = vld [vmem:[%s11743_s26 + $0x28] sm:$0xff]  ;;  %v11170_v19 = vld [vmem:[%s11743_s26 + $0x30] sm:$0xff] }
 0xbd6   : > { %4545 = vmatprep.mubr.bf16.mxu1 %v4181_v51 }
 0xbd7   : > { %4546 = vmatmul.mubr.bf16.gmra.mrb[24].mxu1 %v16592_v58  ;;  %v11171_v58 = vld [vmem:[%s11743_s26 + $0x38] sm:$0xff] }
 0xbd8   : > { %v9944_v34 = vpop.f32.mrb[236].mxu1  ;;  %4555 = vmatprep.mubr.bf16.mxu1 %v4182_v56 }
 0xbd9   : > { %v4134_v49 = vpop.f32.mrb[237].mxu1 }
 0xbda   : > { %v9945_v48 = vpop.f32.mrb[238].mxu1 }
 0xbdb   : > { %v4184_v24 = vpack.c.bf16 %v9945_v48, %v9944_v34  ;;  %v4137_v28 = vpop.f32.mrb[239].mxu1 }
 0xbdc   : > { %v4183_v0 = vpack.c.bf16 %v4137_v28, %v4134_v49 }
 0xbdf   : > { %4556 = vmatmul.mubr.bf16.gmra.mrb[28].mxu1 %v16593_v1 }
 0xbe0   : > { %v9948_v7 = vpop.f32.mrb[240].mxu1  ;;  %4565 = vmatprep.mubr.bf16.mxu1 %v4183_v0 }
 0xbe1   : > { %v4150_v6 = vpop.f32.mrb[241].mxu1 }
 0xbe2   : > { %v9949_v14 = vpop.f32.mrb[242].mxu1 }
 0xbe3   : > { %v4186_v33 = vpack.c.bf16 %v9949_v14, %v9948_v7  ;;  %v4153_v22 = vpop.f32.mrb[243].mxu1 }
 0xbe4   : > { %v4185_v61 = vpack.c.bf16 %v4153_v22, %v4150_v6  ;;  %v11172_v6 = vld [vmem:[%s11743_s26 + $0x40] sm:$0xff] }
 0xbe7   : > { %4566 = vmatmul.mubr.bf16.gmra.mrb[32].mxu1 %v16594_v15 }
 0xbe8   : > { %v9952_v45 = vpop.f32.mrb[244].mxu1  ;;  %4575 = vmatprep.mubr.bf16.mxu1 %v4184_v24 }
 0xbe9   : > { %v4166_v38 = vpop.f32.mrb[245].mxu1 }
 0xbea   : > { %v9953_v5 = vpop.f32.mrb[246].mxu1 }
 0xbeb   : > { %v4188_v36 = vpack.c.bf16 %v9953_v5, %v9952_v45  ;;  %v4169_v46 = vpop.f32.mrb[247].mxu1 }
 0xbec   : > { %v4187_v60 = vpack.c.bf16 %v4169_v46, %v4166_v38  ;;  %v11174_v38 = vld [vmem:[%s11743_s26 + $0x50] sm:$0xff] }
 0xbef   : > { %4576 = vmatmul.mubr.bf16.gmra.mrb[36].mxu1 %v16595_v43 }
 0xbf0   : > { %4585 = vmatprep.mubr.bf16.mxu1 %v4185_v61  ;;  %v11173_v61 = vld [vmem:[%s11743_s26 + $0x48] sm:$0xff] }
 0xbf7   : > { %4586 = vmatmul.mubr.bf16.gmra.mrb[40].mxu1 %v16596_v62 }
 0xbf8   : > { %4595 = vmatprep.mubr.bf16.mxu1 %v4186_v33 }
 0xbff   : > { %4596 = vmatmul.mubr.bf16.gmra.mrb[44].mxu1 %v16597_v17 }
 0xc00   : > { %4605 = vmatprep.mubr.bf16.mxu1 %v4187_v60 }
 0xc07   : > { %4606 = vmatmul.mubr.bf16.gmra.mrb[48].mxu1 %v16598_v35 }
 0xc08   : > { %4615 = vmatprep.mubr.bf16.mxu1 %v4188_v36  ;;  %v11175_v36 = vld [vmem:[%s11743_s26 + $0x58] sm:$0xff] }
 0xc0f   : > { %4616 = vmatmul.mubr.bf16.gmra.mrb[52].mxu1 %v16602_v11  ;;  %v11176_v11 = vld [vmem:[%s11743_s26 + $0x60] sm:$0xff] }
 0xc10   : > { %v4467_v23 = vpop.f32.mrb[248].mxu1 }
 0xc11   : > { %v4468_v18 = vadd.f32 %v4467_v23, %v13959_v26  ;;  %v4469_v3 = vpop.f32.mrb[249].mxu1 }
 0xc12   : > { %v4470_v29 = vadd.f32 %v4469_v3, %v13962_v31  ;;  %v4471_v12 = vpop.f32.mrb[250].mxu1 }
 0xc13   : > { %v13970_v42 = vadd.f32 %v11164_v10, %v4468_v18  ;;  %v4472_v9 = vadd.f32 %v4471_v12, %v13959_v26  ;;  %v4473_v50 = vpop.f32.mrb[251].mxu1 }
 0xc14   : > { %v13974_v59 = vadd.f32 %v11165_v57, %v4470_v29  ;;  %v4474_v53 = vadd.f32 %v4473_v50, %v13962_v31  ;;  %v11177_v29 = vld [vmem:[%s11743_s26 + $0x68] sm:$0xff]  ;;  %v11179_v57 = vld [vmem:[%s11743_s26 + $0x78] sm:$0xff] }
 0xc15   : > { %16603 = vst [vmem:[#allocation50_spill] sm:$0xff] %v13970_v42  ;;  %v13978_v41 = vadd.f32 %v11166_v47, %v4472_v9  ;;  %v11178_v9 = vld [vmem:[%s11743_s26 + $0x70] sm:$0xff] }
 0xc16   : > { %16604 = vst [vmem:[#allocation48_spill] sm:$0xff] %v13974_v59  ;;  %v13981_v4 = vadd.f32 %v11167_v20, %v4474_v53  ;;  %v4690_v40 = vadd.f32 %v13974_v59, %v13970_v42 }
 0xc17   : > { %16605 = vst [vmem:[#allocation74_spill] sm:$0xff] %v13978_v41 }
 0xc18   : > { %16606 = vst [vmem:[#allocation76_spill] sm:$0xff] %v13981_v4  ;;  %v4477_v55 = vpop.f32.mrb[252].mxu1  ;;  %4691 = vadd.xlane.f32.xlu0 %v4690_v40  ;;  %v4693_v32 = vadd.f32 %v13981_v4, %v13978_v41 }
 0xc19   : > { %v4478_v30 = vadd.f32 %v4477_v55, %v13959_v26  ;;  %v4479_v37 = vpop.f32.mrb[253].mxu1 }
 0xc1a   : > { %v4480_v21 = vadd.f32 %v4479_v37, %v13962_v31  ;;  %v4481_v52 = vpop.f32.mrb[254].mxu1  ;;  %4694 = vadd.xlane.f32.xlu1 %v4693_v32 }
 0xc1b   : > { %v13990_v39 = vadd.f32 %v11168_v2, %v4478_v30  ;;  %v4482_v63 = vadd.f32 %v4481_v52, %v13959_v26  ;;  %v4483_v44 = vpop.f32.mrb[255].mxu1 }
 0xc1c   : > { %v13994_v16 = vadd.f32 %v11169_v27, %v4480_v21  ;;  %v4484_v56 = vadd.f32 %v4483_v44, %v13962_v31  ;;  %v11180_v21 = vld [vmem:[%s11743_s26 + $0x80] sm:$0xff]  ;;  %v11181_v44 = vld [vmem:[%s11743_s26 + $0x88] sm:$0xff] }
 0xc1d   : > { %16607 = vst [vmem:[#allocation54_spill] sm:$0xff] %v13990_v39  ;;  %v13998_v51 = vadd.f32 %v11170_v19, %v4482_v63  ;;  %v11182_v19 = vld [vmem:[%s11743_s26 + $0x90] sm:$0xff] }
 0xc1e   : > { %16608 = vst [vmem:[#allocation52_spill] sm:$0xff] %v13994_v16  ;;  %v14001_v34 = vadd.f32 %v11171_v58, %v4484_v56  ;;  %v4696_v49 = vadd.f32 %v13994_v16, %v13990_v39 }
 0xc1f   : > { %16609 = vst [vmem:[#allocation78_spill] sm:$0xff] %v13998_v51 }
 0xc20   : > { %16610 = vst [vmem:[#allocation79_spill] sm:$0xff] %v14001_v34  ;;  %v4487_v48 = vpop.f32.mrb[0].mxu1  ;;  %4697 = vadd.xlane.f32.xlu0 %v4696_v49  ;;  %v4699_v24 = vadd.f32 %v14001_v34, %v13998_v51  ;;  %v11183_v49 = vld [vmem:[%s11743_s26 + $0x98] sm:$0xff] }
 0xc21   : > { %v4488_v28 = vadd.f32 %v4487_v48, %v13959_v26  ;;  %v4489_v0 = vpop.f32.mrb[1].mxu1 }
 0xc22   : > { %v4490_v1 = vadd.f32 %v4489_v0, %v13962_v31  ;;  %v4491_v7 = vpop.f32.mrb[2].mxu1  ;;  %4700 = vadd.xlane.f32.xlu1 %v4699_v24 }
 0xc23   : > { %v14010_v14 = vadd.f32 %v11172_v6, %v4488_v28  ;;  %v4492_v33 = vadd.f32 %v4491_v7, %v13959_v26  ;;  %v4493_v22 = vpop.f32.mrb[3].mxu1 }
 0xc24   : > { %v14014_v15 = vadd.f32 %v11173_v61, %v4490_v1  ;;  %v4494_v45 = vadd.f32 %v4493_v22, %v13962_v31  ;;  %v11184_v22 = vld [vmem:[%s11743_s26 + $0xa0] sm:$0xff] }
 0xc25   : > { %16611 = vst [vmem:[#allocation80_spill] sm:$0xff] %v14010_v14  ;;  %v14018_v5 = vadd.f32 %v11174_v38, %v4492_v33 }
 0xc26   : > { %16612 = vst [vmem:[#allocation81_spill] sm:$0xff] %v14014_v15  ;;  %v14021_v46 = vadd.f32 %v11175_v36, %v4494_v45  ;;  %v4702_v60 = vadd.f32 %v14014_v15, %v14010_v14  ;;  %v11185_v36 = vld [vmem:[%s11743_s26 + $0xa8] sm:$0xff] }
 0xc27   : > { %16613 = vst [vmem:[#allocation82_spill] sm:$0xff] %v14018_v5 }
 0xc28   : > { %16614 = vst [vmem:[#allocation83_spill] sm:$0xff] %v14021_v46  ;;  %v4497_v43 = vpop.f32.mrb[4].mxu1  ;;  %4703 = vadd.xlane.f32.xlu0 %v4702_v60  ;;  %v4705_v62 = vadd.f32 %v14021_v46, %v14018_v5 }
 0xc29   : > { %v4498_v17 = vadd.f32 %v4497_v43, %v13959_v26  ;;  %v4499_v35 = vpop.f32.mrb[5].mxu1 }
 0xc2a   : > { %v4500_v13 = vadd.f32 %v4499_v35, %v13962_v31  ;;  %v4501_v25 = vpop.f32.mrb[6].mxu1  ;;  %4706 = vadd.xlane.f32.xlu1 %v4705_v62  ;;  %v11186_v62 = vld [vmem:[%s11743_s26 + $0xb0] sm:$0xff]  ;;  %v11187_v35 = vld [vmem:[%s11743_s26 + $0xb8] sm:$0xff] }
 0xc2b   : > { %v14030_v23 = vadd.f32 %v11176_v11, %v4498_v17  ;;  %v4502_v18 = vadd.f32 %v4501_v25, %v13959_v26  ;;  %v4503_v3 = vpop.f32.mrb[7].mxu1 }
 0xc2c   : > { %v14034_v12 = vadd.f32 %v11177_v29, %v4500_v13  ;;  %v4504_v10 = vadd.f32 %v4503_v3, %v13962_v31 }
 0xc2d   : > { %16615 = vst [vmem:[#allocation84_spill] sm:$0xff] %v14030_v23  ;;  %v14038_v50 = vadd.f32 %v11178_v9, %v4502_v18 }
 0xc2e   : > { %16616 = vst [vmem:[#allocation85_spill] sm:$0xff] %v14034_v12  ;;  %v14041_v53 = vadd.f32 %v11179_v57, %v4504_v10  ;;  %v4708_v47 = vadd.f32 %v14034_v12, %v14030_v23  ;;  %v11188_v57 = vld [vmem:[%s11743_s26 + $0xc0] sm:$0xff] }
 0xc2f   : > { %16617 = vst [vmem:[#allocation86_spill] sm:$0xff] %v14038_v50 }
 0xc30   : > { %16618 = vst [vmem:[#allocation87_spill] sm:$0xff] %v14041_v53  ;;  %v4507_v20 = vpop.f32.mrb[8].mxu1  ;;  %4709 = vadd.xlane.f32.xlu0 %v4708_v47  ;;  %v4711_v40 = vadd.f32 %v14041_v53, %v14038_v50 }
 0xc31   : > { %v4508_v55 = vadd.f32 %v4507_v20, %v13959_v26  ;;  %v4509_v32 = vpop.f32.mrb[9].mxu1 }
 0xc32   : > { %v4510_v30 = vadd.f32 %v4509_v32, %v13962_v31  ;;  %v4511_v37 = vpop.f32.mrb[10].mxu1  ;;  %4712 = vadd.xlane.f32.xlu1 %v4711_v40 }
 0xc33   : > { %v14050_v52 = vadd.f32 %v11180_v21, %v4508_v55  ;;  %v4512_v2 = vadd.f32 %v4511_v37, %v13959_v26  ;;  %v4513_v63 = vpop.f32.mrb[11].mxu1  ;;  %v11189_v55 = vld [vmem:[%s11743_s26 + $0xc8] sm:$0xff]  ;;  %v11190_v37 = vld [vmem:[%s11743_s26 + $0xd0] sm:$0xff] }
 0xc34   : > { %v14054_v27 = vadd.f32 %v11181_v44, %v4510_v30  ;;  %v4514_v56 = vadd.f32 %v4513_v63, %v13962_v31 }
 0xc35   : > { %16619 = vst [vmem:[#allocation88_spill] sm:$0xff] %v14050_v52  ;;  %v14058_v58 = vadd.f32 %v11182_v19, %v4512_v2  ;;  %v11191_v2 = vld [vmem:[%s11743_s26 + $0xd8] sm:$0xff] }
 0xc36   : > { %16620 = vst [vmem:[#allocation89_spill] sm:$0xff] %v14054_v27  ;;  %v14061_v48 = vadd.f32 %v11183_v49, %v4514_v56  ;;  %v4714_v24 = vadd.f32 %v14054_v27, %v14050_v52 }
 0xc37   : > { %16621 = vst [vmem:[#allocation90_spill] sm:$0xff] %v14058_v58 }
 0xc38   : > { %16622 = vst [vmem:[#allocation91_spill] sm:$0xff] %v14061_v48  ;;  %v4517_v28 = vpop.f32.mrb[12].mxu1  ;;  %4715 = vadd.xlane.f32.xlu0 %v4714_v24  ;;  %v4717_v0 = vadd.f32 %v14061_v48, %v14058_v58 }
 0xc39   : > { %v4518_v1 = vadd.f32 %v4517_v28, %v13959_v26  ;;  %v4519_v7 = vpop.f32.mrb[13].mxu1 }
 0xc3a   : > { %v4520_v6 = vadd.f32 %v4519_v7, %v13962_v31  ;;  %v4521_v33 = vpop.f32.mrb[14].mxu1  ;;  %4718 = vadd.xlane.f32.xlu1 %v4717_v0 }
 0xc3b   : > { %v14070_v61 = vadd.f32 %v11184_v22, %v4518_v1  ;;  %v4522_v45 = vadd.f32 %v4521_v33, %v13959_v26  ;;  %v4523_v38 = vpop.f32.mrb[15].mxu1  ;;  %v11192_v1 = vld [vmem:[%s11743_s26 + $0xe0] sm:$0xff]  ;;  %v11193_v22 = vld [vmem:[%s11743_s26 + $0xe8] sm:$0xff] }
 0xc3c   : > { %v14074_v60 = vadd.f32 %v11185_v36, %v4520_v6  ;;  %v4524_v43 = vadd.f32 %v4523_v38, %v13962_v31  ;;  %v11194_v36 = vld [vmem:[%s11743_s26 + $0xf0] sm:$0xff] }
 0xc3d   : > { %16623 = vst [vmem:[#allocation92_spill] sm:$0xff] %v14070_v61  ;;  %v14078_v17 = vadd.f32 %v11186_v62, %v4522_v45  ;;  %v11195_v62 = vld [vmem:[%s11743_s26 + $0xf8] sm:$0xff] }
 0xc3e   : > { %16624 = vst [vmem:[#allocation93_spill] sm:$0xff] %v14074_v60  ;;  %v14081_v13 = vadd.f32 %v11187_v35, %v4524_v43  ;;  %v4720_v25 = vadd.f32 %v14074_v60, %v14070_v61 }
 0xc3f   : > { %16625 = vst [vmem:[#allocation94_spill] sm:$0xff] %v14078_v17 }
 0xc40   : > { %16626 = vst [vmem:[#allocation64_spill] sm:$0xff] %v14081_v13  ;;  %v4527_v11 = vpop.f32.mrb[16].mxu1  ;;  %4721 = vadd.xlane.f32.xlu0 %v4720_v25  ;;  %v4723_v18 = vadd.f32 %v14081_v13, %v14078_v17 }
 0xc41   : > { %v4528_v3 = vadd.f32 %v4527_v11, %v13959_v26  ;;  %v4529_v29 = vpop.f32.mrb[17].mxu1 }
 0xc42   : > { %v4530_v10 = vadd.f32 %v4529_v29, %v13962_v31  ;;  %v4531_v9 = vpop.f32.mrb[18].mxu1  ;;  %4724 = vadd.xlane.f32.xlu1 %v4723_v18  ;;  %v5386_v18 = vld [vmem:[#allocation10] sm:$0xff]  ;;  %v5387_v29 = vld [vmem:[#allocation10 + $0x8] sm:$0xff] }
 0xc43   : > { %v14090_v47 = vadd.f32 %v11188_v57, %v4528_v3  ;;  %v4532_v20 = vadd.f32 %v4531_v9, %v13959_v26  ;;  %v4533_v40 = vpop.f32.mrb[19].mxu1  ;;  %v5390_v3 = vld [vmem:[#allocation10 + $0x20] sm:$0xff]  ;;  %v5391_v57 = vld [vmem:[#allocation10 + $0x28] sm:$0xff] }
 0xc44   : > { %v14094_v32 = vadd.f32 %v11189_v55, %v4530_v10  ;;  %v4534_v30 = vadd.f32 %v4533_v40, %v13962_v31  ;;  %v9304_v10 = vcombine.low %v5386_v18, %v5390_v3  ;;  %v9305_v9 = vcombine.high %v5386_v18, %v5390_v3  ;;  %v5398_v40 = vld [vmem:[#allocation10 + $0x60] sm:$0xff] }
 0xc45   : > { %16627 = vst [vmem:[#allocation65_spill] sm:$0xff] %v14090_v47  ;;  %v14098_v21 = vadd.f32 %v11190_v37, %v4532_v20  ;;  %v5394_v20 = vld [vmem:[#allocation10 + $0x40] sm:$0xff]  ;;  %v9306_v55 = vcombine.low %v5387_v29, %v5391_v57 }
 0xc46   : > { %16628 = vst [vmem:[#allocation67_spill] sm:$0xff] %v14094_v32  ;;  %v14101_v63 = vadd.f32 %v11191_v2, %v4534_v30  ;;  %v4726_v44 = vadd.f32 %v14094_v32, %v14090_v47  ;;  %v9307_v30 = vcombine.high %v5387_v29, %v5391_v57  ;;  %v9313_v37 = vcombine.high %v5394_v20, %v5398_v40  ;;  %v5395_v2 = vld [vmem:[#allocation10 + $0x48] sm:$0xff]  ;;  %v5418_v29 = vld [vmem:[#allocation10 + $0x100] sm:$0xff] }
 0xc47   : > { %16629 = vst [vmem:[#allocation69_spill] sm:$0xff] %v14098_v21  ;;  %6196 = vmatprep.subr.bf16.mxu0 %v9305_v9  ;;  %v5419_v9 = vld [vmem:[#allocation10 + $0x108] sm:$0xff] }
 0xc48   : > { %16630 = vst [vmem:[#allocation71_spill] sm:$0xff] %v14101_v63  ;;  %v4537_v56 = vpop.f32.mrb[20].mxu1  ;;  %4727 = vadd.xlane.f32.xlu0 %v4726_v44  ;;  %v4729_v19 = vadd.f32 %v14101_v63, %v14098_v21  ;;  %v5399_v44 = vld [vmem:[#allocation10 + $0x68] sm:$0xff]  ;;  %6389 = vmatprep.subr.bf16.mxu1 %v9307_v30 }
 0xc49   : > { %v4538_v49 = vadd.f32 %v4537_v56, %v13959_v26  ;;  %v4539_v24 = vpop.f32.mrb[21].mxu1  ;;  %v5402_v56 = vld [vmem:[#allocation10 + $0x80] sm:$0xff]  ;;  %6197 = vmatpush1.bf16.msra.mxu0 %v9304_v10  ;;  %6390 = vmatpush1.bf16.msra.mxu1 %v9306_v55  ;;  %v5423_v57 = vld [vmem:[#allocation10 + $0x128] sm:$0xff] }
 0xc4a   : > { %v4540_v28 = vadd.f32 %v4539_v24, %v13962_v31  ;;  %v4541_v0 = vpop.f32.mrb[22].mxu1  ;;  %4730 = vadd.xlane.f32.xlu1 %v4729_v19  ;;  %v9315_v19 = vcombine.high %v5395_v2, %v5399_v44  ;;  %v5403_v24 = vld [vmem:[#allocation10 + $0x88] sm:$0xff]  ;;  %6198 = vmatprep.subr.bf16.mxu0 %v9313_v37  ;;  %v5422_v10 = vld [vmem:[#allocation10 + $0x120] sm:$0xff]  ;;  %v9339_v30 = vcombine.high %v5419_v9, %v5423_v57 }
 0xc4b   : > { %v14110_v7 = vadd.f32 %v11192_v1, %v4538_v49  ;;  %v4542_v6 = vadd.f32 %v4541_v0, %v13959_v26  ;;  %v4543_v33 = vpop.f32.mrb[23].mxu1  ;;  %v5406_v49 = vld [vmem:[#allocation10 + $0xa0] sm:$0xff]  ;;  %v9312_v0 = vcombine.low %v5394_v20, %v5398_v40  ;;  %v9314_v1 = vcombine.low %v5395_v2, %v5399_v44  ;;  %v5427_v44 = vld [vmem:[#allocation10 + $0x148] sm:$0xff] }
 0xc4c   : > { %v14114_v45 = vadd.f32 %v11193_v22, %v4540_v28  ;;  %v4544_v38 = vadd.f32 %v4543_v33, %v13962_v31  ;;  %v5407_v28 = vld [vmem:[#allocation10 + $0xa8] sm:$0xff]  ;;  %6391 = vmatprep.subr.bf16.mxu1 %v9315_v19  ;;  %v5410_v22 = vld [vmem:[#allocation10 + $0xc0] sm:$0xff]  ;;  %v9337_v55 = vcombine.high %v5418_v29, %v5422_v10  ;;  %v9336_v19 = vcombine.low %v5418_v29, %v5422_v10 }
 0xc4d   : > { %16631 = vst [vmem:[#allocation73_spill] sm:$0xff] %v14110_v7  ;;  %v14118_v43 = vadd.f32 %v11194_v36, %v4542_v6  ;;  %v9321_v6 = vcombine.high %v5402_v56, %v5406_v49  ;;  %v9323_v33 = vcombine.high %v5403_v24, %v5407_v28  ;;  %v5411_v36 = vld [vmem:[#allocation10 + $0xc8] sm:$0xff]  ;;  %6199 = vmatpush1.bf16.msra.mxu0 %v9312_v0  ;;  %v5426_v37 = vld [vmem:[#allocation10 + $0x140] sm:$0xff] }
 0xc4e   : > { %16632 = vst [vmem:[#allocation75_spill] sm:$0xff] %v14114_v45  ;;  %v14121_v35 = vadd.f32 %v11195_v62, %v4544_v38  ;;  %v4732_v25 = vadd.f32 %v14114_v45, %v14110_v7  ;;  %v5414_v38 = vld [vmem:[#allocation10 + $0xe0] sm:$0xff]  ;;  %v5415_v62 = vld [vmem:[#allocation10 + $0xe8] sm:$0xff]  ;;  %6392 = vmatpush1.bf16.msra.mxu1 %v9314_v1 }
 0xc4f   : > { %16633 = vst [vmem:[#allocation77_spill] sm:$0xff] %v14118_v43  ;;  %6200 = vmatprep.subr.bf16.mxu0 %v9321_v6  ;;  %v9329_v18 = vcombine.high %v5410_v22, %v5414_v38  ;;  %6393 = vmatprep.subr.bf16.mxu1 %v9323_v33  ;;  %v9331_v3 = vcombine.high %v5411_v36, %v5415_v62  ;;  %v5430_v2 = vld [vmem:[#allocation10 + $0x160] sm:$0xff]  ;;  %v5435_v6 = vld [vmem:[#allocation10 + $0x188] sm:$0xff] }
 0xc50   : > { %16634 = vst [vmem:[#allocation56_spill] sm:$0xff] %v14121_v35  ;;  %4733 = vadd.xlane.f32.xlu0 %v4732_v25  ;;  %v4735_v11 = vadd.f32 %v14121_v35, %v14118_v43  ;;  %v9320_v25 = vcombine.low %v5402_v56, %v5406_v49  ;;  %v9328_v20 = vcombine.low %v5410_v22, %v5414_v38  ;;  %v5431_v56 = vld [vmem:[#allocation10 + $0x168] sm:$0xff]  ;;  %v5434_v0 = vld [vmem:[#allocation10 + $0x180] sm:$0xff] }
 0xc51   : > { %v9330_v40 = vcombine.low %v5411_v36, %v5415_v62  ;;  %v9338_v49 = vcombine.low %v5419_v9, %v5423_v57  ;;  %v5438_v1 = vld [vmem:[#allocation10 + $0x1a0] sm:$0xff]  ;;  %v5439_v33 = vld [vmem:[#allocation10 + $0x1a8] sm:$0xff]  ;;  %v9344_v22 = vcombine.low %v5426_v37, %v5430_v2  ;;  %v9346_v38 = vcombine.low %v5427_v44, %v5431_v56 }
 0xc52   : > { %4736 = vadd.xlane.f32.xlu1 %v4735_v11  ;;  %v9322_v11 = vcombine.low %v5403_v24, %v5407_v28  ;;  %6201 = vmatpush1.bf16.msra.mxu0 %v9320_v25  ;;  %v9345_v24 = vcombine.high %v5426_v37, %v5430_v2  ;;  %v9347_v28 = vcombine.high %v5427_v44, %v5431_v56  ;;  %v11196_v57 = vld [vmem:[%s11743_s26 + $0x100] sm:$0xff]  ;;  %v11197_v37 = vld [vmem:[%s11743_s26 + $0x108] sm:$0xff] }
 0xc53   : > { %6202 = vmatprep.subr.bf16.mxu0 %v9329_v18  ;;  %v9353_v36 = vcombine.high %v5434_v0, %v5438_v1  ;;  %v9355_v62 = vcombine.high %v5435_v6, %v5439_v33  ;;  %v9352_v25 = vcombine.low %v5434_v0, %v5438_v1 }
 0xc54   : > { %6394 = vmatpush1.bf16.msra.mxu1 %v9322_v11  ;;  %v9354_v11 = vcombine.low %v5435_v6, %v5439_v33 }
 0xc55   : > { %6395 = vmatprep.subr.bf16.mxu1 %v9331_v3 }
 0xc56   : > { %6203 = vmatpush1.bf16.msra.mxu0 %v9328_v20 }
 0xc57   : > { %6204 = vmatprep.subr.bf16.mxu0 %v9337_v55 }
 0xc58   : > { %6396 = vmatpush1.bf16.msra.mxu1 %v9330_v40 }
 0xc59   : > { %6397 = vmatprep.subr.bf16.mxu1 %v9339_v30 }
 0xc5a   : > { %6205 = vmatpush1.bf16.msra.mxu0 %v9336_v19  ;;  %v11198_v19 = vld [vmem:[%s11743_s26 + $0x110] sm:$0xff] }
 0xc5b   : > { %6206 = vmatprep.subr.bf16.mxu0 %v9345_v24  ;;  %v11199_v24 = vld [vmem:[%s11743_s26 + $0x118] sm:$0xff] }
 0xc5c   : > { %6398 = vmatpush1.bf16.msra.mxu1 %v9338_v49 }
 0xc5d   : > { %6399 = vmatprep.subr.bf16.mxu1 %v9347_v28 }
 0xc5e   : > { %6207 = vmatpush1.bf16.msra.mxu0 %v9344_v22 }
 0xc5f   : > { %6208 = vmatprep.subr.bf16.mxu0 %v9353_v36 }
 0xc60   : > { %6400 = vmatpush1.bf16.msra.mxu1 %v9346_v38 }
 0xc61   : > { %6401 = vmatprep.subr.bf16.mxu1 %v9355_v62 }
 0xc62   : > { %6209 = vmatpush1.bf16.msra.mxu0 %v9352_v25 }
 0xc64   : > { %6402 = vmatpush1.bf16.msra.mxu1 %v9354_v11 }
 0xca5   : > { %v4692_v30 = vpop.xlane.xlu0 %4691 }
 0xca6   : > { %v4786_v0 = vmul.f32 0.00390625, %v4692_v30  ;;  %v11201_v30 = vld [vmem:[%s11743_s26 + $0x128] sm:$0xff] }
 0xca7   : > { %v4695_v56 = vpop.xlane.xlu1 %4694 }
 0xca8   : > { %v4787_v6 = vmul.f32 0.00390625, %v4695_v56 }
 0xcaa   : > { %v4547_v18 = vpop.f32.mrb[24].mxu1  ;;  %v14167_v56 = vsub.f32 %v13981_v4, %v4787_v6 }
 0xcab   : > { %v4548_v3 = vadd.f32 %v4547_v18, %v13959_v26  ;;  %v4549_v29 = vpop.f32.mrb[25].mxu1  ;;  %v14150_v18 = vsub.f32 %v13970_v42, %v4786_v0 }
 0xcac   : > { %v4550_v10 = vadd.f32 %v4549_v29, %v13962_v31  ;;  %v4551_v9 = vpop.f32.mrb[26].mxu1  ;;  %16644 = vst [vmem:[#allocation33_spill] sm:$0xff] %v14167_v56 }
 0xcad   : > { %v14130_v20 = vadd.f32 %v11196_v57, %v4548_v3  ;;  %v4552_v40 = vadd.f32 %v4551_v9, %v13959_v26  ;;  %v4553_v55 = vpop.f32.mrb[27].mxu1  ;;  %v4698_v62 = vpop.xlane.xlu0 %4697  ;;  %16639 = vst [vmem:[#allocation61_spill] sm:$0xff] %v14150_v18  ;;  %v14153_v3 = vsub.f32 %v13974_v59, %v4786_v0 }
 0xcae   : > { %v14134_v2 = vadd.f32 %v11197_v37, %v4550_v10  ;;  %v4554_v44 = vadd.f32 %v4553_v55, %v13962_v31  ;;  %v11200_v10 = vld [vmem:[%s11743_s26 + $0x120] sm:$0xff]  ;;  %v14160_v55 = vsub.f32 %v13978_v41, %v4787_v6 }
 0xcaf   : > { %16635 = vst [vmem:[#allocation57_spill] sm:$0xff] %v14130_v20  ;;  %v14138_v49 = vadd.f32 %v11198_v19, %v4552_v40  ;;  %16640 = vst [vmem:[#allocation62_spill] sm:$0xff] %v14153_v3  ;;  %v4701_v29 = vpop.xlane.xlu1 %4700  ;;  %v4788_v19 = vmul.f32 0.00390625, %v4698_v62 }
 0xcb0   : > { %16636 = vst [vmem:[#allocation58_spill] sm:$0xff] %v14134_v2  ;;  %v14141_v28 = vadd.f32 %v11199_v24, %v4554_v44  ;;  %v4738_v1 = vadd.f32 %v14134_v2, %v14130_v20  ;;  %16642 = vst [vmem:[#allocation31_spill] sm:$0xff] %v14160_v55  ;;  %v11202_v24 = vld [vmem:[%s11743_s26 + $0x130] sm:$0xff]  ;;  %v4884_v6 = vmul.f32 %v14160_v55, %v14160_v55 }
 0xcb1   : > { %16637 = vst [vmem:[#allocation59_spill] sm:$0xff] %v14138_v49  ;;  %v11206_v55 = vld [vmem:[%s11743_s26 + $0x150] sm:$0xff] }
 0xcb2   : > { %16638 = vst [vmem:[#allocation60_spill] sm:$0xff] %v14141_v28  ;;  %v4557_v33 = vpop.f32.mrb[28].mxu1  ;;  %4739 = vadd.xlane.f32.xlu0 %v4738_v1  ;;  %v4741_v36 = vadd.f32 %v14141_v28, %v14138_v49  ;;  %v4789_v1 = vmul.f32 0.00390625, %v4701_v29  ;;  %v14186_v29 = vsub.f32 %v13990_v39, %v4788_v19 }
 0xcb3   : > { %v4558_v22 = vadd.f32 %v4557_v33, %v13959_v26  ;;  %v4559_v38 = vpop.f32.mrb[29].mxu1  ;;  %v11203_v33 = vld [vmem:[%s11743_s26 + $0x138] sm:$0xff] }
 0xcb4   : > { %v4560_v25 = vadd.f32 %v4559_v38, %v13962_v31  ;;  %v4561_v11 = vpop.f32.mrb[30].mxu1  ;;  %4742 = vadd.xlane.f32.xlu1 %v4741_v36  ;;  %v4882_v38 = vmul.f32 %v14150_v18, %v14150_v18  ;;  %v4883_v36 = vmul.f32 %v14153_v3, %v14153_v3  ;;  %16647 = vst [vmem:[#allocation34_spill] sm:$0xff] %v14186_v29  ;;  %v5454_v18 = vld [vmem:[#allocation10 + $0x220] sm:$0xff] }
 0xcb5   : > { %v14156_v9 = vadd.f32 %v11200_v10, %v4558_v22  ;;  %v4562_v57 = vadd.f32 %v4561_v11, %v13959_v26  ;;  %v4563_v40 = vpop.f32.mrb[31].mxu1  ;;  %v4885_v11 = vmul.f32 %v14167_v56, %v14167_v56  ;;  %v4704_v10 = vpop.xlane.xlu0 %4703 }
 0xcb6   : > { %v14163_v37 = vadd.f32 %v11201_v30, %v4560_v25  ;;  %v4564_v44 = vadd.f32 %v4563_v40, %v13962_v31  ;;  %v4790_v42 = vmul.f32 0.00390625, %v4704_v10 }
 0xcb7   : > { %16641 = vst [vmem:[#allocation63_spill] sm:$0xff] %v14156_v9  ;;  %v14170_v0 = vadd.f32 %v11202_v24, %v4562_v57  ;;  %v14195_v24 = vsub.f32 %v13998_v51, %v4789_v1  ;;  %v4707_v39 = vpop.xlane.xlu1 %4706  ;;  %v11205_v51 = vld [vmem:[%s11743_s26 + $0x148] sm:$0xff] }
 0xcb8   : > { %16643 = vst [vmem:[#allocation29_spill] sm:$0xff] %v14163_v37  ;;  %v14173_v22 = vadd.f32 %v11203_v33, %v4564_v44  ;;  %v4744_v25 = vadd.f32 %v14163_v37, %v14156_v9  ;;  %v14192_v44 = vsub.f32 %v13994_v16, %v4788_v19  ;;  %v14198_v33 = vsub.f32 %v14001_v34, %v4789_v1 }
 0xcb9   : > { %16645 = vst [vmem:[#allocation30_spill] sm:$0xff] %v14170_v0  ;;  %16649 = vst [vmem:[#allocation37_spill] sm:$0xff] %v14195_v24  ;;  %v4946_v16 = vadd.f32 %v4883_v36, %v4882_v38  ;;  %v4886_v34 = vmul.f32 %v14186_v29, %v14186_v29  ;;  %v4888_v38 = vmul.f32 %v14195_v24, %v14195_v24  ;;  %v5447_v29 = vld [vmem:[#allocation10 + $0x1e8] sm:$0xff] }
 0xcba   : > { %16646 = vst [vmem:[#allocation32_spill] sm:$0xff] %v14173_v22  ;;  %v4567_v62 = vpop.f32.mrb[32].mxu1  ;;  %4745 = vadd.xlane.f32.xlu0 %v4744_v25  ;;  %v4747_v30 = vadd.f32 %v14173_v22, %v14170_v0  ;;  %16648 = vst [vmem:[#allocation41_spill] sm:$0xff] %v14192_v44  ;;  %v11204_v25 = vld [vmem:[%s11743_s26 + $0x140] sm:$0xff] }
 0xcbb   : > { %v4568_v57 = vadd.f32 %v4567_v62, %v13959_v26  ;;  %v4569_v40 = vpop.f32.mrb[33].mxu1  ;;  %16650 = vst [vmem:[#allocation20_spill] sm:$0xff] %v14198_v33 }
 0xcbc   : > { %v4570_v4 = vadd.f32 %v4569_v40, %v13962_v31  ;;  %v4571_v62 = vpop.f32.mrb[34].mxu1  ;;  %4748 = vadd.xlane.f32.xlu1 %v4747_v30  ;;  %v4791_v40 = vmul.f32 0.00390625, %v4707_v39  ;;  %v4887_v30 = vmul.f32 %v14192_v44, %v14192_v44 }
 0xcbd   : > { %v14202_v41 = vadd.f32 %v11204_v25, %v4568_v57  ;;  %v4572_v59 = vadd.f32 %v4571_v62, %v13959_v26  ;;  %v4573_v19 = vpop.f32.mrb[35].mxu1  ;;  %v4949_v57 = vadd.f32 %v4885_v11, %v4884_v6 }
 0xcbe   : > { %v14206_v56 = vadd.f32 %v11205_v51, %v4570_v4  ;;  %v4574_v1 = vadd.f32 %v4573_v19, %v13962_v31  ;;  %4947 = vadd.xlane.f32.xlu0 %v4946_v16  ;;  %v4889_v4 = vmul.f32 %v14198_v33, %v14198_v33  ;;  %v11207_v51 = vld [vmem:[%s11743_s26 + $0x158] sm:$0xff]  ;;  %v14229_v16 = vsub.f32 %v14014_v15, %v4790_v42  ;;  %v5442_v15 = vld [vmem:[#allocation10 + $0x1c0] sm:$0xff] }
 0xcbf   : > { %16651 = vst [vmem:[#allocation43_spill] sm:$0xff] %v14202_v41  ;;  %v14212_v3 = vadd.f32 %v11206_v55, %v4572_v59  ;;  %v14226_v59 = vsub.f32 %v14010_v14, %v4790_v42  ;;  %v4710_v55 = vpop.xlane.xlu0 %4709  ;;  %v14232_v11 = vsub.f32 %v14018_v5, %v4791_v40  ;;  %v14238_v19 = vsub.f32 %v14021_v46, %v4791_v40  ;;  %v5446_v14 = vld [vmem:[#allocation10 + $0x1e0] sm:$0xff]  ;;  %v4713_v33 = vpop.xlane.xlu1 %4712  ;;  %v5443_v46 = vld [vmem:[#allocation10 + $0x1c8] sm:$0xff] }
 0xcc0   : > { %16652 = vst [vmem:[#allocation47_spill] sm:$0xff] %v14206_v56  ;;  %v14221_v36 = vadd.f32 %v11207_v51, %v4574_v1  ;;  %4950 = vadd.xlane.f32.xlu1 %v4949_v57  ;;  %v4750_v39 = vadd.f32 %v14206_v56, %v14202_v41  ;;  %16656 = vst [vmem:[#allocation55_spill] sm:$0xff] %v14229_v16  ;;  %v4952_v57 = vadd.f32 %v4887_v30, %v4886_v34 }
 0xcc1   : > { %16653 = vst [vmem:[#allocation45_spill] sm:$0xff] %v14212_v3  ;;  %16655 = vst [vmem:[#allocation49_spill] sm:$0xff] %v14226_v59  ;;  %v4955_v51 = vadd.f32 %v4889_v4, %v4888_v38  ;;  %v4792_v5 = vmul.f32 0.00390625, %v4710_v55  ;;  %v9361_v40 = vcombine.high %v5442_v15, %v5446_v14  ;;  %v4890_v34 = vmul.f32 %v14226_v59, %v14226_v59  ;;  %v11209_v38 = vld [vmem:[%s11743_s26 + $0x168] sm:$0xff] }
 0xcc2   : > { %16654 = vst [vmem:[#allocation51_spill] sm:$0xff] %v14221_v36  ;;  %v4577_v6 = vpop.f32.mrb[36].mxu1  ;;  %16657 = vst [vmem:[#allocation53_spill] sm:$0xff] %v14232_v11  ;;  %4751 = vadd.xlane.f32.xlu0 %v4750_v39  ;;  %v4753_v25 = vadd.f32 %v14221_v36, %v14212_v3  ;;  %v4891_v30 = vmul.f32 %v14229_v16, %v14229_v16  ;;  %v4893_v59 = vmul.f32 %v14238_v19, %v14238_v19 }
 0xcc3   : > { %v4578_v10 = vadd.f32 %v4577_v6, %v13959_v26  ;;  %v4579_v62 = vpop.f32.mrb[37].mxu1  ;;  %16658 = vst [vmem:[#allocation27_spill] sm:$0xff] %v14238_v19  ;;  %v11208_v6 = vld [vmem:[%s11743_s26 + $0x160] sm:$0xff]  ;;  %6210 = vmatprep.subr.bf16.mxu0 %v9361_v40  ;;  %v4793_v16 = vmul.f32 0.00390625, %v4713_v33  ;;  %v5451_v19 = vld [vmem:[#allocation10 + $0x208] sm:$0xff] }
 0xcc4   : > { %v4580_v1 = vadd.f32 %v4579_v62, %v13962_v31  ;;  %v4581_v42 = vpop.f32.mrb[38].mxu1  ;;  %4754 = vadd.xlane.f32.xlu1 %v4753_v25  ;;  %v11210_v62 = vld [vmem:[%s11743_s26 + $0x170] sm:$0xff]  ;;  %v4958_v40 = vadd.f32 %v4891_v30, %v4890_v34 }
 0xcc5   : > { %v14242_v39 = vadd.f32 %v11208_v6, %v4578_v10  ;;  %v4582_v24 = vadd.f32 %v4581_v42, %v13959_v26  ;;  %v4583_v44 = vpop.f32.mrb[39].mxu1  ;;  %v4892_v10 = vmul.f32 %v14232_v11, %v14232_v11  ;;  %v9360_v42 = vcombine.low %v5442_v15, %v5446_v14  ;;  %v5450_v6 = vld [vmem:[#allocation10 + $0x200] sm:$0xff]  ;;  %v4716_v33 = vpop.xlane.xlu0 %4715  ;;  %v5463_v11 = vld [vmem:[#allocation10 + $0x268] sm:$0xff] }
 0xcc6   : > { %v14250_v4 = vadd.f32 %v11209_v38, %v4580_v1  ;;  %v4584_v55 = vadd.f32 %v4583_v44, %v13962_v31  ;;  %4953 = vadd.xlane.f32.xlu0 %v4952_v57  ;;  %v9362_v38 = vcombine.low %v5443_v46, %v5447_v29  ;;  %v14264_v44 = vsub.f32 %v14030_v23, %v4792_v5 }
 0xcc7   : > { %16659 = vst [vmem:[#allocation25_spill] sm:$0xff] %v14242_v39  ;;  %v14256_v25 = vadd.f32 %v11210_v62, %v4582_v24  ;;  %v9363_v57 = vcombine.high %v5443_v46, %v5447_v29  ;;  %6211 = vmatpush1.bf16.msra.mxu0 %v9360_v42  ;;  %v14269_v14 = vsub.f32 %v14034_v12, %v4792_v5  ;;  %v5455_v46 = vld [vmem:[#allocation10 + $0x228] sm:$0xff] }
 0xcc8   : > { %16660 = vst [vmem:[#allocation22_spill] sm:$0xff] %v14250_v4  ;;  %v14261_v1 = vadd.f32 %v11211_v54, %v4584_v55  ;;  %16663 = vst [vmem:[#allocation28_spill] sm:$0xff] %v14264_v44  ;;  %4956 = vadd.xlane.f32.xlu1 %v4955_v51  ;;  %v4756_v24 = vadd.f32 %v14250_v4, %v14242_v39  ;;  %v9368_v62 = vcombine.low %v5450_v6, %v5454_v18 }
 0xcc9   : > { %16661 = vst [vmem:[#allocation23_spill] sm:$0xff] %v14256_v25  ;;  %16664 = vst [vmem:[#allocation26_spill] sm:$0xff] %v14269_v14  ;;  %6403 = vmatprep.subr.bf16.mxu1 %v9363_v57  ;;  %v9369_v23 = vcombine.high %v5450_v6, %v5454_v18  ;;  %v14275_v29 = vsub.f32 %v14038_v50, %v4793_v16  ;;  %v14278_v5 = vsub.f32 %v14041_v53, %v4793_v16  ;;  %v4719_v18 = vpop.xlane.xlu1 %4718  ;;  %v11212_v6 = vld [vmem:[%s11743_s26 + $0x180] sm:$0xff] }
 0xcca   : > { %16662 = vst [vmem:[#allocation66_spill] sm:$0xff] %v14261_v1  ;;  %v4587_v15 = vpop.f32.mrb[40].mxu1  ;;  %4757 = vadd.xlane.f32.xlu0 %v4756_v24  ;;  %v4759_v51 = vadd.f32 %v14261_v1, %v14256_v25  ;;  %v4961_v42 = vadd.f32 %v4893_v59, %v4892_v10  ;;  %6404 = vmatpush1.bf16.msra.mxu1 %v9362_v38  ;;  %v5458_v24 = vld [vmem:[#allocation10 + $0x240] sm:$0xff]  ;;  %v4794_v53 = vmul.f32 0.00390625, %v4716_v33 }
 0xccb   : > { %v4588_v54 = vadd.f32 %v4587_v15, %v13959_v26  ;;  %v4589_v55 = vpop.f32.mrb[41].mxu1  ;;  %16665 = vst [vmem:[#allocation24_spill] sm:$0xff] %v14275_v29  ;;  %16666 = vst [vmem:[#allocation44_spill] sm:$0xff] %v14278_v5  ;;  %v5462_v15 = vld [vmem:[#allocation10 + $0x260] sm:$0xff]  ;;  %v4894_v57 = vmul.f32 %v14264_v44, %v14264_v44  ;;  %6212 = vmatprep.subr.bf16.mxu0 %v9369_v23  ;;  %v9370_v38 = vcombine.low %v5451_v19, %v5455_v46  ;;  %v5459_v44 = vld [vmem:[#allocation10 + $0x248] sm:$0xff] }
 0xccc   : > { %v4590_v34 = vadd.f32 %v4589_v55, %v13962_v31  ;;  %v4591_v30 = vpop.f32.mrb[42].mxu1  ;;  %4760 = vadd.xlane.f32.xlu1 %v4759_v51  ;;  %v11213_v55 = vld [vmem:[%s11743_s26 + $0x188] sm:$0xff]  ;;  %6213 = vmatpush1.bf16.msra.mxu0 %v9368_v62  ;;  %v9371_v51 = vcombine.high %v5451_v19, %v5455_v46  ;;  %v9377_v23 = vcombine.high %v5458_v24, %v5462_v15 }
 0xccd   : > { %v14284_v12 = vadd.f32 %v11212_v6, %v4588_v54  ;;  %v4592_v50 = vadd.f32 %v4591_v30, %v13959_v26  ;;  %v4593_v16 = vpop.f32.mrb[43].mxu1  ;;  %v4895_v54 = vmul.f32 %v14269_v14, %v14269_v14  ;;  %v11214_v6 = vld [vmem:[%s11743_s26 + $0x190] sm:$0xff]  ;;  %v4896_v33 = vmul.f32 %v14275_v29, %v14275_v29 }
 0xcce   : > { %v14288_v59 = vadd.f32 %v11213_v55, %v4590_v34  ;;  %v4594_v10 = vadd.f32 %v4593_v16, %v13962_v31  ;;  %4959 = vadd.xlane.f32.xlu0 %v4958_v40  ;;  %v4897_v34 = vmul.f32 %v14278_v5, %v14278_v5  ;;  %v4795_v30 = vmul.f32 0.00390625, %v4719_v18  ;;  %v11215_v16 = vld [vmem:[%s11743_s26 + $0x198] sm:$0xff]  ;;  %6405 = vmatprep.subr.bf16.mxu1 %v9371_v51 }
 0xccf   : > { %16667 = vst [vmem:[#allocation36_spill] sm:$0xff] %v14284_v12  ;;  %v14294_v1 = vadd.f32 %v11214_v6, %v4592_v50  ;;  %v9376_v50 = vcombine.low %v5458_v24, %v5462_v15  ;;  %v9379_v6 = vcombine.high %v5459_v44, %v5463_v11  ;;  %v14306_v19 = vsub.f32 %v14050_v52, %v4794_v53  ;;  %v5466_v24 = vld [vmem:[#allocation10 + $0x280] sm:$0xff] }
 0xcd0   : > { %16668 = vst [vmem:[#allocation35_spill] sm:$0xff] %v14288_v59  ;;  %v14301_v62 = vadd.f32 %v11215_v16, %v4594_v10  ;;  %4962 = vadd.xlane.f32.xlu1 %v4961_v42  ;;  %v4762_v55 = vadd.f32 %v14288_v59, %v14284_v12  ;;  %v14309_v40 = vsub.f32 %v14054_v27, %v4794_v53  ;;  %v5467_v16 = vld [vmem:[#allocation10 + $0x288] sm:$0xff] }
 0xcd1   : > { %16669 = vst [vmem:[#allocation68_spill] sm:$0xff] %v14294_v1  ;;  %16671 = vst [vmem:[#allocation70_spill] sm:$0xff] %v14306_v19  ;;  %6406 = vmatpush1.bf16.msra.mxu1 %v9370_v38  ;;  %v9378_v5 = vcombine.low %v5459_v44, %v5463_v11  ;;  %6214 = vmatprep.subr.bf16.mxu0 %v9377_v23  ;;  %v14315_v15 = vsub.f32 %v14058_v58, %v4795_v30  ;;  %v5470_v38 = vld [vmem:[#allocation10 + $0x2a0] sm:$0xff] }
 0xcd2   : > { %16670 = vst [vmem:[#allocation46_spill] sm:$0xff] %v14301_v62  ;;  %16672 = vst [vmem:[#allocation72_spill] sm:$0xff] %v14309_v40  ;;  %v4597_v46 = vpop.f32.mrb[44].mxu1  ;;  %4763 = vadd.xlane.f32.xlu0 %v4762_v55  ;;  %v4765_v10 = vadd.f32 %v14301_v62, %v14294_v1  ;;  %v14318_v51 = vsub.f32 %v14061_v48, %v4795_v30  ;;  %v4964_v44 = vadd.f32 %v4895_v54, %v4894_v57  ;;  %v5471_v55 = vld [vmem:[#allocation10 + $0x2a8] sm:$0xff] }
 0xcd3   : > { %v4598_v18 = vadd.f32 %v4597_v46, %v13959_v26  ;;  %v4599_v42 = vpop.f32.mrb[45].mxu1  ;;  %16673 = vst [vmem:[#allocation40_spill] sm:$0xff] %v14315_v15  ;;  %6407 = vmatprep.subr.bf16.mxu1 %v9379_v6  ;;  %v11216_v46 = vld [vmem:[%s11743_s26 + $0x1a0] sm:$0xff]  ;;  %v4967_v52 = vadd.f32 %v4897_v34, %v4896_v33  ;;  %6215 = vmatpush1.bf16.msra.mxu0 %v9376_v50  ;;  %v11217_v54 = vld [vmem:[%s11743_s26 + $0x1a8] sm:$0xff]  ;;  %v11218_v33 = vld [vmem:[%s11743_s26 + $0x1b0] sm:$0xff] }
 0xcd4   : > { %16674 = vst [vmem:[#allocation21_spill] sm:$0xff] %v14318_v51  ;;  %v4600_v53 = vadd.f32 %v4599_v42, %v13962_v31  ;;  %v4601_v11 = vpop.f32.mrb[46].mxu1  ;;  %4766 = vadd.xlane.f32.xlu1 %v4765_v10  ;;  %v4898_v30 = vmul.f32 %v14306_v19, %v14306_v19  ;;  %v4899_v57 = vmul.f32 %v14309_v40, %v14309_v40  ;;  %v4722_v10 = vpop.xlane.xlu0 %4721 }
 0xcd5   : > { %v14322_v27 = vadd.f32 %v11216_v46, %v4598_v18  ;;  %v4602_v23 = vadd.f32 %v4601_v11, %v13959_v26  ;;  %v4603_v58 = vpop.f32.mrb[47].mxu1  ;;  %6408 = vmatpush1.bf16.msra.mxu1 %v9378_v5  ;;  %v14333_v18 = vld [vmem:[#allocation10 + $0x2c0] sm:$0xff]  ;;  %v9384_v50 = vcombine.low %v5466_v24, %v5470_v38  ;;  %v9385_v46 = vcombine.high %v5466_v24, %v5470_v38  ;;  %v11219_v5 = vld [vmem:[%s11743_s26 + $0x1b8] sm:$0xff]  ;;  %v5479_v38 = vld [vmem:[#allocation10 + $0x2e8] sm:$0xff] }
 0xcd6   : > { %v14330_v6 = vadd.f32 %v11217_v54, %v4600_v53  ;;  %v4604_v42 = vadd.f32 %v4603_v58, %v13962_v31  ;;  %v14335_v11 = vld [vmem:[#allocation10 + $0x2e0] sm:$0xff]  ;;  %4965 = vadd.xlane.f32.xlu0 %v4964_v44  ;;  %v9387_v48 = vcombine.high %v5467_v16, %v5471_v55  ;;  %v4900_v40 = vmul.f32 %v14315_v15, %v14315_v15  ;;  %v4725_v58 = vpop.xlane.xlu1 %4724  ;;  %v5475_v44 = vld [vmem:[#allocation10 + $0x2c8] sm:$0xff] }
 0xcd7   : > { %16675 = vst [vmem:[#allocation95_spill] sm:$0xff] %v14322_v27  ;;  %v14338_v34 = vadd.f32 %v11218_v33, %v4602_v23  ;;  %v4901_v53 = vmul.f32 %v14318_v51, %v14318_v51  ;;  %v9386_v19 = vcombine.low %v5467_v16, %v5471_v55  ;;  %6216 = vmatprep.subr.bf16.mxu0 %v9385_v46  ;;  %v4796_v33 = vmul.f32 0.00390625, %v4722_v10 }
 0xcd8   : > { %16676 = vst [vmem:[#allocation96_spill] sm:$0xff] %v14330_v6  ;;  %v14345_v54 = vadd.f32 %v11219_v5, %v4604_v42  ;;  %4968 = vadd.xlane.f32.xlu1 %v4967_v52  ;;  %v4768_v23 = vadd.f32 %v14330_v6, %v14322_v27  ;;  %v9393_v24 = vcombine.high %v14333_v18, %v14335_v11  ;;  %v4797_v29 = vmul.f32 0.00390625, %v4725_v58  ;;  %v5482_v58 = vld [vmem:[#allocation10 + $0x300] sm:$0xff]  ;;  %v4728_v14 = vpop.xlane.xlu0 %4727 }
 0xcd9   : > { %16677 = vst [vmem:[#allocation97_spill] sm:$0xff] %v14338_v34  ;;  %6409 = vmatprep.subr.bf16.mxu1 %v9387_v48  ;;  %v4970_v16 = vadd.f32 %v4899_v57, %v4898_v30  ;;  %6217 = vmatpush1.bf16.msra.mxu0 %v9384_v50  ;;  %v4973_v51 = vadd.f32 %v4901_v53, %v4900_v40 }
 0xcda   : > { %16678 = vst [vmem:[#allocation98_spill] sm:$0xff] %v14345_v54  ;;  %v4607_v15 = vpop.f32.mrb[48].mxu1  ;;  %4769 = vadd.xlane.f32.xlu0 %v4768_v23  ;;  %v4771_v52 = vadd.f32 %v14345_v54, %v14338_v34  ;;  %6410 = vmatpush1.bf16.msra.mxu1 %v9386_v19  ;;  %v9392_v48 = vcombine.low %v14333_v18, %v14335_v11  ;;  %v5486_v23 = vld [vmem:[#allocation10 + $0x320] sm:$0xff]  ;;  %v11221_v18 = vld [vmem:[%s11743_s26 + $0x1c8] sm:$0xff] }
 0xcdb   : > { %v4608_v42 = vadd.f32 %v4607_v15, %v13959_v26  ;;  %v4609_v5 = vpop.f32.mrb[49].mxu1  ;;  %v9394_v10 = vcombine.low %v5475_v44, %v5479_v38  ;;  %v11220_v15 = vld [vmem:[%s11743_s26 + $0x1c0] sm:$0xff]  ;;  %6218 = vmatprep.subr.bf16.mxu0 %v9393_v24  ;;  %v9395_v50 = vcombine.high %v5475_v44, %v5479_v38  ;;  %v14362_v19 = vsub.f32 %v14070_v61, %v4796_v33 }
 0xcdc   : > { %v4610_v55 = vadd.f32 %v4609_v5, %v13962_v31  ;;  %v4611_v46 = vpop.f32.mrb[50].mxu1  ;;  %4772 = vadd.xlane.f32.xlu1 %v4771_v52  ;;  %v14365_v40 = vsub.f32 %v14074_v60, %v4796_v33  ;;  %v5487_v5 = vld [vmem:[#allocation10 + $0x328] sm:$0xff]  ;;  %v14372_v52 = vsub.f32 %v14078_v17, %v4797_v29  ;;  %v9401_v44 = vcombine.high %v5482_v58, %v5486_v23  ;;  %v5498_v60 = vld [vmem:[#allocation10 + $0x380] sm:$0xff] }
 0xcdd   : > { %v14358_v6 = vadd.f32 %v11220_v15, %v4608_v42  ;;  %v4612_v30 = vadd.f32 %v4611_v46, %v13959_v26  ;;  %v4613_v57 = vpop.f32.mrb[51].mxu1  ;;  %16680 = vst [vmem:[#allocation100_spill] sm:$0xff] %v14362_v19  ;;  %v5483_v42 = vld [vmem:[#allocation10 + $0x308] sm:$0xff]  ;;  %v11222_v46 = vld [vmem:[%s11743_s26 + $0x1d0] sm:$0xff]  ;;  %6411 = vmatprep.subr.bf16.mxu1 %v9395_v50  ;;  %v14378_v38 = vsub.f32 %v14081_v13, %v4797_v29  ;;  %v4798_v33 = vmul.f32 0.00390625, %v4728_v14  ;;  %v11223_v15 = vld [vmem:[%s11743_s26 + $0x1d8] sm:$0xff]  ;;  %v4734_v13 = vpop.xlane.xlu0 %4733 }
 0xcde   : > { %16681 = vst [vmem:[#allocation101_spill] sm:$0xff] %v14365_v40  ;;  %v14368_v11 = vadd.f32 %v11221_v18, %v4610_v55  ;;  %v4614_v53 = vadd.f32 %v4613_v57, %v13962_v31  ;;  %16683 = vst [vmem:[#allocation103_spill] sm:$0xff] %v14372_v52  ;;  %4971 = vadd.xlane.f32.xlu0 %v4970_v16  ;;  %6219 = vmatpush1.bf16.msra.mxu0 %v9392_v48  ;;  %v5490_v16 = vld [vmem:[#allocation10 + $0x340] sm:$0xff]  ;;  %v4731_v48 = vpop.xlane.xlu1 %4730 }
 0xcdf   : > { %16679 = vst [vmem:[#allocation99_spill] sm:$0xff] %v14358_v6  ;;  %v14375_v24 = vadd.f32 %v11222_v46, %v4612_v30  ;;  %16685 = vst [vmem:[#allocation105_spill] sm:$0xff] %v14378_v38  ;;  %6412 = vmatpush1.bf16.msra.mxu1 %v9394_v10  ;;  %v9400_v57 = vcombine.low %v5482_v58, %v5486_v23  ;;  %6220 = vmatprep.subr.bf16.mxu0 %v9401_v44  ;;  %v5494_v50 = vld [vmem:[#allocation10 + $0x360] sm:$0xff] }
 0xce0   : > { %16682 = vst [vmem:[#allocation102_spill] sm:$0xff] %v14368_v11  ;;  %v14381_v55 = vadd.f32 %v11223_v15, %v4614_v53  ;;  %4974 = vadd.xlane.f32.xlu1 %v4973_v51  ;;  %v4774_v18 = vadd.f32 %v14368_v11, %v14358_v6  ;;  %v9402_v30 = vcombine.low %v5483_v42, %v5487_v5  ;;  %v5502_v61 = vld [vmem:[#allocation10 + $0x3a0] sm:$0xff] }
 0xce1   : > { %16684 = vst [vmem:[#allocation104_spill] sm:$0xff] %v14375_v24  ;;  %v9403_v46 = vcombine.high %v5483_v42, %v5487_v5  ;;  %v14387_v29 = vmul.f32 %v14362_v19, %v14362_v19  ;;  %v14391_v14 = vmul.f32 %v14365_v40, %v14365_v40  ;;  %v14395_v51 = vmul.f32 %v14372_v52, %v14372_v52  ;;  %v5491_v42 = vld [vmem:[#allocation10 + $0x348] sm:$0xff]  ;;  %v5510_v6 = vld [vmem:[#allocation10 + $0x3e0] sm:$0xff] }
 0xce2   : > { %16686 = vst [vmem:[#allocation106_spill] sm:$0xff] %v14381_v55  ;;  %v4617_v10 = vpop.f32.mrb[52].mxu1  ;;  %4775 = vadd.xlane.f32.xlu0 %v4774_v18  ;;  %v4777_v53 = vadd.f32 %v14381_v55, %v14375_v24  ;;  %v5495_v5 = vld [vmem:[#allocation10 + $0x368] sm:$0xff]  ;;  %v14402_v44 = vmul.f32 %v14378_v38, %v14378_v38  ;;  %v14405_v15 = vsub.f32 %v14090_v47, %v4798_v33  ;;  %v4799_v52 = vmul.f32 0.00390625, %v4731_v48 }
 0xce3   : > { %v4618_v58 = vadd.f32 %v4617_v10, %v13959_v26  ;;  %v4619_v23 = vpop.f32.mrb[53].mxu1  ;;  %6413 = vmatprep.subr.bf16.mxu1 %v9403_v46  ;;  %6221 = vmatpush1.bf16.msra.mxu0 %v9400_v57  ;;  %v9408_v18 = vcombine.low %v5490_v16, %v5494_v50  ;;  %v11224_v46 = vld [vmem:[%s11743_s26 + $0x1e0] sm:$0xff]  ;;  %v9409_v47 = vcombine.high %v5490_v16, %v5494_v50  ;;  %v5499_v55 = vld [vmem:[#allocation10 + $0x388] sm:$0xff]  ;;  %v11227_v50 = vld [vmem:[%s11743_s26 + $0x1f8] sm:$0xff] }
 0xce4   : > { %v4620_v17 = vadd.f32 %v4619_v23, %v13962_v31  ;;  %v4621_v10 = vpop.f32.mrb[54].mxu1  ;;  %4778 = vadd.xlane.f32.xlu1 %v4777_v53  ;;  %6414 = vmatpush1.bf16.msra.mxu1 %v9402_v30  ;;  %v5503_v23 = vld [vmem:[#allocation10 + $0x3a8] sm:$0xff]  ;;  %v14413_v24 = vsub.f32 %v14094_v32, %v4798_v33  ;;  %v11226_v53 = vld [vmem:[%s11743_s26 + $0x1f0] sm:$0xff]  ;;  %v9411_v30 = vcombine.high %v5491_v42, %v5495_v5 }
 0xce5   : > { %v14409_v40 = vadd.f32 %v11224_v46, %v4618_v58  ;;  %v4622_v19 = vadd.f32 %v4621_v10, %v13959_v26  ;;  %v4623_v38 = vpop.f32.mrb[55].mxu1  ;;  %v11225_v57 = vld [vmem:[%s11743_s26 + $0x1e8] sm:$0xff]  ;;  %v9410_v58 = vcombine.low %v5491_v42, %v5495_v5  ;;  %v5506_v46 = vld [vmem:[#allocation10 + $0x3c0] sm:$0xff]  ;;  %v4800_v26 = vmul.f32 0.00390625, %v4734_v13  ;;  %v4737_v10 = vpop.xlane.xlu1 %4736  ;;  %6222 = vmatprep.subr.bf16.mxu0 %v9409_v47  ;;  %s16759_s26 = sld [smem:[#allocation118_spill]] }
 0xce6   : > { %v14416_v11 = vadd.f32 %v11225_v57, %v4620_v17  ;;  %v4624_v48 = vadd.f32 %v4623_v38, %v13962_v31  ;;  %v9417_v16 = vcombine.high %v5498_v60, %v5502_v61  ;;  %v9416_v33 = vcombine.low %v5498_v60, %v5502_v61  ;;  %v5507_v38 = vld [vmem:[#allocation10 + $0x3c8] sm:$0xff]  ;;  %6415 = vmatprep.subr.bf16.mxu1 %v9411_v30 }
 0xce7   : > { %16687 = vst [vmem:[#allocation107_spill] sm:$0xff] %v14409_v40  ;;  %v14420_v54 = vadd.f32 %v11226_v53, %v4622_v19  ;;  %6223 = vmatpush1.bf16.msra.mxu0 %v9408_v18  ;;  %v9419_v31 = vcombine.high %v5499_v55, %v5503_v23  ;;  %v5511_v57 = vld [vmem:[#allocation10 + $0x3e8] sm:$0xff]  ;;  %v14428_v13 = vsub.f32 %v14098_v21, %v4799_v52  ;;  %v4801_v42 = vmul.f32 0.00390625, %v4737_v10 }
 0xce8   : > { %16688 = vst [vmem:[#allocation108_spill] sm:$0xff] %v14416_v11  ;;  %v14423_v34 = vadd.f32 %v11227_v50, %v4624_v48  ;;  %v4780_v17 = vadd.f32 %v14416_v11, %v14409_v40  ;;  %v14431_v19 = vsub.f32 %v14101_v63, %v4799_v52  ;;  %6224 = vmatprep.subr.bf16.mxu0 %v9417_v16 }
 0xce9   : > { %16689 = vst [vmem:[#allocation109_spill] sm:$0xff] %v14420_v54  ;;  %v9425_v47 = vcombine.high %v5506_v46, %v5510_v6  ;;  %6416 = vmatpush1.bf16.msra.mxu1 %v9410_v58  ;;  %v9418_v18 = vcombine.low %v5499_v55, %v5503_v23  ;;  %v4906_v61 = vmul.f32 %v14405_v15, %v14405_v15 }
 0xcea   : > { %16690 = vst [vmem:[#allocation110_spill] sm:$0xff] %v14423_v34  ;;  %4781 = vadd.xlane.f32.xlu0 %v4780_v17  ;;  %v4783_v5 = vadd.f32 %v14423_v34, %v14420_v54  ;;  %v4907_v60 = vmul.f32 %v14413_v24, %v14413_v24  ;;  %v4976_v52 = vadd.f32 %v14391_v14, %v14387_v29 }
 0xceb   : > { %6417 = vmatprep.subr.bf16.mxu1 %v9419_v31  ;;  %v9427_v48 = vcombine.high %v5507_v38, %v5511_v57  ;;  %v14442_v53 = vsub.f32 %v14110_v7, %v4800_v26  ;;  %v14445_v10 = vsub.f32 %v14114_v45, %v4800_v26  ;;  %6225 = vmatpush1.bf16.msra.mxu0 %v9416_v33  ;;  %v14467_v31 = vld [vmem:[#allocation10 + $0x10] sm:$0xff] }
 0xcec   : > { %4784 = vadd.xlane.f32.xlu1 %v4783_v5  ;;  %v9424_v55 = vcombine.low %v5506_v46, %v5510_v6  ;;  %v4908_v23 = vmul.f32 %v14428_v13, %v14428_v13  ;;  %v4909_v58 = vmul.f32 %v14431_v19, %v14431_v19  ;;  %v4979_v29 = vadd.f32 %v14402_v44, %v14395_v51  ;;  %v16696_v7 = vld [vmem:[#allocation66_spill] sm:$0xff] }
 0xced   : > { %6226 = vmatprep.subr.bf16.mxu0 %v9425_v47  ;;  %v14454_v14 = vsub.f32 %v14118_v43, %v4801_v42  ;;  %v14457_v30 = vsub.f32 %v14121_v35, %v4801_v42  ;;  %6418 = vmatpush1.bf16.msra.mxu1 %v9418_v18  ;;  %v9426_v26 = vcombine.low %v5507_v38, %v5511_v57  ;;  %v14469_v38 = vld [vmem:[#allocation10 + $0x30] sm:$0xff]  ;;  %v16694_v35 = vld [vmem:[#allocation31_spill] sm:$0xff] }
 0xcee   : > { %4977 = vadd.xlane.f32.xlu0 %v4976_v52  ;;  %6419 = vmatprep.subr.bf16.mxu1 %v9427_v48  ;;  %v4910_v6 = vmul.f32 %v14442_v53, %v14442_v53  ;;  %v4911_v46 = vmul.f32 %v14445_v10, %v14445_v10  ;;  %v4982_v16 = vadd.f32 %v4907_v60, %v4906_v61 }
 0xcef   : > { %6227 = vmatpush1.bf16.msra.mxu0 %v9424_v55  ;;  %v4912_v51 = vmul.f32 %v14454_v14, %v14454_v14  ;;  %v4913_v44 = vmul.f32 %v14457_v30, %v14457_v30  ;;  %v4985_v50 = vadd.f32 %v4909_v58, %v4908_v23  ;;  %v9309_v47 = vcombine.high %v14467_v31, %v14469_v38 }
 0xcf0   : > { %4980 = vadd.xlane.f32.xlu1 %v4979_v29  ;;  %v4988_v17 = vadd.f32 %v4911_v46, %v4910_v6 }
 0xcf1   : > { %6420 = vmatpush1.bf16.msra.mxu1 %v9426_v26  ;;  %v4991_v33 = vadd.f32 %v4913_v44, %v4912_v51  ;;  %6582 = vmatprep.subr.bf16.mxu0 %v9309_v47 }
 0xcf2   : > { %4983 = vadd.xlane.f32.xlu0 %v4982_v16 }
 0xcf4   : > { %4986 = vadd.xlane.f32.xlu1 %v4985_v50 }
 0xcf6   : > { %4989 = vadd.xlane.f32.xlu0 %v4988_v17 }
 0xcf8   : > { %4992 = vadd.xlane.f32.xlu1 %v4991_v33 }
 0xd3f   : > { %v4740_v42 = vpop.xlane.xlu0 %4739 }
 0xd40   : > { %v4802_v5 = vmul.f32 0.00390625, %v4740_v42 }
 0xd41   : > { %v4743_v18 = vpop.xlane.xlu1 %4742 }
 0xd42   : > { %v14476_v61 = vsub.f32 %v14130_v20, %v4802_v5  ;;  %v14479_v60 = vsub.f32 %v14134_v2, %v4802_v5  ;;  %v4803_v52 = vmul.f32 0.00390625, %v4743_v18  ;;  %v16692_v20 = vld [vmem:[#allocation61_spill] sm:$0xff] }
 0xd44   : > { %v4914_v48 = vmul.f32 %v14476_v61, %v14476_v61  ;;  %v4915_v55 = vmul.f32 %v14479_v60, %v14479_v60  ;;  %v14486_v23 = vsub.f32 %v14138_v49, %v4803_v52  ;;  %v14489_v58 = vsub.f32 %v14141_v28, %v4803_v52  ;;  %v14547_v28 = vld [vmem:[#allocation10 + $0xb0] sm:$0xff] }
 0xd46   : > { %v4916_v29 = vmul.f32 %v14486_v23, %v14486_v23  ;;  %v4917_v26 = vmul.f32 %v14489_v58, %v14489_v58  ;;  %v4994_v6 = vadd.f32 %v4915_v55, %v4914_v48 }
 0xd47   : > { %v4746_v46 = vpop.xlane.xlu0 %4745 }
 0xd48   : > { %v4804_v16 = vmul.f32 0.00390625, %v4746_v46  ;;  %4995 = vadd.xlane.f32.xlu0 %v4994_v6  ;;  %v4997_v51 = vadd.f32 %v4917_v26, %v4916_v29 }
 0xd49   : > { %v4749_v44 = vpop.xlane.xlu1 %4748 }
 0xd4a   : > { %v14496_v50 = vsub.f32 %v14156_v9, %v4804_v16  ;;  %v14499_v17 = vsub.f32 %v14163_v37, %v4804_v16  ;;  %v4805_v33 = vmul.f32 0.00390625, %v4749_v44  ;;  %4998 = vadd.xlane.f32.xlu1 %v4997_v51 }
 0xd4b   : > { %v4948_v47 = vpop.xlane.xlu0 %4947 }
 0xd4c   : > { %v4918_v42 = vmul.f32 %v14496_v50, %v14496_v50  ;;  %v4919_v5 = vmul.f32 %v14499_v17, %v14499_v17  ;;  %v14506_v18 = vsub.f32 %v14170_v0, %v4805_v33  ;;  %v14509_v52 = vsub.f32 %v14173_v22, %v4805_v33 }
 0xd4d   : > { %v5042_v48 = vmul.f32 0.00390625, %v4948_v47  ;;  %v4951_v55 = vpop.xlane.xlu1 %4950 }
 0xd4e   : > { %v4920_v29 = vmul.f32 %v14506_v18, %v14506_v18  ;;  %v4921_v26 = vmul.f32 %v14509_v52, %v14509_v52  ;;  %v5043_v6 = vmul.f32 0.00390625, %v4951_v55  ;;  %v5000_v46 = vadd.f32 %v4919_v5, %v4918_v42 }
 0xd4f   : > { %v5074_v16 = vadd.f32 1e-05, %v5042_v48  ;;  %v4752_v51 = vpop.xlane.xlu0 %4751 }
 0xd50   : > { %v5075_v44 = vadd.f32 1e-05, %v5043_v6  ;;  %v4806_v57 = vmul.f32 0.00390625, %v4752_v51  ;;  %5001 = vadd.xlane.f32.xlu0 %v5000_v46  ;;  %v5003_v0 = vadd.f32 %v4921_v26, %v4920_v29 }
 0xd51   : > { %11044 = vrsqrt.f32 %v5074_v16  ;;  %v4755_v37 = vpop.xlane.xlu1 %4754  ;;  %v5278_v16 = vld [vmem:[%s16017_s7] sm:$0x3] }
 0xd52   : > { %11046 = vrsqrt.f32 %v5075_v44  ;;  %v14516_v33 = vsub.f32 %v14202_v41, %v4806_v57  ;;  %v14519_v47 = vsub.f32 %v14206_v56, %v4806_v57  ;;  %v4807_v22 = vmul.f32 0.00390625, %v4755_v37  ;;  %5004 = vadd.xlane.f32.xlu1 %v5003_v0  ;;  %v5202_v37 = vld [vmem:[%s16016_s6] sm:$0x3]  ;;  %v14543_v56 = vld [vmem:[#allocation10 + $0x70] sm:$0xff] }
 0xd53   : > { %v4954_v9 = vpop.xlane.xlu0 %4953  ;;  %v14545_v41 = vld [vmem:[#allocation10 + $0x90] sm:$0xff]  ;;  %v14556_v49 = vrot.slane %v5278_v16, %v16599_v8 }
 0xd54   : > { %v4922_v42 = vmul.f32 %v14516_v33, %v14516_v33  ;;  %v4923_v5 = vmul.f32 %v14519_v47, %v14519_v47  ;;  %v14526_v48 = vsub.f32 %v14212_v3, %v4807_v22  ;;  %v14529_v55 = vsub.f32 %v14221_v36, %v4807_v22 }
 0xd55   : > { %v5044_v29 = vmul.f32 0.00390625, %v4954_v9  ;;  %v4957_v26 = vpop.xlane.xlu1 %4956  ;;  %v14541_v9 = vld [vmem:[#allocation10 + $0x50] sm:$0xff] }
 0xd56   : > { %v4924_v0 = vmul.f32 %v14526_v48, %v14526_v48  ;;  %v4925_v57 = vmul.f32 %v14529_v55, %v14529_v55  ;;  %v5045_v6 = vmul.f32 0.00390625, %v4957_v26  ;;  %v5006_v46 = vadd.f32 %v4923_v5, %v4922_v42  ;;  %v16691_v26 = vld [vmem:[#allocation39_spill] sm:$0xff] }
 0xd57   : > { %v5076_v22 = vadd.f32 1e-05, %v5044_v29  ;;  %v4758_v51 = vpop.xlane.xlu0 %4757  ;;  %v14550_v42 = vrot.slane %v5202_v37, %v16599_v8  ;;  %v14553_v29 = vrot.slane %v5202_v37, %v16691_v26  ;;  %v16695_v37 = vld [vmem:[#allocation33_spill] sm:$0xff] }
 0xd58   : > { %v5077_v44 = vadd.f32 1e-05, %v5045_v6  ;;  %v4808_v36 = vmul.f32 0.00390625, %v4758_v51  ;;  %5007 = vadd.xlane.f32.xlu0 %v5006_v46  ;;  %v5009_v3 = vadd.f32 %v4925_v57, %v4924_v0 }
 0xd59   : > { %11048 = vrsqrt.f32 %v5076_v22  ;;  %v4761_v5 = vpop.xlane.xlu1 %4760  ;;  %v14565_v22 = vrot.slane %v5278_v16, %v16691_v26 }
 0xd5a   : > { %11050 = vrsqrt.f32 %v5077_v44  ;;  %v14559_v0 = vsub.f32 %v14242_v39, %v4808_v36  ;;  %v14562_v57 = vsub.f32 %v14250_v4, %v4808_v36  ;;  %v4809_v6 = vmul.f32 0.00390625, %v4761_v5  ;;  %5010 = vadd.xlane.f32.xlu1 %v5009_v3  ;;  %v16693_v4 = vld [vmem:[#allocation62_spill] sm:$0xff] }
 0xd5b   : > { %v11045_v46 = vpop.eup %11044  ;;  %v4960_v51 = vpop.xlane.xlu0 %4959 }
 0xd5c   : > { %v11047_v39 = vpop.eup %11046  ;;  %v5138_v36 = vmul.f32 %v11045_v46, %v16692_v20  ;;  %v5139_v5 = vmul.f32 %v11045_v46, %v16693_v4  ;;  %v4926_v3 = vmul.f32 %v14559_v0, %v14559_v0  ;;  %v4927_v16 = vmul.f32 %v14562_v57, %v14562_v57 }
 0xd5d   : > { %v5140_v43 = vmul.f32 %v11047_v39, %v16694_v35  ;;  %v5141_v45 = vmul.f32 %v11047_v39, %v16695_v37  ;;  %v14582_v2 = vsub.f32 %v14256_v25, %v4809_v6  ;;  %v14585_v44 = vsub.f32 %v16696_v7, %v4809_v6  ;;  %v4963_v63 = vpop.xlane.xlu1 %4962 }
 0xd5e   : > { %v5214_v20 = vmul.f32 %v14550_v42, %v5138_v36  ;;  %v5046_v4 = vmul.f32 0.00390625, %v4960_v51  ;;  %v5047_v46 = vmul.f32 0.00390625, %v4963_v63  ;;  %v5012_v21 = vadd.f32 %v4927_v16, %v4926_v3 }
 0xd5f   : > { %v5216_v32 = vmul.f32 %v14550_v42, %v5140_v43  ;;  %v4928_v26 = vmul.f32 %v14582_v2, %v14582_v2  ;;  %v4929_v35 = vmul.f32 %v14585_v44, %v14585_v44  ;;  %v4764_v39 = vpop.xlane.xlu0 %4763  ;;  %v5215_v37 = vmul.f32 %v14553_v29, %v5139_v5 }
 0xd60   : > { %v5078_v25 = vadd.f32 1e-05, %v5046_v4  ;;  %v5079_v6 = vadd.f32 1e-05, %v5047_v46  ;;  %v4810_v7 = vmul.f32 0.00390625, %v4764_v39  ;;  %5013 = vadd.xlane.f32.xlu0 %v5012_v21  ;;  %v5217_v36 = vmul.f32 %v14553_v29, %v5141_v45  ;;  %v16701_v39 = vld [vmem:[#allocation41_spill] sm:$0xff] }
 0xd61   : > { %v4767_v51 = vpop.xlane.xlu1 %4766  ;;  %v5015_v63 = vadd.f32 %v4929_v35, %v4928_v26  ;;  %v5290_v3 = vadd.f32 %v14556_v49, %v5214_v20  ;;  %v5292_v43 = vadd.f32 %v14556_v49, %v5216_v32  ;;  %v5291_v26 = vadd.f32 %v14565_v22, %v5215_v37  ;;  %v16700_v35 = vld [vmem:[#allocation34_spill] sm:$0xff] }
 0xd62   : > { %11052 = vrsqrt.f32 %v5078_v25  ;;  %v14600_v8 = vsub.f32 %v14284_v12, %v4810_v7  ;;  %v14603_v5 = vsub.f32 %v14288_v59, %v4810_v7  ;;  %v4811_v4 = vmul.f32 0.00390625, %v4767_v51  ;;  %v16703_v59 = vld [vmem:[#allocation20_spill] sm:$0xff] }
 0xd63   : > { %v11049_v21 = vpop.eup %11048  ;;  %11054 = vrsqrt.f32 %v5079_v6  ;;  %5016 = vadd.xlane.f32.xlu1 %v5015_v63  ;;  %v4966_v45 = vpop.xlane.xlu0 %4965  ;;  %v5293_v20 = vadd.f32 %v14565_v22, %v5217_v36  ;;  %v14607_v32 = vpack.c.bf16 %v5292_v43, %v5290_v3  ;;  %v16702_v6 = vld [vmem:[#allocation37_spill] sm:$0xff] }
 0xd64   : > { %16697 = vst [vmem:[#allocation61_spill] sm:$0xff] %v14600_v8  ;;  %16698 = vst [vmem:[#allocation62_spill] sm:$0xff] %v14603_v5  ;;  %v11051_v46 = vpop.eup %11050  ;;  %v5142_v25 = vmul.f32 %v11049_v21, %v16700_v35  ;;  %v5143_v16 = vmul.f32 %v11049_v21, %v16701_v39  ;;  %v4930_v7 = vmul.f32 %v14600_v8, %v14600_v8  ;;  %v5048_v43 = vmul.f32 0.00390625, %v4966_v45 }
 0xd65   : > { %16699 = vst [vmem:[#allocation31_spill] sm:$0xff] %v14607_v32  ;;  %v4931_v51 = vmul.f32 %v14603_v5, %v14603_v5  ;;  %v5144_v63 = vmul.f32 %v11051_v46, %v16702_v6  ;;  %v5145_v12 = vmul.f32 %v11051_v46, %v16703_v59  ;;  %v14618_v37 = vsub.f32 %v14294_v1, %v4811_v4  ;;  %v4969_v3 = vpop.xlane.xlu1 %4968 }
 0xd66   : > { %v14621_v36 = vsub.f32 %v14301_v62, %v4811_v4  ;;  %v5049_v35 = vmul.f32 0.00390625, %v4969_v3  ;;  %v14623_v21 = vpack.c.bf16 %v5293_v20, %v5291_v26  ;;  %v5219_v59 = vmul.f32 %v14553_v29, %v5143_v16  ;;  %v16705_v3 = vld [vmem:[#allocation96_spill] sm:$0xff] }
 0xd67   : > { %v5018_v39 = vadd.f32 %v4931_v51, %v4930_v7  ;;  %v4932_v8 = vmul.f32 %v14618_v37, %v14618_v37  ;;  %v4770_v5 = vpop.xlane.xlu0 %4769  ;;  %v5221_v46 = vmul.f32 %v14553_v29, %v5145_v12  ;;  %v5080_v1 = vadd.f32 1e-05, %v5048_v43 }
 0xd68   : > { %16704 = vst [vmem:[#allocation33_spill] sm:$0xff] %v14623_v21  ;;  %v4933_v6 = vmul.f32 %v14621_v36, %v14621_v36  ;;  %v5081_v4 = vadd.f32 1e-05, %v5049_v35  ;;  %6228 = vmatprep.mubr.bf16.mxu0 %v14623_v21  ;;  %6421 = vmatprep.mubr.bf16.mxu1 %v14623_v21  ;;  %v4812_v45 = vmul.f32 0.00390625, %v4770_v5  ;;  %v5218_v26 = vmul.f32 %v14550_v42, %v5142_v25 }
 0xd69   : > { %6229 = vmatmul.mubr.bf16.vlgmr.msra.gmra.mrb[72].mxu0 %v14607_v32  ;;  %6422 = vmatmul.mubr.bf16.vlgmr.msra.gmra.mrb[56].mxu1 %v14607_v32  ;;  %v4773_v20 = vpop.xlane.xlu1 %4772  ;;  %v5295_v51 = vadd.f32 %v14565_v22, %v5219_v59  ;;  %v5297_v16 = vadd.f32 %v14565_v22, %v5221_v46  ;;  %11056 = vrsqrt.f32 %v5080_v1  ;;  %v16706_v25 = vcombine.low %v14467_v31, %v14469_v38  ;;  %v16709_v38 = vld [vmem:[#allocation97_spill] sm:$0xff] }
 0xd6a   : > { %v5021_v7 = vadd.f32 %v4933_v6, %v4932_v8  ;;  %v14639_v12 = vsub.f32 %v14322_v27, %v4812_v45  ;;  %v14642_v43 = vsub.f32 %v16705_v3, %v4812_v45  ;;  %5019 = vadd.xlane.f32.xlu0 %v5018_v39  ;;  %v4813_v5 = vmul.f32 0.00390625, %v4773_v20  ;;  %v16711_v45 = vld [vmem:[#allocation98_spill] sm:$0xff]  ;;  %v16715_v27 = vld [vmem:[#allocation53_spill] sm:$0xff] }
 0xd6b   : > { %6583 = vmatpush1.bf16.msra.mxu0 %v16706_v25  ;;  %11058 = vrsqrt.f32 %v5081_v4  ;;  %v4972_v8 = vpop.xlane.xlu0 %4971  ;;  %v14647_v35 = vpack.c.bf16 %v5297_v16, %v5295_v51  ;;  %v5220_v6 = vmul.f32 %v14550_v42, %v5144_v63  ;;  %v5294_v1 = vadd.f32 %v14556_v49, %v5218_v26  ;;  %v16714_v51 = vld [vmem:[#allocation55_spill] sm:$0xff] }
 0xd6c   : > { %5022 = vadd.xlane.f32.xlu1 %v5021_v7  ;;  %v16708_v59 = vcombine.high %v14541_v9, %v14543_v56  ;;  %v11053_v46 = vpop.eup %11052  ;;  %v4934_v39 = vmul.f32 %v14639_v12, %v14639_v12  ;;  %v4935_v31 = vmul.f32 %v14642_v43, %v14642_v43  ;;  %v14659_v4 = vsub.f32 %v16709_v38, %v4813_v5  ;;  %v16713_v7 = vld [vmem:[#allocation49_spill] sm:$0xff]  ;;  %v16716_v38 = vld [vmem:[#allocation27_spill] sm:$0xff] }
 0xd6d   : > { %16707 = vst [vmem:[#allocation34_spill] sm:$0xff] %v14647_v35  ;;  %v14662_v20 = vsub.f32 %v16711_v45, %v4813_v5  ;;  %v11055_v63 = vpop.eup %11054  ;;  %v5146_v26 = vmul.f32 %v11053_v46, %v16713_v7  ;;  %v5147_v16 = vmul.f32 %v11053_v46, %v16714_v51  ;;  %v5050_v25 = vmul.f32 0.00390625, %v4972_v8  ;;  %6238 = vmatprep.mubr.bf16.mxu0 %v14647_v35 }
 0xd6e   : > { %6584 = vmatprep.subr.bf16.mxu0 %v16708_v59  ;;  %16710 = vst [vmem:[#allocation41_spill] sm:$0xff] %v14659_v4  ;;  %v4975_v59 = vpop.xlane.xlu1 %4974  ;;  %6431 = vmatprep.mubr.bf16.mxu1 %v14647_v35  ;;  %v5296_v3 = vadd.f32 %v14556_v49, %v5220_v6  ;;  %v5148_v62 = vmul.f32 %v11055_v63, %v16715_v27 }
 0xd6f   : > { %16712 = vst [vmem:[#allocation37_spill] sm:$0xff] %v14662_v20  ;;  %v5149_v32 = vmul.f32 %v11055_v63, %v16716_v38  ;;  %v4936_v5 = vmul.f32 %v14659_v4, %v14659_v4  ;;  %v4937_v7 = vmul.f32 %v14662_v20, %v14662_v20  ;;  %v16717_v8 = vcombine.low %v14541_v9, %v14543_v56  ;;  %v4776_v35 = vpop.xlane.xlu0 %4775 }
 0xd70   : > { %v5082_v46 = vadd.f32 1e-05, %v5050_v25  ;;  %v5051_v51 = vmul.f32 0.00390625, %v4975_v59  ;;  %v14678_v45 = vpack.c.bf16 %v5296_v3, %v5294_v1  ;;  %v5024_v6 = vadd.f32 %v4935_v31, %v4934_v39  ;;  %v16720_v1 = vld [vmem:[#allocation99_spill] sm:$0xff] }
 0xd71   : > { %6585 = vmatpush1.bf16.msra.mxu0 %v16717_v8  ;;  %v16719_v27 = vcombine.high %v14545_v41, %v14547_v28  ;;  %v4814_v38 = vmul.f32 0.00390625, %v4776_v35  ;;  %v5027_v63 = vadd.f32 %v4937_v7, %v4936_v5  ;;  %v5223_v21 = vmul.f32 %v14553_v29, %v5147_v16  ;;  %v16721_v35 = vld [vmem:[#allocation102_spill] sm:$0xff] }
 0xd72   : > { %16718 = vst [vmem:[#allocation20_spill] sm:$0xff] %v14678_v45  ;;  %v5225_v20 = vmul.f32 %v14553_v29, %v5149_v32  ;;  %11060 = vrsqrt.f32 %v5082_v46  ;;  %v5083_v4 = vadd.f32 1e-05, %v5051_v51  ;;  %6239 = vmatmul.mubr.bf16.gmra.mrb[76].mxu0 %v14678_v45  ;;  %6432 = vmatmul.mubr.bf16.gmra.mrb[60].mxu1 %v14678_v45  ;;  %v4779_v56 = vpop.xlane.xlu1 %4778  ;;  %v5222_v9 = vmul.f32 %v14550_v42, %v5146_v26  ;;  %v16723_v46 = vld [vmem:[#allocation104_spill] sm:$0xff] }
 0xd73   : > { %6586 = vmatprep.subr.bf16.mxu0 %v16719_v27  ;;  %v5224_v3 = vmul.f32 %v14550_v42, %v5148_v62  ;;  %v14690_v39 = vsub.f32 %v16720_v1, %v4814_v38  ;;  %v14693_v31 = vsub.f32 %v16721_v35, %v4814_v38  ;;  %5025 = vadd.xlane.f32.xlu0 %v5024_v6  ;;  %v4815_v16 = vmul.f32 0.00390625, %v4779_v56  ;;  %v11057_v5 = vpop.eup %11056  ;;  %v16725_v6 = vld [vmem:[#allocation28_spill] sm:$0xff]  ;;  %v16726_v38 = vld [vmem:[#allocation26_spill] sm:$0xff] }
 0xd74   : > { %5028 = vadd.xlane.f32.xlu1 %v5027_v63  ;;  %v5299_v32 = vadd.f32 %v14565_v22, %v5223_v21  ;;  %11062 = vrsqrt.f32 %v5083_v4  ;;  %v5301_v25 = vadd.f32 %v14565_v22, %v5225_v20  ;;  %v5298_v59 = vadd.f32 %v14556_v49, %v5222_v9  ;;  %v16724_v4 = vld [vmem:[#allocation106_spill] sm:$0xff]  ;;  %v16729_v56 = vld [vmem:[#allocation24_spill] sm:$0xff] }
 0xd75   : > { %v5300_v26 = vadd.f32 %v14556_v49, %v5224_v3  ;;  %v16722_v62 = vcombine.low %v14545_v41, %v14547_v28  ;;  %v4938_v7 = vmul.f32 %v14690_v39, %v14690_v39  ;;  %v4939_v8 = vmul.f32 %v14693_v31, %v14693_v31  ;;  %v11059_v51 = vpop.eup %11058  ;;  %v16730_v3 = vld [vmem:[#allocation44_spill] sm:$0xff] }
 0xd76   : > { %v14707_v21 = vsub.f32 %v16723_v46, %v4815_v16  ;;  %v14710_v20 = vsub.f32 %v16724_v4, %v4815_v16  ;;  %v5150_v27 = vmul.f32 %v11057_v5, %v16725_v6  ;;  %v5151_v63 = vmul.f32 %v11057_v5, %v16726_v38 }
 0xd77   : > { %6587 = vmatpush1.bf16.msra.mxu0 %v16722_v62  ;;  %v14714_v41 = vpack.c.bf16 %v5301_v25, %v5299_v32  ;;  %v14716_v28 = vpack.c.bf16 %v5300_v26, %v5298_v59  ;;  %v5152_v9 = vmul.f32 %v11059_v51, %v16729_v56  ;;  %v5153_v62 = vmul.f32 %v11059_v51, %v16730_v3  ;;  %v4782_v4 = vpop.xlane.xlu0 %4781 }
 0xd78   : > { %v4940_v46 = vmul.f32 %v14707_v21, %v14707_v21  ;;  %v4941_v16 = vmul.f32 %v14710_v20, %v14710_v20  ;;  %v4816_v5 = vmul.f32 0.00390625, %v4782_v4  ;;  %v5030_v32 = vadd.f32 %v4939_v8, %v4938_v7 }
 0xd79   : > { %16727 = vst [vmem:[#allocation49_spill] sm:$0xff] %v14714_v41  ;;  %16728 = vst [vmem:[#allocation55_spill] sm:$0xff] %v14716_v28  ;;  %6248 = vmatprep.mubr.bf16.mxu0 %v14714_v41  ;;  %6441 = vmatprep.mubr.bf16.mxu1 %v14714_v41  ;;  %v5227_v25 = vmul.f32 %v14553_v29, %v5151_v63  ;;  %v5226_v59 = vmul.f32 %v14550_v42, %v5150_v27  ;;  %v4785_v26 = vpop.xlane.xlu1 %4784  ;;  %v16740_v41 = vld [vmem:[#allocation21_spill] sm:$0xff] }
 0xd7a   : > { %v5033_v6 = vadd.f32 %v4941_v16, %v4940_v46  ;;  %v5229_v51 = vmul.f32 %v14553_v29, %v5153_v62  ;;  %v5228_v38 = vmul.f32 %v14550_v42, %v5152_v9  ;;  %6249 = vmatmul.mubr.bf16.gmra.mrb[80].mxu0 %v14716_v28  ;;  %6442 = vmatmul.mubr.bf16.gmra.mrb[64].mxu1 %v14716_v28  ;;  %v4817_v7 = vmul.f32 0.00390625, %v4785_v26 }
 0xd7b   : > { %v14733_v56 = vsub.f32 %v14409_v40, %v4816_v5  ;;  %v14736_v4 = vsub.f32 %v14416_v11, %v4816_v5  ;;  %v5303_v8 = vadd.f32 %v14565_v22, %v5227_v25  ;;  %5031 = vadd.xlane.f32.xlu0 %v5030_v32  ;;  %v4978_v46 = vpop.xlane.xlu0 %4977  ;;  %v5302_v63 = vadd.f32 %v14556_v49, %v5226_v59  ;;  %v16735_v25 = vld [vmem:[#allocation70_spill] sm:$0xff] }
 0xd7c   : > { %5034 = vadd.xlane.f32.xlu1 %v5033_v6  ;;  %v5305_v27 = vadd.f32 %v14565_v22, %v5229_v51  ;;  %v5304_v9 = vadd.f32 %v14556_v49, %v5228_v38  ;;  %v11061_v3 = vpop.eup %11060  ;;  %v14747_v5 = vsub.f32 %v14420_v54, %v4817_v7  ;;  %v14750_v32 = vsub.f32 %v14423_v34, %v4817_v7  ;;  %v16736_v6 = vld [vmem:[#allocation72_spill] sm:$0xff] }
 0xd7d   : > { %16731 = vst [vmem:[#allocation53_spill] sm:$0xff] %v14733_v56  ;;  %16732 = vst [vmem:[#allocation27_spill] sm:$0xff] %v14736_v4  ;;  %v4942_v62 = vmul.f32 %v14733_v56, %v14733_v56  ;;  %v4943_v16 = vmul.f32 %v14736_v4, %v14736_v4  ;;  %v5154_v26 = vmul.f32 %v11061_v3, %v16735_v25  ;;  %v5052_v59 = vmul.f32 0.00390625, %v4978_v46  ;;  %v4981_v38 = vpop.xlane.xlu1 %4980  ;;  %v16739_v7 = vld [vmem:[#allocation40_spill] sm:$0xff]  ;;  %v5448_v56 = vld [vmem:[#allocation10 + $0x1f0] sm:$0xff] }
 0xd7e   : > { %16733 = vst [vmem:[#allocation28_spill] sm:$0xff] %v14747_v5  ;;  %16734 = vst [vmem:[#allocation26_spill] sm:$0xff] %v14750_v32  ;;  %v5155_v51 = vmul.f32 %v11061_v3, %v16736_v6  ;;  %v14754_v11 = vpack.c.bf16 %v5305_v27, %v5303_v8  ;;  %v11063_v40 = vpop.eup %11062  ;;  %v4944_v35 = vmul.f32 %v14747_v5, %v14747_v5  ;;  %v5053_v54 = vmul.f32 0.00390625, %v4981_v38  ;;  %v5412_v27 = vld [vmem:[#allocation10 + $0xd0] sm:$0xff] }
 0xd7f   : > { %v4945_v1 = vmul.f32 %v14750_v32, %v14750_v32  ;;  %v14760_v28 = vpack.c.bf16 %v5304_v9, %v5302_v63  ;;  %v5156_v34 = vmul.f32 %v11063_v40, %v16739_v7  ;;  %v5157_v25 = vmul.f32 %v11063_v40, %v16740_v41  ;;  %v4984_v8 = vpop.xlane.xlu0 %4983  ;;  %v5416_v3 = vld [vmem:[#allocation10 + $0xf0] sm:$0xff] }
 0xd80   : > { %16737 = vst [vmem:[#allocation24_spill] sm:$0xff] %v14754_v11  ;;  %v5084_v45 = vadd.f32 1e-05, %v5052_v59  ;;  %6258 = vmatprep.mubr.bf16.mxu0 %v14754_v11  ;;  %6451 = vmatprep.mubr.bf16.mxu1 %v14754_v11  ;;  %v5036_v46 = vadd.f32 %v4943_v16, %v4942_v62  ;;  %v5085_v6 = vadd.f32 1e-05, %v5053_v54  ;;  %v5054_v5 = vmul.f32 0.00390625, %v4984_v8 }
 0xd81   : > { %16738 = vst [vmem:[#allocation44_spill] sm:$0xff] %v14760_v28  ;;  %v5039_v4 = vadd.f32 %v4945_v1, %v4944_v35  ;;  %v5231_v38 = vmul.f32 %v14553_v29, %v5155_v51  ;;  %v4987_v63 = vpop.xlane.xlu1 %4986  ;;  %v5233_v9 = vmul.f32 %v14553_v29, %v5157_v25  ;;  %v5230_v40 = vmul.f32 %v14550_v42, %v5154_v26  ;;  %v5420_v1 = vld [vmem:[#allocation10 + $0x110] sm:$0xff]  ;;  %v5393_v11 = vld [vmem:[#allocation10 + $0x38] sm:$0xff] }
 0xd82   : > { %11064 = vrsqrt.f32 %v5084_v45  ;;  %5037 = vadd.xlane.f32.xlu0 %v5036_v46  ;;  %v5232_v41 = vmul.f32 %v14550_v42, %v5156_v34  ;;  %6259 = vmatmul.mubr.bf16.gmra.mrb[84].mxu0 %v14760_v28  ;;  %v5086_v62 = vadd.f32 1e-05, %v5054_v5  ;;  %v5055_v54 = vmul.f32 0.00390625, %v4987_v63  ;;  %v5424_v35 = vld [vmem:[#allocation10 + $0x130] sm:$0xff] }
 0xd83   : > { %11066 = vrsqrt.f32 %v5085_v6  ;;  %6452 = vmatmul.mubr.bf16.gmra.mrb[68].mxu1 %v14760_v28  ;;  %v9332_v16 = vcombine.low %v5412_v27, %v5416_v3  ;;  %5040 = vadd.xlane.f32.xlu1 %v5039_v4  ;;  %v4990_v45 = vpop.xlane.xlu0 %4989  ;;  %v5307_v51 = vadd.f32 %v14565_v22, %v5231_v38  ;;  %v5309_v59 = vadd.f32 %v14565_v22, %v5233_v9  ;;  %v5428_v46 = vld [vmem:[#allocation10 + $0x150] sm:$0xff]  ;;  %v5389_v28 = vld [vmem:[#allocation10 + $0x18] sm:$0xff] }
 0xd84   : > { %v5308_v26 = vadd.f32 %v14556_v49, %v5232_v41  ;;  %v9333_v7 = vcombine.high %v5412_v27, %v5416_v3  ;;  %11068 = vrsqrt.f32 %v5086_v62  ;;  %v5087_v34 = vadd.f32 1e-05, %v5055_v54  ;;  %v5432_v5 = vld [vmem:[#allocation10 + $0x170] sm:$0xff]  ;;  %v5397_v27 = vld [vmem:[#allocation10 + $0x58] sm:$0xff] }
 0xd85   : > { %v5056_v25 = vmul.f32 0.00390625, %v4990_v45  ;;  %v5306_v8 = vadd.f32 %v14556_v49, %v5230_v40  ;;  %v14776_v6 = vpack.c.bf16 %v5309_v59, %v5307_v51  ;;  %v4993_v63 = vpop.xlane.xlu1 %4992  ;;  %v9341_v4 = vcombine.high %v5420_v1, %v5424_v35  ;;  %v5401_v3 = vld [vmem:[#allocation10 + $0x78] sm:$0xff]  ;;  %v5436_v54 = vld [vmem:[#allocation10 + $0x190] sm:$0xff] }
 0xd86   : > { %6588 = vmatprep.subr.bf16.mxu0 %v9333_v7  ;;  %11070 = vrsqrt.f32 %v5087_v34  ;;  %v5057_v9 = vmul.f32 0.00390625, %v4993_v63  ;;  %v9340_v40 = vcombine.low %v5420_v1, %v5424_v35  ;;  %v9349_v41 = vcombine.high %v5428_v46, %v5432_v5  ;;  %v5440_v45 = vld [vmem:[#allocation10 + $0x1b0] sm:$0xff] }
 0xd87   : > { %16741 = vst [vmem:[#allocation70_spill] sm:$0xff] %v14776_v6  ;;  %v5088_v38 = vadd.f32 1e-05, %v5056_v25  ;;  %v14778_v32 = vpack.c.bf16 %v5308_v26, %v5306_v8  ;;  %6589 = vmatpush1.bf16.msra.mxu0 %v9332_v16  ;;  %6268 = vmatprep.mubr.bf16.mxu0 %v14776_v6  ;;  %v9310_v51 = vcombine.low %v5389_v28, %v5393_v11  ;;  %v14784_v16 = vld [vmem:[#allocation10 + $0x98] sm:$0xff]  ;;  %v16743_v8 = vld [vmem:[#allocation100_spill] sm:$0xff] }
 0xd88   : > { %6461 = vmatprep.mubr.bf16.mxu1 %v14776_v6  ;;  %v5089_v62 = vadd.f32 1e-05, %v5057_v9  ;;  %6590 = vmatprep.subr.bf16.mxu0 %v9341_v4  ;;  %v9311_v59 = vcombine.high %v5389_v28, %v5393_v11  ;;  %v9319_v7 = vcombine.high %v5397_v27, %v5401_v3  ;;  %v14786_v26 = vld [vmem:[#allocation10 + $0xb8] sm:$0xff]  ;;  %v9348_v1 = vcombine.low %v5428_v46, %v5432_v5  ;;  %v16744_v4 = vld [vmem:[#allocation101_spill] sm:$0xff]  ;;  %v5444_v6 = vld [vmem:[#allocation10 + $0x1d0] sm:$0xff] }
 0xd89   : > { %16742 = vst [vmem:[#allocation72_spill] sm:$0xff] %v14778_v32  ;;  %11072 = vrsqrt.f32 %v5088_v38  ;;  %v9357_v35 = vcombine.high %v5436_v54, %v5440_v45  ;;  %v9318_v28 = vcombine.low %v5397_v27, %v5401_v3  ;;  %v16745_v38 = vld [vmem:[#allocation103_spill] sm:$0xff]  ;;  %v9327_v46 = vcombine.high %v14784_v16, %v14786_v26 }
 0xd8a   : > { %11074 = vrsqrt.f32 %v5089_v62  ;;  %6269 = vmatmul.mubr.bf16.gmra.mrb[88].mxu0 %v14778_v32  ;;  %6775 = vmatprep.subr.bf16.mxu1 %v9311_v59  ;;  %v16746_v62 = vld [vmem:[#allocation105_spill] sm:$0xff]  ;;  %v9356_v3 = vcombine.low %v5436_v54, %v5440_v45  ;;  %v5452_v54 = vld [vmem:[#allocation10 + $0x210] sm:$0xff] }
 0xd8b   : > { %6462 = vmatmul.mubr.bf16.gmra.mrb[72].mxu1 %v14778_v32  ;;  %6591 = vmatpush1.bf16.msra.mxu0 %v9340_v40  ;;  %v5456_v45 = vld [vmem:[#allocation10 + $0x230] sm:$0xff] }
 0xd8c   : > { %v11065_v34 = vpop.eup %11064  ;;  %6592 = vmatprep.subr.bf16.mxu0 %v9349_v41  ;;  %6776 = vmatpush1.bf16.msra.mxu1 %v9310_v51 }
 0xd8d   : > { %v11067_v25 = vpop.eup %11066  ;;  %v5158_v63 = vmul.f32 %v11065_v34, %v16743_v8  ;;  %v5159_v11 = vmul.f32 %v11065_v34, %v16744_v4  ;;  %6777 = vmatprep.subr.bf16.mxu1 %v9319_v7  ;;  %v9365_v8 = vcombine.high %v5444_v6, %v5448_v56  ;;  %v5413_v4 = vld [vmem:[#allocation10 + $0xd8] sm:$0xff] }
 0xd8e   : > { %v5160_v9 = vmul.f32 %v11067_v25, %v16745_v38  ;;  %v5161_v32 = vmul.f32 %v11067_v25, %v16746_v62  ;;  %v11069_v5 = vpop.eup %11068  ;;  %v14809_v62 = vld [vmem:[#allocation10 + $0x118] sm:$0xff] }
 0xd8f   : > { %v5235_v40 = vmul.f32 %v14553_v29, %v5159_v11  ;;  %v5234_v59 = vmul.f32 %v14550_v42, %v5158_v63  ;;  %v5163_v34 = vmul.f32 %v11069_v5, %v14413_v24  ;;  %6593 = vmatpush1.bf16.msra.mxu0 %v9348_v1  ;;  %v5417_v1 = vld [vmem:[#allocation10 + $0xf8] sm:$0xff] }
 0xd90   : > { %v5237_v41 = vmul.f32 %v14553_v29, %v5161_v32  ;;  %v5236_v27 = vmul.f32 %v14550_v42, %v5160_v9  ;;  %v11071_v51 = vpop.eup %11070  ;;  %6594 = vmatprep.subr.bf16.mxu0 %v9357_v35  ;;  %6778 = vmatpush1.bf16.msra.mxu1 %v9318_v28  ;;  %v5162_v9 = vmul.f32 %v11069_v5, %v14405_v15 }
 0xd91   : > { %v5311_v7 = vadd.f32 %v14565_v22, %v5235_v40  ;;  %v5310_v25 = vadd.f32 %v14556_v49, %v5234_v59  ;;  %v5164_v11 = vmul.f32 %v11071_v51, %v14428_v13  ;;  %v5165_v63 = vmul.f32 %v11071_v51, %v14431_v19  ;;  %6779 = vmatprep.subr.bf16.mxu1 %v9327_v46  ;;  %v14811_v13 = vld [vmem:[#allocation10 + $0x138] sm:$0xff]  ;;  %v5460_v51 = vld [vmem:[#allocation10 + $0x250] sm:$0xff] }
 0xd92   : > { %v5313_v24 = vadd.f32 %v14565_v22, %v5237_v41  ;;  %v5312_v32 = vadd.f32 %v14556_v49, %v5236_v27  ;;  %v5239_v35 = vmul.f32 %v14553_v29, %v5163_v34  ;;  %v9326_v28 = vcombine.low %v14784_v16, %v14786_v26 }
 0xd93   : > { %v11073_v38 = vpop.eup %11072  ;;  %6595 = vmatpush1.bf16.msra.mxu0 %v9356_v3  ;;  %v9364_v59 = vcombine.low %v5444_v6, %v5448_v56  ;;  %v5241_v15 = vmul.f32 %v14553_v29, %v5165_v63  ;;  %v5240_v5 = vmul.f32 %v14550_v42, %v5164_v11  ;;  %v9335_v34 = vcombine.high %v5413_v4, %v5417_v1 }
 0xd94   : > { %v5167_v19 = vmul.f32 %v11073_v38, %v14445_v10  ;;  %v14814_v40 = vpack.c.bf16 %v5313_v24, %v5311_v7  ;;  %v14816_v46 = vpack.c.bf16 %v5312_v32, %v5310_v25  ;;  %v11075_v41 = vpop.eup %11074  ;;  %6596 = vmatprep.subr.bf16.mxu0 %v9365_v8  ;;  %v9373_v16 = vcombine.high %v5452_v54, %v5456_v45  ;;  %v5429_v32 = vld [vmem:[#allocation10 + $0x158] sm:$0xff] }
 0xd95   : > { %v5169_v26 = vmul.f32 %v11075_v41, %v14457_v30  ;;  %v9334_v10 = vcombine.low %v5413_v4, %v5417_v1  ;;  %v9343_v27 = vcombine.high %v14809_v62, %v14811_v13  ;;  %v5315_v56 = vadd.f32 %v14565_v22, %v5239_v35  ;;  %v5464_v30 = vld [vmem:[#allocation10 + $0x270] sm:$0xff]  ;;  %6780 = vmatpush1.bf16.msra.mxu1 %v9326_v28 }
 0xd96   : > { %6278 = vmatprep.mubr.bf16.mxu0 %v14814_v40  ;;  %6471 = vmatprep.mubr.bf16.mxu1 %v14814_v40  ;;  %v5317_v6 = vadd.f32 %v14565_v22, %v5241_v15  ;;  %v5238_v3 = vmul.f32 %v14550_v42, %v5162_v9  ;;  %v5243_v7 = vmul.f32 %v14553_v29, %v5167_v19  ;;  %v5472_v35 = vld [vmem:[#allocation10 + $0x2b0] sm:$0xff] }
 0xd97   : > { %6279 = vmatmul.mubr.bf16.gmra.mrb[92].mxu0 %v14816_v46  ;;  %6472 = vmatmul.mubr.bf16.gmra.mrb[76].mxu1 %v14816_v46  ;;  %v5245_v25 = vmul.f32 %v14553_v29, %v5169_v26  ;;  %v9372_v8 = vcombine.low %v5452_v54, %v5456_v45  ;;  %v5168_v4 = vmul.f32 %v11075_v41, %v14454_v14  ;;  %v5433_v45 = vld [vmem:[#allocation10 + $0x178] sm:$0xff]  ;;  %v5468_v14 = vld [vmem:[#allocation10 + $0x290] sm:$0xff] }
 0xd98   : > { %6597 = vmatpush1.bf16.msra.mxu0 %v9364_v59  ;;  %v14833_v11 = vpack.c.bf16 %v5317_v6, %v5315_v56  ;;  %v5316_v63 = vadd.f32 %v14556_v49, %v5240_v5  ;;  %6781 = vmatprep.subr.bf16.mxu1 %v9335_v34  ;;  %v9381_v1 = vcombine.high %v5460_v51, %v5464_v30  ;;  %v5437_v5 = vld [vmem:[#allocation10 + $0x198] sm:$0xff]  ;;  %v5480_v26 = vld [vmem:[#allocation10 + $0x2f0] sm:$0xff] }
 0xd99   : > { %6598 = vmatprep.subr.bf16.mxu0 %v9373_v16  ;;  %v5321_v24 = vadd.f32 %v14565_v22, %v5245_v25  ;;  %v5166_v9 = vmul.f32 %v11073_v38, %v14442_v53  ;;  %v5314_v54 = vadd.f32 %v14556_v49, %v5238_v3  ;;  %v5319_v28 = vadd.f32 %v14565_v22, %v5243_v7  ;;  %v5445_v3 = vld [vmem:[#allocation10 + $0x1d8] sm:$0xff]  ;;  %v5484_v25 = vld [vmem:[#allocation10 + $0x310] sm:$0xff] }
 0xd9a   : > { %6288 = vmatprep.mubr.bf16.mxu0 %v14833_v11  ;;  %6481 = vmatprep.mubr.bf16.mxu1 %v14833_v11  ;;  %v9342_v19 = vcombine.low %v14809_v62, %v14811_v13  ;;  %v5244_v53 = vmul.f32 %v14550_v42, %v5168_v4  ;;  %v9380_v38 = vcombine.low %v5460_v51, %v5464_v30  ;;  %v5441_v62 = vld [vmem:[#allocation10 + $0x1b8] sm:$0xff]  ;;  %v5476_v13 = vld [vmem:[#allocation10 + $0x2d0] sm:$0xff] }
 0xd9b   : > { %6782 = vmatpush1.bf16.msra.mxu1 %v9334_v10  ;;  %v14844_v59 = vpack.c.bf16 %v5316_v63, %v5314_v54  ;;  %v14847_v41 = vpack.c.bf16 %v5321_v24, %v5319_v28  ;;  %v9351_v15 = vcombine.high %v5429_v32, %v5433_v45  ;;  %v9389_v34 = vcombine.high %v5468_v14, %v5472_v35  ;;  %v5449_v7 = vld [vmem:[#allocation10 + $0x1f8] sm:$0xff] }
 0xd9c   : > { %6599 = vmatpush1.bf16.msra.mxu0 %v9372_v8  ;;  %6783 = vmatprep.subr.bf16.mxu1 %v9343_v27  ;;  %v5242_v16 = vmul.f32 %v14550_v42, %v5166_v9  ;;  %v5320_v10 = vadd.f32 %v14556_v49, %v5244_v53  ;;  %v9350_v27 = vcombine.low %v5429_v32, %v5433_v45  ;;  %v5488_v8 = vld [vmem:[#allocation10 + $0x330] sm:$0xff]  ;;  %v5457_v54 = vld [vmem:[#allocation10 + $0x238] sm:$0xff] }
 0xd9d   : > { %6600 = vmatprep.subr.bf16.mxu0 %v9381_v1  ;;  %v9388_v56 = vcombine.low %v5468_v14, %v5472_v35  ;;  %v9359_v6 = vcombine.high %v5437_v5, %v5441_v62  ;;  %v9397_v51 = vcombine.high %v5476_v13, %v5480_v26  ;;  %v9358_v63 = vcombine.low %v5437_v5, %v5441_v62  ;;  %v5453_v1 = vld [vmem:[#allocation10 + $0x218] sm:$0xff]  ;;  %v5492_v45 = vld [vmem:[#allocation10 + $0x350] sm:$0xff] }
 0xd9e   : > { %v5318_v30 = vadd.f32 %v14556_v49, %v5242_v16  ;;  %v9396_v24 = vcombine.low %v5476_v13, %v5480_v26  ;;  %v9367_v32 = vcombine.high %v5445_v3, %v5449_v7  ;;  %v9405_v9 = vcombine.high %v5484_v25, %v5488_v8  ;;  %v5496_v14 = vld [vmem:[#allocation10 + $0x370] sm:$0xff]  ;;  %v5461_v53 = vld [vmem:[#allocation10 + $0x258] sm:$0xff] }
 0xd9f   : > { %6289 = vmatmul.mubr.bf16.gmra.mrb[96].mxu0 %v14844_v59  ;;  %6482 = vmatmul.mubr.bf16.gmra.mrb[80].mxu1 %v14844_v59  ;;  %v9366_v35 = vcombine.low %v5445_v3, %v5449_v7  ;;  %v9404_v28 = vcombine.low %v5484_v25, %v5488_v8  ;;  %v5500_v5 = vld [vmem:[#allocation10 + $0x390] sm:$0xff]  ;;  %v9374_v16 = vcombine.low %v5453_v1, %v5457_v54  ;;  %v5469_v26 = vld [vmem:[#allocation10 + $0x298] sm:$0xff] }
 0xda0   : > { %6298 = vmatprep.mubr.bf16.mxu0 %v14847_v41  ;;  %6491 = vmatprep.mubr.bf16.mxu1 %v14847_v41  ;;  %v14856_v4 = vpack.c.bf16 %v5320_v10, %v5318_v30  ;;  %v9412_v62 = vcombine.low %v5492_v45, %v5496_v14  ;;  %v5477_v25 = vld [vmem:[#allocation10 + $0x2d8] sm:$0xff] }
 0xda1   : > { %6784 = vmatpush1.bf16.msra.mxu1 %v9342_v19  ;;  %6601 = vmatpush1.bf16.msra.mxu0 %v9380_v38  ;;  %v9375_v19 = vcombine.high %v5453_v1, %v5457_v54  ;;  %v9413_v38 = vcombine.high %v5492_v45, %v5496_v14  ;;  %v5481_v8 = vld [vmem:[#allocation10 + $0x2f8] sm:$0xff] }
 0xda2   : > { %6785 = vmatprep.subr.bf16.mxu1 %v9351_v15  ;;  %6602 = vmatprep.subr.bf16.mxu0 %v9389_v34  ;;  %v5465_v15 = vld [vmem:[#allocation10 + $0x278] sm:$0xff]  ;;  %v5504_v34 = vld [vmem:[#allocation10 + $0x3b0] sm:$0xff]  ;;  %v9398_v54 = vcombine.low %v5477_v25, %v5481_v8 }
 0xda3   : > { %v9383_v13 = vcombine.high %v5461_v53, %v5465_v15  ;;  %v9421_v10 = vcombine.high %v5500_v5, %v5504_v34  ;;  %v9382_v3 = vcombine.low %v5461_v53, %v5465_v15  ;;  %v5485_v1 = vld [vmem:[#allocation10 + $0x318] sm:$0xff] }
 0xda4   : > { %v5493_v14 = vld [vmem:[#allocation10 + $0x358] sm:$0xff] }
 0xda5   : > { %6786 = vmatpush1.bf16.msra.mxu1 %v9350_v27  ;;  %6603 = vmatpush1.bf16.msra.mxu0 %v9388_v56  ;;  %v5473_v27 = vld [vmem:[#allocation10 + $0x2b8] sm:$0xff]  ;;  %v5508_v56 = vld [vmem:[#allocation10 + $0x3d0] sm:$0xff] }
 0xda6   : > { %6787 = vmatprep.subr.bf16.mxu1 %v9359_v6  ;;  %6604 = vmatprep.subr.bf16.mxu0 %v9397_v51  ;;  %v5512_v6 = vld [vmem:[#allocation10 + $0x3f0] sm:$0xff]  ;;  %v9420_v51 = vcombine.low %v5500_v5, %v5504_v34  ;;  %v9391_v30 = vcombine.high %v5469_v26, %v5473_v27  ;;  %v5501_v53 = vld [vmem:[#allocation10 + $0x398] sm:$0xff] }
 0xda7   : > { %6299 = vmatmul.mubr.bf16.gmra.mrb[100].mxu0 %v14856_v4  ;;  %6492 = vmatmul.mubr.bf16.gmra.mrb[84].mxu1 %v14856_v4  ;;  %v9429_v7 = vcombine.high %v5508_v56, %v5512_v6  ;;  %v5509_v34 = vld [vmem:[#allocation10 + $0x3d8] sm:$0xff] }
 0xda9   : > { %6788 = vmatpush1.bf16.msra.mxu1 %v9358_v63  ;;  %6605 = vmatpush1.bf16.msra.mxu0 %v9396_v24  ;;  %v9390_v63 = vcombine.low %v5469_v26, %v5473_v27  ;;  %v9428_v24 = vcombine.low %v5508_v56, %v5512_v6  ;;  %v10534_v26 = vld [vmem:[#allocation12 + $0x4] ss:$8 sps:$4 sm:$0xff]  }
 0xdaa   : > { %6789 = vmatprep.subr.bf16.mxu1 %v9367_v32  ;;  %6606 = vmatprep.subr.bf16.mxu0 %v9405_v9  ;;  %v9399_v32 = vcombine.high %v5477_v25, %v5481_v8  ;;  %v5489_v9 = vld [vmem:[#allocation10 + $0x338] sm:$0xff] }
 0xdab   : > { %v9407_v45 = vcombine.high %v5485_v1, %v5489_v9 }
 0xdad   : > { %6790 = vmatpush1.bf16.msra.mxu1 %v9366_v35  ;;  %6607 = vmatpush1.bf16.msra.mxu0 %v9404_v28  ;;  %v5497_v35 = vld [vmem:[#allocation10 + $0x378] sm:$0xff]  ;;  %v9406_v28 = vcombine.low %v5485_v1, %v5489_v9 }
 0xdae   : > { %6791 = vmatprep.subr.bf16.mxu1 %v9375_v19  ;;  %6608 = vmatprep.subr.bf16.mxu0 %v9413_v38  ;;  %v9415_v19 = vcombine.high %v5493_v14, %v5497_v35  ;;  %v5505_v38 = vld [vmem:[#allocation10 + $0x3b8] sm:$0xff]  ;;  %v9414_v15 = vcombine.low %v5493_v14, %v5497_v35 }
 0xdaf   : > { %v9423_v5 = vcombine.high %v5501_v53, %v5505_v38 }
 0xdb1   : > { %6792 = vmatpush1.bf16.msra.mxu1 %v9374_v16  ;;  %6609 = vmatpush1.bf16.msra.mxu0 %v9412_v62  ;;  %v5513_v16 = vld [vmem:[#allocation10 + $0x3f8] sm:$0xff]  ;;  %v9422_v62 = vcombine.low %v5501_v53, %v5505_v38 }
 0xdb2   : > { %6793 = vmatprep.subr.bf16.mxu1 %v9383_v13  ;;  %6610 = vmatprep.subr.bf16.mxu0 %v9421_v10  ;;  %v9431_v13 = vcombine.high %v5509_v34, %v5513_v16  ;;  %v9430_v10 = vcombine.low %v5509_v34, %v5513_v16 }
 0xdb5   : > { %6794 = vmatpush1.bf16.msra.mxu1 %v9382_v3  ;;  %6611 = vmatpush1.bf16.msra.mxu0 %v9420_v51 }
 0xdb6   : > { %6795 = vmatprep.subr.bf16.mxu1 %v9391_v30  ;;  %6612 = vmatprep.subr.bf16.mxu0 %v9429_v7 }
 0xdb9   : > { %6796 = vmatpush1.bf16.msra.mxu1 %v9390_v63  ;;  %6613 = vmatpush1.bf16.msra.mxu0 %v9428_v24 }
 0xdba   : > { %6797 = vmatprep.subr.bf16.mxu1 %v9399_v32  ;;  %8132 = vmatprep.subr.bf16.mxu0 %v10534_v26 }
 0xdbd   : > { %6798 = vmatpush1.bf16.msra.mxu1 %v9398_v54 }
 0xdbe   : > { %6799 = vmatprep.subr.bf16.mxu1 %v9407_v45 }
 0xdc1   : > { %6800 = vmatpush1.bf16.msra.mxu1 %v9406_v28 }
 0xdc2   : > { %6801 = vmatprep.subr.bf16.mxu1 %v9415_v19 }
 0xdc5   : > { %6802 = vmatpush1.bf16.msra.mxu1 %v9414_v15 }
 0xdc6   : > { %6803 = vmatprep.subr.bf16.mxu1 %v9423_v5 }
 0xdc9   : > { %6804 = vmatpush1.bf16.msra.mxu1 %v9422_v62 }
 0xdca   : > { %6805 = vmatprep.subr.bf16.mxu1 %v9431_v13 }
 0xdcd   : > { %6806 = vmatpush1.bf16.msra.mxu1 %v9430_v10 }
 0xdd5   : > { %v4996_v27 = vpop.xlane.xlu0 %4995 }
 0xdd6   : > { %v5058_v56 = vmul.f32 0.00390625, %v4996_v27 }
 0xdd7   : > { %v4999_v6 = vpop.xlane.xlu1 %4998 }
 0xdd8   : > { %v5090_v3 = vadd.f32 1e-05, %v5058_v56  ;;  %v5059_v51 = vmul.f32 0.00390625, %v4999_v6 }
 0xdda   : > { %11076 = vrsqrt.f32 %v5090_v3  ;;  %v5091_v30 = vadd.f32 1e-05, %v5059_v51 }
 0xddc   : > { %11078 = vrsqrt.f32 %v5091_v30 }
 0xddd   : > { %v5002_v7 = vpop.xlane.xlu0 %5001 }
 0xdde   : > { %v5060_v25 = vmul.f32 0.00390625, %v5002_v7 }
 0xddf   : > { %v5005_v8 = vpop.xlane.xlu1 %5004 }
 0xde0   : > { %v5092_v63 = vadd.f32 1e-05, %v5060_v25  ;;  %v5061_v24 = vmul.f32 0.00390625, %v5005_v8 }
 0xde2   : > { %11080 = vrsqrt.f32 %v5092_v63  ;;  %v5093_v32 = vadd.f32 1e-05, %v5061_v24 }
 0xde4   : > { %v11077_v1 = vpop.eup %11076  ;;  %11082 = vrsqrt.f32 %v5093_v32 }
 0xde5   : > { %v5170_v9 = vmul.f32 %v11077_v1, %v14476_v61  ;;  %v5171_v54 = vmul.f32 %v11077_v1, %v14479_v60  ;;  %v5008_v45 = vpop.xlane.xlu0 %5007 }
 0xde6   : > { %v11079_v14 = vpop.eup %11078  ;;  %v5062_v35 = vmul.f32 0.00390625, %v5008_v45 }
 0xde7   : > { %v5172_v28 = vmul.f32 %v11079_v14, %v14486_v23  ;;  %v5173_v19 = vmul.f32 %v11079_v14, %v14489_v58  ;;  %v5011_v53 = vpop.xlane.xlu1 %5010  ;;  %v5247_v38 = vmul.f32 %v14553_v29, %v5171_v54  ;;  %v5246_v15 = vmul.f32 %v14550_v42, %v5170_v9 }
 0xde8   : > { %v5094_v5 = vadd.f32 1e-05, %v5062_v35  ;;  %v5063_v34 = vmul.f32 0.00390625, %v5011_v53 }
 0xde9   : > { %v5249_v16 = vmul.f32 %v14553_v29, %v5173_v19  ;;  %v5248_v61 = vmul.f32 %v14550_v42, %v5172_v28  ;;  %v5323_v62 = vadd.f32 %v14565_v22, %v5247_v38  ;;  %v5322_v23 = vadd.f32 %v14556_v49, %v5246_v15 }
 0xdea   : > { %11084 = vrsqrt.f32 %v5094_v5  ;;  %v5095_v60 = vadd.f32 1e-05, %v5063_v34 }
 0xdeb   : > { %v5325_v13 = vadd.f32 %v14565_v22, %v5249_v16  ;;  %v5324_v58 = vadd.f32 %v14556_v49, %v5248_v61 }
 0xdec   : > { %v11081_v26 = vpop.eup %11080  ;;  %11086 = vrsqrt.f32 %v5095_v60 }
 0xded   : > { %v5174_v10 = vmul.f32 %v11081_v26, %v14496_v50  ;;  %v5175_v27 = vmul.f32 %v11081_v26, %v14499_v17  ;;  %v5014_v56 = vpop.xlane.xlu0 %5013  ;;  %v14874_v6 = vpack.c.bf16 %v5325_v13, %v5323_v62  ;;  %v14876_v3 = vpack.c.bf16 %v5324_v58, %v5322_v23 }
 0xdee   : > { %v11083_v51 = vpop.eup %11082  ;;  %v5064_v30 = vmul.f32 0.00390625, %v5014_v56 }
 0xdef   : > { %v5176_v7 = vmul.f32 %v11083_v51, %v14506_v18  ;;  %v5177_v25 = vmul.f32 %v11083_v51, %v14509_v52  ;;  %6308 = vmatprep.mubr.bf16.mxu0 %v14874_v6  ;;  %6501 = vmatprep.mubr.bf16.mxu1 %v14874_v6  ;;  %v5251_v8 = vmul.f32 %v14553_v29, %v5175_v27 }
 0xdf0   : > { %v5096_v50 = vadd.f32 1e-05, %v5064_v30  ;;  %v5017_v63 = vpop.xlane.xlu1 %5016  ;;  %6309 = vmatmul.mubr.bf16.gmra.mrb[104].mxu0 %v14876_v3  ;;  %6502 = vmatmul.mubr.bf16.gmra.mrb[88].mxu1 %v14876_v3  ;;  %v5250_v17 = vmul.f32 %v14550_v42, %v5174_v10 }
 0xdf1   : > { %v5065_v24 = vmul.f32 0.00390625, %v5017_v63  ;;  %v5253_v32 = vmul.f32 %v14553_v29, %v5177_v25  ;;  %v5252_v18 = vmul.f32 %v14550_v42, %v5176_v7  ;;  %v5327_v1 = vadd.f32 %v14565_v22, %v5251_v8 }
 0xdf2   : > { %11088 = vrsqrt.f32 %v5096_v50  ;;  %v5326_v14 = vadd.f32 %v14556_v49, %v5250_v17 }
 0xdf3   : > { %v5097_v52 = vadd.f32 1e-05, %v5065_v24  ;;  %v5329_v9 = vadd.f32 %v14565_v22, %v5253_v32  ;;  %v5328_v54 = vadd.f32 %v14556_v49, %v5252_v18 }
 0xdf4   : > { %v11085_v45 = vpop.eup %11084 }
 0xdf5   : > { %v5178_v35 = vmul.f32 %v11085_v45, %v14516_v33  ;;  %v5179_v28 = vmul.f32 %v11085_v45, %v14519_v47  ;;  %11090 = vrsqrt.f32 %v5097_v52  ;;  %v14894_v19 = vpack.c.bf16 %v5329_v9, %v5327_v1 }
 0xdf6   : > { %v11087_v53 = vpop.eup %11086  ;;  %v14896_v38 = vpack.c.bf16 %v5328_v54, %v5326_v14 }
 0xdf7   : > { %v5180_v15 = vmul.f32 %v11087_v53, %v14526_v48  ;;  %v5181_v5 = vmul.f32 %v11087_v53, %v14529_v55  ;;  %v5020_v34 = vpop.xlane.xlu0 %5019  ;;  %6318 = vmatprep.mubr.bf16.mxu0 %v14894_v19  ;;  %6511 = vmatprep.mubr.bf16.mxu1 %v14894_v19  ;;  %v5255_v16 = vmul.f32 %v14553_v29, %v5179_v28 }
 0xdf8   : > { %v5066_v33 = vmul.f32 0.00390625, %v5020_v34  ;;  %6319 = vmatmul.mubr.bf16.gmra.mrb[108].mxu0 %v14896_v38  ;;  %6512 = vmatmul.mubr.bf16.gmra.mrb[92].mxu1 %v14896_v38  ;;  %v5254_v47 = vmul.f32 %v14550_v42, %v5178_v35  ;;  %v16748_v34 = vld [vmem:[#allocation62_spill] sm:$0xff] }
 0xdf9   : > { %v5023_v61 = vpop.xlane.xlu1 %5022  ;;  %v5257_v48 = vmul.f32 %v14553_v29, %v5181_v5  ;;  %v5256_v55 = vmul.f32 %v14550_v42, %v5180_v15  ;;  %v5331_v23 = vadd.f32 %v14565_v22, %v5255_v16  ;;  %v16747_v15 = vld [vmem:[#allocation61_spill] sm:$0xff] }
 0xdfa   : > { %v5067_v60 = vmul.f32 0.00390625, %v5023_v61  ;;  %v5098_v62 = vadd.f32 1e-05, %v5066_v33  ;;  %v5330_v27 = vadd.f32 %v14556_v49, %v5254_v47 }
 0xdfb   : > { %v5333_v58 = vadd.f32 %v14565_v22, %v5257_v48  ;;  %v5332_v26 = vadd.f32 %v14556_v49, %v5256_v55 }
 0xdfc   : > { %v5099_v13 = vadd.f32 1e-05, %v5067_v60  ;;  %v11089_v10 = vpop.eup %11088  ;;  %11092 = vrsqrt.f32 %v5098_v62 }
 0xdfd   : > { %v5182_v56 = vmul.f32 %v11089_v10, %v14559_v0  ;;  %v5183_v51 = vmul.f32 %v11089_v10, %v14562_v57  ;;  %v14914_v30 = vpack.c.bf16 %v5333_v58, %v5331_v23  ;;  %v14916_v7 = vpack.c.bf16 %v5332_v26, %v5330_v27 }
 0xdfe   : > { %11094 = vrsqrt.f32 %v5099_v13 }
 0xdff   : > { %v11091_v25 = vpop.eup %11090  ;;  %6328 = vmatprep.mubr.bf16.mxu0 %v14914_v30  ;;  %6521 = vmatprep.mubr.bf16.mxu1 %v14914_v30  ;;  %v5259_v63 = vmul.f32 %v14553_v29, %v5183_v51  ;;  %v5258_v17 = vmul.f32 %v14550_v42, %v5182_v56 }
 0xe00   : > { %v5026_v8 = vpop.xlane.xlu0 %5025  ;;  %v5184_v0 = vmul.f32 %v11091_v25, %v14582_v2  ;;  %v5185_v57 = vmul.f32 %v11091_v25, %v14585_v44  ;;  %6329 = vmatmul.mubr.bf16.gmra.mrb[112].mxu0 %v14916_v7  ;;  %6522 = vmatmul.mubr.bf16.gmra.mrb[96].mxu1 %v14916_v7 }
 0xe01   : > { %v5029_v50 = vpop.xlane.xlu1 %5028  ;;  %v5068_v24 = vmul.f32 0.00390625, %v5026_v8  ;;  %v5335_v54 = vadd.f32 %v14565_v22, %v5259_v63  ;;  %v5334_v2 = vadd.f32 %v14556_v49, %v5258_v17 }
 0xe02   : > { %v5069_v32 = vmul.f32 0.00390625, %v5029_v50  ;;  %v5261_v1 = vmul.f32 %v14553_v29, %v5185_v57  ;;  %v5260_v9 = vmul.f32 %v14550_v42, %v5184_v0 }
 0xe03   : > { %v5100_v18 = vadd.f32 1e-05, %v5068_v24 }
 0xe04   : > { %v5101_v52 = vadd.f32 1e-05, %v5069_v32  ;;  %v5337_v45 = vadd.f32 %v14565_v22, %v5261_v1  ;;  %v5336_v44 = vadd.f32 %v14556_v49, %v5260_v9  ;;  %v16749_v32 = vld [vmem:[#allocation41_spill] sm:$0xff] }
 0xe05   : > { %11096 = vrsqrt.f32 %v5100_v18 }
 0xe06   : > { %11098 = vrsqrt.f32 %v5101_v52  ;;  %v11093_v14 = vpop.eup %11092  ;;  %v14932_v35 = vpack.c.bf16 %v5337_v45, %v5335_v54  ;;  %v14934_v28 = vpack.c.bf16 %v5336_v44, %v5334_v2  ;;  %v16750_v52 = vld [vmem:[#allocation37_spill] sm:$0xff] }
 0xe07   : > { %v5186_v5 = vmul.f32 %v11093_v14, %v16747_v15  ;;  %v5187_v16 = vmul.f32 %v11093_v14, %v16748_v34 }
 0xe08   : > { %v11095_v53 = vpop.eup %11094  ;;  %v5032_v33 = vpop.xlane.xlu0 %5031  ;;  %6338 = vmatprep.mubr.bf16.mxu0 %v14932_v35  ;;  %6531 = vmatprep.mubr.bf16.mxu1 %v14932_v35 }
 0xe09   : > { %v5035_v61 = vpop.xlane.xlu1 %5034  ;;  %v5188_v47 = vmul.f32 %v11095_v53, %v14618_v37  ;;  %v5189_v60 = vmul.f32 %v11095_v53, %v14621_v36  ;;  %v5070_v48 = vmul.f32 0.00390625, %v5032_v33  ;;  %6339 = vmatmul.mubr.bf16.gmra.mrb[116].mxu0 %v14934_v28  ;;  %6532 = vmatmul.mubr.bf16.gmra.mrb[100].mxu1 %v14934_v28  ;;  %v5263_v62 = vmul.f32 %v14553_v29, %v5187_v16 }
 0xe0a   : > { %v5071_v55 = vmul.f32 0.00390625, %v5035_v61  ;;  %v5262_v13 = vmul.f32 %v14550_v42, %v5186_v5 }
 0xe0b   : > { %v5102_v23 = vadd.f32 1e-05, %v5070_v48  ;;  %v5265_v37 = vmul.f32 %v14553_v29, %v5189_v60  ;;  %v5264_v36 = vmul.f32 %v14550_v42, %v5188_v47  ;;  %v5339_v26 = vadd.f32 %v14565_v22, %v5263_v62 }
 0xe0c   : > { %v5103_v58 = vadd.f32 1e-05, %v5071_v55  ;;  %v5338_v27 = vadd.f32 %v14556_v49, %v5262_v13 }
 0xe0d   : > { %11100 = vrsqrt.f32 %v5102_v23  ;;  %v5341_v10 = vadd.f32 %v14565_v22, %v5265_v37  ;;  %v5340_v56 = vadd.f32 %v14556_v49, %v5264_v36  ;;  %v16751_v36 = vld [vmem:[#allocation53_spill] sm:$0xff] }
 0xe0e   : > { %11102 = vrsqrt.f32 %v5103_v58 }
 0xe0f   : > { %v5038_v51 = vpop.xlane.xlu0 %5037  ;;  %v11097_v25 = vpop.eup %11096  ;;  %v14952_v50 = vpack.c.bf16 %v5341_v10, %v5339_v26  ;;  %v14954_v63 = vpack.c.bf16 %v5340_v56, %v5338_v27  ;;  %v16752_v10 = vld [vmem:[#allocation27_spill] sm:$0xff] }
 0xe10   : > { %v5072_v8 = vmul.f32 0.00390625, %v5038_v51  ;;  %v11099_v17 = vpop.eup %11098  ;;  %v5190_v0 = vmul.f32 %v11097_v25, %v14639_v12  ;;  %v5191_v57 = vmul.f32 %v11097_v25, %v14642_v43  ;;  %v5041_v24 = vpop.xlane.xlu1 %5040 }
 0xe11   : > { %v5192_v18 = vmul.f32 %v11099_v17, %v16749_v32  ;;  %v5193_v1 = vmul.f32 %v11099_v17, %v16750_v52  ;;  %v5073_v54 = vmul.f32 0.00390625, %v5041_v24  ;;  %6348 = vmatprep.mubr.bf16.mxu0 %v14952_v50  ;;  %6541 = vmatprep.mubr.bf16.mxu1 %v14952_v50 }
 0xe12   : > { %v5104_v9 = vadd.f32 1e-05, %v5072_v8  ;;  %6349 = vmatmul.mubr.bf16.gmra.mrb[120].mxu0 %v14954_v63  ;;  %6542 = vmatmul.mubr.bf16.gmra.mrb[104].mxu1 %v14954_v63  ;;  %v5267_v45 = vmul.f32 %v14553_v29, %v5191_v57  ;;  %v5266_v12 = vmul.f32 %v14550_v42, %v5190_v0  ;;  %v16753_v8 = vld [vmem:[#allocation28_spill] sm:$0xff]  ;;  %v16754_v0 = vld [vmem:[#allocation26_spill] sm:$0xff] }
 0xe13   : > { %v5105_v43 = vadd.f32 1e-05, %v5073_v54  ;;  %v5269_v2 = vmul.f32 %v14553_v29, %v5193_v1  ;;  %v5268_v44 = vmul.f32 %v14550_v42, %v5192_v18 }
 0xe14   : > { %11104 = vrsqrt.f32 %v5104_v9  ;;  %v5343_v14 = vadd.f32 %v14565_v22, %v5267_v45  ;;  %v5342_v15 = vadd.f32 %v14556_v49, %v5266_v12 }
 0xe15   : > { %11106 = vrsqrt.f32 %v5105_v43  ;;  %v5345_v53 = vadd.f32 %v14565_v22, %v5269_v2  ;;  %v5344_v5 = vadd.f32 %v14556_v49, %v5268_v44  ;;  %v16756_v2 = vld [vmem:[#allocation31_spill] sm:$0xff] }
 0xe16   : > { %v10535_v44 = vld [vmem:[#allocation12 + $0x10] ss:$8 sps:$4 sm:$0xff]  }
 0xe17   : > { %v11101_v34 = vpop.eup %11100  ;;  %v14972_v16 = vpack.c.bf16 %v5345_v53, %v5343_v14  ;;  %v14974_v33 = vpack.c.bf16 %v5344_v5, %v5342_v15  ;;  %v10540_v14 = vld [vmem:[#allocation12 + $0x24] ss:$8 sps:$4 sm:$0xff]   ;;  %v16758_v53 = vld [vmem:[#allocation38_spill] sm:$0xff] }
 0xe18   : > { %v11103_v61 = vpop.eup %11102  ;;  %v5194_v47 = vmul.f32 %v11101_v34, %v14690_v39  ;;  %v5195_v60 = vmul.f32 %v11101_v34, %v14693_v31  ;;  %v5526_v15 = vsub.s32 2, %v16758_v53  ;;  %v5514_v5 = vld [vmem:[%s16759_s26] sm:$0xff]  ;;  %v5530_v34 = vsub.s32 3, %v16758_v53 }
 0xe19   : > { %v5196_v48 = vmul.f32 %v11103_v61, %v14707_v21  ;;  %v5197_v55 = vmul.f32 %v11103_v61, %v14710_v20  ;;  %6358 = vmatprep.mubr.bf16.mxu0 %v14972_v16  ;;  %6551 = vmatprep.mubr.bf16.mxu1 %v14972_v16  ;;  %v10538_v61 = vld [vmem:[#allocation12 + $0x20] ss:$8 sps:$4 sm:$0xff]  }
 0xe1a   : > { %6359 = vmatmul.mubr.bf16.gmra.mrb[124].mxu0 %v14974_v33  ;;  %6552 = vmatmul.mubr.bf16.gmra.mrb[108].mxu1 %v14974_v33  ;;  %v5271_v62 = vmul.f32 %v14553_v29, %v5195_v60  ;;  %v5270_v13 = vmul.f32 %v14550_v42, %v5194_v47  ;;  %v10543_v47 = vld [vmem:[#allocation12 + $0x34] ss:$8 sps:$4 sm:$0xff]   ;;  %v16760_v60 = vld [vmem:[#allocation20_spill] sm:$0xff] }
 0xe1b   : > { %v5273_v39 = vmul.f32 %v14553_v29, %v5197_v55  ;;  %v5272_v31 = vmul.f32 %v14550_v42, %v5196_v48  ;;  %v16761_v48 = vld [vmem:[#allocation42_spill] sm:$0xff] }
 0xe1c   : > { %v5347_v21 = vadd.f32 %v14565_v22, %v5271_v62  ;;  %v5346_v58 = vadd.f32 %v14556_v49, %v5270_v13  ;;  %v15034_v55 = vrot.slane %v5514_v5, %v16761_v48  ;;  %v15036_v62 = vrot.slane %v5514_v5, %v5526_v15  ;;  %v16762_v13 = vld [vmem:[#allocation49_spill] sm:$0xff] }
 0xe1d   : > { %v5349_v20 = vadd.f32 %v14565_v22, %v5273_v39  ;;  %v5348_v37 = vadd.f32 %v14556_v49, %v5272_v31  ;;  %v16763_v39 = vld [vmem:[#allocation39_spill] sm:$0xff] }
 0xe1e   : > { %v11105_v23 = vpop.eup %11104  ;;  %v15041_v31 = vrot.slane %v5514_v5, %v16763_v39 }
 0xe1f   : > { %v5198_v26 = vmul.f32 %v11105_v23, %v16751_v36  ;;  %v5199_v27 = vmul.f32 %v11105_v23, %v16752_v10  ;;  %v11107_v56 = vpop.eup %11106  ;;  %v14994_v51 = vpack.c.bf16 %v5349_v20, %v5347_v21  ;;  %v14996_v25 = vpack.c.bf16 %v5348_v37, %v5346_v58  ;;  %v10541_v21 = vld [vmem:[#allocation12 + $0x30] ss:$8 sps:$4 sm:$0xff]   ;;  %v10546_v37 = vld [vmem:[#allocation12 + $0x44] ss:$8 sps:$4 sm:$0xff]  }
 0xe20   : > { %v5200_v17 = vmul.f32 %v11107_v56, %v16753_v8  ;;  %v5201_v57 = vmul.f32 %v11107_v56, %v16754_v0  ;;  %v15043_v23 = vrot.slane %v5514_v5, %v5530_v34  ;;  %v16765_v5 = vld [vmem:[#allocation24_spill] sm:$0xff] }
 0xe21   : > { %v5275_v24 = vmul.f32 %v14553_v29, %v5199_v27  ;;  %v5274_v32 = vmul.f32 %v14550_v42, %v5198_v26  ;;  %6368 = vmatprep.mubr.bf16.mxu0 %v14994_v51  ;;  %6561 = vmatprep.mubr.bf16.mxu1 %v14994_v51 }
 0xe22   : > { %6369 = vmatmul.mubr.bf16.gmra.mrb[128].mxu0 %v14996_v25  ;;  %6562 = vmatmul.mubr.bf16.gmra.mrb[112].mxu1 %v14996_v25  ;;  %v5277_v18 = vmul.f32 %v14553_v29, %v5201_v57  ;;  %v5276_v52 = vmul.f32 %v14550_v42, %v5200_v17  ;;  %v16755_v42 = vld [vmem:[#allocation33_spill] sm:$0xff] }
 0xe23   : > { %v5351_v1 = vadd.f32 %v14565_v22, %v5275_v24  ;;  %v5350_v54 = vadd.f32 %v14556_v49, %v5274_v32  ;;  %v10532_v29 = vld [vmem:[#allocation12] ss:$8 sps:$4 sm:$0xff]  }
 0xe24   : > { %v5353_v9 = vadd.f32 %v14565_v22, %v5277_v18  ;;  %v5352_v45 = vadd.f32 %v14556_v49, %v5276_v52  ;;  %v10537_v22 = vld [vmem:[#allocation12 + $0x14] ss:$8 sps:$4 sm:$0xff]   ;;  %v10544_v52 = vld [vmem:[#allocation12 + $0x40] ss:$8 sps:$4 sm:$0xff]  }
 0xe25   : > { %v16757_v49 = vld [vmem:[#allocation34_spill] sm:$0xff] }
 0xe26   : > { %v15012_v12 = vpack.c.bf16 %v5353_v9, %v5351_v1  ;;  %v15014_v43 = vpack.c.bf16 %v5352_v45, %v5350_v54  ;;  %v10549_v54 = vld [vmem:[#allocation12 + $0x54] ss:$8 sps:$4 sm:$0xff]  }
 0xe28   : > { %6378 = vmatprep.mubr.bf16.mxu0 %v15012_v12  ;;  %6571 = vmatprep.mubr.bf16.mxu1 %v15012_v12 }
 0xe2a   : > { %6379 = vmatmul.mubr.bf16.gmra.mrb[132].mxu0 %v15014_v43  ;;  %6572 = vmatmul.mubr.bf16.gmra.mrb[116].mxu1 %v15014_v43 }
 0xe2b   : > { %6614 = vmatprep.mubr.bf16.mxu0 %v16755_v42  ;;  %6807 = vmatprep.mubr.bf16.mxu1 %v16755_v42 }
 0xe32   : > { %6615 = vmatmul.mubr.bf16.vlgmr.msra.gmra.mrb[136].mxu0 %v16756_v2  ;;  %6808 = vmatmul.mubr.bf16.vlgmr.msra.gmra.mrb[120].mxu1 %v16756_v2  ;;  %v16764_v2 = vld [vmem:[#allocation55_spill] sm:$0xff] }
 0xe33   : > { %6624 = vmatprep.mubr.bf16.mxu0 %v16757_v49  ;;  %6817 = vmatprep.mubr.bf16.mxu1 %v16757_v49 }
 0xe34   : > { %8133 = vmatpush1.bf16.msra.mxu0 %v10532_v29 }
 0xe35   : > { %8134 = vmatprep.subr.bf16.mxu0 %v10537_v22 }
 0xe38   : > { %8135 = vmatpush1.bf16.msra.mxu0 %v10535_v44 }
 0xe39   : > { %8136 = vmatprep.subr.bf16.mxu0 %v10540_v14 }
 0xe3a   : > { %6625 = vmatmul.mubr.bf16.gmra.mrb[140].mxu0 %v16760_v60  ;;  %6818 = vmatmul.mubr.bf16.gmra.mrb[124].mxu1 %v16760_v60 }
 0xe3b   : > { %6634 = vmatprep.mubr.bf16.mxu0 %v16762_v13  ;;  %6827 = vmatprep.mubr.bf16.mxu1 %v16762_v13 }
 0xe3c   : > { %8137 = vmatpush1.bf16.msra.mxu0 %v10538_v61  ;;  %v6230_v20 = vpop.f32.mrb[72].mxu0  ;;  %v6423_v58 = vpop.f32.mrb[56].mxu1 }
 0xe3d   : > { %8138 = vmatprep.subr.bf16.mxu0 %v10543_v47  ;;  %v6231_v36 = vadd.f32 %v6230_v20, %v15034_v55  ;;  %v6424_v26 = vadd.f32 %v6423_v58, %v15036_v62  ;;  %v6232_v10 = vpop.f32.mrb[73].mxu0  ;;  %v6425_v27 = vpop.f32.mrb[57].mxu1  ;;  %v10547_v47 = vld [vmem:[#allocation12 + $0x50] ss:$8 sps:$4 sm:$0xff]   ;;  %v10552_v58 = vld [vmem:[#allocation12 + $0x64] ss:$8 sps:$4 sm:$0xff]  }
 0xe3e   : > { %v6233_v56 = vadd.f32 %v6232_v10, %v15041_v31  ;;  %v6426_v8 = vadd.f32 %v6425_v27, %v15043_v23  ;;  %v6234_v17 = vpop.f32.mrb[74].mxu0  ;;  %v6427_v0 = vpop.f32.mrb[58].mxu1 }
 0xe3f   : > { %v6235_v57 = vadd.f32 %v6234_v17, %v15034_v55  ;;  %v6428_v24 = vadd.f32 %v6427_v0, %v15036_v62  ;;  %v6236_v32 = vpop.f32.mrb[75].mxu0  ;;  %v6429_v18 = vpop.f32.mrb[59].mxu1  ;;  %v6968_v45 = vmax.f32 %v6231_v36, 0.0  ;;  %v6970_v42 = vmax.f32 %v6424_v26, 0.0 }
 0xe40   : > { %8139 = vmatpush1.bf16.msra.mxu0 %v10541_v21  ;;  %v6237_v1 = vadd.f32 %v6236_v32, %v15041_v31  ;;  %v6430_v9 = vadd.f32 %v6429_v18, %v15043_v23  ;;  %v6969_v49 = vmax.f32 %v6233_v56, 0.0  ;;  %v6971_v44 = vmax.f32 %v6426_v8, 0.0  ;;  %v10550_v18 = vld [vmem:[#allocation12 + $0x60] ss:$8 sps:$4 sm:$0xff]  }
 0xe41   : > { %8140 = vmatprep.subr.bf16.mxu0 %v10546_v37  ;;  %v6976_v29 = vmax.f32 %v6235_v57, 0.0  ;;  %v6978_v22 = vmax.f32 %v6428_v24, 0.0 }
 0xe42   : > { %6635 = vmatmul.mubr.bf16.gmra.mrb[144].mxu0 %v16764_v2  ;;  %6828 = vmatmul.mubr.bf16.gmra.mrb[128].mxu1 %v16764_v2  ;;  %v6977_v14 = vmax.f32 %v6237_v1, 0.0  ;;  %v6979_v15 = vmax.f32 %v6430_v9, 0.0  ;;  %v10555_v9 = vld [vmem:[#allocation12 + $0x74] ss:$8 sps:$4 sm:$0xff]  }
 0xe43   : > { %6644 = vmatprep.mubr.bf16.mxu0 %v16765_v5  ;;  %6837 = vmatprep.mubr.bf16.mxu1 %v16765_v5  ;;  %v15057_v34 = vpack.c.bf16 %v6976_v29, %v6968_v45  ;;  %v15059_v61 = vpack.c.bf16 %v6978_v22, %v6970_v42  ;;  %v16766_v22 = vld [vmem:[#allocation44_spill] sm:$0xff] }
 0xe44   : > { %8141 = vmatpush1.bf16.msra.mxu0 %v10544_v52  ;;  %v15061_v60 = vpack.c.bf16 %v6977_v14, %v6969_v49  ;;  %v15063_v13 = vpack.c.bf16 %v6979_v15, %v6971_v44  ;;  %v16767_v15 = vld [vmem:[#allocation70_spill] sm:$0xff] }
 0xe45   : > { %v6240_v21 = vpop.f32.mrb[76].mxu0  ;;  %v6433_v20 = vpop.f32.mrb[60].mxu1  ;;  %8142 = vmatprep.subr.bf16.mxu0 %v10549_v54 }
 0xe46   : > { %v6241_v37 = vadd.f32 %v6240_v21, %v15034_v55  ;;  %v6434_v36 = vadd.f32 %v6433_v20, %v15036_v62  ;;  %v6242_v26 = vpop.f32.mrb[77].mxu0  ;;  %v6435_v10 = vpop.f32.mrb[61].mxu1  ;;  %v10553_v21 = vld [vmem:[#allocation12 + $0x70] ss:$8 sps:$4 sm:$0xff]  }
 0xe47   : > { %v6243_v27 = vadd.f32 %v6242_v26, %v15041_v31  ;;  %v6436_v56 = vadd.f32 %v6435_v10, %v15043_v23  ;;  %v6244_v8 = vpop.f32.mrb[78].mxu0  ;;  %v6437_v17 = vpop.f32.mrb[62].mxu1  ;;  %v10558_v26 = vld [vmem:[#allocation12 + $0x84] ss:$8 sps:$4 sm:$0xff]  }
 0xe48   : > { %v6245_v0 = vadd.f32 %v6244_v8, %v15034_v55  ;;  %v6438_v57 = vadd.f32 %v6437_v17, %v15036_v62  ;;  %v6246_v24 = vpop.f32.mrb[79].mxu0  ;;  %v6439_v32 = vpop.f32.mrb[63].mxu1  ;;  %8143 = vmatpush1.bf16.msra.mxu0 %v10547_v47  ;;  %v6984_v54 = vmax.f32 %v6241_v37, 0.0  ;;  %v6986_v45 = vmax.f32 %v6434_v36, 0.0 }
 0xe49   : > { %v6247_v52 = vadd.f32 %v6246_v24, %v15041_v31  ;;  %v6440_v1 = vadd.f32 %v6439_v32, %v15043_v23  ;;  %8144 = vmatprep.subr.bf16.mxu0 %v10552_v58  ;;  %v6985_v2 = vmax.f32 %v6243_v27, 0.0  ;;  %v6987_v49 = vmax.f32 %v6436_v56, 0.0 }
 0xe4a   : > { %v6992_v42 = vmax.f32 %v6245_v0, 0.0  ;;  %v6994_v29 = vmax.f32 %v6438_v57, 0.0  ;;  %6645 = vmatmul.mubr.bf16.gmra.mrb[148].mxu0 %v16766_v22  ;;  %6838 = vmatmul.mubr.bf16.gmra.mrb[132].mxu1 %v16766_v22 }
 0xe4b   : > { %v6993_v44 = vmax.f32 %v6247_v52, 0.0  ;;  %v6995_v14 = vmax.f32 %v6440_v1, 0.0  ;;  %6654 = vmatprep.mubr.bf16.mxu0 %v16767_v15  ;;  %6847 = vmatprep.mubr.bf16.mxu1 %v16767_v15 }
 0xe4c   : > { %v15077_v5 = vpack.c.bf16 %v6992_v42, %v6984_v54  ;;  %v15079_v47 = vpack.c.bf16 %v6994_v29, %v6986_v45  ;;  %8145 = vmatpush1.bf16.msra.mxu0 %v10550_v18  ;;  %v10561_v42 = vld [vmem:[#allocation12 + $0x94] ss:$8 sps:$4 sm:$0xff]  }
 0xe4d   : > { %v15081_v20 = vpack.c.bf16 %v6993_v44, %v6985_v2  ;;  %v15083_v58 = vpack.c.bf16 %v6995_v14, %v6987_v49  ;;  %v6250_v37 = vpop.f32.mrb[80].mxu0  ;;  %v6443_v36 = vpop.f32.mrb[64].mxu1  ;;  %8146 = vmatprep.subr.bf16.mxu0 %v10555_v9  ;;  %v10556_v9 = vld [vmem:[#allocation12 + $0x80] ss:$8 sps:$4 sm:$0xff]  }
 0xe4e   : > { %v6251_v10 = vadd.f32 %v6250_v37, %v15034_v55  ;;  %v6444_v27 = vadd.f32 %v6443_v36, %v15036_v62  ;;  %v6252_v56 = vpop.f32.mrb[81].mxu0  ;;  %v6445_v8 = vpop.f32.mrb[65].mxu1  ;;  %v16768_v44 = vld [vmem:[#allocation72_spill] sm:$0xff] }
 0xe4f   : > { %v6253_v17 = vadd.f32 %v6252_v56, %v15041_v31  ;;  %v6446_v0 = vadd.f32 %v6445_v8, %v15043_v23  ;;  %v6254_v57 = vpop.f32.mrb[82].mxu0  ;;  %v6447_v24 = vpop.f32.mrb[66].mxu1 }
 0xe50   : > { %v6255_v32 = vadd.f32 %v6254_v57, %v15034_v55  ;;  %v6448_v18 = vadd.f32 %v6447_v24, %v15036_v62  ;;  %v6256_v52 = vpop.f32.mrb[83].mxu0  ;;  %v6449_v1 = vpop.f32.mrb[67].mxu1  ;;  %8147 = vmatpush1.bf16.msra.mxu0 %v10553_v21  ;;  %v7000_v29 = vmax.f32 %v6251_v10, 0.0  ;;  %v7002_v22 = vmax.f32 %v6444_v27, 0.0  ;;  %v10559_v10 = vld [vmem:[#allocation12 + $0x90] ss:$8 sps:$4 sm:$0xff]  }
 0xe51   : > { %v6257_v54 = vadd.f32 %v6256_v52, %v15041_v31  ;;  %v6450_v45 = vadd.f32 %v6449_v1, %v15043_v23  ;;  %8148 = vmatprep.subr.bf16.mxu0 %v10558_v26  ;;  %v7001_v14 = vmax.f32 %v6253_v17, 0.0  ;;  %v7003_v15 = vmax.f32 %v6446_v0, 0.0  ;;  %v10564_v17 = vld [vmem:[#allocation12 + $0xa4] ss:$8 sps:$4 sm:$0xff]  }
 0xe52   : > { %v7008_v2 = vmax.f32 %v6255_v32, 0.0  ;;  %v7010_v49 = vmax.f32 %v6448_v18, 0.0  ;;  %6655 = vmatmul.mubr.bf16.gmra.mrb[152].mxu0 %v16768_v44  ;;  %6848 = vmatmul.mubr.bf16.gmra.mrb[136].mxu1 %v16768_v44  ;;  %v10567_v44 = vld [vmem:[#allocation12 + $0xb4] ss:$8 sps:$4 sm:$0xff]  }
 0xe53   : > { %v7009_v37 = vmax.f32 %v6257_v54, 0.0  ;;  %v7011_v36 = vmax.f32 %v6450_v45, 0.0  ;;  %6664 = vmatprep.mubr.bf16.mxu0 %v14814_v40  ;;  %6857 = vmatprep.mubr.bf16.mxu1 %v14814_v40 }
 0xe54   : > { %v15097_v21 = vpack.c.bf16 %v7008_v2, %v7000_v29  ;;  %v15099_v26 = vpack.c.bf16 %v7010_v49, %v7002_v22  ;;  %8149 = vmatpush1.bf16.msra.mxu0 %v10556_v9 }
 0xe55   : > { %v15101_v27 = vpack.c.bf16 %v7009_v37, %v7001_v14  ;;  %v15103_v56 = vpack.c.bf16 %v7011_v36, %v7003_v15  ;;  %v6260_v8 = vpop.f32.mrb[84].mxu0  ;;  %8150 = vmatprep.subr.bf16.mxu0 %v10561_v42  ;;  %v10562_v42 = vld [vmem:[#allocation12 + $0xa0] ss:$8 sps:$4 sm:$0xff]  }
 0xe56   : > { %v6453_v57 = vpop.f32.mrb[68].mxu1  ;;  %v6261_v0 = vadd.f32 %v6260_v8, %v15034_v55  ;;  %v6262_v32 = vpop.f32.mrb[85].mxu0 }
 0xe57   : > { %v6454_v24 = vadd.f32 %v6453_v57, %v15036_v62  ;;  %v6455_v40 = vpop.f32.mrb[69].mxu1  ;;  %v6263_v18 = vadd.f32 %v6262_v32, %v15041_v31  ;;  %v6264_v1 = vpop.f32.mrb[86].mxu0 }
 0xe58   : > { %v6456_v52 = vadd.f32 %v6455_v40, %v15043_v23  ;;  %v6457_v9 = vpop.f32.mrb[70].mxu1  ;;  %v6265_v54 = vadd.f32 %v6264_v1, %v15034_v55  ;;  %v6266_v29 = vpop.f32.mrb[87].mxu0  ;;  %8151 = vmatpush1.bf16.msra.mxu0 %v10559_v10  ;;  %v7016_v14 = vmax.f32 %v6261_v0, 0.0  ;;  %v10565_v0 = vld [vmem:[#allocation12 + $0xb0] ss:$8 sps:$4 sm:$0xff]  }
 0xe59   : > { %v6458_v45 = vadd.f32 %v6457_v9, %v15036_v62  ;;  %v6459_v22 = vpop.f32.mrb[71].mxu1  ;;  %v6267_v2 = vadd.f32 %v6266_v29, %v15041_v31  ;;  %8152 = vmatprep.subr.bf16.mxu0 %v10564_v17  ;;  %v7018_v15 = vmax.f32 %v6454_v24, 0.0  ;;  %v7017_v8 = vmax.f32 %v6263_v18, 0.0  ;;  %v10570_v18 = vld [vmem:[#allocation12 + $0xc4] ss:$8 sps:$4 sm:$0xff]  }
 0xe5a   : > { %v6460_v49 = vadd.f32 %v6459_v22, %v15043_v23  ;;  %v7024_v37 = vmax.f32 %v6265_v54, 0.0  ;;  %6665 = vmatmul.mubr.bf16.gmra.mrb[156].mxu0 %v14816_v46  ;;  %6858 = vmatmul.mubr.bf16.gmra.mrb[140].mxu1 %v14816_v46  ;;  %v7019_v57 = vmax.f32 %v6456_v52, 0.0 }
 0xe5b   : > { %v7026_v36 = vmax.f32 %v6458_v45, 0.0  ;;  %v7025_v32 = vmax.f32 %v6267_v2, 0.0  ;;  %6674 = vmatprep.mubr.bf16.mxu0 %v14833_v11  ;;  %6867 = vmatprep.mubr.bf16.mxu1 %v14833_v11 }
 0xe5c   : > { %v7027_v40 = vmax.f32 %v6460_v49, 0.0  ;;  %v15117_v10 = vpack.c.bf16 %v7024_v37, %v7016_v14  ;;  %8153 = vmatpush1.bf16.msra.mxu0 %v10562_v42 }
 0xe5d   : > { %v15119_v17 = vpack.c.bf16 %v7026_v36, %v7018_v15  ;;  %v15121_v24 = vpack.c.bf16 %v7025_v32, %v7017_v8  ;;  %v6270_v9 = vpop.f32.mrb[88].mxu0  ;;  %8154 = vmatprep.subr.bf16.mxu0 %v10567_v44  ;;  %v10568_v44 = vld [vmem:[#allocation12 + $0xc0] ss:$8 sps:$4 sm:$0xff]  }
 0xe5e   : > { %v15123_v1 = vpack.c.bf16 %v7027_v40, %v7019_v57  ;;  %v6463_v46 = vpop.f32.mrb[72].mxu1  ;;  %v6271_v52 = vadd.f32 %v6270_v9, %v15034_v55  ;;  %v6272_v45 = vpop.f32.mrb[89].mxu0  ;;  %v10573_v57 = vld [vmem:[#allocation12 + $0xd4] ss:$8 sps:$4 sm:$0xff]  }
 0xe5f   : > { %v6464_v54 = vadd.f32 %v6463_v46, %v15036_v62  ;;  %v6465_v11 = vpop.f32.mrb[73].mxu1  ;;  %v6273_v29 = vadd.f32 %v6272_v45, %v15041_v31  ;;  %v6274_v42 = vpop.f32.mrb[90].mxu0 }
 0xe60   : > { %v6466_v22 = vadd.f32 %v6465_v11, %v15043_v23  ;;  %v6467_v2 = vpop.f32.mrb[74].mxu1  ;;  %v6275_v49 = vadd.f32 %v6274_v42, %v15034_v55  ;;  %v6276_v15 = vpop.f32.mrb[91].mxu0  ;;  %8155 = vmatpush1.bf16.msra.mxu0 %v10565_v0  ;;  %v7032_v32 = vmax.f32 %v6271_v52, 0.0  ;;  %v10571_v52 = vld [vmem:[#allocation12 + $0xd0] ss:$8 sps:$4 sm:$0xff]  }
 0xe61   : > { %v6468_v14 = vadd.f32 %v6467_v2, %v15036_v62  ;;  %v6469_v37 = vpop.f32.mrb[75].mxu1  ;;  %v6277_v36 = vadd.f32 %v6276_v15, %v15041_v31  ;;  %8156 = vmatprep.subr.bf16.mxu0 %v10570_v18  ;;  %v7034_v40 = vmax.f32 %v6464_v54, 0.0  ;;  %v7033_v45 = vmax.f32 %v6273_v29, 0.0  ;;  %v10574_v29 = vld [vmem:[#allocation12 + $0xe0] ss:$8 sps:$4 sm:$0xff]  }
 0xe62   : > { %v6470_v8 = vadd.f32 %v6469_v37, %v15043_v23  ;;  %v7040_v9 = vmax.f32 %v6275_v49, 0.0  ;;  %6675 = vmatmul.mubr.bf16.gmra.mrb[160].mxu0 %v14844_v59  ;;  %6868 = vmatmul.mubr.bf16.gmra.mrb[144].mxu1 %v14844_v59  ;;  %v7035_v11 = vmax.f32 %v6466_v22, 0.0  ;;  %v10576_v59 = vld [vmem:[#allocation12 + $0xe4] ss:$8 sps:$4 sm:$0xff]   ;;  %v10579_v15 = vld [vmem:[#allocation12 + $0xf4] ss:$8 sps:$4 sm:$0xff]  }
 0xe63   : > { %v7042_v46 = vmax.f32 %v6468_v14, 0.0  ;;  %v7041_v42 = vmax.f32 %v6277_v36, 0.0  ;;  %6684 = vmatprep.mubr.bf16.mxu0 %v14847_v41  ;;  %6877 = vmatprep.mubr.bf16.mxu1 %v14847_v41 }
 0xe64   : > { %v7043_v2 = vmax.f32 %v6470_v8, 0.0  ;;  %v15137_v0 = vpack.c.bf16 %v7040_v9, %v7032_v32  ;;  %8157 = vmatpush1.bf16.msra.mxu0 %v10568_v44 }
 0xe65   : > { %v15139_v18 = vpack.c.bf16 %v7042_v46, %v7034_v40  ;;  %v15141_v54 = vpack.c.bf16 %v7041_v42, %v7033_v45  ;;  %8158 = vmatprep.subr.bf16.mxu0 %v10573_v57 }
 0xe66   : > { %v15143_v49 = vpack.c.bf16 %v7043_v2, %v7035_v11  ;;  %v10577_v11 = vld [vmem:[#allocation12 + $0xf0] ss:$8 sps:$4 sm:$0xff]  }
 0xe68   : > { %8159 = vmatpush1.bf16.msra.mxu0 %v10571_v52 }
 0xe69   : > { %8160 = vmatprep.subr.bf16.mxu0 %v10576_v59 }
 0xe6a   : > { %v6280_v22 = vpop.f32.mrb[92].mxu0  ;;  %v6473_v14 = vpop.f32.mrb[76].mxu1  ;;  %6685 = vmatmul.mubr.bf16.gmra.mrb[164].mxu0 %v14856_v4  ;;  %6878 = vmatmul.mubr.bf16.gmra.mrb[148].mxu1 %v14856_v4 }
 0xe6b   : > { %v6281_v41 = vadd.f32 %v6280_v22, %v15034_v55  ;;  %v6474_v37 = vadd.f32 %v6473_v14, %v15036_v62  ;;  %v6282_v44 = vpop.f32.mrb[93].mxu0  ;;  %v6475_v36 = vpop.f32.mrb[77].mxu1  ;;  %6694 = vmatprep.mubr.bf16.mxu0 %v14874_v6  ;;  %6887 = vmatprep.mubr.bf16.mxu1 %v14874_v6  ;;  %v10582_v6 = vld [vmem:[#allocation12 + $0x104] ss:$8 sps:$4 sm:$0xff]  }
 0xe6c   : > { %v6283_v8 = vadd.f32 %v6282_v44, %v15041_v31  ;;  %v6476_v57 = vadd.f32 %v6475_v36, %v15043_v23  ;;  %v6284_v32 = vpop.f32.mrb[94].mxu0  ;;  %v6477_v40 = vpop.f32.mrb[78].mxu1  ;;  %8161 = vmatpush1.bf16.msra.mxu0 %v10574_v29 }
 0xe6d   : > { %v6285_v9 = vadd.f32 %v6284_v32, %v15034_v55  ;;  %v6478_v4 = vadd.f32 %v6477_v40, %v15036_v62  ;;  %v6286_v46 = vpop.f32.mrb[95].mxu0  ;;  %v6479_v45 = vpop.f32.mrb[79].mxu1  ;;  %8162 = vmatprep.subr.bf16.mxu0 %v10579_v15  ;;  %v7048_v52 = vmax.f32 %v6281_v41, 0.0  ;;  %v7050_v59 = vmax.f32 %v6474_v37, 0.0 }
 0xe6e   : > { %v6287_v42 = vadd.f32 %v6286_v46, %v15041_v31  ;;  %v6480_v2 = vadd.f32 %v6479_v45, %v15043_v23  ;;  %v7049_v44 = vmax.f32 %v6283_v8, 0.0  ;;  %v7051_v36 = vmax.f32 %v6476_v57, 0.0 }
 0xe6f   : > { %v7056_v22 = vmax.f32 %v6285_v9, 0.0  ;;  %v7058_v14 = vmax.f32 %v6478_v4, 0.0 }
 0xe70   : > { %v7057_v39 = vmax.f32 %v6287_v42, 0.0  ;;  %v7059_v32 = vmax.f32 %v6480_v2, 0.0  ;;  %8163 = vmatpush1.bf16.msra.mxu0 %v10577_v11 }
 0xe71   : > { %v15157_v48 = vpack.c.bf16 %v7056_v22, %v7048_v52  ;;  %v15159_v40 = vpack.c.bf16 %v7058_v14, %v7050_v59  ;;  %8325 = vmatprep.subr.bf16.mxu0 %v10582_v6 }
 0xe72   : > { %v15161_v29 = vpack.c.bf16 %v7057_v39, %v7049_v44  ;;  %v15163_v46 = vpack.c.bf16 %v7059_v32, %v7051_v36  ;;  %v6290_v45 = vpop.f32.mrb[96].mxu0  ;;  %v6483_v15 = vpop.f32.mrb[80].mxu1  ;;  %6695 = vmatmul.mubr.bf16.gmra.mrb[168].mxu0 %v14876_v3  ;;  %6888 = vmatmul.mubr.bf16.gmra.mrb[152].mxu1 %v14876_v3 }
 0xe73   : > { %16769 = vst [vmem:[#allocation40_spill] sm:$0xff] %v15159_v40  ;;  %v6291_v41 = vadd.f32 %v6290_v45, %v15034_v55  ;;  %v6484_v37 = vadd.f32 %v6483_v15, %v15036_v62  ;;  %v6292_v8 = vpop.f32.mrb[97].mxu0  ;;  %v6485_v57 = vpop.f32.mrb[81].mxu1  ;;  %6704 = vmatprep.mubr.bf16.mxu0 %v14894_v19  ;;  %6897 = vmatprep.mubr.bf16.mxu1 %v14894_v19 }
 0xe74   : > { %v6293_v39 = vadd.f32 %v6292_v8, %v15041_v31  ;;  %v6486_v9 = vadd.f32 %v6485_v57, %v15043_v23  ;;  %v6294_v4 = vpop.f32.mrb[98].mxu0  ;;  %v6487_v11 = vpop.f32.mrb[82].mxu1 }
 0xe75   : > { %v6295_v42 = vadd.f32 %v6294_v4, %v15034_v55  ;;  %v6488_v3 = vadd.f32 %v6487_v11, %v15036_v62  ;;  %v6296_v2 = vpop.f32.mrb[99].mxu0  ;;  %v6489_v6 = vpop.f32.mrb[83].mxu1  ;;  %v7064_v22 = vmax.f32 %v6291_v41, 0.0  ;;  %v7066_v14 = vmax.f32 %v6484_v37, 0.0 }
 0xe76   : > { %v6297_v52 = vadd.f32 %v6296_v2, %v15041_v31  ;;  %v6490_v59 = vadd.f32 %v6489_v6, %v15043_v23  ;;  %v7065_v36 = vmax.f32 %v6293_v39, 0.0  ;;  %v7067_v32 = vmax.f32 %v6486_v9, 0.0 }
 0xe77   : > { %v7072_v44 = vmax.f32 %v6295_v42, 0.0  ;;  %v7074_v19 = vmax.f32 %v6488_v3, 0.0 }
 0xe78   : > { %v7073_v45 = vmax.f32 %v6297_v52, 0.0  ;;  %v7075_v15 = vmax.f32 %v6490_v59, 0.0 }
 0xe79   : > { %v15177_v8 = vpack.c.bf16 %v7072_v44, %v7064_v22  ;;  %v15179_v57 = vpack.c.bf16 %v7074_v19, %v7066_v14 }
 0xe7a   : > { %v15181_v4 = vpack.c.bf16 %v7073_v45, %v7065_v36  ;;  %v15183_v11 = vpack.c.bf16 %v7075_v15, %v7067_v32  ;;  %v6300_v40 = vpop.f32.mrb[100].mxu0  ;;  %v6493_v2 = vpop.f32.mrb[84].mxu1  ;;  %6705 = vmatmul.mubr.bf16.gmra.mrb[172].mxu0 %v14896_v38  ;;  %6898 = vmatmul.mubr.bf16.gmra.mrb[156].mxu1 %v14896_v38 }
 0xe7b   : > { %16770 = vst [vmem:[#allocation21_spill] sm:$0xff] %v15179_v57  ;;  %v6301_v41 = vadd.f32 %v6300_v40, %v15034_v55  ;;  %v6494_v37 = vadd.f32 %v6493_v2, %v15036_v62  ;;  %v6302_v39 = vpop.f32.mrb[101].mxu0  ;;  %v6495_v9 = vpop.f32.mrb[85].mxu1  ;;  %6714 = vmatprep.mubr.bf16.mxu0 %v14914_v30  ;;  %6907 = vmatprep.mubr.bf16.mxu1 %v14914_v30 }
 0xe7c   : > { %v6303_v42 = vadd.f32 %v6302_v39, %v15041_v31  ;;  %v6496_v3 = vadd.f32 %v6495_v9, %v15043_v23  ;;  %v6304_v6 = vpop.f32.mrb[102].mxu0  ;;  %v6497_v52 = vpop.f32.mrb[86].mxu1 }
 0xe7d   : > { %v6305_v59 = vadd.f32 %v6304_v6, %v15034_v55  ;;  %v6498_v38 = vadd.f32 %v6497_v52, %v15036_v62  ;;  %v6306_v22 = vpop.f32.mrb[103].mxu0  ;;  %v6499_v40 = vpop.f32.mrb[87].mxu1  ;;  %v7080_v19 = vmax.f32 %v6301_v41, 0.0  ;;  %v7082_v36 = vmax.f32 %v6494_v37, 0.0 }
 0xe7e   : > { %v6307_v14 = vadd.f32 %v6306_v22, %v15041_v31  ;;  %v6500_v44 = vadd.f32 %v6499_v40, %v15043_v23  ;;  %v7081_v45 = vmax.f32 %v6303_v42, 0.0  ;;  %v7083_v15 = vmax.f32 %v6496_v3, 0.0 }
 0xe7f   : > { %v7088_v32 = vmax.f32 %v6305_v59, 0.0  ;;  %v7090_v30 = vmax.f32 %v6498_v38, 0.0 }
 0xe80   : > { %v7089_v2 = vmax.f32 %v6307_v14, 0.0  ;;  %v7091_v39 = vmax.f32 %v6500_v44, 0.0  ;;  %v10598_v14 = vld [vmem:[#allocation12 + $0x160] ss:$8 sps:$4 sm:$0xff]  }
 0xe81   : > { %v15197_v9 = vpack.c.bf16 %v7088_v32, %v7080_v19  ;;  %v15199_v57 = vpack.c.bf16 %v7090_v30, %v7082_v36  ;;  %v10603_v36 = vld [vmem:[#allocation12 + $0x174] ss:$8 sps:$4 sm:$0xff]  }
 0xe82   : > { %v15201_v6 = vpack.c.bf16 %v7089_v2, %v7081_v45  ;;  %v15203_v52 = vpack.c.bf16 %v7091_v39, %v7083_v15  ;;  %6715 = vmatmul.mubr.bf16.gmra.mrb[176].mxu0 %v14916_v7  ;;  %6908 = vmatmul.mubr.bf16.gmra.mrb[160].mxu1 %v14916_v7  ;;  %v10580_v7 = vld [vmem:[#allocation12 + $0x100] ss:$8 sps:$4 sm:$0xff]  }
 0xe83   : > { %6724 = vmatprep.mubr.bf16.mxu0 %v14932_v35  ;;  %6917 = vmatprep.mubr.bf16.mxu1 %v14932_v35  ;;  %v10585_v35 = vld [vmem:[#allocation12 + $0x114] ss:$8 sps:$4 sm:$0xff]  }
 0xe8a   : > { %6725 = vmatmul.mubr.bf16.gmra.mrb[180].mxu0 %v14934_v28  ;;  %6918 = vmatmul.mubr.bf16.gmra.mrb[164].mxu1 %v14934_v28  ;;  %v10583_v28 = vld [vmem:[#allocation12 + $0x110] ss:$8 sps:$4 sm:$0xff]  }
 0xe8b   : > { %6734 = vmatprep.mubr.bf16.mxu0 %v14952_v50  ;;  %6927 = vmatprep.mubr.bf16.mxu1 %v14952_v50  ;;  %v10588_v50 = vld [vmem:[#allocation12 + $0x124] ss:$8 sps:$4 sm:$0xff]  }
 0xe92   : > { %6735 = vmatmul.mubr.bf16.gmra.mrb[184].mxu0 %v14954_v63  ;;  %6928 = vmatmul.mubr.bf16.gmra.mrb[168].mxu1 %v14954_v63  ;;  %v10586_v63 = vld [vmem:[#allocation12 + $0x120] ss:$8 sps:$4 sm:$0xff]  }
 0xe93   : > { %6744 = vmatprep.mubr.bf16.mxu0 %v14972_v16  ;;  %6937 = vmatprep.mubr.bf16.mxu1 %v14972_v16  ;;  %v10591_v16 = vld [vmem:[#allocation12 + $0x134] ss:$8 sps:$4 sm:$0xff]  }
 0xe9a   : > { %6745 = vmatmul.mubr.bf16.gmra.mrb[188].mxu0 %v14974_v33  ;;  %6938 = vmatmul.mubr.bf16.gmra.mrb[172].mxu1 %v14974_v33  ;;  %v10589_v33 = vld [vmem:[#allocation12 + $0x130] ss:$8 sps:$4 sm:$0xff]  }
 0xe9b   : > { %6754 = vmatprep.mubr.bf16.mxu0 %v14994_v51  ;;  %6947 = vmatprep.mubr.bf16.mxu1 %v14994_v51  ;;  %v10594_v51 = vld [vmem:[#allocation12 + $0x144] ss:$8 sps:$4 sm:$0xff]  }
 0xea2   : > { %6755 = vmatmul.mubr.bf16.gmra.mrb[192].mxu0 %v14996_v25  ;;  %6948 = vmatmul.mubr.bf16.gmra.mrb[176].mxu1 %v14996_v25  ;;  %v10592_v25 = vld [vmem:[#allocation12 + $0x140] ss:$8 sps:$4 sm:$0xff]  }
 0xea3   : > { %6764 = vmatprep.mubr.bf16.mxu0 %v15012_v12  ;;  %6957 = vmatprep.mubr.bf16.mxu1 %v15012_v12  ;;  %v10597_v12 = vld [vmem:[#allocation12 + $0x154] ss:$8 sps:$4 sm:$0xff]  }
 0xeaa   : > { %6765 = vmatmul.mubr.bf16.gmra.mrb[196].mxu0 %v15014_v43  ;;  %6958 = vmatmul.mubr.bf16.gmra.mrb[180].mxu1 %v15014_v43  ;;  %v10595_v43 = vld [vmem:[#allocation12 + $0x150] ss:$8 sps:$4 sm:$0xff]  }
 0xeab   : > { %8164 = vmatprep.mubr.bf16.mxu0 %v15061_v60 }
 0xeb2   : > { %8165 = vmatmul.mubr.bf16.vlgmr.msra.gmra.mrb[200].mxu0 %v15057_v34 }
 0xeb3   : > { %8174 = vmatprep.mubr.bf16.mxu0 %v15081_v20  ;;  %8326 = vmatpush1.bf16.msra.mxu0 %v10580_v7 }
 0xeb4   : > { %8327 = vmatprep.subr.bf16.mxu0 %v10585_v35 }
 0xeb7   : > { %8328 = vmatpush1.bf16.msra.mxu0 %v10583_v28 }
 0xeb8   : > { %8329 = vmatprep.subr.bf16.mxu0 %v10588_v50 }
 0xeba   : > { %8175 = vmatmul.mubr.bf16.gmra.mrb[204].mxu0 %v15077_v5  ;;  %v10600_v5 = vld [vmem:[#allocation12 + $0x164] ss:$8 sps:$4 sm:$0xff]  }
 0xebb   : > { %8184 = vmatprep.mubr.bf16.mxu0 %v15101_v27  ;;  %8330 = vmatpush1.bf16.msra.mxu0 %v10586_v63  ;;  %v10601_v63 = vld [vmem:[#allocation12 + $0x170] ss:$8 sps:$4 sm:$0xff]  }
 0xebc   : > { %8331 = vmatprep.subr.bf16.mxu0 %v10591_v16 }
 0xebf   : > { %8332 = vmatpush1.bf16.msra.mxu0 %v10589_v33 }
 0xec0   : > { %8333 = vmatprep.subr.bf16.mxu0 %v10594_v51 }
 0xec2   : > { %8185 = vmatmul.mubr.bf16.gmra.mrb[208].mxu0 %v15097_v21 }
 0xec3   : > { %8194 = vmatprep.mubr.bf16.mxu0 %v15121_v24  ;;  %8334 = vmatpush1.bf16.msra.mxu0 %v10592_v25  ;;  %v6310_v34 = vpop.f32.mrb[104].mxu0  ;;  %v6503_v60 = vpop.f32.mrb[88].mxu1 }
 0xec4   : > { %8335 = vmatprep.subr.bf16.mxu0 %v10597_v12  ;;  %v6311_v20 = vadd.f32 %v6310_v34, %v15034_v55  ;;  %v6504_v27 = vadd.f32 %v6503_v60, %v15036_v62  ;;  %v6312_v41 = vpop.f32.mrb[105].mxu0  ;;  %v6505_v37 = vpop.f32.mrb[89].mxu1  ;;  %v10606_v12 = vld [vmem:[#allocation12 + $0x184] ss:$8 sps:$4 sm:$0xff]  }
 0xec5   : > { %v6313_v42 = vadd.f32 %v6312_v41, %v15041_v31  ;;  %v6506_v3 = vadd.f32 %v6505_v37, %v15043_v23  ;;  %v6314_v59 = vpop.f32.mrb[106].mxu0  ;;  %v6507_v21 = vpop.f32.mrb[90].mxu1 }
 0xec6   : > { %v6315_v24 = vadd.f32 %v6314_v59, %v15034_v55  ;;  %v6508_v38 = vadd.f32 %v6507_v21, %v15036_v62  ;;  %v6316_v22 = vpop.f32.mrb[107].mxu0  ;;  %v6509_v40 = vpop.f32.mrb[91].mxu1  ;;  %v7096_v32 = vmax.f32 %v6311_v20, 0.0  ;;  %v7098_v30 = vmax.f32 %v6504_v27, 0.0  ;;  %v10604_v59 = vld [vmem:[#allocation12 + $0x180] ss:$8 sps:$4 sm:$0xff]  }
 0xec7   : > { %8336 = vmatpush1.bf16.msra.mxu0 %v10595_v43  ;;  %v6317_v44 = vadd.f32 %v6316_v22, %v15041_v31  ;;  %v6510_v19 = vadd.f32 %v6509_v40, %v15043_v23  ;;  %v7097_v2 = vmax.f32 %v6313_v42, 0.0  ;;  %v7099_v39 = vmax.f32 %v6506_v3, 0.0 }
 0xec8   : > { %8337 = vmatprep.subr.bf16.mxu0 %v10600_v5  ;;  %v7104_v45 = vmax.f32 %v6315_v24, 0.0  ;;  %v7106_v15 = vmax.f32 %v6508_v38, 0.0  ;;  %v10609_v38 = vld [vmem:[#allocation12 + $0x194] ss:$8 sps:$4 sm:$0xff]  }
 0xec9   : > { %v7105_v7 = vmax.f32 %v6317_v44, 0.0  ;;  %v7107_v35 = vmax.f32 %v6510_v19, 0.0 }
 0xeca   : > { %8195 = vmatmul.mubr.bf16.gmra.mrb[212].mxu0 %v15117_v10  ;;  %v15243_v28 = vpack.c.bf16 %v7104_v45, %v7096_v32  ;;  %v15245_v50 = vpack.c.bf16 %v7106_v15, %v7098_v30 }
 0xecb   : > { %8204 = vmatprep.mubr.bf16.mxu0 %v15141_v54  ;;  %8338 = vmatpush1.bf16.msra.mxu0 %v10598_v14  ;;  %v15248_v16 = vpack.c.bf16 %v7105_v7, %v7097_v2  ;;  %v15250_v33 = vpack.c.bf16 %v7107_v35, %v7099_v39  ;;  %v6320_v51 = vpop.f32.mrb[108].mxu0  ;;  %v6513_v25 = vpop.f32.mrb[92].mxu1  ;;  %v10607_v2 = vld [vmem:[#allocation12 + $0x190] ss:$8 sps:$4 sm:$0xff]  }
 0xecc   : > { %8339 = vmatprep.subr.bf16.mxu0 %v10603_v36  ;;  %v6321_v43 = vadd.f32 %v6320_v51, %v15034_v55  ;;  %v6514_v10 = vadd.f32 %v6513_v25, %v15036_v62  ;;  %v6322_v34 = vpop.f32.mrb[109].mxu0  ;;  %v6515_v60 = vpop.f32.mrb[93].mxu1  ;;  %v10612_v51 = vld [vmem:[#allocation12 + $0x1a4] ss:$8 sps:$4 sm:$0xff]  }
 0xecd   : > { %v6323_v5 = vadd.f32 %v6322_v34, %v15041_v31  ;;  %v6516_v54 = vadd.f32 %v6515_v60, %v15043_v23  ;;  %v6324_v20 = vpop.f32.mrb[110].mxu0  ;;  %v6517_v27 = vpop.f32.mrb[94].mxu1 }
 0xece   : > { %v6325_v41 = vadd.f32 %v6324_v20, %v15034_v55  ;;  %v6518_v37 = vadd.f32 %v6517_v27, %v15036_v62  ;;  %v6326_v42 = vpop.f32.mrb[111].mxu0  ;;  %v6519_v3 = vpop.f32.mrb[95].mxu1  ;;  %v7112_v22 = vmax.f32 %v6321_v43, 0.0  ;;  %v7114_v40 = vmax.f32 %v6514_v10, 0.0 }
 0xecf   : > { %8340 = vmatpush1.bf16.msra.mxu0 %v10601_v63  ;;  %v6327_v21 = vadd.f32 %v6326_v42, %v15041_v31  ;;  %v6520_v24 = vadd.f32 %v6519_v3, %v15043_v23  ;;  %v7113_v19 = vmax.f32 %v6323_v5, 0.0  ;;  %v7115_v36 = vmax.f32 %v6516_v54, 0.0  ;;  %v10615_v3 = vld [vmem:[#allocation12 + $0x1b4] ss:$8 sps:$4 sm:$0xff]  }
 0xed0   : > { %8341 = vmatprep.subr.bf16.mxu0 %v10606_v12  ;;  %v7120_v14 = vmax.f32 %v6325_v41, 0.0  ;;  %v7122_v44 = vmax.f32 %v6518_v37, 0.0  ;;  %v10610_v41 = vld [vmem:[#allocation12 + $0x1a0] ss:$8 sps:$4 sm:$0xff]  }
 0xed1   : > { %v7121_v32 = vmax.f32 %v6327_v21, 0.0  ;;  %v7123_v30 = vmax.f32 %v6520_v24, 0.0 }
 0xed2   : > { %8205 = vmatmul.mubr.bf16.gmra.mrb[216].mxu0 %v15137_v0  ;;  %v15261_v45 = vpack.c.bf16 %v7120_v14, %v7112_v22  ;;  %v15263_v15 = vpack.c.bf16 %v7122_v44, %v7114_v40 }
 0xed3   : > { %8214 = vmatprep.mubr.bf16.mxu0 %v15161_v29  ;;  %8342 = vmatpush1.bf16.msra.mxu0 %v10604_v59  ;;  %v15266_v39 = vpack.c.bf16 %v7121_v32, %v7113_v19  ;;  %v15268_v7 = vpack.c.bf16 %v7123_v30, %v7115_v36  ;;  %v6330_v35 = vpop.f32.mrb[112].mxu0  ;;  %v6523_v63 = vpop.f32.mrb[96].mxu1  ;;  %v10613_v32 = vld [vmem:[#allocation12 + $0x1b0] ss:$8 sps:$4 sm:$0xff]  }
 0xed4   : > { %8343 = vmatprep.subr.bf16.mxu0 %v10609_v38  ;;  %v6331_v25 = vadd.f32 %v6330_v35, %v15034_v55  ;;  %v6524_v0 = vadd.f32 %v6523_v63, %v15036_v62  ;;  %v6332_v12 = vpop.f32.mrb[113].mxu0  ;;  %v6525_v43 = vpop.f32.mrb[97].mxu1  ;;  %v10618_v35 = vld [vmem:[#allocation12 + $0x1c4] ss:$8 sps:$4 sm:$0xff]  }
 0xed5   : > { %v6333_v10 = vadd.f32 %v6332_v12, %v15041_v31  ;;  %v6526_v29 = vadd.f32 %v6525_v43, %v15043_v23  ;;  %v6334_v34 = vpop.f32.mrb[114].mxu0  ;;  %v6527_v60 = vpop.f32.mrb[98].mxu1 }
 0xed6   : > { %v6335_v5 = vadd.f32 %v6334_v34, %v15034_v55  ;;  %v6528_v54 = vadd.f32 %v6527_v60, %v15036_v62  ;;  %v6336_v20 = vpop.f32.mrb[115].mxu0  ;;  %v6529_v27 = vpop.f32.mrb[99].mxu1  ;;  %v7128_v59 = vmax.f32 %v6331_v25, 0.0  ;;  %v7130_v21 = vmax.f32 %v6524_v0, 0.0  ;;  %v10616_v34 = vld [vmem:[#allocation12 + $0x1c0] ss:$8 sps:$4 sm:$0xff]  }
 0xed7   : > { %8344 = vmatpush1.bf16.msra.mxu0 %v10607_v2  ;;  %v6337_v37 = vadd.f32 %v6336_v20, %v15041_v31  ;;  %v6530_v42 = vadd.f32 %v6529_v27, %v15043_v23  ;;  %v7129_v22 = vmax.f32 %v6333_v10, 0.0  ;;  %v7131_v40 = vmax.f32 %v6526_v29, 0.0  ;;  %v10621_v27 = vld [vmem:[#allocation12 + $0x1d4] ss:$8 sps:$4 sm:$0xff]  }
 0xed8   : > { %8345 = vmatprep.subr.bf16.mxu0 %v10612_v51  ;;  %v7136_v24 = vmax.f32 %v6335_v5, 0.0  ;;  %v7138_v38 = vmax.f32 %v6528_v54, 0.0 }
 0xed9   : > { %v7137_v14 = vmax.f32 %v6337_v37, 0.0  ;;  %v7139_v44 = vmax.f32 %v6530_v42, 0.0 }
 0xeda   : > { %8215 = vmatmul.mubr.bf16.gmra.mrb[220].mxu0 %v15157_v48  ;;  %v15279_v19 = vpack.c.bf16 %v7136_v24, %v7128_v59  ;;  %v15281_v36 = vpack.c.bf16 %v7138_v38, %v7130_v21 }
 0xedb   : > { %8224 = vmatprep.mubr.bf16.mxu0 %v15181_v4  ;;  %8346 = vmatpush1.bf16.msra.mxu0 %v10610_v41  ;;  %v15284_v30 = vpack.c.bf16 %v7137_v14, %v7129_v22  ;;  %v15286_v2 = vpack.c.bf16 %v7139_v44, %v7131_v40  ;;  %v10619_v14 = vld [vmem:[#allocation12 + $0x1d0] ss:$8 sps:$4 sm:$0xff]  }
 0xedc   : > { %8347 = vmatprep.subr.bf16.mxu0 %v10615_v3  ;;  %v6340_v63 = vpop.f32.mrb[116].mxu0  ;;  %v6533_v51 = vpop.f32.mrb[100].mxu1 }
 0xedd   : > { %v6341_v25 = vadd.f32 %v6340_v63, %v15034_v55  ;;  %v6534_v48 = vadd.f32 %v6533_v51, %v15036_v62  ;;  %v6342_v0 = vpop.f32.mrb[117].mxu0  ;;  %v6535_v12 = vpop.f32.mrb[101].mxu1 }
 0xede   : > { %v6343_v43 = vadd.f32 %v6342_v0, %v15041_v31  ;;  %v6536_v4 = vadd.f32 %v6535_v12, %v15043_v23  ;;  %v6344_v10 = vpop.f32.mrb[118].mxu0  ;;  %v6537_v29 = vpop.f32.mrb[102].mxu1 }
 0xedf   : > { %8348 = vmatpush1.bf16.msra.mxu0 %v10613_v32  ;;  %v6345_v60 = vadd.f32 %v6344_v10, %v15034_v55  ;;  %v6538_v5 = vadd.f32 %v6537_v29, %v15036_v62  ;;  %v6346_v54 = vpop.f32.mrb[119].mxu0  ;;  %v6539_v20 = vpop.f32.mrb[103].mxu1  ;;  %v7144_v42 = vmax.f32 %v6341_v25, 0.0  ;;  %v7146_v3 = vmax.f32 %v6534_v48, 0.0 }
 0xee0   : > { %8349 = vmatprep.subr.bf16.mxu0 %v10618_v35  ;;  %v6347_v41 = vadd.f32 %v6346_v54, %v15041_v31  ;;  %v6540_v37 = vadd.f32 %v6539_v20, %v15043_v23  ;;  %v7145_v24 = vmax.f32 %v6343_v43, 0.0  ;;  %v7147_v38 = vmax.f32 %v6536_v4, 0.0  ;;  %v10624_v35 = vld [vmem:[#allocation12 + $0x1e4] ss:$8 sps:$4 sm:$0xff]  }
 0xee1   : > { %v7152_v59 = vmax.f32 %v6345_v60, 0.0  ;;  %v7154_v21 = vmax.f32 %v6538_v5, 0.0 }
 0xee2   : > { %8225 = vmatmul.mubr.bf16.gmra.mrb[224].mxu0 %v15177_v8  ;;  %v7153_v22 = vmax.f32 %v6347_v41, 0.0  ;;  %v7155_v40 = vmax.f32 %v6540_v37, 0.0 }
 0xee3   : > { %8234 = vmatprep.mubr.bf16.mxu0 %v15201_v6  ;;  %8350 = vmatpush1.bf16.msra.mxu0 %v10616_v34  ;;  %v15298_v44 = vpack.c.bf16 %v7152_v59, %v7144_v42  ;;  %v15300_v32 = vpack.c.bf16 %v7154_v21, %v7146_v3  ;;  %v10622_v34 = vld [vmem:[#allocation12 + $0x1e0] ss:$8 sps:$4 sm:$0xff]  }
 0xee4   : > { %8351 = vmatprep.subr.bf16.mxu0 %v10621_v27  ;;  %v15302_v63 = vpack.c.bf16 %v7153_v22, %v7145_v24  ;;  %v15304_v51 = vpack.c.bf16 %v7155_v40, %v7147_v38  ;;  %v10627_v27 = vld [vmem:[#allocation12 + $0x1f4] ss:$8 sps:$4 sm:$0xff]  }
 0xee5   : > { %v6350_v25 = vpop.f32.mrb[120].mxu0  ;;  %v6543_v8 = vpop.f32.mrb[104].mxu1 }
 0xee6   : > { %v6351_v48 = vadd.f32 %v6350_v25, %v15034_v55  ;;  %v6544_v0 = vadd.f32 %v6543_v8, %v15036_v62  ;;  %v6352_v12 = vpop.f32.mrb[121].mxu0  ;;  %v6545_v6 = vpop.f32.mrb[105].mxu1  ;;  %v10630_v8 = vld [vmem:[#allocation12 + $0x204] ss:$8 sps:$4 sm:$0xff]  }
 0xee7   : > { %v6353_v43 = vadd.f32 %v6352_v12, %v15041_v31  ;;  %v6546_v4 = vadd.f32 %v6545_v6, %v15043_v23  ;;  %v6354_v10 = vpop.f32.mrb[122].mxu0  ;;  %v6547_v29 = vpop.f32.mrb[106].mxu1  ;;  %8352 = vmatpush1.bf16.msra.mxu0 %v10619_v14  ;;  %v10625_v14 = vld [vmem:[#allocation12 + $0x1f0] ss:$8 sps:$4 sm:$0xff]  }
 0xee8   : > { %v6355_v60 = vadd.f32 %v6354_v10, %v15034_v55  ;;  %v6548_v5 = vadd.f32 %v6547_v29, %v15036_v62  ;;  %v6356_v54 = vpop.f32.mrb[123].mxu0  ;;  %v6549_v20 = vpop.f32.mrb[107].mxu1  ;;  %8353 = vmatprep.subr.bf16.mxu0 %v10624_v35  ;;  %v7160_v42 = vmax.f32 %v6351_v48, 0.0  ;;  %v7162_v3 = vmax.f32 %v6544_v0, 0.0 }
 0xee9   : > { %v6357_v41 = vadd.f32 %v6356_v54, %v15041_v31  ;;  %v6550_v37 = vadd.f32 %v6549_v20, %v15043_v23  ;;  %v7161_v24 = vmax.f32 %v6353_v43, 0.0  ;;  %v7163_v38 = vmax.f32 %v6546_v4, 0.0 }
 0xeea   : > { %v7168_v59 = vmax.f32 %v6355_v60, 0.0  ;;  %v7170_v21 = vmax.f32 %v6548_v5, 0.0  ;;  %8235 = vmatmul.mubr.bf16.gmra.mrb[228].mxu0 %v15197_v9 }
 0xeeb   : > { %v7169_v22 = vmax.f32 %v6357_v41, 0.0  ;;  %v7171_v40 = vmax.f32 %v6550_v37, 0.0  ;;  %8244 = vmatprep.mubr.bf16.mxu0 %v15248_v16  ;;  %8354 = vmatpush1.bf16.msra.mxu0 %v10622_v34 }
 0xeec   : > { %v15316_v35 = vpack.c.bf16 %v7168_v59, %v7160_v42  ;;  %v15318_v25 = vpack.c.bf16 %v7170_v21, %v7162_v3  ;;  %8355 = vmatprep.subr.bf16.mxu0 %v10627_v27 }
 0xeed   : > { %v15320_v48 = vpack.c.bf16 %v7169_v22, %v7161_v24  ;;  %v15322_v0 = vpack.c.bf16 %v7171_v40, %v7163_v38  ;;  %v6360_v12 = vpop.f32.mrb[124].mxu0  ;;  %v6553_v9 = vpop.f32.mrb[108].mxu1 }
 0xeee   : > { %v6361_v6 = vadd.f32 %v6360_v12, %v15034_v55  ;;  %v6554_v43 = vadd.f32 %v6553_v9, %v15036_v62  ;;  %v6362_v4 = vpop.f32.mrb[125].mxu0  ;;  %v6555_v16 = vpop.f32.mrb[109].mxu1 }
 0xeef   : > { %v6363_v10 = vadd.f32 %v6362_v4, %v15041_v31  ;;  %v6556_v29 = vadd.f32 %v6555_v16, %v15043_v23  ;;  %v6364_v34 = vpop.f32.mrb[126].mxu0  ;;  %v6557_v60 = vpop.f32.mrb[110].mxu1  ;;  %8356 = vmatpush1.bf16.msra.mxu0 %v10625_v14 }
 0xef0   : > { %v6365_v5 = vadd.f32 %v6364_v34, %v15034_v55  ;;  %v6558_v54 = vadd.f32 %v6557_v60, %v15036_v62  ;;  %v6366_v20 = vpop.f32.mrb[127].mxu0  ;;  %v6559_v27 = vpop.f32.mrb[111].mxu1  ;;  %8518 = vmatprep.subr.bf16.mxu0 %v10630_v8  ;;  %v7176_v42 = vmax.f32 %v6361_v6, 0.0  ;;  %v7178_v3 = vmax.f32 %v6554_v43, 0.0 }
 0xef1   : > { %v6367_v41 = vadd.f32 %v6366_v20, %v15041_v31  ;;  %v6560_v37 = vadd.f32 %v6559_v27, %v15043_v23  ;;  %v7177_v24 = vmax.f32 %v6363_v10, 0.0  ;;  %v7179_v38 = vmax.f32 %v6556_v29, 0.0 }
 0xef2   : > { %v7184_v59 = vmax.f32 %v6365_v5, 0.0  ;;  %v7186_v21 = vmax.f32 %v6558_v54, 0.0  ;;  %8245 = vmatmul.mubr.bf16.gmra.mrb[232].mxu0 %v15243_v28 }
 0xef3   : > { %v7185_v22 = vmax.f32 %v6367_v41, 0.0  ;;  %v7187_v40 = vmax.f32 %v6560_v37, 0.0  ;;  %8254 = vmatprep.mubr.bf16.mxu0 %v15266_v39 }
 0xef4   : > { %v15334_v14 = vpack.c.bf16 %v7184_v59, %v7176_v42  ;;  %v15336_v12 = vpack.c.bf16 %v7186_v21, %v7178_v3 }
 0xef5   : > { %v15338_v8 = vpack.c.bf16 %v7185_v22, %v7177_v24  ;;  %v15340_v9 = vpack.c.bf16 %v7187_v40, %v7179_v38  ;;  %v6370_v6 = vpop.f32.mrb[128].mxu0  ;;  %v6563_v43 = vpop.f32.mrb[112].mxu1 }
 0xef6   : > { %v6371_v4 = vadd.f32 %v6370_v6, %v15034_v55  ;;  %v6564_v28 = vadd.f32 %v6563_v43, %v15036_v62  ;;  %v6372_v16 = vpop.f32.mrb[129].mxu0  ;;  %v6565_v10 = vpop.f32.mrb[113].mxu1 }
 0xef7   : > { %v6373_v29 = vadd.f32 %v6372_v16, %v15041_v31  ;;  %v6566_v39 = vadd.f32 %v6565_v10, %v15043_v23  ;;  %v6374_v34 = vpop.f32.mrb[130].mxu0  ;;  %v6567_v60 = vpop.f32.mrb[114].mxu1  ;;  %v5534_v16 = vsub.s32 4, %v16758_v53  ;;  %v5542_v10 = vsub.s32 6, %v16758_v53 }
 0xef8   : > { %v6375_v5 = vadd.f32 %v6374_v34, %v15034_v55  ;;  %v6568_v54 = vadd.f32 %v6567_v60, %v15036_v62  ;;  %v6376_v20 = vpop.f32.mrb[131].mxu0  ;;  %v6569_v27 = vpop.f32.mrb[115].mxu1  ;;  %v7192_v42 = vmax.f32 %v6371_v4, 0.0  ;;  %v7194_v3 = vmax.f32 %v6564_v28, 0.0 }
 0xef9   : > { %v6377_v41 = vadd.f32 %v6376_v20, %v15041_v31  ;;  %v6570_v37 = vadd.f32 %v6569_v27, %v15043_v23  ;;  %v7193_v24 = vmax.f32 %v6373_v29, 0.0  ;;  %v7195_v38 = vmax.f32 %v6566_v39, 0.0 }
 0xefa   : > { %v7200_v59 = vmax.f32 %v6375_v5, 0.0  ;;  %v7202_v21 = vmax.f32 %v6568_v54, 0.0  ;;  %8255 = vmatmul.mubr.bf16.gmra.mrb[236].mxu0 %v15261_v45  ;;  %v5538_v29 = vsub.s32 5, %v16758_v53  ;;  %v5546_v39 = vsub.s32 7, %v16758_v53  ;;  %v11228_v53 = vld [vmem:[%s16759_s26] sm:$0xff] }
 0xefb   : > { %v7201_v22 = vmax.f32 %v6377_v41, 0.0  ;;  %v7203_v40 = vmax.f32 %v6570_v37, 0.0  ;;  %8264 = vmatprep.mubr.bf16.mxu0 %v15284_v30 }
 0xefc   : > { %v15352_v6 = vpack.c.bf16 %v7200_v59, %v7192_v42  ;;  %v15354_v43 = vpack.c.bf16 %v7202_v21, %v7194_v3 }
 0xefd   : > { %v15358_v4 = vpack.c.bf16 %v7201_v22, %v7193_v24  ;;  %v15360_v28 = vpack.c.bf16 %v7203_v40, %v7195_v38  ;;  %v6380_v34 = vpop.f32.mrb[132].mxu0  ;;  %v6573_v45 = vpop.f32.mrb[116].mxu1  ;;  %v15373_v24 = vrot.slane %v11228_v53, %v5534_v16  ;;  %v15375_v38 = vrot.slane %v11228_v53, %v5542_v10 }
 0xefe   : > { %16771 = vst [vmem:[#allocation100_spill] sm:$0xff] %v15354_v43  ;;  %v6381_v30 = vadd.f32 %v6380_v34, %v15034_v55  ;;  %v6574_v60 = vadd.f32 %v6573_v45, %v15036_v62  ;;  %v6382_v5 = vpop.f32.mrb[133].mxu0  ;;  %v6575_v54 = vpop.f32.mrb[117].mxu1  ;;  %v15379_v34 = vrot.slane %v11228_v53, %v5538_v29  ;;  %v15381_v45 = vrot.slane %v11228_v53, %v5546_v39 }
 0xeff   : > { %v6383_v20 = vadd.f32 %v6382_v5, %v15041_v31  ;;  %v6576_v27 = vadd.f32 %v6575_v54, %v15043_v23  ;;  %v6384_v41 = vpop.f32.mrb[134].mxu0  ;;  %v6577_v37 = vpop.f32.mrb[118].mxu1 }
 0xf00   : > { %v6385_v42 = vadd.f32 %v6384_v41, %v15034_v55  ;;  %v6578_v3 = vadd.f32 %v6577_v37, %v15036_v62  ;;  %v6386_v59 = vpop.f32.mrb[135].mxu0  ;;  %v6579_v21 = vpop.f32.mrb[119].mxu1  ;;  %v7208_v55 = vmax.f32 %v6381_v30, 0.0  ;;  %v7210_v62 = vmax.f32 %v6574_v60, 0.0 }
 0xf01   : > { %v6387_v22 = vadd.f32 %v6386_v59, %v15041_v31  ;;  %v6580_v40 = vadd.f32 %v6579_v21, %v15043_v23  ;;  %v7209_v41 = vmax.f32 %v6383_v20, 0.0  ;;  %v7211_v37 = vmax.f32 %v6576_v27, 0.0 }
 0xf02   : > { %v7216_v5 = vmax.f32 %v6385_v42, 0.0  ;;  %v7218_v54 = vmax.f32 %v6578_v3, 0.0  ;;  %8265 = vmatmul.mubr.bf16.gmra.mrb[240].mxu0 %v15279_v19 }
 0xf03   : > { %v7217_v16 = vmax.f32 %v6387_v22, 0.0  ;;  %v7219_v43 = vmax.f32 %v6580_v40, 0.0  ;;  %8274 = vmatprep.mubr.bf16.mxu0 %v15302_v63 }
 0xf04   : > { %v15385_v10 = vpack.c.bf16 %v7216_v5, %v7208_v55  ;;  %v15387_v31 = vpack.c.bf16 %v7218_v54, %v7210_v62 }
 0xf05   : > { %v15389_v23 = vpack.c.bf16 %v7217_v16, %v7209_v41  ;;  %v15391_v29 = vpack.c.bf16 %v7219_v43, %v7211_v37  ;;  %v6616_v39 = vpop.f32.mrb[136].mxu0  ;;  %v6809_v30 = vpop.f32.mrb[120].mxu1 }
 0xf06   : > { %v6617_v60 = vadd.f32 %v6616_v39, %v15373_v24  ;;  %v6810_v19 = vadd.f32 %v6809_v30, %v15375_v38  ;;  %v6618_v20 = vpop.f32.mrb[137].mxu0  ;;  %v6811_v27 = vpop.f32.mrb[121].mxu1 }
 0xf07   : > { %v6619_v42 = vadd.f32 %v6618_v20, %v15379_v34  ;;  %v6812_v63 = vadd.f32 %v6811_v27, %v15381_v45  ;;  %v6620_v3 = vpop.f32.mrb[138].mxu0  ;;  %v6813_v59 = vpop.f32.mrb[122].mxu1 }
 0xf08   : > { %v6621_v21 = vadd.f32 %v6620_v3, %v15373_v24  ;;  %v6814_v53 = vadd.f32 %v6813_v59, %v15375_v38  ;;  %v6622_v43 = vpop.f32.mrb[139].mxu0  ;;  %v6815_v22 = vpop.f32.mrb[123].mxu1  ;;  %v6972_v62 = vmax.f32 %v6617_v60, 0.0  ;;  %v6974_v5 = vmax.f32 %v6810_v19, 0.0 }
 0xf09   : > { %v6623_v40 = vadd.f32 %v6622_v43, %v15379_v34  ;;  %v6816_v55 = vadd.f32 %v6815_v22, %v15381_v45  ;;  %v6973_v37 = vmax.f32 %v6619_v42, 0.0  ;;  %v6975_v16 = vmax.f32 %v6812_v63, 0.0 }
 0xf0a   : > { %v6980_v54 = vmax.f32 %v6621_v21, 0.0  ;;  %v6982_v41 = vmax.f32 %v6814_v53, 0.0  ;;  %8275 = vmatmul.mubr.bf16.gmra.mrb[244].mxu0 %v15298_v44 }
 0xf0b   : > { %v6981_v39 = vmax.f32 %v6623_v40, 0.0  ;;  %v6983_v30 = vmax.f32 %v6816_v55, 0.0  ;;  %8284 = vmatprep.mubr.bf16.mxu0 %v15320_v48 }
 0xf0c   : > { %v15403_v20 = vpack.c.bf16 %v6980_v54, %v6972_v62  ;;  %v15405_v27 = vpack.c.bf16 %v6982_v41, %v6974_v5 }
 0xf0d   : > { %v15407_v3 = vpack.c.bf16 %v6981_v39, %v6973_v37  ;;  %v15409_v59 = vpack.c.bf16 %v6983_v30, %v6975_v16  ;;  %v6626_v60 = vpop.f32.mrb[140].mxu0  ;;  %v6819_v19 = vpop.f32.mrb[124].mxu1 }
 0xf0e   : > { %16772 = vst [vmem:[#allocation101_spill] sm:$0xff] %v15405_v27  ;;  %v6627_v21 = vadd.f32 %v6626_v60, %v15373_v24  ;;  %v6820_v44 = vadd.f32 %v6819_v19, %v15375_v38  ;;  %v6628_v42 = vpop.f32.mrb[141].mxu0  ;;  %v6821_v63 = vpop.f32.mrb[125].mxu1 }
 0xf0f   : > { %16773 = vst [vmem:[#allocation103_spill] sm:$0xff] %v15409_v59  ;;  %v6629_v53 = vadd.f32 %v6628_v42, %v15379_v34  ;;  %v6822_v48 = vadd.f32 %v6821_v63, %v15381_v45  ;;  %v6630_v43 = vpop.f32.mrb[142].mxu0  ;;  %v6823_v22 = vpop.f32.mrb[126].mxu1 }
 0xf10   : > { %v6631_v40 = vadd.f32 %v6630_v43, %v15373_v24  ;;  %v6824_v55 = vadd.f32 %v6823_v22, %v15375_v38  ;;  %v6632_v62 = vpop.f32.mrb[143].mxu0  ;;  %v6825_v5 = vpop.f32.mrb[127].mxu1  ;;  %v6988_v37 = vmax.f32 %v6627_v21, 0.0  ;;  %v6990_v16 = vmax.f32 %v6820_v44, 0.0 }
 0xf11   : > { %v6633_v54 = vadd.f32 %v6632_v62, %v15379_v34  ;;  %v6826_v41 = vadd.f32 %v6825_v5, %v15381_v45  ;;  %v6989_v60 = vmax.f32 %v6629_v53, 0.0  ;;  %v6991_v19 = vmax.f32 %v6822_v48, 0.0 }
 0xf12   : > { %v6996_v39 = vmax.f32 %v6631_v40, 0.0  ;;  %v6998_v30 = vmax.f32 %v6824_v55, 0.0  ;;  %8285 = vmatmul.mubr.bf16.gmra.mrb[248].mxu0 %v15316_v35 }
 0xf13   : > { %v6997_v42 = vmax.f32 %v6633_v54, 0.0  ;;  %v6999_v63 = vmax.f32 %v6826_v41, 0.0  ;;  %8294 = vmatprep.mubr.bf16.mxu0 %v15338_v8 }
 0xf14   : > { %v15421_v43 = vpack.c.bf16 %v6996_v39, %v6988_v37  ;;  %v15423_v22 = vpack.c.bf16 %v6998_v30, %v6990_v16 }
 0xf15   : > { %v15425_v27 = vpack.c.bf16 %v6997_v42, %v6989_v60  ;;  %v15427_v62 = vpack.c.bf16 %v6999_v63, %v6991_v19  ;;  %v6636_v21 = vpop.f32.mrb[144].mxu0  ;;  %v6829_v44 = vpop.f32.mrb[128].mxu1 }
 0xf16   : > { %16774 = vst [vmem:[#allocation105_spill] sm:$0xff] %v15423_v22  ;;  %v6637_v40 = vadd.f32 %v6636_v21, %v15373_v24  ;;  %v6830_v35 = vadd.f32 %v6829_v44, %v15375_v38  ;;  %v6638_v53 = vpop.f32.mrb[145].mxu0  ;;  %v6831_v48 = vpop.f32.mrb[129].mxu1 }
 0xf17   : > { %16775 = vst [vmem:[#allocation61_spill] sm:$0xff] %v15427_v62  ;;  %v6639_v55 = vadd.f32 %v6638_v53, %v15379_v34  ;;  %v6832_v8 = vadd.f32 %v6831_v48, %v15381_v45  ;;  %v6640_v5 = vpop.f32.mrb[146].mxu0  ;;  %v6833_v54 = vpop.f32.mrb[130].mxu1 }
 0xf18   : > { %v6641_v41 = vadd.f32 %v6640_v5, %v15373_v24  ;;  %v6834_v37 = vadd.f32 %v6833_v54, %v15375_v38  ;;  %v6642_v16 = vpop.f32.mrb[147].mxu0  ;;  %v6835_v39 = vpop.f32.mrb[131].mxu1  ;;  %v7004_v19 = vmax.f32 %v6637_v40, 0.0  ;;  %v7006_v42 = vmax.f32 %v6830_v35, 0.0 }
 0xf19   : > { %v6643_v30 = vadd.f32 %v6642_v16, %v15379_v34  ;;  %v6836_v60 = vadd.f32 %v6835_v39, %v15381_v45  ;;  %v7005_v44 = vmax.f32 %v6639_v55, 0.0  ;;  %v7007_v53 = vmax.f32 %v6832_v8, 0.0 }
 0xf1a   : > { %v7012_v63 = vmax.f32 %v6641_v41, 0.0  ;;  %v7014_v21 = vmax.f32 %v6834_v37, 0.0  ;;  %8295 = vmatmul.mubr.bf16.gmra.mrb[252].mxu0 %v15334_v14 }
 0xf1b   : > { %v7013_v48 = vmax.f32 %v6643_v30, 0.0  ;;  %v7015_v22 = vmax.f32 %v6836_v60, 0.0  ;;  %8304 = vmatprep.mubr.bf16.mxu0 %v15358_v4 }
 0xf1c   : > { %v15439_v5 = vpack.c.bf16 %v7012_v63, %v7004_v19  ;;  %v15441_v54 = vpack.c.bf16 %v7014_v21, %v7006_v42 }
 0xf1d   : > { %v15443_v62 = vpack.c.bf16 %v7013_v48, %v7005_v44  ;;  %v15445_v16 = vpack.c.bf16 %v7015_v22, %v7007_v53  ;;  %v6646_v40 = vpop.f32.mrb[148].mxu0  ;;  %v6839_v35 = vpop.f32.mrb[132].mxu1 }
 0xf1e   : > { %16776 = vst [vmem:[#allocation62_spill] sm:$0xff] %v15441_v54  ;;  %v6647_v41 = vadd.f32 %v6646_v40, %v15373_v24  ;;  %v6840_v14 = vadd.f32 %v6839_v35, %v15375_v38  ;;  %v6648_v55 = vpop.f32.mrb[149].mxu0  ;;  %v6841_v8 = vpop.f32.mrb[133].mxu1 }
 0xf1f   : > { %16777 = vst [vmem:[#allocation41_spill] sm:$0xff] %v15445_v16  ;;  %v6649_v37 = vadd.f32 %v6648_v55, %v15379_v34  ;;  %v6842_v4 = vadd.f32 %v6841_v8, %v15381_v45  ;;  %v6650_v39 = vpop.f32.mrb[150].mxu0  ;;  %v6843_v30 = vpop.f32.mrb[134].mxu1 }
 0xf20   : > { %v6651_v60 = vadd.f32 %v6650_v39, %v15373_v24  ;;  %v6844_v19 = vadd.f32 %v6843_v30, %v15375_v38  ;;  %v6652_v22 = vpop.f32.mrb[151].mxu0  ;;  %v6845_v42 = vpop.f32.mrb[135].mxu1  ;;  %v7020_v44 = vmax.f32 %v6647_v41, 0.0  ;;  %v7022_v53 = vmax.f32 %v6840_v14, 0.0 }
 0xf21   : > { %v6653_v63 = vadd.f32 %v6652_v22, %v15379_v34  ;;  %v6846_v21 = vadd.f32 %v6845_v42, %v15381_v45  ;;  %v7021_v35 = vmax.f32 %v6649_v37, 0.0  ;;  %v7023_v55 = vmax.f32 %v6842_v4, 0.0 }
 0xf22   : > { %v7028_v48 = vmax.f32 %v6651_v60, 0.0  ;;  %v7030_v40 = vmax.f32 %v6844_v19, 0.0  ;;  %8305 = vmatmul.mubr.bf16.gmra.mrb[0].mxu0 %v15352_v6 }
 0xf23   : > { %v7029_v8 = vmax.f32 %v6653_v63, 0.0  ;;  %v7031_v54 = vmax.f32 %v6846_v21, 0.0  ;;  %8314 = vmatprep.mubr.bf16.mxu0 %v15389_v23 }
 0xf24   : > { %v15457_v39 = vpack.c.bf16 %v7028_v48, %v7020_v44  ;;  %v15459_v30 = vpack.c.bf16 %v7030_v40, %v7022_v53 }
 0xf25   : > { %v15461_v16 = vpack.c.bf16 %v7029_v8, %v7021_v35  ;;  %v15463_v22 = vpack.c.bf16 %v7031_v54, %v7023_v55  ;;  %v6656_v41 = vpop.f32.mrb[152].mxu0  ;;  %v6849_v14 = vpop.f32.mrb[136].mxu1 }
 0xf26   : > { %16778 = vst [vmem:[#allocation37_spill] sm:$0xff] %v15459_v30  ;;  %v6657_v60 = vadd.f32 %v6656_v41, %v15373_v24  ;;  %v6850_v6 = vadd.f32 %v6849_v14, %v15375_v38  ;;  %v6658_v37 = vpop.f32.mrb[153].mxu0  ;;  %v6851_v4 = vpop.f32.mrb[137].mxu1 }
 0xf27   : > { %16779 = vst [vmem:[#allocation53_spill] sm:$0xff] %v15463_v22  ;;  %v6659_v19 = vadd.f32 %v6658_v37, %v15379_v34  ;;  %v6852_v23 = vadd.f32 %v6851_v4, %v15381_v45  ;;  %v6660_v42 = vpop.f32.mrb[154].mxu0  ;;  %v6853_v63 = vpop.f32.mrb[138].mxu1 }
 0xf28   : > { %v6661_v21 = vadd.f32 %v6660_v42, %v15373_v24  ;;  %v6854_v44 = vadd.f32 %v6853_v63, %v15375_v38  ;;  %v6662_v54 = vpop.f32.mrb[155].mxu0  ;;  %v6855_v53 = vpop.f32.mrb[139].mxu1  ;;  %v7036_v35 = vmax.f32 %v6657_v60, 0.0  ;;  %v7038_v55 = vmax.f32 %v6850_v6, 0.0 }
 0xf29   : > { %v6663_v48 = vadd.f32 %v6662_v54, %v15379_v34  ;;  %v6856_v40 = vadd.f32 %v6855_v53, %v15381_v45  ;;  %v7037_v14 = vmax.f32 %v6659_v19, 0.0  ;;  %v7039_v37 = vmax.f32 %v6852_v23, 0.0 }
 0xf2a   : > { %v7044_v8 = vmax.f32 %v6661_v21, 0.0  ;;  %v7046_v41 = vmax.f32 %v6854_v44, 0.0  ;;  %8315 = vmatmul.mubr.bf16.gmra.mrb[4].mxu0 %v15385_v10 }
 0xf2b   : > { %v7045_v4 = vmax.f32 %v6663_v48, 0.0  ;;  %v7047_v30 = vmax.f32 %v6856_v40, 0.0  ;;  %8357 = vmatprep.mubr.bf16.mxu0 %v15063_v13  ;;  %v10628_v40 = vld [vmem:[#allocation12 + $0x200] ss:$8 sps:$4 sm:$0xff]  }
 0xf2c   : > { %v15475_v42 = vpack.c.bf16 %v7044_v8, %v7036_v35  ;;  %v15477_v63 = vpack.c.bf16 %v7046_v41, %v7038_v55  ;;  %v10633_v41 = vld [vmem:[#allocation12 + $0x214] ss:$8 sps:$4 sm:$0xff]  }
 0xf2d   : > { %v15479_v22 = vpack.c.bf16 %v7045_v4, %v7037_v14  ;;  %v15481_v54 = vpack.c.bf16 %v7047_v30, %v7039_v37  ;;  %v6666_v60 = vpop.f32.mrb[156].mxu0  ;;  %v6859_v6 = vpop.f32.mrb[140].mxu1 }
 0xf2e   : > { %16780 = vst [vmem:[#allocation27_spill] sm:$0xff] %v15475_v42  ;;  %16781 = vst [vmem:[#allocation28_spill] sm:$0xff] %v15477_v63  ;;  %v6667_v21 = vadd.f32 %v6666_v60, %v15373_v24  ;;  %v6860_v10 = vadd.f32 %v6859_v6, %v15375_v38  ;;  %v6668_v19 = vpop.f32.mrb[157].mxu0  ;;  %v6861_v23 = vpop.f32.mrb[141].mxu1 }
 0xf2f   : > { %16782 = vst [vmem:[#allocation26_spill] sm:$0xff] %v15481_v54  ;;  %v6669_v44 = vadd.f32 %v6668_v19, %v15379_v34  ;;  %v6862_v13 = vadd.f32 %v6861_v23, %v15381_v45  ;;  %v6670_v53 = vpop.f32.mrb[158].mxu0  ;;  %v6863_v48 = vpop.f32.mrb[142].mxu1 }
 0xf30   : > { %v6671_v35 = vadd.f32 %v6670_v53, %v15373_v24  ;;  %v6864_v30 = vadd.f32 %v6863_v48, %v15375_v38  ;;  %v6672_v55 = vpop.f32.mrb[159].mxu0  ;;  %v6865_v8 = vpop.f32.mrb[143].mxu1  ;;  %v7052_v4 = vmax.f32 %v6667_v21, 0.0  ;;  %v7054_v60 = vmax.f32 %v6860_v10, 0.0  ;;  %v10631_v53 = vld [vmem:[#allocation12 + $0x210] ss:$8 sps:$4 sm:$0xff]  }
 0xf31   : > { %v6673_v14 = vadd.f32 %v6672_v55, %v15379_v34  ;;  %v6866_v37 = vadd.f32 %v6865_v8, %v15381_v45  ;;  %v7053_v23 = vmax.f32 %v6669_v44, 0.0  ;;  %v7055_v63 = vmax.f32 %v6862_v13, 0.0  ;;  %v10636_v55 = vld [vmem:[#allocation12 + $0x224] ss:$8 sps:$4 sm:$0xff]  }
 0xf32   : > { %v7060_v6 = vmax.f32 %v6671_v35, 0.0  ;;  %v7062_v19 = vmax.f32 %v6864_v30, 0.0  ;;  %8358 = vmatmul.mubr.bf16.vlgmr.msra.gmra.mrb[200].mxu0 %v15059_v61 }
 0xf33   : > { %v7061_v54 = vmax.f32 %v6673_v14, 0.0  ;;  %v7063_v59 = vmax.f32 %v6866_v37, 0.0  ;;  %8367 = vmatprep.mubr.bf16.mxu0 %v15083_v58  ;;  %8519 = vmatpush1.bf16.msra.mxu0 %v10628_v40 }
 0xf34   : > { %v15493_v48 = vpack.c.bf16 %v7060_v6, %v7052_v4  ;;  %v15495_v42 = vpack.c.bf16 %v7062_v19, %v7054_v60  ;;  %8520 = vmatprep.subr.bf16.mxu0 %v10633_v41  ;;  %v10634_v41 = vld [vmem:[#allocation12 + $0x220] ss:$8 sps:$4 sm:$0xff]   ;;  %v10639_v60 = vld [vmem:[#allocation12 + $0x234] ss:$8 sps:$4 sm:$0xff]  }
 0xf35   : > { %v15497_v21 = vpack.c.bf16 %v7061_v54, %v7053_v23  ;;  %v15499_v10 = vpack.c.bf16 %v7063_v59, %v7055_v63  ;;  %v6676_v35 = vpop.f32.mrb[160].mxu0  ;;  %v6869_v61 = vpop.f32.mrb[144].mxu1 }
 0xf36   : > { %16783 = vst [vmem:[#allocation33_spill] sm:$0xff] %v15495_v42  ;;  %v6677_v44 = vadd.f32 %v6676_v35, %v15373_v24  ;;  %v6870_v13 = vadd.f32 %v6869_v61, %v15375_v38  ;;  %v6678_v30 = vpop.f32.mrb[161].mxu0  ;;  %v6871_v58 = vpop.f32.mrb[145].mxu1 }
 0xf37   : > { %16784 = vst [vmem:[#allocation31_spill] sm:$0xff] %v15499_v10  ;;  %v6679_v40 = vadd.f32 %v6678_v30, %v15379_v34  ;;  %v6872_v8 = vadd.f32 %v6871_v58, %v15381_v45  ;;  %v6680_v14 = vpop.f32.mrb[162].mxu0  ;;  %v6873_v37 = vpop.f32.mrb[146].mxu1  ;;  %8521 = vmatpush1.bf16.msra.mxu0 %v10631_v53 }
 0xf38   : > { %v6681_v54 = vadd.f32 %v6680_v14, %v15373_v24  ;;  %v6874_v59 = vadd.f32 %v6873_v37, %v15375_v38  ;;  %v6682_v63 = vpop.f32.mrb[163].mxu0  ;;  %v6875_v4 = vpop.f32.mrb[147].mxu1  ;;  %8522 = vmatprep.subr.bf16.mxu0 %v10636_v55  ;;  %v7068_v23 = vmax.f32 %v6677_v44, 0.0  ;;  %v7070_v35 = vmax.f32 %v6870_v13, 0.0  ;;  %v10637_v37 = vld [vmem:[#allocation12 + $0x230] ss:$8 sps:$4 sm:$0xff]  }
 0xf39   : > { %v6683_v6 = vadd.f32 %v6682_v63, %v15379_v34  ;;  %v6876_v19 = vadd.f32 %v6875_v4, %v15381_v45  ;;  %v7069_v53 = vmax.f32 %v6679_v40, 0.0  ;;  %v7071_v58 = vmax.f32 %v6872_v8, 0.0  ;;  %v10642_v63 = vld [vmem:[#allocation12 + $0x244] ss:$8 sps:$4 sm:$0xff]  }
 0xf3a   : > { %v7076_v61 = vmax.f32 %v6681_v54, 0.0  ;;  %v7078_v30 = vmax.f32 %v6874_v59, 0.0  ;;  %8368 = vmatmul.mubr.bf16.gmra.mrb[204].mxu0 %v15079_v47 }
 0xf3b   : > { %v7077_v42 = vmax.f32 %v6683_v6, 0.0  ;;  %v7079_v14 = vmax.f32 %v6876_v19, 0.0  ;;  %8377 = vmatprep.mubr.bf16.mxu0 %v15103_v56  ;;  %8523 = vmatpush1.bf16.msra.mxu0 %v10634_v41 }
 0xf3c   : > { %v15511_v55 = vpack.c.bf16 %v7076_v61, %v7068_v23  ;;  %v15513_v10 = vpack.c.bf16 %v7078_v30, %v7070_v35  ;;  %8524 = vmatprep.subr.bf16.mxu0 %v10639_v60  ;;  %v10640_v60 = vld [vmem:[#allocation12 + $0x240] ss:$8 sps:$4 sm:$0xff]   ;;  %v10645_v30 = vld [vmem:[#allocation12 + $0x254] ss:$8 sps:$4 sm:$0xff]  }
 0xf3d   : > { %v15515_v44 = vpack.c.bf16 %v7077_v42, %v7069_v53  ;;  %v15517_v13 = vpack.c.bf16 %v7079_v14, %v7071_v58  ;;  %v6686_v54 = vpop.f32.mrb[164].mxu0  ;;  %v6879_v47 = vpop.f32.mrb[148].mxu1 }
 0xf3e   : > { %16785 = vst [vmem:[#allocation34_spill] sm:$0xff] %v15513_v10  ;;  %v6687_v40 = vadd.f32 %v6686_v54, %v15373_v24  ;;  %v6880_v8 = vadd.f32 %v6879_v47, %v15375_v38  ;;  %v6688_v59 = vpop.f32.mrb[165].mxu0  ;;  %v6881_v56 = vpop.f32.mrb[149].mxu1 }
 0xf3f   : > { %16786 = vst [vmem:[#allocation38_spill] sm:$0xff] %v15517_v13  ;;  %v6689_v41 = vadd.f32 %v6688_v59, %v15379_v34  ;;  %v6882_v4 = vadd.f32 %v6881_v56, %v15381_v45  ;;  %v6690_v6 = vpop.f32.mrb[166].mxu0  ;;  %v6883_v19 = vpop.f32.mrb[150].mxu1  ;;  %8525 = vmatpush1.bf16.msra.mxu0 %v10637_v37 }
 0xf40   : > { %v6691_v42 = vadd.f32 %v6690_v6, %v15373_v24  ;;  %v6884_v23 = vadd.f32 %v6883_v19, %v15375_v38  ;;  %v6692_v35 = vpop.f32.mrb[167].mxu0  ;;  %v6885_v61 = vpop.f32.mrb[151].mxu1  ;;  %8526 = vmatprep.subr.bf16.mxu0 %v10642_v63  ;;  %v7084_v14 = vmax.f32 %v6687_v40, 0.0  ;;  %v7086_v54 = vmax.f32 %v6880_v8, 0.0  ;;  %v10643_v19 = vld [vmem:[#allocation12 + $0x250] ss:$8 sps:$4 sm:$0xff]  }
 0xf41   : > { %v6693_v53 = vadd.f32 %v6692_v35, %v15379_v34  ;;  %v6886_v58 = vadd.f32 %v6885_v61, %v15381_v45  ;;  %v7085_v37 = vmax.f32 %v6689_v41, 0.0  ;;  %v7087_v56 = vmax.f32 %v6882_v4, 0.0  ;;  %v10648_v35 = vld [vmem:[#allocation12 + $0x264] ss:$8 sps:$4 sm:$0xff]  }
 0xf42   : > { %v7092_v47 = vmax.f32 %v6691_v42, 0.0  ;;  %v7094_v59 = vmax.f32 %v6884_v23, 0.0  ;;  %8378 = vmatmul.mubr.bf16.gmra.mrb[208].mxu0 %v15099_v26 }
 0xf43   : > { %v7093_v10 = vmax.f32 %v6693_v53, 0.0  ;;  %v7095_v6 = vmax.f32 %v6886_v58, 0.0  ;;  %8387 = vmatprep.mubr.bf16.mxu0 %v15123_v1  ;;  %8527 = vmatpush1.bf16.msra.mxu0 %v10640_v60 }
 0xf44   : > { %v15529_v63 = vpack.c.bf16 %v7092_v47, %v7084_v14  ;;  %v15531_v13 = vpack.c.bf16 %v7094_v59, %v7086_v54  ;;  %8528 = vmatprep.subr.bf16.mxu0 %v10645_v30  ;;  %v10646_v30 = vld [vmem:[#allocation12 + $0x260] ss:$8 sps:$4 sm:$0xff]   ;;  %v10651_v59 = vld [vmem:[#allocation12 + $0x274] ss:$8 sps:$4 sm:$0xff]  }
 0xf45   : > { %v15533_v40 = vpack.c.bf16 %v7093_v10, %v7085_v37  ;;  %v15535_v8 = vpack.c.bf16 %v7095_v6, %v7087_v56  ;;  %v6696_v42 = vpop.f32.mrb[168].mxu0  ;;  %v6889_v26 = vpop.f32.mrb[152].mxu1 }
 0xf46   : > { %16787 = vst [vmem:[#allocation20_spill] sm:$0xff] %v15531_v13  ;;  %v6697_v41 = vadd.f32 %v6696_v42, %v15373_v24  ;;  %v6890_v4 = vadd.f32 %v6889_v26, %v15375_v38  ;;  %v6698_v23 = vpop.f32.mrb[169].mxu0  ;;  %v6891_v1 = vpop.f32.mrb[153].mxu1 }
 0xf47   : > { %16788 = vst [vmem:[#allocation49_spill] sm:$0xff] %v15535_v8  ;;  %v6699_v60 = vadd.f32 %v6698_v23, %v15379_v34  ;;  %v6892_v61 = vadd.f32 %v6891_v1, %v15381_v45  ;;  %v6700_v53 = vpop.f32.mrb[170].mxu0  ;;  %v6893_v58 = vpop.f32.mrb[154].mxu1  ;;  %8529 = vmatpush1.bf16.msra.mxu0 %v10643_v19 }
 0xf48   : > { %v6701_v10 = vadd.f32 %v6700_v53, %v15373_v24  ;;  %v6894_v14 = vadd.f32 %v6893_v58, %v15375_v38  ;;  %v6702_v54 = vpop.f32.mrb[171].mxu0  ;;  %v6895_v47 = vpop.f32.mrb[155].mxu1  ;;  %8530 = vmatprep.subr.bf16.mxu0 %v10648_v35  ;;  %v7100_v6 = vmax.f32 %v6697_v41, 0.0  ;;  %v7102_v42 = vmax.f32 %v6890_v4, 0.0  ;;  %v10649_v58 = vld [vmem:[#allocation12 + $0x270] ss:$8 sps:$4 sm:$0xff]  }
 0xf49   : > { %v6703_v37 = vadd.f32 %v6702_v54, %v15379_v34  ;;  %v6896_v56 = vadd.f32 %v6895_v47, %v15381_v45  ;;  %v7101_v19 = vmax.f32 %v6699_v60, 0.0  ;;  %v7103_v1 = vmax.f32 %v6892_v61, 0.0  ;;  %v10654_v54 = vld [vmem:[#allocation12 + $0x284] ss:$8 sps:$4 sm:$0xff]  }
 0xf4a   : > { %v7108_v26 = vmax.f32 %v6701_v10, 0.0  ;;  %v7110_v23 = vmax.f32 %v6894_v14, 0.0  ;;  %8388 = vmatmul.mubr.bf16.gmra.mrb[212].mxu0 %v15119_v17 }
 0xf4b   : > { %v7109_v13 = vmax.f32 %v6703_v37, 0.0  ;;  %v7111_v53 = vmax.f32 %v6896_v56, 0.0  ;;  %8397 = vmatprep.mubr.bf16.mxu0 %v15143_v49  ;;  %8531 = vmatpush1.bf16.msra.mxu0 %v10646_v30 }
 0xf4c   : > { %v15547_v35 = vpack.c.bf16 %v7108_v26, %v7100_v6  ;;  %v15549_v8 = vpack.c.bf16 %v7110_v23, %v7102_v42  ;;  %8532 = vmatprep.subr.bf16.mxu0 %v10651_v59  ;;  %v10652_v59 = vld [vmem:[#allocation12 + $0x280] ss:$8 sps:$4 sm:$0xff]   ;;  %v10657_v23 = vld [vmem:[#allocation12 + $0x294] ss:$8 sps:$4 sm:$0xff]  }
 0xf4d   : > { %v15551_v41 = vpack.c.bf16 %v7109_v13, %v7101_v19  ;;  %v15553_v4 = vpack.c.bf16 %v7111_v53, %v7103_v1  ;;  %v6706_v10 = vpop.f32.mrb[172].mxu0  ;;  %v6899_v17 = vpop.f32.mrb[156].mxu1 }
 0xf4e   : > { %16789 = vst [vmem:[#allocation55_spill] sm:$0xff] %v15549_v8  ;;  %v6707_v60 = vadd.f32 %v6706_v10, %v15373_v24  ;;  %v6900_v61 = vadd.f32 %v6899_v17, %v15375_v38  ;;  %v6708_v14 = vpop.f32.mrb[173].mxu0  ;;  %v6901_v49 = vpop.f32.mrb[157].mxu1 }
 0xf4f   : > { %16790 = vst [vmem:[#allocation24_spill] sm:$0xff] %v15553_v4  ;;  %v6709_v30 = vadd.f32 %v6708_v14, %v15379_v34  ;;  %v6902_v47 = vadd.f32 %v6901_v49, %v15381_v45  ;;  %v6710_v37 = vpop.f32.mrb[174].mxu0  ;;  %v6903_v56 = vpop.f32.mrb[158].mxu1  ;;  %8533 = vmatpush1.bf16.msra.mxu0 %v10649_v58 }
 0xf50   : > { %v6711_v13 = vadd.f32 %v6710_v37, %v15373_v24  ;;  %v6904_v6 = vadd.f32 %v6903_v56, %v15375_v38  ;;  %v6712_v42 = vpop.f32.mrb[175].mxu0  ;;  %v6905_v26 = vpop.f32.mrb[159].mxu1  ;;  %8534 = vmatprep.subr.bf16.mxu0 %v10654_v54  ;;  %v7116_v53 = vmax.f32 %v6707_v60, 0.0  ;;  %v7118_v10 = vmax.f32 %v6900_v61, 0.0  ;;  %v10655_v56 = vld [vmem:[#allocation12 + $0x290] ss:$8 sps:$4 sm:$0xff]  }
 0xf51   : > { %v6713_v19 = vadd.f32 %v6712_v42, %v15379_v34  ;;  %v6906_v1 = vadd.f32 %v6905_v26, %v15381_v45  ;;  %v7117_v58 = vmax.f32 %v6709_v30, 0.0  ;;  %v7119_v49 = vmax.f32 %v6902_v47, 0.0  ;;  %v10660_v42 = vld [vmem:[#allocation12 + $0x2a4] ss:$8 sps:$4 sm:$0xff]  }
 0xf52   : > { %v7124_v17 = vmax.f32 %v6711_v13, 0.0  ;;  %v7126_v14 = vmax.f32 %v6904_v6, 0.0  ;;  %8398 = vmatmul.mubr.bf16.gmra.mrb[216].mxu0 %v15139_v18 }
 0xf53   : > { %v7125_v8 = vmax.f32 %v6713_v19, 0.0  ;;  %v7127_v37 = vmax.f32 %v6906_v1, 0.0  ;;  %8407 = vmatprep.mubr.bf16.mxu0 %v15163_v46  ;;  %8535 = vmatpush1.bf16.msra.mxu0 %v10652_v59 }
 0xf54   : > { %v15565_v54 = vpack.c.bf16 %v7124_v17, %v7116_v53  ;;  %v15567_v4 = vpack.c.bf16 %v7126_v14, %v7118_v10  ;;  %8536 = vmatprep.subr.bf16.mxu0 %v10657_v23  ;;  %v10658_v23 = vld [vmem:[#allocation12 + $0x2a0] ss:$8 sps:$4 sm:$0xff]   ;;  %v10663_v14 = vld [vmem:[#allocation12 + $0x2b4] ss:$8 sps:$4 sm:$0xff]  }
 0xf55   : > { %v15569_v60 = vpack.c.bf16 %v7125_v8, %v7117_v58  ;;  %v15571_v61 = vpack.c.bf16 %v7127_v37, %v7119_v49  ;;  %v6716_v13 = vpop.f32.mrb[176].mxu0  ;;  %v6909_v18 = vpop.f32.mrb[160].mxu1 }
 0xf56   : > { %16791 = vst [vmem:[#allocation44_spill] sm:$0xff] %v15565_v54  ;;  %16792 = vst [vmem:[#allocation70_spill] sm:$0xff] %v15567_v4  ;;  %v6717_v30 = vadd.f32 %v6716_v13, %v15373_v24  ;;  %v6910_v47 = vadd.f32 %v6909_v18, %v15375_v38  ;;  %v6718_v6 = vpop.f32.mrb[177].mxu0  ;;  %v6911_v46 = vpop.f32.mrb[161].mxu1 }
 0xf57   : > { %16793 = vst [vmem:[#allocation72_spill] sm:$0xff] %v15571_v61  ;;  %v6719_v59 = vadd.f32 %v6718_v6, %v15379_v34  ;;  %v6912_v26 = vadd.f32 %v6911_v46, %v15381_v45  ;;  %v6720_v19 = vpop.f32.mrb[178].mxu0  ;;  %v6913_v1 = vpop.f32.mrb[162].mxu1  ;;  %8537 = vmatpush1.bf16.msra.mxu0 %v10655_v56  ;;  %v16794_v46 = vld [vmem:[#allocation40_spill] sm:$0xff] }
 0xf58   : > { %v6721_v8 = vadd.f32 %v6720_v19, %v15373_v24  ;;  %v6914_v53 = vadd.f32 %v6913_v1, %v15375_v38  ;;  %v6722_v10 = vpop.f32.mrb[179].mxu0  ;;  %v6915_v17 = vpop.f32.mrb[163].mxu1  ;;  %8538 = vmatprep.subr.bf16.mxu0 %v10660_v42  ;;  %v7132_v37 = vmax.f32 %v6717_v30, 0.0  ;;  %v7134_v13 = vmax.f32 %v6910_v47, 0.0  ;;  %v10661_v1 = vld [vmem:[#allocation12 + $0x2b0] ss:$8 sps:$4 sm:$0xff]  }
 0xf59   : > { %v6723_v58 = vadd.f32 %v6722_v10, %v15379_v34  ;;  %v6916_v49 = vadd.f32 %v6915_v17, %v15381_v45  ;;  %v7133_v56 = vmax.f32 %v6719_v59, 0.0  ;;  %v7135_v4 = vmax.f32 %v6912_v26, 0.0  ;;  %v10666_v10 = vld [vmem:[#allocation12 + $0x2c4] ss:$8 sps:$4 sm:$0xff]  }
 0xf5a   : > { %v7140_v18 = vmax.f32 %v6721_v8, 0.0  ;;  %v7142_v6 = vmax.f32 %v6914_v53, 0.0  ;;  %8408 = vmatmul.mubr.bf16.gmra.mrb[220].mxu0 %v16794_v46 }
 0xf5b   : > { %v7141_v61 = vmax.f32 %v6723_v58, 0.0  ;;  %v7143_v19 = vmax.f32 %v6916_v49, 0.0  ;;  %8417 = vmatprep.mubr.bf16.mxu0 %v15183_v11  ;;  %8539 = vmatpush1.bf16.msra.mxu0 %v10658_v23 }
 0xf5c   : > { %v15583_v42 = vpack.c.bf16 %v7140_v18, %v7132_v37  ;;  %v15585_v54 = vpack.c.bf16 %v7142_v6, %v7134_v13  ;;  %8540 = vmatprep.subr.bf16.mxu0 %v10663_v14  ;;  %v10664_v14 = vld [vmem:[#allocation12 + $0x2c0] ss:$8 sps:$4 sm:$0xff]   ;;  %v10669_v6 = vld [vmem:[#allocation12 + $0x2d4] ss:$8 sps:$4 sm:$0xff]  }
 0xf5d   : > { %v15587_v30 = vpack.c.bf16 %v7141_v61, %v7133_v56  ;;  %v15589_v47 = vpack.c.bf16 %v7143_v19, %v7135_v4  ;;  %v6726_v8 = vpop.f32.mrb[180].mxu0  ;;  %v6919_v53 = vpop.f32.mrb[164].mxu1 }
 0xf5e   : > { %16795 = vst [vmem:[#allocation40_spill] sm:$0xff] %v15583_v42  ;;  %16796 = vst [vmem:[#allocation111_spill] sm:$0xff] %v15585_v54  ;;  %v6727_v59 = vadd.f32 %v6726_v8, %v15373_v24  ;;  %v6920_v26 = vadd.f32 %v6919_v53, %v15375_v38  ;;  %v6728_v17 = vpop.f32.mrb[181].mxu0  ;;  %v6921_v11 = vpop.f32.mrb[165].mxu1 }
 0xf5f   : > { %16797 = vst [vmem:[#allocation112_spill] sm:$0xff] %v15589_v47  ;;  %v6729_v23 = vadd.f32 %v6728_v17, %v15379_v34  ;;  %v6922_v58 = vadd.f32 %v6921_v11, %v15381_v45  ;;  %v6730_v49 = vpop.f32.mrb[182].mxu0  ;;  %v6923_v37 = vpop.f32.mrb[166].mxu1  ;;  %8541 = vmatpush1.bf16.msra.mxu0 %v10661_v1  ;;  %v16798_v11 = vld [vmem:[#allocation21_spill] sm:$0xff] }
 0xf60   : > { %v6731_v61 = vadd.f32 %v6730_v49, %v15373_v24  ;;  %v6924_v4 = vadd.f32 %v6923_v37, %v15375_v38  ;;  %v6732_v13 = vpop.f32.mrb[183].mxu0  ;;  %v6925_v18 = vpop.f32.mrb[167].mxu1  ;;  %8542 = vmatprep.subr.bf16.mxu0 %v10666_v10  ;;  %v7148_v19 = vmax.f32 %v6727_v59, 0.0  ;;  %v7150_v8 = vmax.f32 %v6920_v26, 0.0  ;;  %v10667_v37 = vld [vmem:[#allocation12 + $0x2d0] ss:$8 sps:$4 sm:$0xff]  }
 0xf61   : > { %v6733_v46 = vadd.f32 %v6732_v13, %v15379_v34  ;;  %v6926_v56 = vadd.f32 %v6925_v18, %v15381_v45  ;;  %v7149_v1 = vmax.f32 %v6729_v23, 0.0  ;;  %v7151_v54 = vmax.f32 %v6922_v58, 0.0  ;;  %v10672_v13 = vld [vmem:[#allocation12 + $0x2e4] ss:$8 sps:$4 sm:$0xff]  }
 0xf62   : > { %v7156_v53 = vmax.f32 %v6731_v61, 0.0  ;;  %v7158_v17 = vmax.f32 %v6924_v4, 0.0  ;;  %8418 = vmatmul.mubr.bf16.gmra.mrb[224].mxu0 %v16798_v11 }
 0xf63   : > { %v7157_v47 = vmax.f32 %v6733_v46, 0.0  ;;  %v7159_v49 = vmax.f32 %v6926_v56, 0.0  ;;  %8427 = vmatprep.mubr.bf16.mxu0 %v15203_v52  ;;  %8543 = vmatpush1.bf16.msra.mxu0 %v10664_v14 }
 0xf64   : > { %v15601_v10 = vpack.c.bf16 %v7156_v53, %v7148_v19  ;;  %v15603_v42 = vpack.c.bf16 %v7158_v17, %v7150_v8  ;;  %8544 = vmatprep.subr.bf16.mxu0 %v10669_v6  ;;  %v10670_v6 = vld [vmem:[#allocation12 + $0x2e0] ss:$8 sps:$4 sm:$0xff]   ;;  %v10675_v17 = vld [vmem:[#allocation12 + $0x2f4] ss:$8 sps:$4 sm:$0xff]  }
 0xf65   : > { %v15605_v59 = vpack.c.bf16 %v7157_v47, %v7149_v1  ;;  %v15607_v26 = vpack.c.bf16 %v7159_v49, %v7151_v54  ;;  %v6736_v61 = vpop.f32.mrb[184].mxu0  ;;  %v6929_v4 = vpop.f32.mrb[168].mxu1 }
 0xf66   : > { %16799 = vst [vmem:[#allocation21_spill] sm:$0xff] %v15603_v42  ;;  %v6737_v23 = vadd.f32 %v6736_v61, %v15373_v24  ;;  %v6930_v58 = vadd.f32 %v6929_v4, %v15375_v38  ;;  %v6738_v18 = vpop.f32.mrb[185].mxu0  ;;  %v6931_v52 = vpop.f32.mrb[169].mxu1 }
 0xf67   : > { %16800 = vst [vmem:[#allocation113_spill] sm:$0xff] %v15607_v26  ;;  %v6739_v14 = vadd.f32 %v6738_v18, %v15379_v34  ;;  %v6932_v46 = vadd.f32 %v6931_v52, %v15381_v45  ;;  %v6740_v56 = vpop.f32.mrb[186].mxu0  ;;  %v6933_v19 = vpop.f32.mrb[170].mxu1  ;;  %8545 = vmatpush1.bf16.msra.mxu0 %v10667_v37 }
 0xf68   : > { %v6741_v47 = vadd.f32 %v6740_v56, %v15373_v24  ;;  %v6934_v54 = vadd.f32 %v6933_v19, %v15375_v38  ;;  %v6742_v8 = vpop.f32.mrb[187].mxu0  ;;  %v6935_v53 = vpop.f32.mrb[171].mxu1  ;;  %8546 = vmatprep.subr.bf16.mxu0 %v10672_v13  ;;  %v7164_v49 = vmax.f32 %v6737_v23, 0.0  ;;  %v7166_v61 = vmax.f32 %v6930_v58, 0.0  ;;  %v10673_v19 = vld [vmem:[#allocation12 + $0x2f0] ss:$8 sps:$4 sm:$0xff]  }
 0xf69   : > { %v6743_v11 = vadd.f32 %v6742_v8, %v15379_v34  ;;  %v6936_v1 = vadd.f32 %v6935_v53, %v15381_v45  ;;  %v7165_v37 = vmax.f32 %v6739_v14, 0.0  ;;  %v7167_v52 = vmax.f32 %v6932_v46, 0.0  ;;  %v10678_v8 = vld [vmem:[#allocation12 + $0x304] ss:$8 sps:$4 sm:$0xff]  }
 0xf6a   : > { %v7172_v4 = vmax.f32 %v6741_v47, 0.0  ;;  %v7174_v18 = vmax.f32 %v6934_v54, 0.0  ;;  %8428 = vmatmul.mubr.bf16.gmra.mrb[228].mxu0 %v15199_v57 }
 0xf6b   : > { %v7173_v42 = vmax.f32 %v6743_v11, 0.0  ;;  %v7175_v56 = vmax.f32 %v6936_v1, 0.0  ;;  %8437 = vmatprep.mubr.bf16.mxu0 %v15250_v33  ;;  %8547 = vmatpush1.bf16.msra.mxu0 %v10670_v6 }
 0xf6c   : > { %v15619_v13 = vpack.c.bf16 %v7172_v4, %v7164_v49  ;;  %v15621_v26 = vpack.c.bf16 %v7174_v18, %v7166_v61  ;;  %8548 = vmatprep.subr.bf16.mxu0 %v10675_v17 }
 0xf6d   : > { %v15623_v23 = vpack.c.bf16 %v7173_v42, %v7165_v37  ;;  %v15625_v58 = vpack.c.bf16 %v7175_v56, %v7167_v52  ;;  %v6746_v47 = vpop.f32.mrb[188].mxu0  ;;  %v6939_v57 = vpop.f32.mrb[172].mxu1 }
 0xf6e   : > { %v6747_v14 = vadd.f32 %v6746_v47, %v15373_v24  ;;  %v6940_v46 = vadd.f32 %v6939_v57, %v15375_v38  ;;  %v6748_v54 = vpop.f32.mrb[189].mxu0  ;;  %v6941_v33 = vpop.f32.mrb[173].mxu1 }
 0xf6f   : > { %v6749_v6 = vadd.f32 %v6748_v54, %v15379_v34  ;;  %v6942_v53 = vadd.f32 %v6941_v33, %v15381_v45  ;;  %v6750_v11 = vpop.f32.mrb[190].mxu0  ;;  %v6943_v1 = vpop.f32.mrb[174].mxu1  ;;  %8549 = vmatpush1.bf16.msra.mxu0 %v10673_v19 }
 0xf70   : > { %v6751_v42 = vadd.f32 %v6750_v11, %v15373_v24  ;;  %v6944_v17 = vadd.f32 %v6943_v1, %v15375_v38  ;;  %v6752_v49 = vpop.f32.mrb[191].mxu0  ;;  %v6945_v61 = vpop.f32.mrb[175].mxu1  ;;  %8711 = vmatprep.subr.bf16.mxu0 %v10678_v8  ;;  %v7180_v37 = vmax.f32 %v6747_v14, 0.0  ;;  %v7182_v52 = vmax.f32 %v6940_v46, 0.0 }
 0xf71   : > { %v6753_v4 = vadd.f32 %v6752_v49, %v15379_v34  ;;  %v6946_v18 = vadd.f32 %v6945_v61, %v15381_v45  ;;  %v7181_v57 = vmax.f32 %v6749_v6, 0.0  ;;  %v7183_v54 = vmax.f32 %v6942_v53, 0.0 }
 0xf72   : > { %v7188_v56 = vmax.f32 %v6751_v42, 0.0  ;;  %v7190_v47 = vmax.f32 %v6944_v17, 0.0  ;;  %8438 = vmatmul.mubr.bf16.gmra.mrb[232].mxu0 %v15245_v50 }
 0xf73   : > { %v7189_v19 = vmax.f32 %v6753_v4, 0.0  ;;  %v7191_v33 = vmax.f32 %v6946_v18, 0.0  ;;  %8447 = vmatprep.mubr.bf16.mxu0 %v15268_v7 }
 0xf74   : > { %v15637_v11 = vpack.c.bf16 %v7188_v56, %v7180_v37  ;;  %v15639_v1 = vpack.c.bf16 %v7190_v47, %v7182_v52 }
 0xf75   : > { %v15641_v8 = vpack.c.bf16 %v7189_v19, %v7181_v57  ;;  %v15643_v49 = vpack.c.bf16 %v7191_v33, %v7183_v54  ;;  %v6756_v14 = vpop.f32.mrb[192].mxu0  ;;  %v6949_v46 = vpop.f32.mrb[176].mxu1 }
 0xf76   : > { %16801 = vst [vmem:[#allocation114_spill] sm:$0xff] %v15639_v1  ;;  %v6757_v42 = vadd.f32 %v6756_v14, %v15373_v24  ;;  %v6950_v50 = vadd.f32 %v6949_v46, %v15375_v38  ;;  %v6758_v6 = vpop.f32.mrb[193].mxu0  ;;  %v6951_v53 = vpop.f32.mrb[177].mxu1 }
 0xf77   : > { %16802 = vst [vmem:[#allocation115_spill] sm:$0xff] %v15643_v49  ;;  %v6759_v17 = vadd.f32 %v6758_v6, %v15379_v34  ;;  %v6952_v7 = vadd.f32 %v6951_v53, %v15381_v45  ;;  %v6760_v61 = vpop.f32.mrb[194].mxu0  ;;  %v6953_v4 = vpop.f32.mrb[178].mxu1 }
 0xf78   : > { %v6761_v18 = vadd.f32 %v6760_v61, %v15373_v24  ;;  %v6954_v37 = vadd.f32 %v6953_v4, %v15375_v38  ;;  %v6762_v52 = vpop.f32.mrb[195].mxu0  ;;  %v6955_v56 = vpop.f32.mrb[179].mxu1  ;;  %v7196_v54 = vmax.f32 %v6757_v42, 0.0  ;;  %v7198_v19 = vmax.f32 %v6950_v50, 0.0 }
 0xf79   : > { %v6763_v47 = vadd.f32 %v6762_v52, %v15379_v34  ;;  %v6956_v57 = vadd.f32 %v6955_v56, %v15381_v45  ;;  %v7197_v46 = vmax.f32 %v6759_v17, 0.0  ;;  %v7199_v6 = vmax.f32 %v6952_v7, 0.0 }
 0xf7a   : > { %v7204_v33 = vmax.f32 %v6761_v18, 0.0  ;;  %v7206_v14 = vmax.f32 %v6954_v37, 0.0  ;;  %8448 = vmatmul.mubr.bf16.gmra.mrb[236].mxu0 %v15263_v15 }
 0xf7b   : > { %v7205_v53 = vmax.f32 %v6763_v47, 0.0  ;;  %v7207_v1 = vmax.f32 %v6956_v57, 0.0  ;;  %8457 = vmatprep.mubr.bf16.mxu0 %v15286_v2 }
 0xf7c   : > { %v15655_v61 = vpack.c.bf16 %v7204_v33, %v7196_v54  ;;  %v15657_v4 = vpack.c.bf16 %v7206_v14, %v7198_v19 }
 0xf7d   : > { %v15659_v49 = vpack.c.bf16 %v7205_v53, %v7197_v46  ;;  %v15661_v52 = vpack.c.bf16 %v7207_v1, %v7199_v6  ;;  %v6766_v42 = vpop.f32.mrb[196].mxu0  ;;  %v6959_v50 = vpop.f32.mrb[180].mxu1 }
 0xf7e   : > { %16803 = vst [vmem:[#allocation116_spill] sm:$0xff] %v15657_v4  ;;  %v6767_v18 = vadd.f32 %v6766_v42, %v15373_v24  ;;  %v6960_v15 = vadd.f32 %v6959_v50, %v15375_v38  ;;  %v6768_v17 = vpop.f32.mrb[197].mxu0  ;;  %v6961_v7 = vpop.f32.mrb[181].mxu1 }
 0xf7f   : > { %v6769_v37 = vadd.f32 %v6768_v17, %v15379_v34  ;;  %v6962_v2 = vadd.f32 %v6961_v7, %v15381_v45  ;;  %v6770_v56 = vpop.f32.mrb[198].mxu0  ;;  %v6963_v47 = vpop.f32.mrb[182].mxu1 }
 0xf80   : > { %v6771_v57 = vadd.f32 %v6770_v56, %v15373_v24  ;;  %v6964_v54 = vadd.f32 %v6963_v47, %v15375_v38  ;;  %v6772_v1 = vpop.f32.mrb[199].mxu0  ;;  %v6965_v19 = vpop.f32.mrb[183].mxu1  ;;  %v7212_v46 = vmax.f32 %v6767_v18, 0.0  ;;  %v7214_v6 = vmax.f32 %v6960_v15, 0.0  ;;  %v16805_v18 = vld [vmem:[#allocation27_spill] sm:$0xff] }
 0xf81   : > { %v6773_v33 = vadd.f32 %v6772_v1, %v15379_v34  ;;  %v6966_v14 = vadd.f32 %v6965_v19, %v15381_v45  ;;  %v7213_v50 = vmax.f32 %v6769_v37, 0.0  ;;  %v7215_v17 = vmax.f32 %v6962_v2, 0.0  ;;  %v10690_v45 = vld [vmem:[#allocation12 + $0x344] ss:$8 sps:$4 sm:$0xff]   ;;  %v10703_v15 = vld [vmem:[#allocation12 + $0x390] ss:$8 sps:$4 sm:$0xff]  }
 0xf82   : > { %v7220_v53 = vmax.f32 %v6771_v57, 0.0  ;;  %v7222_v42 = vmax.f32 %v6964_v54, 0.0  ;;  %8458 = vmatmul.mubr.bf16.gmra.mrb[240].mxu0 %v15281_v36  ;;  %v16804_v36 = vld [vmem:[#allocation100_spill] sm:$0xff]  ;;  %v10709_v2 = vld [vmem:[#allocation12 + $0x3b0] ss:$8 sps:$4 sm:$0xff]  }
 0xf83   : > { %v7221_v7 = vmax.f32 %v6773_v33, 0.0  ;;  %v7223_v4 = vmax.f32 %v6966_v14, 0.0  ;;  %8467 = vmatprep.mubr.bf16.mxu0 %v15304_v51  ;;  %v10676_v51 = vld [vmem:[#allocation12 + $0x300] ss:$8 sps:$4 sm:$0xff]   ;;  %v10708_v37 = vld [vmem:[#allocation12 + $0x3a4] ss:$8 sps:$4 sm:$0xff]  }
 0xf84   : > { %v15673_v24 = vpack.c.bf16 %v7220_v53, %v7212_v46  ;;  %v15675_v38 = vpack.c.bf16 %v7222_v42, %v7214_v6  ;;  %v10714_v47 = vld [vmem:[#allocation12 + $0x3c4] ss:$8 sps:$4 sm:$0xff]   ;;  %v10712_v57 = vld [vmem:[#allocation12 + $0x3c0] ss:$8 sps:$4 sm:$0xff]   ;;  %v10715_v54 = vld [vmem:[#allocation12 + $0x3d0] ss:$8 sps:$4 sm:$0xff]  }
 0xf85   : > { %v15677_v56 = vpack.c.bf16 %v7221_v7, %v7213_v50  ;;  %v15679_v34 = vpack.c.bf16 %v7223_v4, %v7215_v17  ;;  %v10702_v4 = vld [vmem:[#allocation12 + $0x384] ss:$8 sps:$4 sm:$0xff]   ;;  %v10721_v19 = vld [vmem:[#allocation12 + $0x3f0] ss:$8 sps:$4 sm:$0xff]  }
 0xf86   : > { %v10720_v1 = vld [vmem:[#allocation12 + $0x3e4] ss:$8 sps:$4 sm:$0xff]   ;;  %v16821_v33 = vld [vmem:[#allocation34_spill] sm:$0xff]  ;;  %v16825_v53 = vld [vmem:[#allocation55_spill] sm:$0xff] }
 0xf87   : > { %v16822_v14 = vld [vmem:[#allocation49_spill] sm:$0xff]  ;;  %v16823_v46 = vld [vmem:[#allocation20_spill] sm:$0xff]  ;;  %v16827_v50 = vld [vmem:[#allocation70_spill] sm:$0xff] }
 0xf88   : > { %v16824_v6 = vld [vmem:[#allocation24_spill] sm:$0xff]  ;;  %v16829_v7 = vld [vmem:[#allocation111_spill] sm:$0xff] }
 0xf89   : > { %v16826_v42 = vld [vmem:[#allocation72_spill] sm:$0xff] }
 0xf8a   : > { %8468 = vmatmul.mubr.bf16.gmra.mrb[244].mxu0 %v15300_v32  ;;  %v10681_v32 = vld [vmem:[#allocation12 + $0x314] ss:$8 sps:$4 sm:$0xff]   ;;  %v16828_v17 = vld [vmem:[#allocation112_spill] sm:$0xff] }
 0xf8b   : > { %8477 = vmatprep.mubr.bf16.mxu0 %v15322_v0  ;;  %v10684_v0 = vld [vmem:[#allocation12 + $0x324] ss:$8 sps:$4 sm:$0xff]  }
 0xf92   : > { %8478 = vmatmul.mubr.bf16.gmra.mrb[248].mxu0 %v15318_v25  ;;  %v10679_v25 = vld [vmem:[#allocation12 + $0x310] ss:$8 sps:$4 sm:$0xff]  }
 0xf93   : > { %8487 = vmatprep.mubr.bf16.mxu0 %v15340_v9  ;;  %v10687_v9 = vld [vmem:[#allocation12 + $0x334] ss:$8 sps:$4 sm:$0xff]  }
 0xf9a   : > { %8488 = vmatmul.mubr.bf16.gmra.mrb[252].mxu0 %v15336_v12  ;;  %v10682_v12 = vld [vmem:[#allocation12 + $0x320] ss:$8 sps:$4 sm:$0xff]  }
 0xf9b   : > { %8497 = vmatprep.mubr.bf16.mxu0 %v15360_v28  ;;  %v10685_v28 = vld [vmem:[#allocation12 + $0x330] ss:$8 sps:$4 sm:$0xff]  }
 0xfa2   : > { %8498 = vmatmul.mubr.bf16.gmra.mrb[0].mxu0 %v16804_v36  ;;  %v16832_v36 = vld [vmem:[#allocation115_spill] sm:$0xff] }
 0xfa3   : > { %8507 = vmatprep.mubr.bf16.mxu0 %v15391_v29  ;;  %v10693_v29 = vld [vmem:[#allocation12 + $0x354] ss:$8 sps:$4 sm:$0xff]  }
 0xfaa   : > { %8508 = vmatmul.mubr.bf16.gmra.mrb[4].mxu0 %v15387_v31  ;;  %v10688_v31 = vld [vmem:[#allocation12 + $0x340] ss:$8 sps:$4 sm:$0xff]  }
 0xfab   : > { %8550 = vmatprep.mubr.bf16.mxu0 %v15407_v3  ;;  %v10694_v3 = vld [vmem:[#allocation12 + $0x360] ss:$8 sps:$4 sm:$0xff]  }
 0xfb2   : > { %8551 = vmatmul.mubr.bf16.vlgmr.msra.gmra.mrb[200].mxu0 %v15403_v20  ;;  %v10691_v20 = vld [vmem:[#allocation12 + $0x350] ss:$8 sps:$4 sm:$0xff]  }
 0xfb3   : > { %8560 = vmatprep.mubr.bf16.mxu0 %v15425_v27  ;;  %8712 = vmatpush1.bf16.msra.mxu0 %v10676_v51  ;;  %v10696_v27 = vld [vmem:[#allocation12 + $0x364] ss:$8 sps:$4 sm:$0xff]   ;;  %v16833_v51 = vld [vmem:[#allocation114_spill] sm:$0xff] }
 0xfb4   : > { %8713 = vmatprep.subr.bf16.mxu0 %v10681_v32  ;;  %v16834_v32 = vld [vmem:[#allocation116_spill] sm:$0xff] }
 0xfb7   : > { %8714 = vmatpush1.bf16.msra.mxu0 %v10679_v25  ;;  %v7480_v25 = vld [vmem:[%s16835_s28] sm:$0x3] }
 0xfb8   : > { %8715 = vmatprep.subr.bf16.mxu0 %v10684_v0 }
 0xfba   : > { %8561 = vmatmul.mubr.bf16.gmra.mrb[204].mxu0 %v15421_v43  ;;  %v10699_v43 = vld [vmem:[#allocation12 + $0x374] ss:$8 sps:$4 sm:$0xff]  }
 0xfbb   : > { %8570 = vmatprep.mubr.bf16.mxu0 %v15443_v62  ;;  %8716 = vmatpush1.bf16.msra.mxu0 %v10682_v12  ;;  %v10697_v62 = vld [vmem:[#allocation12 + $0x370] ss:$8 sps:$4 sm:$0xff]  }
 0xfbc   : > { %8717 = vmatprep.subr.bf16.mxu0 %v10687_v9 }
 0xfbf   : > { %8718 = vmatpush1.bf16.msra.mxu0 %v10685_v28 }
 0xfc0   : > { %8719 = vmatprep.subr.bf16.mxu0 %v10690_v45 }
 0xfc2   : > { %8571 = vmatmul.mubr.bf16.gmra.mrb[208].mxu0 %v15439_v5  ;;  %v10700_v5 = vld [vmem:[#allocation12 + $0x380] ss:$8 sps:$4 sm:$0xff]  }
 0xfc3   : > { %8580 = vmatprep.mubr.bf16.mxu0 %v15461_v16  ;;  %8720 = vmatpush1.bf16.msra.mxu0 %v10688_v31  ;;  %v10705_v16 = vld [vmem:[#allocation12 + $0x394] ss:$8 sps:$4 sm:$0xff]  }
 0xfc4   : > { %8721 = vmatprep.subr.bf16.mxu0 %v10693_v29 }
 0xfc7   : > { %8722 = vmatpush1.bf16.msra.mxu0 %v10691_v20 }
 0xfc8   : > { %8723 = vmatprep.subr.bf16.mxu0 %v10696_v27  ;;  %v16839_v27 = vld [vmem:[#allocation48_spill] sm:$0xff] }
 0xfca   : > { %8581 = vmatmul.mubr.bf16.gmra.mrb[212].mxu0 %v15457_v39  ;;  %v10706_v39 = vld [vmem:[#allocation12 + $0x3a0] ss:$8 sps:$4 sm:$0xff]  }
 0xfcb   : > { %8590 = vmatprep.mubr.bf16.mxu0 %v15479_v22  ;;  %8724 = vmatpush1.bf16.msra.mxu0 %v10694_v3  ;;  %v10711_v22 = vld [vmem:[#allocation12 + $0x3b4] ss:$8 sps:$4 sm:$0xff]  }
 0xfcc   : > { %8725 = vmatprep.subr.bf16.mxu0 %v10699_v43 }
 0xfcf   : > { %8726 = vmatpush1.bf16.msra.mxu0 %v10697_v62  ;;  %v16840_v62 = vld [vmem:[#allocation74_spill] sm:$0xff] }
 0xfd0   : > { %8727 = vmatprep.subr.bf16.mxu0 %v10702_v4 }
 0xfd2   : > { %8591 = vmatmul.mubr.bf16.gmra.mrb[216].mxu0 %v16805_v18 }
 0xfd3   : > { %8600 = vmatprep.mubr.bf16.mxu0 %v15497_v21  ;;  %8728 = vmatpush1.bf16.msra.mxu0 %v10700_v5  ;;  %v10717_v21 = vld [vmem:[#allocation12 + $0x3d4] ss:$8 sps:$4 sm:$0xff]   ;;  %v16841_v5 = vld [vmem:[#allocation76_spill] sm:$0xff] }
 0xfd4   : > { %8729 = vmatprep.subr.bf16.mxu0 %v10705_v16 }
 0xfd7   : > { %8730 = vmatpush1.bf16.msra.mxu0 %v10703_v15 }
 0xfd8   : > { %8731 = vmatprep.subr.bf16.mxu0 %v10708_v37 }
 0xfda   : > { %8601 = vmatmul.mubr.bf16.gmra.mrb[220].mxu0 %v15493_v48  ;;  %v10718_v48 = vld [vmem:[#allocation12 + $0x3e0] ss:$8 sps:$4 sm:$0xff]  }
 0xfdb   : > { %8610 = vmatprep.mubr.bf16.mxu0 %v15515_v44  ;;  %8732 = vmatpush1.bf16.msra.mxu0 %v10706_v39  ;;  %v10723_v44 = vld [vmem:[#allocation12 + $0x3f4] ss:$8 sps:$4 sm:$0xff]  }
 0xfdc   : > { %8733 = vmatprep.subr.bf16.mxu0 %v10711_v22 }
 0xfdf   : > { %8734 = vmatpush1.bf16.msra.mxu0 %v10709_v2  ;;  %v16842_v2 = vld [vmem:[#allocation54_spill] sm:$0xff] }
 0xfe0   : > { %8735 = vmatprep.subr.bf16.mxu0 %v10714_v47 }
 0xfe2   : > { %8611 = vmatmul.mubr.bf16.gmra.mrb[224].mxu0 %v15511_v55  ;;  %v16806_v55 = vld [vmem:[#allocation44_spill] sm:$0xff] }
 0xfe3   : > { %8620 = vmatprep.mubr.bf16.mxu0 %v15533_v40  ;;  %8736 = vmatpush1.bf16.msra.mxu0 %v10712_v57  ;;  %v16807_v40 = vld [vmem:[#allocation40_spill] sm:$0xff] }
 0xfe4   : > { %8737 = vmatprep.subr.bf16.mxu0 %v10717_v21 }
 0xfe7   : > { %8738 = vmatpush1.bf16.msra.mxu0 %v10715_v54  ;;  %v16843_v54 = vld [vmem:[#allocation52_spill] sm:$0xff] }
 0xfe8   : > { %8739 = vmatprep.subr.bf16.mxu0 %v10720_v1 }
 0xfea   : > { %8621 = vmatmul.mubr.bf16.gmra.mrb[228].mxu0 %v15529_v63  ;;  %v16808_v63 = vld [vmem:[#allocation103_spill] sm:$0xff] }
 0xfeb   : > { %8630 = vmatprep.mubr.bf16.mxu0 %v15551_v41  ;;  %8740 = vmatpush1.bf16.msra.mxu0 %v10718_v48  ;;  %v16810_v41 = vld [vmem:[#allocation61_spill] sm:$0xff] }
 0xfec   : > { %8741 = vmatprep.subr.bf16.mxu0 %v10723_v44  ;;  %v16844_v44 = vld [vmem:[#allocation78_spill] sm:$0xff] }
 0xfef   : > { %8742 = vmatpush1.bf16.msra.mxu0 %v10721_v19 }
 0xff2   : > { %8631 = vmatmul.mubr.bf16.gmra.mrb[232].mxu0 %v15547_v35  ;;  %v16809_v35 = vld [vmem:[#allocation101_spill] sm:$0xff] }
 0xff3   : > { %8640 = vmatprep.mubr.bf16.mxu0 %v15569_v60  ;;  %v16811_v60 = vld [vmem:[#allocation105_spill] sm:$0xff] }
 0xffa   : > { %8641 = vmatmul.mubr.bf16.gmra.mrb[236].mxu0 %v16806_v55  ;;  %v16845_v55 = vld [vmem:[#allocation79_spill] sm:$0xff] }
 0xffb   : > { %8650 = vmatprep.mubr.bf16.mxu0 %v15587_v30  ;;  %v16812_v30 = vld [vmem:[#allocation41_spill] sm:$0xff] }
0x1002   : > { %8651 = vmatmul.mubr.bf16.gmra.mrb[240].mxu0 %v16807_v40 }
0x1003   : > { %8660 = vmatprep.mubr.bf16.mxu0 %v15605_v59  ;;  %v16814_v59 = vld [vmem:[#allocation53_spill] sm:$0xff] }
0x100a   : > { %8661 = vmatmul.mubr.bf16.gmra.mrb[244].mxu0 %v15601_v10  ;;  %v16813_v10 = vld [vmem:[#allocation62_spill] sm:$0xff] }
0x100b   : > { %8670 = vmatprep.mubr.bf16.mxu0 %v15623_v23  ;;  %v16816_v23 = vld [vmem:[#allocation26_spill] sm:$0xff] }
0x1012   : > { %8671 = vmatmul.mubr.bf16.gmra.mrb[248].mxu0 %v15619_v13  ;;  %v16815_v13 = vld [vmem:[#allocation37_spill] sm:$0xff] }
0x1013   : > { %8680 = vmatprep.mubr.bf16.mxu0 %v15641_v8  ;;  %v16818_v8 = vld [vmem:[#allocation31_spill] sm:$0xff] }
0x101a   : > { %8681 = vmatmul.mubr.bf16.gmra.mrb[252].mxu0 %v15637_v11  ;;  %v16817_v11 = vld [vmem:[#allocation28_spill] sm:$0xff] }
0x101b   : > { %8690 = vmatprep.mubr.bf16.mxu0 %v15659_v49  ;;  %v16819_v49 = vld [vmem:[#allocation33_spill] sm:$0xff] }
0x1022   : > { %8691 = vmatmul.mubr.bf16.gmra.mrb[0].mxu0 %v15655_v61  ;;  %v16820_v61 = vld [vmem:[#allocation38_spill] sm:$0xff] }
0x1023   : > { %8700 = vmatprep.mubr.bf16.mxu0 %v15677_v56  ;;  %v16831_v56 = vld [vmem:[#allocation21_spill] sm:$0xff] }
0x102a   : > { %8701 = vmatmul.mubr.bf16.gmra.mrb[4].mxu0 %v15673_v24  ;;  %v16830_v24 = vld [vmem:[#allocation113_spill] sm:$0xff] }
0x102b   : > { %8743 = vmatprep.mubr.bf16.mxu0 %v16808_v63 }
0x1032   : > { %8744 = vmatmul.mubr.bf16.vlgmr.msra.gmra.mrb[200].mxu0 %v16809_v35 }
0x1033   : > { %8753 = vmatprep.mubr.bf16.mxu0 %v16810_v41 }
0x103a   : > { %8754 = vmatmul.mubr.bf16.gmra.mrb[204].mxu0 %v16811_v60 }
0x103b   : > { %8763 = vmatprep.mubr.bf16.mxu0 %v16812_v30 }
0x1042   : > { %8764 = vmatmul.mubr.bf16.gmra.mrb[208].mxu0 %v16813_v10  ;;  %v16846_v10 = vld [vmem:[#allocation80_spill] sm:$0xff] }
0x1043   : > { %8773 = vmatprep.mubr.bf16.mxu0 %v16814_v59 }
0x104a   : > { %8774 = vmatmul.mubr.bf16.gmra.mrb[212].mxu0 %v16815_v13 }
0x104b   : > { %8783 = vmatprep.mubr.bf16.mxu0 %v16816_v23 }
0x1052   : > { %8784 = vmatmul.mubr.bf16.gmra.mrb[216].mxu0 %v16817_v11  ;;  %v16847_v11 = vld [vmem:[#allocation81_spill] sm:$0xff] }
0x1053   : > { %8793 = vmatprep.mubr.bf16.mxu0 %v16818_v8 }
0x105a   : > { %8794 = vmatmul.mubr.bf16.gmra.mrb[220].mxu0 %v16819_v49 }
0x105b   : > { %8803 = vmatprep.mubr.bf16.mxu0 %v16820_v61  ;;  %v16848_v61 = vld [vmem:[#allocation82_spill] sm:$0xff] }
0x1062   : > { %8804 = vmatmul.mubr.bf16.gmra.mrb[224].mxu0 %v16821_v33 }
0x1063   : > { %8813 = vmatprep.mubr.bf16.mxu0 %v16822_v14  ;;  %v16849_v14 = vld [vmem:[#allocation83_spill] sm:$0xff] }
0x106a   : > { %8814 = vmatmul.mubr.bf16.gmra.mrb[228].mxu0 %v16823_v46 }
0x106b   : > { %8823 = vmatprep.mubr.bf16.mxu0 %v16824_v6 }
0x1072   : > { %8824 = vmatmul.mubr.bf16.gmra.mrb[232].mxu0 %v16825_v53 }
0x1073   : > { %8833 = vmatprep.mubr.bf16.mxu0 %v16826_v42 }
0x107a   : > { %8834 = vmatmul.mubr.bf16.gmra.mrb[236].mxu0 %v16827_v50 }
0x107b   : > { %8843 = vmatprep.mubr.bf16.mxu0 %v16828_v17 }
0x1082   : > { %8844 = vmatmul.mubr.bf16.gmra.mrb[240].mxu0 %v16829_v7  ;;  %v16850_v7 = vld [vmem:[#allocation84_spill] sm:$0xff] }
0x1083   : > { %8853 = vmatprep.mubr.bf16.mxu0 %v16830_v24 }
0x108a   : > { %8854 = vmatmul.mubr.bf16.gmra.mrb[244].mxu0 %v16831_v56 }
0x108b   : > { %8863 = vmatprep.mubr.bf16.mxu0 %v15625_v58  ;;  %v16836_v58 = vld [vmem:[#allocation42_spill] sm:$0xff] }
0x108c   : > { %v15758_v0 = vrot.slane %v7480_v25, %v16836_v58  ;;  %v16852_v58 = vld [vmem:[#allocation86_spill] sm:$0xff] }
0x1092   : > { %8864 = vmatmul.mubr.bf16.gmra.mrb[248].mxu0 %v15621_v26  ;;  %v16837_v26 = vld [vmem:[#allocation39_spill] sm:$0xff] }
0x1093   : > { %8873 = vmatprep.mubr.bf16.mxu0 %v16832_v36  ;;  %v15761_v12 = vrot.slane %v7480_v25, %v16837_v26 }
0x109a   : > { %8874 = vmatmul.mubr.bf16.gmra.mrb[252].mxu0 %v16833_v51  ;;  %v16851_v51 = vld [vmem:[#allocation85_spill] sm:$0xff] }
0x109b   : > { %8883 = vmatprep.mubr.bf16.mxu0 %v15661_v52 }
0x10a2   : > { %8884 = vmatmul.mubr.bf16.gmra.mrb[0].mxu0 %v16834_v32 }
0x10a3   : > { %8893 = vmatprep.mubr.bf16.mxu0 %v15679_v34  ;;  %v16838_v34 = vld [vmem:[#allocation50_spill] sm:$0xff] }
0x10aa   : > { %8894 = vmatmul.mubr.bf16.gmra.mrb[4].mxu0 %v15675_v38 }
0x1105   : > { %v8745_v9 = vpop.f32.mrb[200].mxu0 }
0x1106   : > { %v9986_v52 = vadd.f32 %v8745_v9, %v15758_v0  ;;  %v8747_v28 = vpop.f32.mrb[201].mxu0  ;;  %v16853_v9 = vld [vmem:[#allocation87_spill] sm:$0xff] }
0x1107   : > { %v9987_v45 = vadd.f32 %v8747_v28, %v15761_v12  ;;  %v8749_v31 = vpop.f32.mrb[202].mxu0 }
0x1108   : > { %v8904_v29 = vadd.f32 %v9986_v52, %v16838_v34  ;;  %v9988_v38 = vadd.f32 %v8749_v31, %v15758_v0  ;;  %v8751_v20 = vpop.f32.mrb[203].mxu0 }
0x1109   : > { %v8905_v3 = vadd.f32 %v9987_v45, %v16839_v27  ;;  %v9989_v43 = vadd.f32 %v8751_v20, %v15761_v12 }
0x110a   : > { %8968 = vst [vmem:[%s15771_s1] sm:$0xff] %v8904_v29  ;;  %v8906_v4 = vadd.f32 %v9988_v38, %v16840_v62  ;;  %v16854_v38 = vld [vmem:[#allocation88_spill] sm:$0xff] }
0x110b   : > { %8969 = vst [vmem:[%s15771_s1 + $0x8] sm:$0xff] %v8905_v3  ;;  %v8907_v16 = vadd.f32 %v9989_v43, %v16841_v5  ;;  %v16855_v43 = vld [vmem:[#allocation89_spill] sm:$0xff]  ;;  %v16856_v5 = vld [vmem:[#allocation90_spill] sm:$0xff] }
0x110c   : > { %8970 = vst [vmem:[%s15771_s1 + $0x10] sm:$0xff] %v8906_v4 }
0x110d   : > { %8971 = vst [vmem:[%s15771_s1 + $0x18] sm:$0xff] %v8907_v16  ;;  %v8755_v18 = vpop.f32.mrb[204].mxu0 }
0x110e   : > { %v9990_v15 = vadd.f32 %v8755_v18, %v15758_v0  ;;  %v8757_v37 = vpop.f32.mrb[205].mxu0  ;;  %v16857_v18 = vld [vmem:[#allocation91_spill] sm:$0xff] }
0x110f   : > { %v9991_v39 = vadd.f32 %v8757_v37, %v15761_v12  ;;  %v8759_v22 = vpop.f32.mrb[206].mxu0 }
0x1110   : > { %v8908_v47 = vadd.f32 %v9990_v15, %v16842_v2  ;;  %v9992_v57 = vadd.f32 %v8759_v22, %v15758_v0  ;;  %v8761_v21 = vpop.f32.mrb[207].mxu0 }
0x1111   : > { %v8909_v1 = vadd.f32 %v9991_v39, %v16843_v54  ;;  %v9993_v48 = vadd.f32 %v8761_v21, %v15761_v12 }
0x1112   : > { %8972 = vst [vmem:[%s15771_s1 + $0x20] sm:$0xff] %v8908_v47  ;;  %v8910_v19 = vadd.f32 %v9992_v57, %v16844_v44  ;;  %v16858_v57 = vld [vmem:[#allocation92_spill] sm:$0xff] }
0x1113   : > { %8973 = vst [vmem:[%s15771_s1 + $0x28] sm:$0xff] %v8909_v1  ;;  %v8911_v40 = vadd.f32 %v9993_v48, %v16845_v55  ;;  %v16859_v48 = vld [vmem:[#allocation93_spill] sm:$0xff]  ;;  %v16860_v55 = vld [vmem:[#allocation94_spill] sm:$0xff] }
0x1114   : > { %8974 = vst [vmem:[%s15771_s1 + $0x30] sm:$0xff] %v8910_v19 }
0x1115   : > { %8975 = vst [vmem:[%s15771_s1 + $0x38] sm:$0xff] %v8911_v40  ;;  %v8765_v63 = vpop.f32.mrb[208].mxu0 }
0x1116   : > { %v9994_v35 = vadd.f32 %v8765_v63, %v15758_v0  ;;  %v8767_v41 = vpop.f32.mrb[209].mxu0  ;;  %v16861_v63 = vld [vmem:[#allocation64_spill] sm:$0xff] }
0x1117   : > { %v9995_v60 = vadd.f32 %v8767_v41, %v15761_v12  ;;  %v8769_v30 = vpop.f32.mrb[210].mxu0 }
0x1118   : > { %v8912_v59 = vadd.f32 %v9994_v35, %v16846_v10  ;;  %v9996_v13 = vadd.f32 %v8769_v30, %v15758_v0  ;;  %v8771_v23 = vpop.f32.mrb[211].mxu0 }
0x1119   : > { %v8913_v8 = vadd.f32 %v9995_v60, %v16847_v11  ;;  %v9997_v49 = vadd.f32 %v8771_v23, %v15761_v12 }
0x111a   : > { %8976 = vst [vmem:[%s15771_s1 + $0x40] sm:$0xff] %v8912_v59  ;;  %v8914_v33 = vadd.f32 %v9996_v13, %v16848_v61  ;;  %v16862_v13 = vld [vmem:[#allocation65_spill] sm:$0xff] }
0x111b   : > { %8977 = vst [vmem:[%s15771_s1 + $0x48] sm:$0xff] %v8913_v8  ;;  %v8915_v46 = vadd.f32 %v9997_v49, %v16849_v14  ;;  %v16863_v49 = vld [vmem:[#allocation67_spill] sm:$0xff]  ;;  %v16864_v14 = vld [vmem:[#allocation69_spill] sm:$0xff] }
0x111c   : > { %8978 = vst [vmem:[%s15771_s1 + $0x50] sm:$0xff] %v8914_v33 }
0x111d   : > { %8979 = vst [vmem:[%s15771_s1 + $0x58] sm:$0xff] %v8915_v46  ;;  %v8775_v6 = vpop.f32.mrb[212].mxu0 }
0x111e   : > { %v9998_v53 = vadd.f32 %v8775_v6, %v15758_v0  ;;  %v8777_v42 = vpop.f32.mrb[213].mxu0  ;;  %v16865_v6 = vld [vmem:[#allocation71_spill] sm:$0xff] }
0x111f   : > { %v9999_v50 = vadd.f32 %v8777_v42, %v15761_v12  ;;  %v8779_v17 = vpop.f32.mrb[214].mxu0 }
0x1120   : > { %v8916_v24 = vadd.f32 %v9998_v53, %v16850_v7  ;;  %v10000_v56 = vadd.f32 %v8779_v17, %v15758_v0  ;;  %v8781_v36 = vpop.f32.mrb[215].mxu0 }
0x1121   : > { %v8917_v32 = vadd.f32 %v9999_v50, %v16851_v51  ;;  %v10001_v25 = vadd.f32 %v8781_v36, %v15761_v12 }
0x1122   : > { %8980 = vst [vmem:[%s15771_s1 + $0x60] sm:$0xff] %v8916_v24  ;;  %v8918_v26 = vadd.f32 %v10000_v56, %v16852_v58  ;;  %v16866_v56 = vld [vmem:[#allocation73_spill] sm:$0xff] }
0x1123   : > { %8981 = vst [vmem:[%s15771_s1 + $0x68] sm:$0xff] %v8917_v32  ;;  %v8919_v52 = vadd.f32 %v10001_v25, %v16853_v9  ;;  %v16867_v25 = vld [vmem:[#allocation75_spill] sm:$0xff]  ;;  %v16868_v9 = vld [vmem:[#allocation77_spill] sm:$0xff] }
0x1124   : > { %8982 = vst [vmem:[%s15771_s1 + $0x70] sm:$0xff] %v8918_v26 }
0x1125   : > { %8983 = vst [vmem:[%s15771_s1 + $0x78] sm:$0xff] %v8919_v52  ;;  %v8785_v28 = vpop.f32.mrb[216].mxu0 }
0x1126   : > { %v10002_v45 = vadd.f32 %v8785_v28, %v15758_v0  ;;  %v8787_v31 = vpop.f32.mrb[217].mxu0  ;;  %v16869_v28 = vld [vmem:[#allocation56_spill] sm:$0xff] }
0x1127   : > { %v10003_v34 = vadd.f32 %v8787_v31, %v15761_v12  ;;  %v8789_v29 = vpop.f32.mrb[218].mxu0 }
0x1128   : > { %v8920_v20 = vadd.f32 %v10002_v45, %v16854_v38  ;;  %v10004_v27 = vadd.f32 %v8789_v29, %v15758_v0  ;;  %v8791_v3 = vpop.f32.mrb[219].mxu0 }
0x1129   : > { %v8921_v62 = vadd.f32 %v10003_v34, %v16855_v43  ;;  %v10005_v4 = vadd.f32 %v8791_v3, %v15761_v12 }
0x112a   : > { %8984 = vst [vmem:[%s15771_s1 + $0x80] sm:$0xff] %v8920_v20  ;;  %v8922_v16 = vadd.f32 %v10004_v27, %v16856_v5  ;;  %v16870_v27 = vld [vmem:[#allocation57_spill] sm:$0xff] }
0x112b   : > { %8985 = vst [vmem:[%s15771_s1 + $0x88] sm:$0xff] %v8921_v62  ;;  %v8923_v15 = vadd.f32 %v10005_v4, %v16857_v18  ;;  %v16871_v4 = vld [vmem:[#allocation58_spill] sm:$0xff]  ;;  %v16872_v18 = vld [vmem:[#allocation59_spill] sm:$0xff] }
0x112c   : > { %8986 = vst [vmem:[%s15771_s1 + $0x90] sm:$0xff] %v8922_v16 }
0x112d   : > { %8987 = vst [vmem:[%s15771_s1 + $0x98] sm:$0xff] %v8923_v15  ;;  %v8795_v37 = vpop.f32.mrb[220].mxu0 }
0x112e   : > { %v10006_v39 = vadd.f32 %v8795_v37, %v15758_v0  ;;  %v8797_v22 = vpop.f32.mrb[221].mxu0  ;;  %v16873_v37 = vld [vmem:[#allocation60_spill] sm:$0xff] }
0x112f   : > { %v10007_v2 = vadd.f32 %v8797_v22, %v15761_v12  ;;  %v8799_v47 = vpop.f32.mrb[222].mxu0 }
0x1130   : > { %v8924_v21 = vadd.f32 %v10006_v39, %v16858_v57  ;;  %v10008_v54 = vadd.f32 %v8799_v47, %v15758_v0  ;;  %v8801_v1 = vpop.f32.mrb[223].mxu0 }
0x1131   : > { %v8925_v44 = vadd.f32 %v10007_v2, %v16859_v48  ;;  %v10009_v19 = vadd.f32 %v8801_v1, %v15761_v12 }
0x1132   : > { %8988 = vst [vmem:[%s15771_s1 + $0xa0] sm:$0xff] %v8924_v21  ;;  %v8926_v40 = vadd.f32 %v10008_v54, %v16860_v55  ;;  %v16874_v54 = vld [vmem:[#allocation63_spill] sm:$0xff] }
0x1133   : > { %8989 = vst [vmem:[%s15771_s1 + $0xa8] sm:$0xff] %v8925_v44  ;;  %v8927_v35 = vadd.f32 %v10009_v19, %v16861_v63  ;;  %v16875_v19 = vld [vmem:[#allocation29_spill] sm:$0xff]  ;;  %v16876_v63 = vld [vmem:[#allocation30_spill] sm:$0xff] }
0x1134   : > { %8990 = vst [vmem:[%s15771_s1 + $0xb0] sm:$0xff] %v8926_v40 }
0x1135   : > { %8991 = vst [vmem:[%s15771_s1 + $0xb8] sm:$0xff] %v8927_v35  ;;  %v8805_v41 = vpop.f32.mrb[224].mxu0 }
0x1136   : > { %v10010_v60 = vadd.f32 %v8805_v41, %v15758_v0  ;;  %v8807_v30 = vpop.f32.mrb[225].mxu0  ;;  %v16877_v41 = vld [vmem:[#allocation32_spill] sm:$0xff] }
0x1137   : > { %v10011_v10 = vadd.f32 %v8807_v30, %v15761_v12  ;;  %v8809_v59 = vpop.f32.mrb[226].mxu0 }
0x1138   : > { %v8928_v23 = vadd.f32 %v10010_v60, %v16862_v13  ;;  %v10012_v11 = vadd.f32 %v8809_v59, %v15758_v0  ;;  %v8811_v8 = vpop.f32.mrb[227].mxu0 }
0x1139   : > { %v8929_v61 = vadd.f32 %v10011_v10, %v16863_v49  ;;  %v10013_v33 = vadd.f32 %v8811_v8, %v15761_v12 }
0x113a   : > { %8992 = vst [vmem:[%s15771_s1 + $0xc0] sm:$0xff] %v8928_v23  ;;  %v8930_v46 = vadd.f32 %v10012_v11, %v16864_v14  ;;  %v16878_v11 = vld [vmem:[#allocation43_spill] sm:$0xff] }
0x113b   : > { %8993 = vst [vmem:[%s15771_s1 + $0xc8] sm:$0xff] %v8929_v61  ;;  %v8931_v53 = vadd.f32 %v10013_v33, %v16865_v6  ;;  %v16879_v33 = vld [vmem:[#allocation47_spill] sm:$0xff]  ;;  %v16880_v6 = vld [vmem:[#allocation45_spill] sm:$0xff] }
0x113c   : > { %8994 = vst [vmem:[%s15771_s1 + $0xd0] sm:$0xff] %v8930_v46 }
0x113d   : > { %8995 = vst [vmem:[%s15771_s1 + $0xd8] sm:$0xff] %v8931_v53  ;;  %v8815_v42 = vpop.f32.mrb[228].mxu0 }
0x113e   : > { %v10014_v50 = vadd.f32 %v8815_v42, %v15758_v0  ;;  %v8817_v17 = vpop.f32.mrb[229].mxu0  ;;  %v16881_v42 = vld [vmem:[#allocation51_spill] sm:$0xff] }
0x113f   : > { %v10015_v7 = vadd.f32 %v8817_v17, %v15761_v12  ;;  %v8819_v24 = vpop.f32.mrb[230].mxu0 }
0x1140   : > { %v8932_v36 = vadd.f32 %v10014_v50, %v16866_v56  ;;  %v10016_v51 = vadd.f32 %v8819_v24, %v15758_v0  ;;  %v8821_v32 = vpop.f32.mrb[231].mxu0 }
0x1141   : > { %v8933_v58 = vadd.f32 %v10015_v7, %v16867_v25  ;;  %v10017_v26 = vadd.f32 %v8821_v32, %v15761_v12 }
0x1142   : > { %8996 = vst [vmem:[%s15771_s1 + $0xe0] sm:$0xff] %v8932_v36  ;;  %v8934_v52 = vadd.f32 %v10016_v51, %v16868_v9  ;;  %v16882_v51 = vld [vmem:[#allocation25_spill] sm:$0xff] }
0x1143   : > { %8997 = vst [vmem:[%s15771_s1 + $0xe8] sm:$0xff] %v8933_v58  ;;  %v8935_v45 = vadd.f32 %v10017_v26, %v16869_v28  ;;  %v16883_v26 = vld [vmem:[#allocation22_spill] sm:$0xff]  ;;  %v16884_v28 = vld [vmem:[#allocation23_spill] sm:$0xff] }
0x1144   : > { %8998 = vst [vmem:[%s15771_s1 + $0xf0] sm:$0xff] %v8934_v52 }
0x1145   : > { %8999 = vst [vmem:[%s15771_s1 + $0xf8] sm:$0xff] %v8935_v45  ;;  %v8825_v31 = vpop.f32.mrb[232].mxu0 }
0x1146   : > { %v10018_v34 = vadd.f32 %v8825_v31, %v15758_v0  ;;  %v8827_v29 = vpop.f32.mrb[233].mxu0  ;;  %v16885_v31 = vld [vmem:[#allocation66_spill] sm:$0xff] }
0x1147   : > { %v10019_v38 = vadd.f32 %v8827_v29, %v15761_v12  ;;  %v8829_v20 = vpop.f32.mrb[234].mxu0 }
0x1148   : > { %v8936_v3 = vadd.f32 %v10018_v34, %v16870_v27  ;;  %v10020_v43 = vadd.f32 %v8829_v20, %v15758_v0  ;;  %v8831_v62 = vpop.f32.mrb[235].mxu0 }
0x1149   : > { %v8937_v5 = vadd.f32 %v10019_v38, %v16871_v4  ;;  %v10021_v16 = vadd.f32 %v8831_v62, %v15761_v12 }
0x114a   : > { %9000 = vst [vmem:[%s15771_s1 + $0x100] sm:$0xff] %v8936_v3  ;;  %v8938_v15 = vadd.f32 %v10020_v43, %v16872_v18  ;;  %v16886_v43 = vld [vmem:[#allocation36_spill] sm:$0xff] }
0x114b   : > { %9001 = vst [vmem:[%s15771_s1 + $0x108] sm:$0xff] %v8937_v5  ;;  %v8939_v39 = vadd.f32 %v10021_v16, %v16873_v37  ;;  %v16887_v16 = vld [vmem:[#allocation35_spill] sm:$0xff]  ;;  %v16888_v37 = vld [vmem:[#allocation68_spill] sm:$0xff] }
0x114c   : > { %9002 = vst [vmem:[%s15771_s1 + $0x110] sm:$0xff] %v8938_v15 }
0x114d   : > { %9003 = vst [vmem:[%s15771_s1 + $0x118] sm:$0xff] %v8939_v39  ;;  %v8835_v22 = vpop.f32.mrb[236].mxu0 }
0x114e   : > { %v10022_v2 = vadd.f32 %v8835_v22, %v15758_v0  ;;  %v8837_v47 = vpop.f32.mrb[237].mxu0  ;;  %v16889_v22 = vld [vmem:[#allocation46_spill] sm:$0xff] }
0x114f   : > { %v10023_v57 = vadd.f32 %v8837_v47, %v15761_v12  ;;  %v8839_v21 = vpop.f32.mrb[238].mxu0 }
0x1150   : > { %v8940_v1 = vadd.f32 %v10022_v2, %v16874_v54  ;;  %v10024_v48 = vadd.f32 %v8839_v21, %v15758_v0  ;;  %v8841_v44 = vpop.f32.mrb[239].mxu0 }
0x1151   : > { %v8941_v55 = vadd.f32 %v10023_v57, %v16875_v19  ;;  %v10025_v40 = vadd.f32 %v8841_v44, %v15761_v12 }
0x1152   : > { %9004 = vst [vmem:[%s15771_s1 + $0x120] sm:$0xff] %v8940_v1  ;;  %v8942_v35 = vadd.f32 %v10024_v48, %v16876_v63  ;;  %v16890_v48 = vld [vmem:[#allocation95_spill] sm:$0xff] }
0x1153   : > { %9005 = vst [vmem:[%s15771_s1 + $0x128] sm:$0xff] %v8941_v55  ;;  %v8943_v60 = vadd.f32 %v10025_v40, %v16877_v41  ;;  %v16891_v40 = vld [vmem:[#allocation96_spill] sm:$0xff]  ;;  %v16892_v41 = vld [vmem:[#allocation97_spill] sm:$0xff] }
0x1154   : > { %9006 = vst [vmem:[%s15771_s1 + $0x130] sm:$0xff] %v8942_v35 }
0x1155   : > { %9007 = vst [vmem:[%s15771_s1 + $0x138] sm:$0xff] %v8943_v60  ;;  %v8845_v30 = vpop.f32.mrb[240].mxu0 }
0x1156   : > { %v10026_v10 = vadd.f32 %v8845_v30, %v15758_v0  ;;  %v8847_v59 = vpop.f32.mrb[241].mxu0  ;;  %v16893_v30 = vld [vmem:[#allocation98_spill] sm:$0xff] }
0x1157   : > { %v10027_v13 = vadd.f32 %v8847_v59, %v15761_v12  ;;  %v8849_v23 = vpop.f32.mrb[242].mxu0 }
0x1158   : > { %v8944_v8 = vadd.f32 %v10026_v10, %v16878_v11  ;;  %v10028_v49 = vadd.f32 %v8849_v23, %v15758_v0  ;;  %v8851_v61 = vpop.f32.mrb[243].mxu0 }
0x1159   : > { %v8945_v14 = vadd.f32 %v10027_v13, %v16879_v33  ;;  %v10029_v46 = vadd.f32 %v8851_v61, %v15761_v12 }
0x115a   : > { %9008 = vst [vmem:[%s15771_s1 + $0x140] sm:$0xff] %v8944_v8  ;;  %v8946_v53 = vadd.f32 %v10028_v49, %v16880_v6  ;;  %v16894_v49 = vld [vmem:[#allocation99_spill] sm:$0xff] }
0x115b   : > { %9009 = vst [vmem:[%s15771_s1 + $0x148] sm:$0xff] %v8945_v14  ;;  %v8947_v50 = vadd.f32 %v10029_v46, %v16881_v42  ;;  %v16895_v46 = vld [vmem:[#allocation102_spill] sm:$0xff]  ;;  %v16896_v42 = vld [vmem:[#allocation104_spill] sm:$0xff] }
0x115c   : > { %9010 = vst [vmem:[%s15771_s1 + $0x150] sm:$0xff] %v8946_v53 }
0x115d   : > { %9011 = vst [vmem:[%s15771_s1 + $0x158] sm:$0xff] %v8947_v50  ;;  %v8855_v17 = vpop.f32.mrb[244].mxu0 }
0x115e   : > { %v10030_v7 = vadd.f32 %v8855_v17, %v15758_v0  ;;  %v8857_v24 = vpop.f32.mrb[245].mxu0  ;;  %v16897_v17 = vld [vmem:[#allocation106_spill] sm:$0xff] }
0x115f   : > { %v10031_v56 = vadd.f32 %v8857_v24, %v15761_v12  ;;  %v8859_v36 = vpop.f32.mrb[246].mxu0 }
0x1160   : > { %v8948_v32 = vadd.f32 %v10030_v7, %v16882_v51  ;;  %v10032_v25 = vadd.f32 %v8859_v36, %v15758_v0  ;;  %v8861_v58 = vpop.f32.mrb[247].mxu0 }
0x1161   : > { %v8949_v9 = vadd.f32 %v10031_v56, %v16883_v26  ;;  %v10033_v52 = vadd.f32 %v8861_v58, %v15761_v12 }
0x1162   : > { %9012 = vst [vmem:[%s15771_s1 + $0x160] sm:$0xff] %v8948_v32  ;;  %v8950_v45 = vadd.f32 %v10032_v25, %v16884_v28  ;;  %v16898_v25 = vld [vmem:[#allocation107_spill] sm:$0xff] }
0x1163   : > { %9013 = vst [vmem:[%s15771_s1 + $0x168] sm:$0xff] %v8949_v9  ;;  %v8951_v34 = vadd.f32 %v10033_v52, %v16885_v31  ;;  %v16899_v52 = vld [vmem:[#allocation108_spill] sm:$0xff]  ;;  %v16900_v31 = vld [vmem:[#allocation109_spill] sm:$0xff] }
0x1164   : > { %9014 = vst [vmem:[%s15771_s1 + $0x170] sm:$0xff] %v8950_v45 }
0x1165   : > { %9015 = vst [vmem:[%s15771_s1 + $0x178] sm:$0xff] %v8951_v34  ;;  %v8865_v29 = vpop.f32.mrb[248].mxu0 }
0x1166   : > { %v10034_v38 = vadd.f32 %v8865_v29, %v15758_v0  ;;  %v8867_v20 = vpop.f32.mrb[249].mxu0 }
0x1167   : > { %v10035_v27 = vadd.f32 %v8867_v20, %v15761_v12  ;;  %v8869_v3 = vpop.f32.mrb[250].mxu0 }
0x1168   : > { %v8952_v62 = vadd.f32 %v10034_v38, %v16886_v43  ;;  %v10036_v4 = vadd.f32 %v8869_v3, %v15758_v0  ;;  %v8871_v5 = vpop.f32.mrb[251].mxu0 }
0x1169   : > { %v8953_v18 = vadd.f32 %v10035_v27, %v16887_v16  ;;  %v10037_v15 = vadd.f32 %v8871_v5, %v15761_v12 }
0x116a   : > { %9016 = vst [vmem:[%s15771_s1 + $0x180] sm:$0xff] %v8952_v62  ;;  %v8954_v39 = vadd.f32 %v10036_v4, %v16888_v37 }
0x116b   : > { %9017 = vst [vmem:[%s15771_s1 + $0x188] sm:$0xff] %v8953_v18  ;;  %v8955_v2 = vadd.f32 %v10037_v15, %v16889_v22 }
0x116c   : > { %9018 = vst [vmem:[%s15771_s1 + $0x190] sm:$0xff] %v8954_v39 }
0x116d   : > { %9019 = vst [vmem:[%s15771_s1 + $0x198] sm:$0xff] %v8955_v2  ;;  %v8875_v47 = vpop.f32.mrb[252].mxu0 }
0x116e   : > { %v10038_v57 = vadd.f32 %v8875_v47, %v15758_v0  ;;  %v8877_v21 = vpop.f32.mrb[253].mxu0 }
0x116f   : > { %v10039_v54 = vadd.f32 %v8877_v21, %v15761_v12  ;;  %v8879_v1 = vpop.f32.mrb[254].mxu0 }
0x1170   : > { %v8956_v44 = vadd.f32 %v10038_v57, %v16890_v48  ;;  %v10040_v19 = vadd.f32 %v8879_v1, %v15758_v0  ;;  %v8881_v55 = vpop.f32.mrb[255].mxu0 }
0x1171   : > { %v8957_v63 = vadd.f32 %v10039_v54, %v16891_v40  ;;  %v10041_v35 = vadd.f32 %v8881_v55, %v15761_v12 }
0x1172   : > { %9020 = vst [vmem:[%s15771_s1 + $0x1a0] sm:$0xff] %v8956_v44  ;;  %v8958_v60 = vadd.f32 %v10040_v19, %v16892_v41 }
0x1173   : > { %9021 = vst [vmem:[%s15771_s1 + $0x1a8] sm:$0xff] %v8957_v63  ;;  %v8959_v10 = vadd.f32 %v10041_v35, %v16893_v30 }
0x1174   : > { %9022 = vst [vmem:[%s15771_s1 + $0x1b0] sm:$0xff] %v8958_v60 }
0x1175   : > { %9023 = vst [vmem:[%s15771_s1 + $0x1b8] sm:$0xff] %v8959_v10  ;;  %v8885_v59 = vpop.f32.mrb[0].mxu0 }
0x1176   : > { %v10042_v13 = vadd.f32 %v8885_v59, %v15758_v0  ;;  %v8887_v23 = vpop.f32.mrb[1].mxu0 }
0x1177   : > { %v10043_v11 = vadd.f32 %v8887_v23, %v15761_v12  ;;  %v8889_v8 = vpop.f32.mrb[2].mxu0 }
0x1178   : > { %v8960_v61 = vadd.f32 %v10042_v13, %v16894_v49  ;;  %v10044_v33 = vadd.f32 %v8889_v8, %v15758_v0  ;;  %v8891_v14 = vpop.f32.mrb[3].mxu0 }
0x1179   : > { %v8961_v6 = vadd.f32 %v10043_v11, %v16895_v46  ;;  %v10045_v53 = vadd.f32 %v8891_v14, %v15761_v12 }
0x117a   : > { %9024 = vst [vmem:[%s15771_s1 + $0x1c0] sm:$0xff] %v8960_v61  ;;  %v8962_v50 = vadd.f32 %v10044_v33, %v16896_v42 }
0x117b   : > { %9025 = vst [vmem:[%s15771_s1 + $0x1c8] sm:$0xff] %v8961_v6  ;;  %v8963_v7 = vadd.f32 %v10045_v53, %v16897_v17 }
0x117c   : > { %9026 = vst [vmem:[%s15771_s1 + $0x1d0] sm:$0xff] %v8962_v50 }
0x117d   : > { %9027 = vst [vmem:[%s15771_s1 + $0x1d8] sm:$0xff] %v8963_v7  ;;  %v8895_v24 = vpop.f32.mrb[4].mxu0 }
0x117e   : > { %v10046_v56 = vadd.f32 %v8895_v24, %v15758_v0  ;;  %v8897_v36 = vpop.f32.mrb[5].mxu0 }
0x117f   : > { %v10047_v51 = vadd.f32 %v8897_v36, %v15761_v12  ;;  %v8899_v32 = vpop.f32.mrb[6].mxu0 }
0x1180   : > { %v8964_v58 = vadd.f32 %v10046_v56, %v16898_v25  ;;  %v10048_v26 = vadd.f32 %v8899_v32, %v15758_v0  ;;  %v8901_v9 = vpop.f32.mrb[7].mxu0  ;;  %v16902_v0 = vld [vmem:[#allocation110_spill] sm:$0xff] }
0x1181   : > { %v8965_v28 = vadd.f32 %v10047_v51, %v16899_v52  ;;  %v10049_v45 = vadd.f32 %v8901_v9, %v15761_v12 }
0x1182   : > { %9028 = vst [vmem:[%s15771_s1 + $0x1e0] sm:$0xff] %v8964_v58  ;;  %v8966_v34 = vadd.f32 %v10048_v26, %v16900_v31 }
0x1183   : > { %9029 = vst [vmem:[%s15771_s1 + $0x1e8] sm:$0xff] %v8965_v28  ;;  %v8967_v29 = vadd.f32 %v10049_v45, %v16902_v0 }
0x1184   : > { %9030 = vst [vmem:[%s15771_s1 + $0x1f0] sm:$0xff] %v8966_v34 }
0x1185   : > { %9031 = vst [vmem:[%s15771_s1 + $0x1f8] sm:$0xff] %v8967_v29 }
0x1186   : > { %11384 = shalt.err (!%p11381_p13)
}
0x1187   : > { %s11385_s16 = scalar_lea.hbm %s15960_s14, 8192  ;;  %s11389_s11 = scalar_lea.hbm %s16901_s12, 16384 }
0x1188   : > { %p11386_p9 = scmp.ne.s32.totalorder %s15960_s14, %s11385_s16  ;;  %p11390_p4 = scmp.lt.u32.totalorder %s15960_s14, %s16901_s12 }
0x1189   : > { %p11391_p8 = scmp.lt.u32.totalorder %s11389_s11, %s11385_s16  ;;  %p11393_p3 = scmp.lt.u32.totalorder %s11385_s16, %s15960_s14 }
0x118a   : > { %p11387_p0 = pnand %p11386_p9, %p11685_p10 }
0x118b   : > { %p11392_p6 = por %p11391_p8, %p11390_p4 }
0x118c   : > { %p11388_p11 = pneg %p11387_p0 }
0x118d   : > { %p11394_p5 = por %p11393_p3, %p11392_p6 }
0x118f   : > { %p11395_p7 = pnand %p11394_p5, %p11388_p11 }
0x1191   : > { %11398 = shalt.err (!%p11395_p7)
}
0x1192   : > { %s11462_s9 = smov 256   ;;  %s11463_s27 = smov 16  }
0x1193   : > { %10260 = dma.vmem_to_hbm [thread:$0]  (%p11685_p10), %s15962_s18, 8192, %s15960_s14, %s9033_s25, %s11462_s9, %s11462_s9, %s11463_s27  }
0x1194 PF: > { %s16903_s29 = sld [smem:[#allocation18_spill]]  ;;  %s16904_s17 = sld [smem:[#allocation19_spill]] }
0x1195   : > { %p16906_p2 = scmp.ge.s32.totalorder %s11445_s24, 2 }
0x119a   : > { %s9062_s28 = sand.u32 1, %s16903_s29   ;;  %p16905_p12 = scmp.ne.s32.totalorder %s16904_s17, 0 }
0x119b   : > { %s9063_s16 = scalar_lea.sflag [#allocation6], %s9062_s28 }
0x119c   : > { %p10280_p1 = pnand %p16906_p2, %p16905_p12 }
0x119e   : > { %11428 = dma.done.wait (!%p10280_p1), %s9063_s16, 8192  }
0x119f   : > { %11430 = vsyncadd (!%p10280_p1), %s9063_s16, 4294959104  ;;  %p27_p13 = scmp.ge.s32.totalorder %s11675_s30, 4   ;;  %s16907_s21 = smov %s11437_s22 }
0x11a0   : > { %s16908_s22 = smov %s11441_s23  ;;  %s16909_s23 = smov %s11691_s20 }
0x11a1   : > { %s16910_s24 = smov %s11675_s30  ;;  %29 = sbr.rel (!%p27_p13) target bundleno = 12 (0xc), region = 129 }
0x11a8   :  { %9068 = vsyncpa [#allocation5], 1 }
0x11a9   :  { %9070 = vsyncpa [#allocation5 + $0x1], 1 }
0x11aa   :  { %9071 = vsyncpa [#allocation8], 1 }
0x11ab   :  { %9072 = vsyncpa [#allocation11], 1 }
0x11ac   :  { %9073 = vsyncpa [#allocation6], 1 }
0x11ad   :  { %9075 = vsyncpa [#allocation6 + $0x1], 1 }

</bundles_post_ra>
